<compile_context>
chip_gen: v6e
topology: v6e:2x2x1
jax: 0.10.0
libtpu: 0.0.40
codegen_flags: <defaults>
</compile_context>

<pallas_src>
import jax
import jax.numpy as jnp
import numpy as np
from jax.experimental import pallas as pl
from jax.experimental.pallas import tpu as pltpu


_H1, _C1 = 28, 32            # conv1: 28x28x1 -> 28x28x32 -> pool -> 14x14x32
_H2, _C2 = 14, 64            # conv2: 14x14x32 -> 14x14x64 -> pool -> 7x7x64
_LANES1 = (_H1 // 2) * _C1   # 448 lanes after stage 1 (w_half*32 + c)
_LANES2 = (_H2 // 2) * _C2   # 448 lanes after stage 2 (w_half*64 + c)
_FC_HID = 128
_NCLASS = 10


# ---------------------------------------------------------------------------
# Fused Pallas kernel: conv1+ReLU+pool -> conv2+ReLU+pool -> fc1+ReLU -> fc2
# ---------------------------------------------------------------------------
def _cnn_fused_kernel(x_ref, be1_ref, bo1_ref, brow1_ref,
                      be2_ref, bo2_ref, brow2_ref,
                      w1_ref, b1_ref, w2_ref, b2_ref, out_ref):
    f32 = jnp.float32
    cdt = be1_ref.dtype                      # bf16 compute dtype for MXU operands
    bb = out_ref.shape[0]                    # images per grid step (multiple of 8)

    def bias_relu_hpool_vpool(acc_e, acc_o, bias_row):
        # bias + ReLU in f32; horizontal 2-pool = max of the two column-parity
        # accumulators; vertical 2-pool = max of adjacent h row-groups (rows
        # are h-major, so each h is a contiguous, tile-aligned bb-row block).
        acc_e = jnp.maximum(acc_e + bias_row, 0.0)
        acc_o = jnp.maximum(acc_o + bias_row, 0.0)
        hmax = jnp.maximum(acc_e, acc_o)
        nh = hmax.shape[0] // (2 * bb)
        return jnp.concatenate(
            [jnp.maximum(hmax[(2 * a) * bb:(2 * a + 1) * bb, :],
                         hmax[(2 * a + 1) * bb:(2 * a + 2) * bb, :])
             for a in range(nh)], axis=0)                       # stays in f32

    # ---- stage 1: conv1 (3x3, pad 1) + ReLU + 2x2 max-pool ------------------
    # The input already carries the three vertical taps side-by-side in lanes
    # (host-side repack), so each parity is ONE matmul with K = 3*28 = 84.
    x1 = x_ref[...]                                             # (28*bb, 84) bf16
    acc_e = jnp.dot(x1, be1_ref[...], preferred_element_type=f32)
    acc_o = jnp.dot(x1, bo1_ref[...], preferred_element_type=f32)
    p1 = bias_relu_hpool_vpool(acc_e, acc_o, brow1_ref[...])    # (14*bb, 448) f32

    # ---- stage 2: conv2 (3x3, pad 1) + ReLU + 2x2 max-pool ------------------
    # Vertical taps via aligned row shifts (no MXU, no O(bb^2) shift matrices):
    # rows are h-major, so the h+/-1 neighbour is exactly +/-bb rows away and
    # the image-top / image-bottom padding rows are the first / last bb rows.
    rows2 = p1.shape[0]                                         # 14*bb
    zrow = jnp.zeros((bb, _LANES1), f32)
    up = jnp.concatenate([zrow, p1[:rows2 - bb, :]], axis=0).astype(cdt)   # h-1
    mid = p1.astype(cdt)                                                   # h
    down = jnp.concatenate([p1[bb:, :], zrow], axis=0).astype(cdt)         # h+1
    acc_e = jnp.zeros((rows2, _LANES2), f32)
    acc_o = jnp.zeros((rows2, _LANES2), f32)
    for dy, slab in enumerate((up, mid, down)):                 # static unroll
        acc_e = acc_e + jnp.dot(slab, be2_ref[dy], preferred_element_type=f32)
        acc_o = acc_o + jnp.dot(slab, bo2_ref[dy], preferred_element_type=f32)
    p2 = bias_relu_hpool_vpool(acc_e, acc_o, brow2_ref[...])    # (7*bb, 448) f32

    # ---- fc1 + ReLU + fc2 (fused epilogue, no feature HBM round trip) -------
    # p2 row h*bb+img holds the (w*64+c) features of image `img` at height h;
    # fc1 is the sum over h of aligned (bb,448)@(448,128) matmuls.
    hid = jnp.zeros((bb, _FC_HID), f32)
    for h in range(_H2 // 2):                                   # static unroll
        xh = p2[h * bb:(h + 1) * bb, :].astype(cdt)
        hid = hid + jnp.dot(xh, w1_ref[h], preferred_element_type=f32)
    hid = jnp.maximum(hid + b1_ref[...], 0.0).astype(cdt)
    logits = jnp.dot(hid, w2_ref[...], preferred_element_type=f32) + b2_ref[...]
    out_ref[...] = logits.astype(out_ref.dtype)                 # (bb, 128) lane-dense


# ---------------------------------------------------------------------------
# One-time host-side parameter preparation (hoisted out of the jitted forward)
# ---------------------------------------------------------------------------
def _banded_conv_mats(w_oihw, width, parity):
    """B[dy] (width*Cin, (width//2)*Cout): (vertically shifted X) @ B[dy]
    accumulates the dx taps of a 3x3 "same" conv for output columns of the
    given parity; horizontal padding is encoded by the missing bands."""
    cout, cin, _, _ = w_oihw.shape
    half = width // 2
    b = np.zeros((3, width * cin, half * cout), np.float32)
    for dy in range(3):
        for dx in range(3):
            blk = w_oihw[:, :, dy, dx].T                  # (Cin, Cout)
            for j in range(half):
                w_in = 2 * j + parity + dx - 1            # padding = 1
                if 0 <= w_in < width:
                    b[dy, w_in * cin:(w_in + 1) * cin, j * cout:(j + 1) * cout] = blk
    return b


def prepare_params(params, compute_dtype=jnp.bfloat16):
    cw1 = np.asarray(params["conv1_w"], np.float32)
    cb1 = np.asarray(params["conv1_b"], np.float32)
    cw2 = np.asarray(params["conv2_w"], np.float32)
    cb2 = np.asarray(params["conv2_b"], np.float32)
    fw1 = np.asarray(params["fc1_w"], np.float32)
    fb1 = np.asarray(params["fc1_b"], np.float32)
    fw2 = np.asarray(params["fc2_w"], np.float32)
    fb2 = np.asarray(params["fc2_b"], np.float32)
    cd = compute_dtype

    # stage 1: the three dy taps are stacked along K (matches the host-side
    # lane packing of the input), giving one (84, 448) matrix per parity.
    be1 = _banded_conv_mats(cw1, _H1, 0).reshape(3 * _H1, _LANES1)
    bo1 = _banded_conv_mats(cw1, _H1, 1).reshape(3 * _H1, _LANES1)
    # stage 2: K=448 per dy is already >= MXU depth, keep taps separate.
    be2 = _banded_conv_mats(cw2, _H2, 0)                  # (3, 448, 448)
    bo2 = _banded_conv_mats(cw2, _H2, 1)

    # fc1: permute from PyTorch's NCHW flatten (c*49 + h*7 + w) to the kernel's
    # per-height (w*64 + c) row order, stacked as (7, 448, 128).
    w1 = fw1.reshape(_FC_HID, _C2, _H2 // 2, _H2 // 2).transpose(2, 3, 1, 0)
    w1 = np.ascontiguousarray(w1).reshape(_H2 // 2, (_H2 // 2) * _C2, _FC_HID)
    # fc2: zero-pad 10 -> 128 output lanes so the store is lane-dense.
    w2 = np.zeros((_FC_HID, _FC_HID), np.float32)
    w2[:, :_NCLASS] = fw2.T
    b2 = np.zeros((1, _FC_HID), np.float32)
    b2[0, :_NCLASS] = fb2

    return {
        "be1": jnp.asarray(be1, cd),
        "bo1": jnp.asarray(bo1, cd),
        "brow1": jnp.asarray(np.tile(cb1, _H1 // 2)[None, :], jnp.float32),
        "be2": jnp.asarray(be2, cd),
        "bo2": jnp.asarray(bo2, cd),
        "brow2": jnp.asarray(np.tile(cb2, _H2 // 2)[None, :], jnp.float32),
        "w1": jnp.asarray(w1, cd),
        "b1": jnp.asarray(fb1[None, :], jnp.float32),
        "w2": jnp.asarray(w2, cd),
        "b2": jnp.asarray(b2, jnp.float32),
    }


def init_params(key):
    ks = jax.random.split(key, 8)

    def u(k, shape, fan_in):
        bound = 1.0 / jnp.sqrt(jnp.float32(fan_in))
        return jax.random.uniform(k, shape, jnp.float32, -bound, bound)

    return {
        "conv1_w": u(ks[0], (32, 1, 3, 3), 1 * 9),
        "conv1_b": u(ks[1], (32,), 1 * 9),
        "conv2_w": u(ks[2], (64, 32, 3, 3), 32 * 9),
        "conv2_b": u(ks[3], (64,), 32 * 9),
        "fc1_w": u(ks[4], (128, 64 * 7 * 7), 64 * 7 * 7),
        "fc1_b": u(ks[5], (128,), 64 * 7 * 7),
        "fc2_w": u(ks[6], (10, 128), 128),
        "fc2_b": u(ks[7], (10,), 128),
    }


# ---------------------------------------------------------------------------
# Forward pass (mirrors CNN.forward)
# ---------------------------------------------------------------------------
def _choose_bb(n):
    # Big blocks amortize per-step pipeline overhead; keep >= 2 grid steps when
    # possible (feeds both v7x TensorCores) and avoid huge padding for tiny batches.
    for bb in (32, 16, 8):
        if n >= 2 * bb:
            return bb
    return 8


def _const_spec(shape):
    zeros = (0,) * len(shape)
    return pl.BlockSpec(shape, lambda i, _z=zeros: _z)


@jax.jit
def cnn_forward(prepped, x_nchw):
    """NCHW float32 input (N, 1, 28, 28) -> (N, 10) float32 logits."""
    n = x_nchw.shape[0]
    bb = _choose_bb(n)
    n_pad = ((n + bb - 1) // bb) * bb
    if n_pad != n:
        x_nchw = jnp.pad(x_nchw, ((0, n_pad - n), (0, 0), (0, 0), (0, 0)))
    nblk = n_pad // bb

    # Host-side repack of the tiny input: the three vertical taps (h-1, h, h+1,
    # zero at the image border) are packed side-by-side in lanes (84 lanes), and
    # rows are ordered h-major / image-minor within each bb-image block, so all
    # in-kernel row ops are (8,128)-tile aligned.
    x3 = x_nchw.reshape(n_pad, _H1, _H1)
    up = jnp.pad(x3, ((0, 0), (1, 0), (0, 0)))[:, :_H1, :]
    dn = jnp.pad(x3, ((0, 0), (0, 1), (0, 0)))[:, 1:, :]
    xcat = jnp.concatenate([up, x3, dn], axis=2)                  # (n_pad, 28, 84)
    x2d = (xcat.reshape(nblk, bb, _H1, 3 * _H1)
               .transpose(0, 2, 1, 3)
               .reshape(nblk * _H1 * bb, 3 * _H1)
               .astype(jnp.bfloat16))

    logits = pl.pallas_call(
        _cnn_fused_kernel,
        out_shape=jax.ShapeDtypeStruct((n_pad, _FC_HID), jnp.float32),
        grid=(nblk,),
        in_specs=[
            pl.BlockSpec((_H1 * bb, 3 * _H1), lambda i: (i, 0)),
            _const_spec((3 * _H1, _LANES1)),
            _const_spec((3 * _H1, _LANES1)),
            _const_spec((1, _LANES1)),
            _const_spec((3, _LANES1, _LANES2)),
            _const_spec((3, _LANES1, _LANES2)),
            _const_spec((1, _LANES2)),
            _const_spec((_H2 // 2, _LANES2, _FC_HID)),
            _const_spec((1, _FC_HID)),
            _const_spec((_FC_HID, _FC_HID)),
            _const_spec((1, _FC_HID)),
        ],
        out_specs=pl.BlockSpec((bb, _FC_HID), lambda i: (i, 0)),
        compiler_params=pltpu.CompilerParams(
            dimension_semantics=("parallel",),
            vmem_limit_bytes=32 * 1024 * 1024),
    )(x2d, prepped["be1"], prepped["bo1"], prepped["brow1"],
      prepped["be2"], prepped["bo2"], prepped["brow2"],
      prepped["w1"], prepped["b1"], prepped["w2"], prepped["b2"])

    return logits[:n, :_NCLASS]


# ---------------------------------------------------------------------------
# Pure-JAX f32 reference (mirrors the PyTorch module) for a sanity check
# ---------------------------------------------------------------------------
def _reference_forward(params, x_nchw):
    x = jnp.transpose(x_nchw, (0, 2, 3, 1))  # NHWC

    def conv_relu(x, w_oihw, b):
        w = jnp.transpose(w_oihw, (2, 3, 1, 0))  # HWIO
        y = jax.lax.conv_general_dilated(
            x, w, window_strides=(1, 1), padding=((1, 1), (1, 1)),
            dimension_numbers=("NHWC", "HWIO", "NHWC"))
        return jnp.maximum(y + b, 0.0)

    def pool(x):
        return jax.lax.reduce_window(x, -jnp.inf, jax.lax.max,
                                     (1, 2, 2, 1), (1, 2, 2, 1), "VALID")

    x = pool(conv_relu(x, params["conv1_w"], params["conv1_b"]))
    x = pool(conv_relu(x, params["conv2_w"], params["conv2_b"]))
    x = jnp.transpose(x, (0, 3, 1, 2)).reshape(x.shape[0], -1)  # NCHW flatten
    x = jnp.maximum(x @ params["fc1_w"].T + params["fc1_b"], 0.0)
    return x @ params["fc2_w"].T + params["fc2_b"]


if __name__ == "__main__":
    key = jax.random.PRNGKey(0)
    pkey, xkey = jax.random.split(key)
    params = init_params(pkey)
    prepped = prepare_params(params)

    # 64*7*7 in fc1 implies 28x28 single-channel input; use batch=2.
    x = jax.random.normal(xkey, (2, 1, 28, 28), jnp.float32)
    out = jax.block_until_ready(cnn_forward(prepped, x))
    assert out.shape == (2, _NCLASS) and out.dtype == jnp.float32

    ref = _reference_forward(params, x)
    max_err = float(jnp.max(jnp.abs(out - ref)))
    assert max_err < 5e-2, f"mismatch vs pure-JAX reference: max abs err {max_err}"
    print("KERNEL_OK")
</pallas_src>

<mosaic_0001>
module attributes {stable_mosaic.version = 11 : i64} {
  func.func @_cnn_fused_kernel(%arg0: i32, %arg1: memref<224x84xbf16, #tpu.memory_space<vmem>>, %arg2: memref<84x448xbf16, #tpu.memory_space<vmem>>, %arg3: memref<84x448xbf16, #tpu.memory_space<vmem>>, %arg4: memref<1x448xf32, #tpu.memory_space<vmem>>, %arg5: memref<3x448x448xbf16, #tpu.memory_space<vmem>>, %arg6: memref<3x448x448xbf16, #tpu.memory_space<vmem>>, %arg7: memref<1x448xf32, #tpu.memory_space<vmem>>, %arg8: memref<7x448x128xbf16, #tpu.memory_space<vmem>>, %arg9: memref<1x128xf32, #tpu.memory_space<vmem>>, %arg10: memref<128x128xbf16, #tpu.memory_space<vmem>>, %arg11: memref<1x128xf32, #tpu.memory_space<vmem>>, %arg12: memref<8x128xf32, #tpu.memory_space<vmem>>) attributes {dimension_semantics = [#tpu.dimension_semantics<parallel>], iteration_bounds = array<i64: 1>, scalar_prefetch = 0 : i64, scratch_operands = 0 : i64, tpu.core_type = #tpu.core_type<tc>, window_params = [{transform_indices = @transform_0, window_bounds = array<i64: 224, 84>}, {pipeline_mode = #tpu.pipeline_mode<synchronous>, transform_indices = @transform_1, window_bounds = array<i64: 84, 448>}, {pipeline_mode = #tpu.pipeline_mode<synchronous>, transform_indices = @transform_2, window_bounds = array<i64: 84, 448>}, {pipeline_mode = #tpu.pipeline_mode<synchronous>, transform_indices = @transform_3, window_bounds = array<i64: 1, 448>}, {pipeline_mode = #tpu.pipeline_mode<synchronous>, transform_indices = @transform_4, window_bounds = array<i64: 3, 448, 448>}, {pipeline_mode = #tpu.pipeline_mode<synchronous>, transform_indices = @transform_5, window_bounds = array<i64: 3, 448, 448>}, {pipeline_mode = #tpu.pipeline_mode<synchronous>, transform_indices = @transform_6, window_bounds = array<i64: 1, 448>}, {pipeline_mode = #tpu.pipeline_mode<synchronous>, transform_indices = @transform_7, window_bounds = array<i64: 7, 448, 128>}, {pipeline_mode = #tpu.pipeline_mode<synchronous>, transform_indices = @transform_8, window_bounds = array<i64: 1, 128>}, {pipeline_mode = #tpu.pipeline_mode<synchronous>, transform_indices = @transform_9, window_bounds = array<i64: 128, 128>}, {pipeline_mode = #tpu.pipeline_mode<synchronous>, transform_indices = @transform_10, window_bounds = array<i64: 1, 128>}, {transform_indices = @transform_11, window_bounds = array<i64: 8, 128>}]} {
    %c0 = arith.constant 0 : index
    %c0_0 = arith.constant 0 : index
    %0 = vector.load %arg1[%c0, %c0_0] : memref<224x84xbf16, #tpu.memory_space<vmem>>, vector<224x84xbf16>
    %c0_1 = arith.constant 0 : index
    %c0_2 = arith.constant 0 : index
    %1 = vector.load %arg2[%c0_1, %c0_2] : memref<84x448xbf16, #tpu.memory_space<vmem>>, vector<84x448xbf16>
    %cst = arith.constant dense<0.000000e+00> : vector<224x448xf32>
    %2 = tpu.matmul %0, %1, %cst {dimension_numbers = #tpu.dot_dimension_numbers<[1], [0], [0], [1], [0, 0, 1, 1], [], []>} : vector<224x84xbf16>, vector<84x448xbf16>, vector<224x448xf32> -> vector<224x448xf32>
    %c0_3 = arith.constant 0 : index
    %c0_4 = arith.constant 0 : index
    %3 = vector.load %arg3[%c0_3, %c0_4] : memref<84x448xbf16, #tpu.memory_space<vmem>>, vector<84x448xbf16>
    %cst_5 = arith.constant dense<0.000000e+00> : vector<224x448xf32>
    %4 = tpu.matmul %0, %3, %cst_5 {dimension_numbers = #tpu.dot_dimension_numbers<[1], [0], [0], [1], [0, 0, 1, 1], [], []>} : vector<224x84xbf16>, vector<84x448xbf16>, vector<224x448xf32> -> vector<224x448xf32>
    %c0_6 = arith.constant 0 : index
    %c0_7 = arith.constant 0 : index
    %5 = vector.load %arg4[%c0_6, %c0_7] : memref<1x448xf32, #tpu.memory_space<vmem>>, vector<1x448xf32>
    %6 = vector.broadcast %5 : vector<1x448xf32> to vector<224x448xf32>
    %7 = arith.addf %2, %6 : vector<224x448xf32>
    %cst_8 = arith.constant 0.000000e+00 : f32
    %8 = vector.broadcast %cst_8 : f32 to vector<224x448xf32>
    %9 = arith.maximumf %7, %8 : vector<224x448xf32>
    %10 = vector.broadcast %5 : vector<1x448xf32> to vector<224x448xf32>
    %11 = arith.addf %4, %10 : vector<224x448xf32>
    %cst_9 = arith.constant 0.000000e+00 : f32
    %12 = vector.broadcast %cst_9 : f32 to vector<224x448xf32>
    %13 = arith.maximumf %11, %12 : vector<224x448xf32>
    %14 = arith.maximumf %9, %13 : vector<224x448xf32>
    %15 = vector.extract_strided_slice %14 {offsets = [0, 0], sizes = [8, 448], strides = [1, 1]} : vector<224x448xf32> to vector<8x448xf32>
    %16 = vector.extract_strided_slice %14 {offsets = [8, 0], sizes = [8, 448], strides = [1, 1]} : vector<224x448xf32> to vector<8x448xf32>
    %17 = arith.maximumf %15, %16 : vector<8x448xf32>
    %18 = vector.extract_strided_slice %14 {offsets = [16, 0], sizes = [8, 448], strides = [1, 1]} : vector<224x448xf32> to vector<8x448xf32>
    %19 = vector.extract_strided_slice %14 {offsets = [24, 0], sizes = [8, 448], strides = [1, 1]} : vector<224x448xf32> to vector<8x448xf32>
    %20 = arith.maximumf %18, %19 : vector<8x448xf32>
    %21 = vector.extract_strided_slice %14 {offsets = [32, 0], sizes = [8, 448], strides = [1, 1]} : vector<224x448xf32> to vector<8x448xf32>
    %22 = vector.extract_strided_slice %14 {offsets = [40, 0], sizes = [8, 448], strides = [1, 1]} : vector<224x448xf32> to vector<8x448xf32>
    %23 = arith.maximumf %21, %22 : vector<8x448xf32>
    %24 = vector.extract_strided_slice %14 {offsets = [48, 0], sizes = [8, 448], strides = [1, 1]} : vector<224x448xf32> to vector<8x448xf32>
    %25 = vector.extract_strided_slice %14 {offsets = [56, 0], sizes = [8, 448], strides = [1, 1]} : vector<224x448xf32> to vector<8x448xf32>
    %26 = arith.maximumf %24, %25 : vector<8x448xf32>
    %27 = vector.extract_strided_slice %14 {offsets = [64, 0], sizes = [8, 448], strides = [1, 1]} : vector<224x448xf32> to vector<8x448xf32>
    %28 = vector.extract_strided_slice %14 {offsets = [72, 0], sizes = [8, 448], strides = [1, 1]} : vector<224x448xf32> to vector<8x448xf32>
    %29 = arith.maximumf %27, %28 : vector<8x448xf32>
    %30 = vector.extract_strided_slice %14 {offsets = [80, 0], sizes = [8, 448], strides = [1, 1]} : vector<224x448xf32> to vector<8x448xf32>
    %31 = vector.extract_strided_slice %14 {offsets = [88, 0], sizes = [8, 448], strides = [1, 1]} : vector<224x448xf32> to vector<8x448xf32>
    %32 = arith.maximumf %30, %31 : vector<8x448xf32>
    %33 = vector.extract_strided_slice %14 {offsets = [96, 0], sizes = [8, 448], strides = [1, 1]} : vector<224x448xf32> to vector<8x448xf32>
    %34 = vector.extract_strided_slice %14 {offsets = [104, 0], sizes = [8, 448], strides = [1, 1]} : vector<224x448xf32> to vector<8x448xf32>
    %35 = arith.maximumf %33, %34 : vector<8x448xf32>
    %36 = vector.extract_strided_slice %14 {offsets = [112, 0], sizes = [8, 448], strides = [1, 1]} : vector<224x448xf32> to vector<8x448xf32>
    %37 = vector.extract_strided_slice %14 {offsets = [120, 0], sizes = [8, 448], strides = [1, 1]} : vector<224x448xf32> to vector<8x448xf32>
    %38 = arith.maximumf %36, %37 : vector<8x448xf32>
    %39 = vector.extract_strided_slice %14 {offsets = [128, 0], sizes = [8, 448], strides = [1, 1]} : vector<224x448xf32> to vector<8x448xf32>
    %40 = vector.extract_strided_slice %14 {offsets = [136, 0], sizes = [8, 448], strides = [1, 1]} : vector<224x448xf32> to vector<8x448xf32>
    %41 = arith.maximumf %39, %40 : vector<8x448xf32>
    %42 = vector.extract_strided_slice %14 {offsets = [144, 0], sizes = [8, 448], strides = [1, 1]} : vector<224x448xf32> to vector<8x448xf32>
    %43 = vector.extract_strided_slice %14 {offsets = [152, 0], sizes = [8, 448], strides = [1, 1]} : vector<224x448xf32> to vector<8x448xf32>
    %44 = arith.maximumf %42, %43 : vector<8x448xf32>
    %45 = vector.extract_strided_slice %14 {offsets = [160, 0], sizes = [8, 448], strides = [1, 1]} : vector<224x448xf32> to vector<8x448xf32>
    %46 = vector.extract_strided_slice %14 {offsets = [168, 0], sizes = [8, 448], strides = [1, 1]} : vector<224x448xf32> to vector<8x448xf32>
    %47 = arith.maximumf %45, %46 : vector<8x448xf32>
    %48 = vector.extract_strided_slice %14 {offsets = [176, 0], sizes = [8, 448], strides = [1, 1]} : vector<224x448xf32> to vector<8x448xf32>
    %49 = vector.extract_strided_slice %14 {offsets = [184, 0], sizes = [8, 448], strides = [1, 1]} : vector<224x448xf32> to vector<8x448xf32>
    %50 = arith.maximumf %48, %49 : vector<8x448xf32>
    %51 = vector.extract_strided_slice %14 {offsets = [192, 0], sizes = [8, 448], strides = [1, 1]} : vector<224x448xf32> to vector<8x448xf32>
    %52 = vector.extract_strided_slice %14 {offsets = [200, 0], sizes = [8, 448], strides = [1, 1]} : vector<224x448xf32> to vector<8x448xf32>
    %53 = arith.maximumf %51, %52 : vector<8x448xf32>
    %54 = vector.extract_strided_slice %14 {offsets = [208, 0], sizes = [8, 448], strides = [1, 1]} : vector<224x448xf32> to vector<8x448xf32>
    %55 = vector.extract_strided_slice %14 {offsets = [216, 0], sizes = [8, 448], strides = [1, 1]} : vector<224x448xf32> to vector<8x448xf32>
    %56 = arith.maximumf %54, %55 : vector<8x448xf32>
    %57 = tpu.concatenate %17, %20, %23, %26, %29, %32, %35, %38, %41, %44, %47, %50, %53, %56 in 0 : vector<8x448xf32>, vector<8x448xf32>, vector<8x448xf32>, vector<8x448xf32>, vector<8x448xf32>, vector<8x448xf32>, vector<8x448xf32>, vector<8x448xf32>, vector<8x448xf32>, vector<8x448xf32>, vector<8x448xf32>, vector<8x448xf32>, vector<8x448xf32>, vector<8x448xf32> -> vector<112x448xf32>
    %cst_10 = arith.constant 0.000000e+00 : f32
    %58 = vector.broadcast %cst_10 : f32 to vector<8x448xf32>
    %59 = vector.extract_strided_slice %57 {offsets = [0, 0], sizes = [104, 448], strides = [1, 1]} : vector<112x448xf32> to vector<104x448xf32>
    %60 = tpu.concatenate %58, %59 in 0 : vector<8x448xf32>, vector<104x448xf32> -> vector<112x448xf32>
    %61 = arith.truncf %60 : vector<112x448xf32> to vector<112x448xbf16>
    %62 = arith.truncf %57 : vector<112x448xf32> to vector<112x448xbf16>
    %63 = vector.extract_strided_slice %57 {offsets = [8, 0], sizes = [104, 448], strides = [1, 1]} : vector<112x448xf32> to vector<104x448xf32>
    %64 = tpu.concatenate %63, %58 in 0 : vector<104x448xf32>, vector<8x448xf32> -> vector<112x448xf32>
    %65 = arith.truncf %64 : vector<112x448xf32> to vector<112x448xbf16>
    %cst_11 = arith.constant 0.000000e+00 : f32
    %66 = vector.broadcast %cst_11 : f32 to vector<112x448xf32>
    %cst_12 = arith.constant 0.000000e+00 : f32
    %67 = vector.broadcast %cst_12 : f32 to vector<112x448xf32>
    %c0_13 = arith.constant 0 : index
    %c0_14 = arith.constant 0 : index
    %c0_15 = arith.constant 0 : index
    %68 = vector.load %arg5[%c0_13, %c0_14, %c0_15] : memref<3x448x448xbf16, #tpu.memory_space<vmem>>, vector<1x448x448xbf16>
    %69 = vector.shape_cast %68 : vector<1x448x448xbf16> to vector<448x448xbf16>
    %cst_16 = arith.constant dense<0.000000e+00> : vector<112x448xf32>
    %70 = tpu.matmul %61, %69, %cst_16 {dimension_numbers = #tpu.dot_dimension_numbers<[1], [0], [0], [1], [0, 0, 1, 1], [], []>} : vector<112x448xbf16>, vector<448x448xbf16>, vector<112x448xf32> -> vector<112x448xf32>
    %71 = arith.addf %66, %70 : vector<112x448xf32>
    %c0_17 = arith.constant 0 : index
    %c0_18 = arith.constant 0 : index
    %c0_19 = arith.constant 0 : index
    %72 = vector.load %arg6[%c0_17, %c0_18, %c0_19] : memref<3x448x448xbf16, #tpu.memory_space<vmem>>, vector<1x448x448xbf16>
    %73 = vector.shape_cast %72 : vector<1x448x448xbf16> to vector<448x448xbf16>
    %cst_20 = arith.constant dense<0.000000e+00> : vector<112x448xf32>
    %74 = tpu.matmul %61, %73, %cst_20 {dimension_numbers = #tpu.dot_dimension_numbers<[1], [0], [0], [1], [0, 0, 1, 1], [], []>} : vector<112x448xbf16>, vector<448x448xbf16>, vector<112x448xf32> -> vector<112x448xf32>
    %75 = arith.addf %67, %74 : vector<112x448xf32>
    %c1 = arith.constant 1 : index
    %c0_21 = arith.constant 0 : index
    %c0_22 = arith.constant 0 : index
    %76 = vector.load %arg5[%c1, %c0_21, %c0_22] : memref<3x448x448xbf16, #tpu.memory_space<vmem>>, vector<1x448x448xbf16>
    %77 = vector.shape_cast %76 : vector<1x448x448xbf16> to vector<448x448xbf16>
    %cst_23 = arith.constant dense<0.000000e+00> : vector<112x448xf32>
    %78 = tpu.matmul %62, %77, %cst_23 {dimension_numbers = #tpu.dot_dimension_numbers<[1], [0], [0], [1], [0, 0, 1, 1], [], []>} : vector<112x448xbf16>, vector<448x448xbf16>, vector<112x448xf32> -> vector<112x448xf32>
    %79 = arith.addf %71, %78 : vector<112x448xf32>
    %c1_24 = arith.constant 1 : index
    %c0_25 = arith.constant 0 : index
    %c0_26 = arith.constant 0 : index
    %80 = vector.load %arg6[%c1_24, %c0_25, %c0_26] : memref<3x448x448xbf16, #tpu.memory_space<vmem>>, vector<1x448x448xbf16>
    %81 = vector.shape_cast %80 : vector<1x448x448xbf16> to vector<448x448xbf16>
    %cst_27 = arith.constant dense<0.000000e+00> : vector<112x448xf32>
    %82 = tpu.matmul %62, %81, %cst_27 {dimension_numbers = #tpu.dot_dimension_numbers<[1], [0], [0], [1], [0, 0, 1, 1], [], []>} : vector<112x448xbf16>, vector<448x448xbf16>, vector<112x448xf32> -> vector<112x448xf32>
    %83 = arith.addf %75, %82 : vector<112x448xf32>
    %c2 = arith.constant 2 : index
    %c0_28 = arith.constant 0 : index
    %c0_29 = arith.constant 0 : index
    %84 = vector.load %arg5[%c2, %c0_28, %c0_29] : memref<3x448x448xbf16, #tpu.memory_space<vmem>>, vector<1x448x448xbf16>
    %85 = vector.shape_cast %84 : vector<1x448x448xbf16> to vector<448x448xbf16>
    %cst_30 = arith.constant dense<0.000000e+00> : vector<112x448xf32>
    %86 = tpu.matmul %65, %85, %cst_30 {dimension_numbers = #tpu.dot_dimension_numbers<[1], [0], [0], [1], [0, 0, 1, 1], [], []>} : vector<112x448xbf16>, vector<448x448xbf16>, vector<112x448xf32> -> vector<112x448xf32>
    %87 = arith.addf %79, %86 : vector<112x448xf32>
    %c2_31 = arith.constant 2 : index
    %c0_32 = arith.constant 0 : index
    %c0_33 = arith.constant 0 : index
    %88 = vector.load %arg6[%c2_31, %c0_32, %c0_33] : memref<3x448x448xbf16, #tpu.memory_space<vmem>>, vector<1x448x448xbf16>
    %89 = vector.shape_cast %88 : vector<1x448x448xbf16> to vector<448x448xbf16>
    %cst_34 = arith.constant dense<0.000000e+00> : vector<112x448xf32>
    %90 = tpu.matmul %65, %89, %cst_34 {dimension_numbers = #tpu.dot_dimension_numbers<[1], [0], [0], [1], [0, 0, 1, 1], [], []>} : vector<112x448xbf16>, vector<448x448xbf16>, vector<112x448xf32> -> vector<112x448xf32>
    %91 = arith.addf %83, %90 : vector<112x448xf32>
    %c0_35 = arith.constant 0 : index
    %c0_36 = arith.constant 0 : index
    %92 = vector.load %arg7[%c0_35, %c0_36] : memref<1x448xf32, #tpu.memory_space<vmem>>, vector<1x448xf32>
    %93 = vector.broadcast %92 : vector<1x448xf32> to vector<112x448xf32>
    %94 = arith.addf %87, %93 : vector<112x448xf32>
    %cst_37 = arith.constant 0.000000e+00 : f32
    %95 = vector.broadcast %cst_37 : f32 to vector<112x448xf32>
    %96 = arith.maximumf %94, %95 : vector<112x448xf32>
    %97 = vector.broadcast %92 : vector<1x448xf32> to vector<112x448xf32>
    %98 = arith.addf %91, %97 : vector<112x448xf32>
    %cst_38 = arith.constant 0.000000e+00 : f32
    %99 = vector.broadcast %cst_38 : f32 to vector<112x448xf32>
    %100 = arith.maximumf %98, %99 : vector<112x448xf32>
    %101 = arith.maximumf %96, %100 : vector<112x448xf32>
    %102 = vector.extract_strided_slice %101 {offsets = [0, 0], sizes = [8, 448], strides = [1, 1]} : vector<112x448xf32> to vector<8x448xf32>
    %103 = vector.extract_strided_slice %101 {offsets = [8, 0], sizes = [8, 448], strides = [1, 1]} : vector<112x448xf32> to vector<8x448xf32>
    %104 = arith.maximumf %102, %103 : vector<8x448xf32>
    %105 = vector.extract_strided_slice %101 {offsets = [16, 0], sizes = [8, 448], strides = [1, 1]} : vector<112x448xf32> to vector<8x448xf32>
    %106 = vector.extract_strided_slice %101 {offsets = [24, 0], sizes = [8, 448], strides = [1, 1]} : vector<112x448xf32> to vector<8x448xf32>
    %107 = arith.maximumf %105, %106 : vector<8x448xf32>
    %108 = vector.extract_strided_slice %101 {offsets = [32, 0], sizes = [8, 448], strides = [1, 1]} : vector<112x448xf32> to vector<8x448xf32>
    %109 = vector.extract_strided_slice %101 {offsets = [40, 0], sizes = [8, 448], strides = [1, 1]} : vector<112x448xf32> to vector<8x448xf32>
    %110 = arith.maximumf %108, %109 : vector<8x448xf32>
    %111 = vector.extract_strided_slice %101 {offsets = [48, 0], sizes = [8, 448], strides = [1, 1]} : vector<112x448xf32> to vector<8x448xf32>
    %112 = vector.extract_strided_slice %101 {offsets = [56, 0], sizes = [8, 448], strides = [1, 1]} : vector<112x448xf32> to vector<8x448xf32>
    %113 = arith.maximumf %111, %112 : vector<8x448xf32>
    %114 = vector.extract_strided_slice %101 {offsets = [64, 0], sizes = [8, 448], strides = [1, 1]} : vector<112x448xf32> to vector<8x448xf32>
    %115 = vector.extract_strided_slice %101 {offsets = [72, 0], sizes = [8, 448], strides = [1, 1]} : vector<112x448xf32> to vector<8x448xf32>
    %116 = arith.maximumf %114, %115 : vector<8x448xf32>
    %117 = vector.extract_strided_slice %101 {offsets = [80, 0], sizes = [8, 448], strides = [1, 1]} : vector<112x448xf32> to vector<8x448xf32>
    %118 = vector.extract_strided_slice %101 {offsets = [88, 0], sizes = [8, 448], strides = [1, 1]} : vector<112x448xf32> to vector<8x448xf32>
    %119 = arith.maximumf %117, %118 : vector<8x448xf32>
    %120 = vector.extract_strided_slice %101 {offsets = [96, 0], sizes = [8, 448], strides = [1, 1]} : vector<112x448xf32> to vector<8x448xf32>
    %121 = vector.extract_strided_slice %101 {offsets = [104, 0], sizes = [8, 448], strides = [1, 1]} : vector<112x448xf32> to vector<8x448xf32>
    %122 = arith.maximumf %120, %121 : vector<8x448xf32>
    %123 = tpu.concatenate %104, %107, %110, %113, %116, %119, %122 in 0 : vector<8x448xf32>, vector<8x448xf32>, vector<8x448xf32>, vector<8x448xf32>, vector<8x448xf32>, vector<8x448xf32>, vector<8x448xf32> -> vector<56x448xf32>
    %cst_39 = arith.constant 0.000000e+00 : f32
    %124 = vector.broadcast %cst_39 : f32 to vector<8x128xf32>
    %125 = vector.extract_strided_slice %123 {offsets = [0, 0], sizes = [8, 448], strides = [1, 1]} : vector<56x448xf32> to vector<8x448xf32>
    %126 = arith.truncf %125 : vector<8x448xf32> to vector<8x448xbf16>
    %c0_40 = arith.constant 0 : index
    %c0_41 = arith.constant 0 : index
    %c0_42 = arith.constant 0 : index
    %127 = vector.load %arg8[%c0_40, %c0_41, %c0_42] : memref<7x448x128xbf16, #tpu.memory_space<vmem>>, vector<1x448x128xbf16>
    %128 = vector.shape_cast %127 : vector<1x448x128xbf16> to vector<448x128xbf16>
    %cst_43 = arith.constant dense<0.000000e+00> : vector<8x128xf32>
    %129 = tpu.matmul %126, %128, %cst_43 {dimension_numbers = #tpu.dot_dimension_numbers<[1], [0], [0], [1], [0, 0, 1, 1], [], []>} : vector<8x448xbf16>, vector<448x128xbf16>, vector<8x128xf32> -> vector<8x128xf32>
    %130 = arith.addf %124, %129 : vector<8x128xf32>
    %131 = vector.extract_strided_slice %123 {offsets = [8, 0], sizes = [8, 448], strides = [1, 1]} : vector<56x448xf32> to vector<8x448xf32>
    %132 = arith.truncf %131 : vector<8x448xf32> to vector<8x448xbf16>
    %c1_44 = arith.constant 1 : index
    %c0_45 = arith.constant 0 : index
    %c0_46 = arith.constant 0 : index
    %133 = vector.load %arg8[%c1_44, %c0_45, %c0_46] : memref<7x448x128xbf16, #tpu.memory_space<vmem>>, vector<1x448x128xbf16>
    %134 = vector.shape_cast %133 : vector<1x448x128xbf16> to vector<448x128xbf16>
    %cst_47 = arith.constant dense<0.000000e+00> : vector<8x128xf32>
    %135 = tpu.matmul %132, %134, %cst_47 {dimension_numbers = #tpu.dot_dimension_numbers<[1], [0], [0], [1], [0, 0, 1, 1], [], []>} : vector<8x448xbf16>, vector<448x128xbf16>, vector<8x128xf32> -> vector<8x128xf32>
    %136 = arith.addf %130, %135 : vector<8x128xf32>
    %137 = vector.extract_strided_slice %123 {offsets = [16, 0], sizes = [8, 448], strides = [1, 1]} : vector<56x448xf32> to vector<8x448xf32>
    %138 = arith.truncf %137 : vector<8x448xf32> to vector<8x448xbf16>
    %c2_48 = arith.constant 2 : index
    %c0_49 = arith.constant 0 : index
    %c0_50 = arith.constant 0 : index
    %139 = vector.load %arg8[%c2_48, %c0_49, %c0_50] : memref<7x448x128xbf16, #tpu.memory_space<vmem>>, vector<1x448x128xbf16>
    %140 = vector.shape_cast %139 : vector<1x448x128xbf16> to vector<448x128xbf16>
    %cst_51 = arith.constant dense<0.000000e+00> : vector<8x128xf32>
    %141 = tpu.matmul %138, %140, %cst_51 {dimension_numbers = #tpu.dot_dimension_numbers<[1], [0], [0], [1], [0, 0, 1, 1], [], []>} : vector<8x448xbf16>, vector<448x128xbf16>, vector<8x128xf32> -> vector<8x128xf32>
    %142 = arith.addf %136, %141 : vector<8x128xf32>
    %143 = vector.extract_strided_slice %123 {offsets = [24, 0], sizes = [8, 448], strides = [1, 1]} : vector<56x448xf32> to vector<8x448xf32>
    %144 = arith.truncf %143 : vector<8x448xf32> to vector<8x448xbf16>
    %c3 = arith.constant 3 : index
    %c0_52 = arith.constant 0 : index
    %c0_53 = arith.constant 0 : index
    %145 = vector.load %arg8[%c3, %c0_52, %c0_53] : memref<7x448x128xbf16, #tpu.memory_space<vmem>>, vector<1x448x128xbf16>
    %146 = vector.shape_cast %145 : vector<1x448x128xbf16> to vector<448x128xbf16>
    %cst_54 = arith.constant dense<0.000000e+00> : vector<8x128xf32>
    %147 = tpu.matmul %144, %146, %cst_54 {dimension_numbers = #tpu.dot_dimension_numbers<[1], [0], [0], [1], [0, 0, 1, 1], [], []>} : vector<8x448xbf16>, vector<448x128xbf16>, vector<8x128xf32> -> vector<8x128xf32>
    %148 = arith.addf %142, %147 : vector<8x128xf32>
    %149 = vector.extract_strided_slice %123 {offsets = [32, 0], sizes = [8, 448], strides = [1, 1]} : vector<56x448xf32> to vector<8x448xf32>
    %150 = arith.truncf %149 : vector<8x448xf32> to vector<8x448xbf16>
    %c4 = arith.constant 4 : index
    %c0_55 = arith.constant 0 : index
    %c0_56 = arith.constant 0 : index
    %151 = vector.load %arg8[%c4, %c0_55, %c0_56] : memref<7x448x128xbf16, #tpu.memory_space<vmem>>, vector<1x448x128xbf16>
    %152 = vector.shape_cast %151 : vector<1x448x128xbf16> to vector<448x128xbf16>
    %cst_57 = arith.constant dense<0.000000e+00> : vector<8x128xf32>
    %153 = tpu.matmul %150, %152, %cst_57 {dimension_numbers = #tpu.dot_dimension_numbers<[1], [0], [0], [1], [0, 0, 1, 1], [], []>} : vector<8x448xbf16>, vector<448x128xbf16>, vector<8x128xf32> -> vector<8x128xf32>
    %154 = arith.addf %148, %153 : vector<8x128xf32>
    %155 = vector.extract_strided_slice %123 {offsets = [40, 0], sizes = [8, 448], strides = [1, 1]} : vector<56x448xf32> to vector<8x448xf32>
    %156 = arith.truncf %155 : vector<8x448xf32> to vector<8x448xbf16>
    %c5 = arith.constant 5 : index
    %c0_58 = arith.constant 0 : index
    %c0_59 = arith.constant 0 : index
    %157 = vector.load %arg8[%c5, %c0_58, %c0_59] : memref<7x448x128xbf16, #tpu.memory_space<vmem>>, vector<1x448x128xbf16>
    %158 = vector.shape_cast %157 : vector<1x448x128xbf16> to vector<448x128xbf16>
    %cst_60 = arith.constant dense<0.000000e+00> : vector<8x128xf32>
    %159 = tpu.matmul %156, %158, %cst_60 {dimension_numbers = #tpu.dot_dimension_numbers<[1], [0], [0], [1], [0, 0, 1, 1], [], []>} : vector<8x448xbf16>, vector<448x128xbf16>, vector<8x128xf32> -> vector<8x128xf32>
    %160 = arith.addf %154, %159 : vector<8x128xf32>
    %161 = vector.extract_strided_slice %123 {offsets = [48, 0], sizes = [8, 448], strides = [1, 1]} : vector<56x448xf32> to vector<8x448xf32>
    %162 = arith.truncf %161 : vector<8x448xf32> to vector<8x448xbf16>
    %c6 = arith.constant 6 : index
    %c0_61 = arith.constant 0 : index
    %c0_62 = arith.constant 0 : index
    %163 = vector.load %arg8[%c6, %c0_61, %c0_62] : memref<7x448x128xbf16, #tpu.memory_space<vmem>>, vector<1x448x128xbf16>
    %164 = vector.shape_cast %163 : vector<1x448x128xbf16> to vector<448x128xbf16>
    %cst_63 = arith.constant dense<0.000000e+00> : vector<8x128xf32>
    %165 = tpu.matmul %162, %164, %cst_63 {dimension_numbers = #tpu.dot_dimension_numbers<[1], [0], [0], [1], [0, 0, 1, 1], [], []>} : vector<8x448xbf16>, vector<448x128xbf16>, vector<8x128xf32> -> vector<8x128xf32>
    %166 = arith.addf %160, %165 : vector<8x128xf32>
    %c0_64 = arith.constant 0 : index
    %c0_65 = arith.constant 0 : index
    %167 = vector.load %arg9[%c0_64, %c0_65] : memref<1x128xf32, #tpu.memory_space<vmem>>, vector<1x128xf32>
    %168 = vector.broadcast %167 : vector<1x128xf32> to vector<8x128xf32>
    %169 = arith.addf %166, %168 : vector<8x128xf32>
    %cst_66 = arith.constant 0.000000e+00 : f32
    %170 = vector.broadcast %cst_66 : f32 to vector<8x128xf32>
    %171 = arith.maximumf %169, %170 : vector<8x128xf32>
    %172 = arith.truncf %171 : vector<8x128xf32> to vector<8x128xbf16>
    %c0_67 = arith.constant 0 : index
    %c0_68 = arith.constant 0 : index
    %173 = vector.load %arg10[%c0_67, %c0_68] : memref<128x128xbf16, #tpu.memory_space<vmem>>, vector<128x128xbf16>
    %cst_69 = arith.constant dense<0.000000e+00> : vector<8x128xf32>
    %174 = tpu.matmul %172, %173, %cst_69 {dimension_numbers = #tpu.dot_dimension_numbers<[1], [0], [0], [1], [0, 0, 1, 1], [], []>} : vector<8x128xbf16>, vector<128x128xbf16>, vector<8x128xf32> -> vector<8x128xf32>
    %c0_70 = arith.constant 0 : index
    %c0_71 = arith.constant 0 : index
    %175 = vector.load %arg11[%c0_70, %c0_71] : memref<1x128xf32, #tpu.memory_space<vmem>>, vector<1x128xf32>
    %176 = vector.broadcast %175 : vector<1x128xf32> to vector<8x128xf32>
    %177 = arith.addf %174, %176 : vector<8x128xf32>
    %c0_72 = arith.constant 0 : index
    %c0_73 = arith.constant 0 : index
    %178 = vector.load %arg12[%c0_72, %c0_73] : memref<8x128xf32, #tpu.memory_space<vmem>>, vector<8x128xf32>
    tpu.vector_store %arg12[%c0_72, %c0_73], %177 {strides = array<i32>} : memref<8x128xf32, #tpu.memory_space<vmem>>, vector<8x128xf32>,
    return
  }
  func.func @transform_0(%arg0: i32) -> (i32, i32) {
    %c0_i32 = arith.constant 0 : i32
    %c0_i32_0 = arith.constant 0 : i32
    return %arg0, %c0_i32 : i32, i32
  }
  func.func @transform_1(%arg0: i32) -> (i32, i32) {
    %c0_i32 = arith.constant 0 : i32
    %c0_i32_0 = arith.constant 0 : i32
    %c0_i32_1 = arith.constant 0 : i32
    return %c0_i32, %c0_i32_0 : i32, i32
  }
  func.func @transform_2(%arg0: i32) -> (i32, i32) {
    %c0_i32 = arith.constant 0 : i32
    %c0_i32_0 = arith.constant 0 : i32
    %c0_i32_1 = arith.constant 0 : i32
    return %c0_i32, %c0_i32_0 : i32, i32
  }
  func.func @transform_3(%arg0: i32) -> (i32, i32) {
    %c0_i32 = arith.constant 0 : i32
    %c0_i32_0 = arith.constant 0 : i32
    %c0_i32_1 = arith.constant 0 : i32
    return %c0_i32, %c0_i32_0 : i32, i32
  }
  func.func @transform_4(%arg0: i32) -> (i32, i32, i32) {
    %c0_i32 = arith.constant 0 : i32
    %c0_i32_0 = arith.constant 0 : i32
    %c0_i32_1 = arith.constant 0 : i32
    %c0_i32_2 = arith.constant 0 : i32
    return %c0_i32, %c0_i32_0, %c0_i32_1 : i32, i32, i32
  }
  func.func @transform_5(%arg0: i32) -> (i32, i32, i32) {
    %c0_i32 = arith.constant 0 : i32
    %c0_i32_0 = arith.constant 0 : i32
    %c0_i32_1 = arith.constant 0 : i32
    %c0_i32_2 = arith.constant 0 : i32
    return %c0_i32, %c0_i32_0, %c0_i32_1 : i32, i32, i32
  }
  func.func @transform_6(%arg0: i32) -> (i32, i32) {
    %c0_i32 = arith.constant 0 : i32
    %c0_i32_0 = arith.constant 0 : i32
    %c0_i32_1 = arith.constant 0 : i32
    return %c0_i32, %c0_i32_0 : i32, i32
  }
  func.func @transform_7(%arg0: i32) -> (i32, i32, i32) {
    %c0_i32 = arith.constant 0 : i32
    %c0_i32_0 = arith.constant 0 : i32
    %c0_i32_1 = arith.constant 0 : i32
    %c0_i32_2 = arith.constant 0 : i32
    return %c0_i32, %c0_i32_0, %c0_i32_1 : i32, i32, i32
  }
  func.func @transform_8(%arg0: i32) -> (i32, i32) {
    %c0_i32 = arith.constant 0 : i32
    %c0_i32_0 = arith.constant 0 : i32
    %c0_i32_1 = arith.constant 0 : i32
    return %c0_i32, %c0_i32_0 : i32, i32
  }
  func.func @transform_9(%arg0: i32) -> (i32, i32) {
    %c0_i32 = arith.constant 0 : i32
    %c0_i32_0 = arith.constant 0 : i32
    %c0_i32_1 = arith.constant 0 : i32
    return %c0_i32, %c0_i32_0 : i32, i32
  }
  func.func @transform_10(%arg0: i32) -> (i32, i32) {
    %c0_i32 = arith.constant 0 : i32
    %c0_i32_0 = arith.constant 0 : i32
    %c0_i32_1 = arith.constant 0 : i32
    return %c0_i32, %c0_i32_0 : i32, i32
  }
  func.func @transform_11(%arg0: i32) -> (i32, i32) {
    %c0_i32 = arith.constant 0 : i32
    %c0_i32_0 = arith.constant 0 : i32
    return %arg0, %c0_i32 : i32, i32
  }
}

</mosaic_0001>

<bundles_post_ra>
// kernel: cnn_forward.1
= control target key start
LH: loop header
LB: loop body
LE: loop exit
PB: predicated region body
PF: predicated region fallthrough
CT: control target
= control target key end

     0   :  { %16 = vsyncpa [#allocation3], 0  ;;  %s17262_s0 = inlined_call_operand.vmem [shape: bf16[224,84], index: 0, kind: input, shape index: {}]   ;;  %s17263_s1 = inlined_call_operand.hbm [shape: bf16[84,448], index: 1, kind: input, shape index: {}]   ;;  %s17264_s2 = inlined_call_operand.hbm [shape: bf16[84,448], index: 2, kind: input, shape index: {}]   ;;  %s17265_s3 = inlined_call_operand.hbm [shape: f32[1,448], index: 3, kind: input, shape index: {}]   ;;  %s17266_s4 = inlined_call_operand.hbm [shape: bf16[3,448,448], index: 4, kind: input, shape index: {}]   ;;  %s17267_s5 = inlined_call_operand.hbm [shape: bf16[3,448,448], index: 5, kind: input, shape index: {}]   ;;  %s17268_s6 = inlined_call_operand.hbm [shape: f32[1,448], index: 6, kind: input, shape index: {}]   ;;  %s17269_s7 = inlined_call_operand.hbm [shape: bf16[7,448,128], index: 7, kind: input, shape index: {}]   ;;  %s17270_s8 = inlined_call_operand.hbm [shape: f32[1,128], index: 8, kind: input, shape index: {}]   ;;  %s17271_s9 = inlined_call_operand.hbm [shape: bf16[128,128], index: 9, kind: input, shape index: {}]   ;;  %s17272_s10 = inlined_call_operand.hbm [shape: f32[1,128], index: 10, kind: input, shape index: {}]   ;;  %s17273_s11 = inlined_call_operand.vmem [shape: f32[8,128], index: 11, kind: output, shape index: {}]  }
   0x1   :  { %17 = vsyncpa [#allocation5], 0 }
   0x2   :  { %18 = vsyncpa [#allocation8], 0 }
   0x3   :  { %19 = vsyncpa [#allocation11], 0 }
   0x4   :  { %20 = vsyncpa [#allocation14], 0 }
   0x5   :  { %21 = vsyncpa [#allocation17], 0  ;;  %s13876_s17 = smov [#allocation4]   ;;  %s13877_s19 = smov [#allocation7]  }
   0x6   :  { %s41_s18 = sshll.u32 %s13876_s17, 4  ;;  %s63_s20 = sshll.u32 %s13877_s19, 4  ;;  %s42_s18 = int_to_ptr.vmem [resolvable:$true] %s41_s18  ;;  %s64_s20 = int_to_ptr.vmem [resolvable:$true] %s63_s20 }
   0x7   :  { %s13672_s21 = scalar_lea.vmem %s42_s18, 2816  ;;  %p13677_p1 = scmp.lt.s32.totalorder %s42_s18, %s42_s18 }
   0x8   :  { %p13673_p0 = scmp.ne.s32.totalorder %s42_s18, %s13672_s21  ;;  %p13678_p2 = scmp.lt.s32.totalorder %s13672_s21, %s13672_s21 }
   0xa   :  { %p13679_p3 = por %p13678_p2, %p13677_p1 }
   0xc   :  { %p13680_p4 = pnand %p13679_p3, %p13673_p0 }
   0xe   :  { %13683 = shalt.err (!%p13680_p4)
}
   0xf   :  { %s13878_s22 = smov 256   ;;  %s13879_s23 = smov 16  }
  0x10   :  { %47 = dma.hbm_to_vmem [thread:$0]  %s17264_s2, 2816, %s42_s18, [#allocation5], %s13878_s22, %s13878_s22, %s13879_s23  }
  0x11   :  { %s13692_s26 = scalar_lea.vmem %s64_s20, 43008  ;;  %p13697_p6 = scmp.lt.s32.totalorder %s64_s20, %s64_s20 }
  0x12   :  { %p13693_p5 = scmp.ne.s32.totalorder %s64_s20, %s13692_s26  ;;  %p13698_p7 = scmp.lt.s32.totalorder %s13692_s26, %s13692_s26 }
  0x14   :  { %p13699_p8 = por %p13698_p7, %p13697_p6 }
  0x16   :  { %p13700_p9 = pnand %p13699_p8, %p13693_p5 }
  0x18   :  { %13703 = shalt.err (!%p13700_p9)
}
  0x19   :  { %69 = dma.hbm_to_vmem [thread:$0]  %s17266_s4, 43008, %s64_s20, [#allocation8], %s13878_s22, %s13878_s22, %s13879_s23  }
  0x1a   :  { %s13880_s29 = smov [#allocation10]   ;;  %s13881_s12 = smov [#allocation13]  }
  0x1b   :  { %s88_s30 = sshll.u32 %s13880_s29, 4  ;;  %s110_s13 = sshll.u32 %s13881_s12, 4  ;;  %s89_s30 = int_to_ptr.vmem [resolvable:$true] %s88_s30  ;;  %s111_s13 = int_to_ptr.vmem [resolvable:$true] %s110_s13 }
  0x1c   :  { %s13712_s2 = scalar_lea.vmem %s89_s30, 64  ;;  %p13717_p11 = scmp.lt.s32.totalorder %s89_s30, %s89_s30 }
  0x1d   :  { %p13713_p10 = scmp.ne.s32.totalorder %s89_s30, %s13712_s2  ;;  %p13718_p12 = scmp.lt.s32.totalorder %s13712_s2, %s13712_s2 }
  0x1f   :  { %p13719_p13 = por %p13718_p12, %p13717_p11 }
  0x21   :  { %p13720_p0 = pnand %p13719_p13, %p13713_p10 }
  0x23   :  { %13723 = shalt.err (!%p13720_p0)
}
  0x24   :  { %91 = dma.hbm_to_vmem [thread:$0]  %s17268_s6, 64, %s89_s30, [#allocation11]  }
  0x25   :  { %s13732_s16 = scalar_lea.vmem %s111_s13, 16  ;;  %s13736_s4 = scalar_lea.vmem %s111_s13, 32 }
  0x26   :  { %p13733_p1 = scmp.ne.s32.totalorder %s111_s13, %s13732_s16  ;;  %p13737_p2 = scmp.lt.s32.totalorder %s111_s13, %s111_s13 }
  0x27   :  { %p13738_p3 = scmp.lt.s32.totalorder %s13736_s4, %s13732_s16 }
  0x29   :  { %p13739_p4 = por %p13738_p3, %p13737_p2 }
  0x2b   :  { %p13740_p5 = pnand %p13739_p4, %p13733_p1 }
  0x2d   :  { %13743 = shalt.err (!%p13740_p5)
}
  0x2e   :  { %113 = dma.hbm_to_vmem [thread:$0]  %s17270_s8, 16, %s111_s13, [#allocation14]  }
  0x2f   :  { %s13882_s19 = smov [#allocation2]   ;;  %s13883_s21 = smov [#allocation6]  }
  0x30   :  { %s29_s20 = sshll.u32 %s13882_s19, 4  ;;  %s54_s24 = sshll.u32 %s13883_s21, 4  ;;  %s30_s20 = int_to_ptr.vmem [resolvable:$true] %s29_s20  ;;  %s55_s24 = int_to_ptr.vmem [resolvable:$true] %s54_s24 }
  0x31   :  { %s13752_s25 = scalar_lea.vmem %s30_s20, 2816  ;;  %p13757_p7 = scmp.lt.s32.totalorder %s30_s20, %s30_s20 }
  0x32   :  { %p13753_p6 = scmp.ne.s32.totalorder %s30_s20, %s13752_s25  ;;  %p13758_p8 = scmp.lt.s32.totalorder %s13752_s25, %s13752_s25 }
  0x34   :  { %p13759_p9 = por %p13758_p8, %p13757_p7 }
  0x36   :  { %p13760_p10 = pnand %p13759_p9, %p13753_p6 }
  0x38   :  { %13763 = shalt.err (!%p13760_p10)
}
  0x39   :  { %35 = dma.hbm_to_vmem [thread:$0]  %s17263_s1, 2816, %s30_s20, [#allocation3], %s13878_s22, %s13878_s22, %s13879_s23  }
  0x3a   :  { %s13772_s8 = scalar_lea.vmem %s55_s24, 64  ;;  %p13777_p12 = scmp.lt.s32.totalorder %s55_s24, %s55_s24 }
  0x3b   :  { %p13773_p11 = scmp.ne.s32.totalorder %s55_s24, %s13772_s8  ;;  %p13778_p13 = scmp.lt.s32.totalorder %s13772_s8, %s13772_s8 }
  0x3d   :  { %p13779_p0 = por %p13778_p13, %p13777_p12 }
  0x3f   :  { %p13780_p1 = pnand %p13779_p0, %p13773_p11 }
  0x41   :  { %13783 = shalt.err (!%p13780_p1)
}
  0x42   :  { %57 = dma.hbm_to_vmem [thread:$0]  %s17265_s3, 64, %s55_s24, [#allocation5]  }
  0x43   :  { %s13884_s29 = smov [#allocation9]   ;;  %s13885_s12 = smov [#allocation12]  }
  0x44   :  { %s75_s30 = sshll.u32 %s13884_s29, 4  ;;  %s97_s13 = sshll.u32 %s13885_s12, 4  ;;  %s76_s30 = int_to_ptr.vmem [resolvable:$true] %s75_s30  ;;  %s98_s13 = int_to_ptr.vmem [resolvable:$true] %s97_s13 }
  0x45   :  { %s13792_s2 = scalar_lea.vmem %s76_s30, 43008  ;;  %p13797_p3 = scmp.lt.s32.totalorder %s76_s30, %s76_s30 }
  0x46   :  { %p13793_p2 = scmp.ne.s32.totalorder %s76_s30, %s13792_s2  ;;  %p13798_p4 = scmp.lt.s32.totalorder %s13792_s2, %s13792_s2 }
  0x48   :  { %p13799_p5 = por %p13798_p4, %p13797_p3 }
  0x4a   :  { %p13800_p6 = pnand %p13799_p5, %p13793_p2 }
  0x4c   :  { %13803 = shalt.err (!%p13800_p6)
}
  0x4d   :  { %81 = dma.hbm_to_vmem [thread:$0]  %s17267_s5, 43008, %s76_s30, [#allocation8], %s13878_s22, %s13878_s22, %s13879_s23  }
  0x4e   :  { %s13812_s3 = scalar_lea.vmem %s98_s13, 25088  ;;  %p13817_p8 = scmp.lt.s32.totalorder %s98_s13, %s98_s13 }
  0x4f   :  { %p13813_p7 = scmp.ne.s32.totalorder %s98_s13, %s13812_s3  ;;  %p13818_p9 = scmp.lt.s32.totalorder %s13812_s3, %s13812_s3 }
  0x51   :  { %p13819_p10 = por %p13818_p9, %p13817_p8 }
  0x53   :  { %p13820_p11 = pnand %p13819_p10, %p13813_p7 }
  0x55   :  { %13823 = shalt.err (!%p13820_p11)
}
  0x56   :  { %s13886_s15 = smov 64   ;;  %s13887_s16 = smov 4  }
  0x57   :  { %103 = dma.hbm_to_vmem [thread:$0]  %s17269_s7, 25088, %s98_s13, [#allocation11], %s13886_s15, %s13886_s15, %s13887_s16  }
  0x58   :  { %s13888_s18 = smov [#allocation15]   ;;  %s13889_s20 = smov [#allocation16]  }
  0x59   :  { %s119_s19 = sshll.u32 %s13888_s18, 4  ;;  %s132_s21 = sshll.u32 %s13889_s20, 4  ;;  %s120_s19 = int_to_ptr.vmem [resolvable:$true] %s119_s19  ;;  %s133_s21 = int_to_ptr.vmem [resolvable:$true] %s132_s21 }
  0x5a   :  { %s13832_s5 = scalar_lea.vmem %s120_s19, 1024  ;;  %p13837_p13 = scmp.lt.s32.totalorder %s120_s19, %s120_s19 }
  0x5b   :  { %p13833_p12 = scmp.ne.s32.totalorder %s120_s19, %s13832_s5  ;;  %p13838_p0 = scmp.lt.s32.totalorder %s13832_s5, %s13832_s5 }
  0x5d   :  { %p13839_p1 = por %p13838_p0, %p13837_p13 }
  0x5f   :  { %p13840_p2 = pnand %p13839_p1, %p13833_p12 }
  0x61   :  { %13843 = shalt.err (!%p13840_p2)
}
  0x62   :  { %125 = dma.hbm_to_vmem [thread:$0]  %s17271_s9, 1024, %s120_s19, [#allocation14], %s13886_s15, %s13886_s15, %s13887_s16  }
  0x63   :  { %s13852_s24 = scalar_lea.vmem %s133_s21, 16  ;;  %s13856_s7 = scalar_lea.vmem %s133_s21, 32 }
  0x64   :  { %p13853_p3 = scmp.ne.s32.totalorder %s133_s21, %s13852_s24  ;;  %p13857_p4 = scmp.lt.s32.totalorder %s133_s21, %s133_s21 }
  0x65   :  { %p13858_p5 = scmp.lt.s32.totalorder %s13856_s7, %s13852_s24 }
  0x67   :  { %p13859_p6 = por %p13858_p5, %p13857_p4 }
  0x69   :  { %p13860_p7 = pnand %p13859_p6, %p13853_p3 }
  0x6b   :  { %13863 = shalt.err (!%p13860_p7)
}
  0x6c   :  { %135 = dma.hbm_to_vmem [thread:$0]  %s17272_s10, 16, %s133_s21, [#allocation17]  }
  0x6d   :  { %13864 = dma.done.wait [#allocation3], 2816  }
  0x6e   :  { %13865 = vsyncadd [#allocation3], 4294964480 }
  0x6f   :  { %13866 = dma.done.wait [#allocation5], 2880  }
  0x70   :  { %13867 = vsyncadd [#allocation5], 4294964416 }
  0x71   :  { %13868 = dma.done.wait [#allocation8], 86016  }
  0x72   :  { %13869 = vsyncadd [#allocation8], 4294881280 }
  0x73   :  { %13870 = dma.done.wait [#allocation11], 25152  }
  0x74   :  { %13871 = vsyncadd [#allocation11], 4294942144 }
  0x75   :  { %13872 = dma.done.wait [#allocation14], 1040  }
  0x76   :  { %13873 = vsyncadd [#allocation14], 4294966256 }
  0x77   :  { %13874 = dma.done.wait [#allocation17], 16  }
  0x78   :  { %13875 = vsyncadd [#allocation17], 4294967280  ;;  %v17278_v0 = vmov 0   ;;  %v215_v1 = vld [vmem:[#allocation2 + $0xa0] sm:$0x33]  ;;  %vm484_vm0 = vcmask 1041408  }
  0x79   :  { %529 = vmatprep.mubr.bf16.mxu0 %v17278_v0  ;;  %702 = vmatprep.mubr.bf16.mxu1 %v17278_v0  ;;  %v216_v2 = vld [vmem:[#allocation2 + $0xa8] sm:$0x33]  ;;  %v11114_v3 = vcombine.high %v215_v1, %v215_v1  ;;  %v11113_v5 = vcombine.low %v215_v1, %v215_v1  ;;  %v12374_v7 = vld [vmem:[#allocation2 + $0x84] ss:$16 sps:$4 sm:$0xff]   ;;  %v12378_v11 = vld [vmem:[#allocation2 + $0x80] ss:$16 sps:$4 sm:$0xff]  }
  0x7a   :  { %v11116_v4 = vcombine.high %v216_v2, %v216_v2  ;;  %v11115_v6 = vcombine.low %v216_v2, %v216_v2  ;;  %v12376_v8 = vld [vmem:[#allocation2 + $0x8c] ss:$16 sps:$4 sm:$0xff]   ;;  %v12379_v12 = vld [vmem:[#allocation2 + $0x88] ss:$16 sps:$4 sm:$0xff]   ;;  %v12380_v13 = vld [vmem:[#allocation2 + $0x64] ss:$16 sps:$4 sm:$0xff]  }
  0x7b   :  { %11117 = vmatprep.subr.msk.bf16.mxu0 %vm484_vm0, %v11114_v3  ;;  %v486_v9 = vsel %vm484_vm0, %v11113_v5, 0  ;;  %v12382_v14 = vld [vmem:[#allocation2 + $0x6c] ss:$16 sps:$4 sm:$0xff]   ;;  %v12384_v15 = vld [vmem:[#allocation2 + $0x60] ss:$16 sps:$4 sm:$0xff]   ;;  %vm441_vm1 = vcmask 687104  }
  0x7c   :  { %11132 = vmatprep.subr.msk.bf16.mxu1 %vm484_vm0, %v11116_v4  ;;  %v492_v10 = vsel %vm484_vm0, %v11115_v6, 0  ;;  %502 = vmatpush1.bf16.msra.mxu0 %v486_v9  ;;  %v12385_v16 = vld [vmem:[#allocation2 + $0x68] ss:$16 sps:$4 sm:$0xff]   ;;  %v12386_v17 = vld [vmem:[#allocation2 + $0x44] ss:$16 sps:$4 sm:$0xff]   ;;  %vm2660_vm2 = vcmask 523264  }
  0x7d   :  { %675 = vmatpush1.bf16.msra.mxu1 %v492_v10  ;;  %503 = vmatprep.subr.bf16.mxu0 %v12374_v7  ;;  %v12388_v18 = vld [vmem:[#allocation2 + $0x4c] ss:$16 sps:$4 sm:$0xff]   ;;  %v12390_v19 = vld [vmem:[#allocation2 + $0x40] ss:$16 sps:$4 sm:$0xff]   ;;  %v12391_v20 = vld [vmem:[#allocation2 + $0x48] ss:$16 sps:$4 sm:$0xff]  }
  0x7e   :  { %676 = vmatprep.subr.bf16.mxu1 %v12376_v8  ;;  %v12392_v21 = vld [vmem:[#allocation2 + $0x24] ss:$16 sps:$4 sm:$0xff]   ;;  %v12394_v22 = vld [vmem:[#allocation2 + $0x2c] ss:$16 sps:$4 sm:$0xff]   ;;  %v12396_v23 = vld [vmem:[#allocation2 + $0x20] ss:$16 sps:$4 sm:$0xff]  }
  0x7f   :  { %v12397_v24 = vld [vmem:[#allocation2 + $0x28] ss:$16 sps:$4 sm:$0xff]   ;;  %v12398_v25 = vld [vmem:[#allocation2 + $0x4] ss:$16 sps:$4 sm:$0xff]   ;;  %v12400_v26 = vld [vmem:[#allocation2 + $0xc] ss:$16 sps:$4 sm:$0xff]  }
  0x80   :  { %504 = vmatpush1.bf16.msra.mxu0 %v12378_v11  ;;  %v237_v27 = vld [vmem:[#allocation4 + $0xa0] sm:$0x33]  ;;  %v238_v28 = vld [vmem:[#allocation4 + $0xa8] sm:$0x33]  ;;  %v14004_v35 = vld [vmem:[%s17262_s0] sm:$0xff]   ;;  %vm13892_vm3 = vmmov 0  }
  0x81   :  { %677 = vmatpush1.bf16.msra.mxu1 %v12379_v12  ;;  %505 = vmatprep.subr.bf16.mxu0 %v12380_v13  ;;  %v12402_v29 = vld [vmem:[#allocation2] ss:$16 sps:$4 sm:$0xff]   ;;  %v12403_v30 = vld [vmem:[#allocation2 + $0x8] ss:$16 sps:$4 sm:$0xff]   ;;  %v11168_v31 = vcombine.high %v237_v27, %v237_v27  ;;  %v11170_v32 = vcombine.high %v238_v28, %v238_v28  ;;  %v11167_v33 = vcombine.low %v237_v27, %v237_v27  ;;  %v12413_v36 = vld [vmem:[#allocation4 + $0x84] ss:$16 sps:$4 sm:$0xff]  }
  0x82   :  { %678 = vmatprep.subr.bf16.mxu1 %v12382_v14  ;;  %v11169_v34 = vcombine.low %v238_v28, %v238_v28  ;;  %v12411_v39 = vld [vmem:[#allocation4 + $0x80] ss:$16 sps:$4 sm:$0xff]   ;;  %v12416_v40 = vld [vmem:[#allocation4 + $0x8c] ss:$16 sps:$4 sm:$0xff]   ;;  %v12414_v41 = vld [vmem:[#allocation4 + $0x88] ss:$16 sps:$4 sm:$0xff]  }
  0x83   :  { %v1066_v37 = vsel %vm484_vm0, %v11167_v33, 0  ;;  %v12421_v42 = vld [vmem:[#allocation4 + $0x64] ss:$16 sps:$4 sm:$0xff]   ;;  %v12424_v43 = vld [vmem:[#allocation4 + $0x6c] ss:$16 sps:$4 sm:$0xff]  }
  0x84   :  { %506 = vmatpush1.bf16.msra.mxu0 %v12384_v15  ;;  %v1072_v38 = vsel %vm484_vm0, %v11169_v34, 0  ;;  %v14019_v44 = vld [vmem:[%s17262_s0 + $0x8] sm:$0xff]   ;;  %v12419_v45 = vld [vmem:[#allocation4 + $0x60] ss:$16 sps:$4 sm:$0xff]   ;;  %v12430_v47 = vld [vmem:[#allocation4 + $0x44] ss:$16 sps:$4 sm:$0xff]  }
  0x85   :  { %679 = vmatpush1.bf16.msra.mxu1 %v12385_v16  ;;  %507 = vmatprep.subr.bf16.mxu0 %v12386_v17  ;;  %v12422_v46 = vld [vmem:[#allocation4 + $0x68] ss:$16 sps:$4 sm:$0xff]   ;;  %v12433_v48 = vld [vmem:[#allocation4 + $0x4c] ss:$16 sps:$4 sm:$0xff]   ;;  %v12428_v49 = vld [vmem:[#allocation4 + $0x40] ss:$16 sps:$4 sm:$0xff]  }
  0x86   :  { %680 = vmatprep.subr.bf16.mxu1 %v12388_v18  ;;  %v14030_v50 = vld [vmem:[%s17262_s0 + $0x10] sm:$0xff]   ;;  %v12431_v51 = vld [vmem:[#allocation4 + $0x48] ss:$16 sps:$4 sm:$0xff]   ;;  %v12441_v53 = vld [vmem:[#allocation4 + $0x2c] ss:$16 sps:$4 sm:$0xff]  }
  0x87   :  { %v12438_v52 = vld [vmem:[#allocation4 + $0x24] ss:$16 sps:$4 sm:$0xff]   ;;  %v12436_v54 = vld [vmem:[#allocation4 + $0x20] ss:$16 sps:$4 sm:$0xff]   ;;  %v12439_v55 = vld [vmem:[#allocation4 + $0x28] ss:$16 sps:$4 sm:$0xff]  }
  0x88   :  { %508 = vmatpush1.bf16.msra.mxu0 %v12390_v19  ;;  %v12446_v56 = vld [vmem:[#allocation4 + $0x4] ss:$16 sps:$4 sm:$0xff]   ;;  %v12449_v57 = vld [vmem:[#allocation4 + $0xc] ss:$16 sps:$4 sm:$0xff]   ;;  %v12444_v58 = vld [vmem:[#allocation4] ss:$16 sps:$4 sm:$0xff]  }
  0x89   :  { %681 = vmatpush1.bf16.msra.mxu1 %v12391_v20  ;;  %509 = vmatprep.subr.bf16.mxu0 %v12392_v21  ;;  %v12447_v59 = vld [vmem:[#allocation4 + $0x8] ss:$16 sps:$4 sm:$0xff]   ;;  %v14052_v61 = vld [vmem:[%s17262_s0 + $0x20] sm:$0xff]   ;;  %v14074_v63 = vld [vmem:[%s17262_s0 + $0x30] sm:$0xff]  }
  0x8a   :  { %682 = vmatprep.subr.bf16.mxu1 %v12394_v22  ;;  %v14041_v60 = vld [vmem:[%s17262_s0 + $0x18] sm:$0xff]   ;;  %v14063_v62 = vld [vmem:[%s17262_s0 + $0x28] sm:$0xff]   ;;  %v14096_v2 = vld [vmem:[%s17262_s0 + $0x40] sm:$0xff]  }
  0x8b   :  { %v14085_v1 = vld [vmem:[%s17262_s0 + $0x38] sm:$0xff]   ;;  %v14107_v3 = vld [vmem:[%s17262_s0 + $0x48] sm:$0xff]   ;;  %v14118_v4 = vld [vmem:[%s17262_s0 + $0x50] sm:$0xff]  }
  0x8c   :  { %510 = vmatpush1.bf16.msra.mxu0 %v12396_v23  ;;  %v14129_v5 = vld [vmem:[%s17262_s0 + $0x58] sm:$0xff]   ;;  %v14140_v6 = vld [vmem:[%s17262_s0 + $0x60] sm:$0xff]   ;;  %v14151_v7 = vld [vmem:[%s17262_s0 + $0x68] sm:$0xff]  }
  0x8d   :  { %683 = vmatpush1.bf16.msra.mxu1 %v12397_v24  ;;  %511 = vmatprep.subr.bf16.mxu0 %v12398_v25  ;;  %v12452_v8 = vld [vmem:[#allocation7 + $0x460] ss:$16 sps:$4 sm:$0xff]   ;;  %v12454_v9 = vld [vmem:[#allocation7 + $0x464] ss:$16 sps:$4 sm:$0xff]  }
  0x8e   :  { %684 = vmatprep.subr.bf16.mxu1 %v12400_v26  ;;  %v12457_v10 = vld [vmem:[#allocation7 + $0x444] ss:$16 sps:$4 sm:$0xff]   ;;  %v12455_v11 = vld [vmem:[#allocation7 + $0x440] ss:$16 sps:$4 sm:$0xff]  }
  0x8f   :  { %v12458_v12 = vld [vmem:[#allocation7 + $0x660] ss:$16 sps:$4 sm:$0xff]   ;;  %v12460_v13 = vld [vmem:[#allocation7 + $0x664] ss:$16 sps:$4 sm:$0xff]  }
  0x90   :  { %512 = vmatpush1.bf16.msra.mxu0 %v12402_v29  ;;  %v12463_v14 = vld [vmem:[#allocation7 + $0x424] ss:$16 sps:$4 sm:$0xff]   ;;  %v12461_v15 = vld [vmem:[#allocation7 + $0x420] ss:$16 sps:$4 sm:$0xff]  }
  0x91   :  { %685 = vmatpush1.bf16.msra.mxu1 %v12403_v30  ;;  %11171 = vmatprep.subr.msk.bf16.mxu0 %vm484_vm0, %v11168_v31  ;;  %v12469_v16 = vld [vmem:[#allocation7 + $0x404] ss:$16 sps:$4 sm:$0xff]   ;;  %v12467_v17 = vld [vmem:[#allocation7 + $0x400] ss:$16 sps:$4 sm:$0xff]  }
  0x92   :  { %11186 = vmatprep.subr.msk.bf16.mxu1 %vm484_vm0, %v11170_v32  ;;  %v12464_v18 = vld [vmem:[#allocation7 + $0x640] ss:$16 sps:$4 sm:$0xff]   ;;  %v12466_v19 = vld [vmem:[#allocation7 + $0x644] ss:$16 sps:$4 sm:$0xff]  }
  0x93   :  { %11118 = vmatmul.mubr.msk.bf16.vlgmr.msra.gmra.mxu0 %vm441_vm1, %v14004_v35  ;;  %v12472_v20 = vld [vmem:[#allocation7 + $0x3e4] ss:$16 sps:$4 sm:$0xff]   ;;  %v12470_v21 = vld [vmem:[#allocation7 + $0x3e0] ss:$16 sps:$4 sm:$0xff]  }
  0x94   :  { %11133 = vmatmul.mubr.msk.bf16.vlgmr.msra.gmra.mxu1 %vm441_vm1, %v14004_v35  ;;  %1082 = vmatpush1.bf16.msra.mxu0 %v1066_v37  ;;  %v12478_v22 = vld [vmem:[#allocation7 + $0x3c4] ss:$16 sps:$4 sm:$0xff]   ;;  %v12476_v23 = vld [vmem:[#allocation7 + $0x3c0] ss:$16 sps:$4 sm:$0xff]  }
  0x95   :  { %1255 = vmatpush1.bf16.msra.mxu1 %v1072_v38  ;;  %539 = vmatprep.mubr.bf16.mxu0 %v17278_v0  ;;  %v12473_v24 = vld [vmem:[#allocation7 + $0x620] ss:$16 sps:$4 sm:$0xff]   ;;  %v12475_v25 = vld [vmem:[#allocation7 + $0x624] ss:$16 sps:$4 sm:$0xff]  }
  0x96   :  { %712 = vmatprep.mubr.bf16.mxu1 %v17278_v0  ;;  %1083 = vmatprep.subr.bf16.mxu0 %v12413_v36  ;;  %v12481_v26 = vld [vmem:[#allocation7 + $0x3a4] ss:$16 sps:$4 sm:$0xff]   ;;  %v12479_v27 = vld [vmem:[#allocation7 + $0x3a0] ss:$16 sps:$4 sm:$0xff]  }
  0x97   :  { %1256 = vmatprep.subr.bf16.mxu1 %v12416_v40  ;;  %v12484_v28 = vld [vmem:[#allocation7 + $0x384] ss:$16 sps:$4 sm:$0xff]   ;;  %v12482_v30 = vld [vmem:[#allocation7 + $0x380] ss:$16 sps:$4 sm:$0xff]  }
  0x98   :  { %1084 = vmatpush1.bf16.msra.mxu0 %v12411_v39  ;;  %v12487_v29 = vld [vmem:[#allocation7 + $0x604] ss:$16 sps:$4 sm:$0xff]   ;;  %v12485_v31 = vld [vmem:[#allocation7 + $0x600] ss:$16 sps:$4 sm:$0xff]  }
  0x99   :  { %1257 = vmatpush1.bf16.msra.mxu1 %v12414_v41  ;;  %1085 = vmatprep.subr.bf16.mxu0 %v12421_v42  ;;  %v12490_v32 = vld [vmem:[#allocation7 + $0x564] ss:$16 sps:$4 sm:$0xff]   ;;  %v12488_v34 = vld [vmem:[#allocation7 + $0x560] ss:$16 sps:$4 sm:$0xff]  }
  0x9a   :  { %1258 = vmatprep.subr.bf16.mxu1 %v12424_v43  ;;  %v12493_v33 = vld [vmem:[#allocation7 + $0x5e4] ss:$16 sps:$4 sm:$0xff]   ;;  %v12494_v38 = vld [vmem:[#allocation7 + $0x540] ss:$16 sps:$4 sm:$0xff]  }
  0x9b   :  { %11119 = vmatmul.mubr.msk.bf16.gmra.mxu0 %vm441_vm1, %v14019_v44  ;;  %v12496_v36 = vld [vmem:[#allocation7 + $0x544] ss:$16 sps:$4 sm:$0xff]   ;;  %v12497_v39 = vld [vmem:[#allocation7 + $0x5c0] ss:$16 sps:$4 sm:$0xff]  }
  0x9c   :  { %11134 = vmatmul.mubr.msk.bf16.gmra.mxu1 %vm441_vm1, %v14019_v44  ;;  %549 = vmatprep.mubr.bf16.mxu0 %v17278_v0  ;;  %v12499_v37 = vld [vmem:[#allocation7 + $0x5c4] ss:$16 sps:$4 sm:$0xff]   ;;  %v12500_v42 = vld [vmem:[#allocation7 + $0x520] ss:$16 sps:$4 sm:$0xff]  }
  0x9d   :  { %722 = vmatprep.mubr.bf16.mxu1 %v17278_v0  ;;  %1086 = vmatpush1.bf16.msra.mxu0 %v12419_v45  ;;  %v12502_v40 = vld [vmem:[#allocation7 + $0x524] ss:$16 sps:$4 sm:$0xff]   ;;  %v12503_v43 = vld [vmem:[#allocation7 + $0x5a0] ss:$16 sps:$4 sm:$0xff]  }
  0x9e   :  { %1259 = vmatpush1.bf16.msra.mxu1 %v12422_v46  ;;  %1087 = vmatprep.subr.bf16.mxu0 %v12430_v47  ;;  %v12505_v41 = vld [vmem:[#allocation7 + $0x5a4] ss:$16 sps:$4 sm:$0xff]   ;;  %v12506_v46 = vld [vmem:[#allocation7 + $0x500] ss:$16 sps:$4 sm:$0xff]  }
  0x9f   :  { %1260 = vmatprep.subr.bf16.mxu1 %v12433_v48  ;;  %v12511_v45 = vld [vmem:[#allocation7 + $0x584] ss:$16 sps:$4 sm:$0xff]   ;;  %v12509_v47 = vld [vmem:[#allocation7 + $0x580] ss:$16 sps:$4 sm:$0xff]  }
  0xa0   :  { %v12514_v48 = vld [vmem:[#allocation7 + $0x4e4] ss:$16 sps:$4 sm:$0xff]  }
  0xa1   :  { %1088 = vmatpush1.bf16.msra.mxu0 %v12428_v49  ;;  %v12517_v49 = vld [vmem:[#allocation7 + $0x6e4] ss:$16 sps:$4 sm:$0xff]  }
  0xa2   :  { %1261 = vmatpush1.bf16.msra.mxu1 %v12431_v51  ;;  %1089 = vmatprep.subr.bf16.mxu0 %v12438_v52  ;;  %v12515_v51 = vld [vmem:[#allocation7 + $0x6e0] ss:$16 sps:$4 sm:$0xff]   ;;  %v12520_v52 = vld [vmem:[#allocation7 + $0x4c4] ss:$16 sps:$4 sm:$0xff]  }
  0xa3   :  { %1262 = vmatprep.subr.bf16.mxu1 %v12441_v53  ;;  %11120 = vmatmul.mubr.msk.bf16.gmra.mxu0 %vm441_vm1, %v14030_v50  ;;  %v12523_v53 = vld [vmem:[#allocation7 + $0x6c4] ss:$16 sps:$4 sm:$0xff]  }
  0xa4   :  { %11135 = vmatmul.mubr.msk.bf16.gmra.mxu1 %vm441_vm1, %v14030_v50  ;;  %559 = vmatprep.mubr.bf16.mxu0 %v17278_v0 }
  0xa5   :  { %732 = vmatprep.mubr.bf16.mxu1 %v17278_v0  ;;  %1090 = vmatpush1.bf16.msra.mxu0 %v12436_v54  ;;  %v12518_v54 = vld [vmem:[#allocation7 + $0x4c0] ss:$16 sps:$4 sm:$0xff]  }
  0xa6   :  { %1263 = vmatpush1.bf16.msra.mxu1 %v12439_v55  ;;  %1091 = vmatprep.subr.bf16.mxu0 %v12446_v56  ;;  %v12521_v55 = vld [vmem:[#allocation7 + $0x6c0] ss:$16 sps:$4 sm:$0xff]  }
  0xa7   :  { %1264 = vmatprep.subr.bf16.mxu1 %v12449_v57 }
  0xa9   :  { %1092 = vmatpush1.bf16.msra.mxu0 %v12444_v58 }
  0xaa   :  { %1265 = vmatpush1.bf16.msra.mxu1 %v12447_v59  ;;  %2682 = vmatprep.subr.bf16.mxu0 %v12454_v9  ;;  %v12535_v9 = vld [vmem:[#allocation7 + $0x684] ss:$16 sps:$4 sm:$0xff]  }
  0xab   :  { %11121 = vmatmul.mubr.msk.bf16.gmra.mxu0 %vm441_vm1, %v14041_v60  ;;  %2785 = vmatprep.subr.bf16.mxu1 %v12460_v13 }
  0xac   :  { %11136 = vmatmul.mubr.msk.bf16.gmra.mxu1 %vm441_vm1, %v14041_v60  ;;  %569 = vmatprep.mubr.bf16.mxu0 %v17278_v0 }
  0xad   :  { %742 = vmatprep.mubr.bf16.mxu1 %v17278_v0 }
  0xb3   :  { %11122 = vmatmul.mubr.msk.bf16.gmra.mxu0 %vm441_vm1, %v14052_v61 }
  0xb4   :  { %11137 = vmatmul.mubr.msk.bf16.gmra.mxu1 %vm441_vm1, %v14052_v61  ;;  %579 = vmatprep.mubr.bf16.mxu0 %v17278_v0 }
  0xb5   :  { %752 = vmatprep.mubr.bf16.mxu1 %v17278_v0 }
  0xbb   :  { %11123 = vmatmul.mubr.msk.bf16.gmra.mxu0 %vm441_vm1, %v14063_v62 }
  0xbc   :  { %11138 = vmatmul.mubr.msk.bf16.gmra.mxu1 %vm441_vm1, %v14063_v62  ;;  %589 = vmatprep.mubr.bf16.mxu0 %v17278_v0 }
  0xbd   :  { %762 = vmatprep.mubr.bf16.mxu1 %v17278_v0 }
  0xc3   :  { %11124 = vmatmul.mubr.msk.bf16.gmra.mxu0 %vm441_vm1, %v14074_v63 }
  0xc4   :  { %11139 = vmatmul.mubr.msk.bf16.gmra.mxu1 %vm441_vm1, %v14074_v63  ;;  %599 = vmatprep.mubr.bf16.mxu0 %v17278_v0 }
  0xc5   :  { %772 = vmatprep.mubr.bf16.mxu1 %v17278_v0 }
  0xcb   :  { %11125 = vmatmul.mubr.msk.bf16.gmra.mxu0 %vm441_vm1, %v14085_v1 }
  0xcc   :  { %11140 = vmatmul.mubr.msk.bf16.gmra.mxu1 %vm441_vm1, %v14085_v1  ;;  %609 = vmatprep.mubr.bf16.mxu0 %v17278_v0 }
  0xcd   :  { %782 = vmatprep.mubr.bf16.mxu1 %v17278_v0 }
  0xd3   :  { %11126 = vmatmul.mubr.msk.bf16.gmra.mxu0 %vm441_vm1, %v14096_v2 }
  0xd4   :  { %11141 = vmatmul.mubr.msk.bf16.gmra.mxu1 %vm441_vm1, %v14096_v2  ;;  %619 = vmatprep.mubr.bf16.mxu0 %v17278_v0 }
  0xd5   :  { %792 = vmatprep.mubr.bf16.mxu1 %v17278_v0 }
  0xdb   :  { %11127 = vmatmul.mubr.msk.bf16.gmra.mxu0 %vm441_vm1, %v14107_v3 }
  0xdc   :  { %11142 = vmatmul.mubr.msk.bf16.gmra.mxu1 %vm441_vm1, %v14107_v3  ;;  %629 = vmatprep.mubr.bf16.mxu0 %v17278_v0 }
  0xdd   :  { %802 = vmatprep.mubr.bf16.mxu1 %v17278_v0 }
  0xe3   :  { %11128 = vmatmul.mubr.msk.bf16.gmra.mxu0 %vm441_vm1, %v14118_v4 }
  0xe4   :  { %11143 = vmatmul.mubr.msk.bf16.gmra.mxu1 %vm441_vm1, %v14118_v4  ;;  %639 = vmatprep.mubr.bf16.mxu0 %v17278_v0 }
  0xe5   :  { %812 = vmatprep.mubr.bf16.mxu1 %v17278_v0 }
  0xeb   :  { %11129 = vmatmul.mubr.msk.bf16.gmra.mxu0 %vm441_vm1, %v14129_v5 }
  0xec   :  { %11144 = vmatmul.mubr.msk.bf16.gmra.mxu1 %vm441_vm1, %v14129_v5  ;;  %649 = vmatprep.mubr.bf16.mxu0 %v17278_v0 }
  0xed   :  { %822 = vmatprep.mubr.bf16.mxu1 %v17278_v0 }
  0xf3   :  { %11130 = vmatmul.mubr.msk.bf16.gmra.mxu0 %vm441_vm1, %v14140_v6 }
  0xf4   :  { %11145 = vmatmul.mubr.msk.bf16.gmra.mxu1 %vm441_vm1, %v14140_v6  ;;  %659 = vmatprep.mubr.bf16.mxu0 %v17278_v0 }
  0xf5   :  { %832 = vmatprep.mubr.bf16.mxu1 %v17278_v0 }
  0xfb   :  { %11131 = vmatmul.mubr.msk.bf16.gmra.mxu0 %vm441_vm1, %v14151_v7 }
  0xfc   :  { %11146 = vmatmul.mubr.msk.bf16.gmra.mxu1 %vm441_vm1, %v14151_v7  ;;  %1109 = vmatprep.mubr.bf16.mxu0 %v17278_v0 }
  0xfd   :  { %1282 = vmatprep.mubr.bf16.mxu1 %v17278_v0 }
 0x103   :  { %11172 = vmatmul.mubr.msk.bf16.vlgmr.msra.gmra.mxu0 %vm441_vm1, %v14004_v35 }
 0x104   :  { %11187 = vmatmul.mubr.msk.bf16.vlgmr.msra.gmra.mxu1 %vm441_vm1, %v14004_v35  ;;  %1119 = vmatprep.mubr.bf16.mxu0 %v17278_v0  ;;  %v12491_v35 = vld [vmem:[#allocation7 + $0x5e0] ss:$16 sps:$4 sm:$0xff]  }
 0x105   :  { %1292 = vmatprep.mubr.bf16.mxu1 %v17278_v0  ;;  %2683 = vmatpush1.bf16.msra.mxu0 %v12452_v8  ;;  %v12532_v8 = vld [vmem:[#allocation7 + $0x484] ss:$16 sps:$4 sm:$0xff]  }
 0x106   :  { %2684 = vmatprep.subr.bf16.mxu0 %v12457_v10  ;;  %2786 = vmatpush1.bf16.msra.mxu1 %v12458_v12  ;;  %v12530_v10 = vld [vmem:[#allocation7 + $0x480] ss:$16 sps:$4 sm:$0xff]  }
 0x107   :  { %2787 = vmatprep.subr.bf16.mxu1 %v12466_v19 }
 0x109   :  { %2685 = vmatpush1.bf16.msra.mxu0 %v12455_v11  ;;  %v12533_v11 = vld [vmem:[#allocation7 + $0x680] ss:$16 sps:$4 sm:$0xff]  }
 0x10a   :  { %2686 = vmatprep.subr.bf16.mxu0 %v12463_v14  ;;  %2788 = vmatpush1.bf16.msra.mxu1 %v12464_v18 }
 0x10b   :  { %11173 = vmatmul.mubr.msk.bf16.gmra.mxu0 %vm441_vm1, %v14019_v44  ;;  %2789 = vmatprep.subr.bf16.mxu1 %v12475_v25 }
 0x10c   :  { %11188 = vmatmul.mubr.msk.bf16.gmra.mxu1 %vm441_vm1, %v14019_v44  ;;  %1129 = vmatprep.mubr.bf16.mxu0 %v17278_v0  ;;  %v12508_v44 = vld [vmem:[#allocation7 + $0x504] ss:$16 sps:$4 sm:$0xff]  }
 0x10d   :  { %1302 = vmatprep.mubr.bf16.mxu1 %v17278_v0  ;;  %2687 = vmatpush1.bf16.msra.mxu0 %v12461_v15 }
 0x10e   :  { %2688 = vmatprep.subr.bf16.mxu0 %v12469_v16  ;;  %2790 = vmatpush1.bf16.msra.mxu1 %v12473_v24 }
 0x10f   :  { %2791 = vmatprep.subr.bf16.mxu1 %v12487_v29 }
 0x111   :  { %2689 = vmatpush1.bf16.msra.mxu0 %v12467_v17 }
 0x112   :  { %2690 = vmatprep.subr.bf16.mxu0 %v12472_v20  ;;  %2792 = vmatpush1.bf16.msra.mxu1 %v12485_v31 }
 0x113   :  { %11174 = vmatmul.mubr.msk.bf16.gmra.mxu0 %vm441_vm1, %v14030_v50  ;;  %2793 = vmatprep.subr.bf16.mxu1 %v12493_v33 }
 0x114   :  { %11189 = vmatmul.mubr.msk.bf16.gmra.mxu1 %vm441_vm1, %v14030_v50  ;;  %1139 = vmatprep.mubr.bf16.mxu0 %v17278_v0  ;;  %v12512_v50 = vld [vmem:[#allocation7 + $0x4e0] ss:$16 sps:$4 sm:$0xff]  }
 0x115   :  { %1312 = vmatprep.mubr.bf16.mxu1 %v17278_v0  ;;  %2691 = vmatpush1.bf16.msra.mxu0 %v12470_v21 }
 0x116   :  { %2692 = vmatprep.subr.bf16.mxu0 %v12478_v22  ;;  %2794 = vmatpush1.bf16.msra.mxu1 %v12491_v35 }
 0x117   :  { %2795 = vmatprep.subr.bf16.mxu1 %v12499_v37 }
 0x119   :  { %2693 = vmatpush1.bf16.msra.mxu0 %v12476_v23 }
 0x11a   :  { %2694 = vmatprep.subr.bf16.mxu0 %v12481_v26  ;;  %2796 = vmatpush1.bf16.msra.mxu1 %v12497_v39 }
 0x11b   :  { %11175 = vmatmul.mubr.msk.bf16.gmra.mxu0 %vm441_vm1, %v14041_v60  ;;  %2797 = vmatprep.subr.bf16.mxu1 %v12505_v41 }
 0x11c   :  { %11190 = vmatmul.mubr.msk.bf16.gmra.mxu1 %vm441_vm1, %v14041_v60  ;;  %1149 = vmatprep.mubr.bf16.mxu0 %v17278_v0  ;;  %v12526_v60 = vld [vmem:[#allocation7 + $0x4a4] ss:$16 sps:$4 sm:$0xff]  }
 0x11d   :  { %1322 = vmatprep.mubr.bf16.mxu1 %v17278_v0  ;;  %2695 = vmatpush1.bf16.msra.mxu0 %v12479_v27 }
 0x11e   :  { %2696 = vmatprep.subr.bf16.mxu0 %v12484_v28  ;;  %2798 = vmatpush1.bf16.msra.mxu1 %v12503_v43 }
 0x11f   :  { %2799 = vmatprep.subr.bf16.mxu1 %v12511_v45  ;;  %v239_v45 = vld [vmem:[#allocation6] sm:$0xf] }
 0x121   :  { %2697 = vmatpush1.bf16.msra.mxu0 %v12482_v30 }
 0x122   :  { %2698 = vmatprep.subr.bf16.mxu0 %v12490_v32  ;;  %2800 = vmatpush1.bf16.msra.mxu1 %v12509_v47 }
 0x123   :  { %11176 = vmatmul.mubr.msk.bf16.gmra.mxu0 %vm441_vm1, %v14052_v61  ;;  %2809 = vmatprep.subr.bf16.mxu1 %v12517_v49 }
 0x124   :  { %11191 = vmatmul.mubr.msk.bf16.gmra.mxu1 %vm441_vm1, %v14052_v61  ;;  %1159 = vmatprep.mubr.bf16.mxu0 %v17278_v0  ;;  %v12529_v61 = vld [vmem:[#allocation7 + $0x6a4] ss:$16 sps:$4 sm:$0xff]  }
 0x125   :  { %1332 = vmatprep.mubr.bf16.mxu1 %v17278_v0  ;;  %2699 = vmatpush2.bf16.msra.mxu0 %v12488_v34 }
 0x126   :  { %2700 = vmatprep.subr.bf16.mxu0 %v12496_v36  ;;  %2810 = vmatpush2.bf16.msra.mxu1 %v12515_v51  ;;  %v241_v36 = vlaneseq }
 0x127   :  { %2811 = vmatprep.subr.bf16.mxu1 %v12523_v53 }
 0x129   :  { %2701 = vmatpush2.bf16.msra.mxu0 %v12494_v38 }
 0x12a   :  { %2702 = vmatprep.subr.bf16.mxu0 %v12502_v40  ;;  %2812 = vmatpush2.bf16.msra.mxu1 %v12521_v55  ;;  %v14317_v40 = vshrl.u32 %v241_v36, 7 }
 0x12b   :  { %11177 = vmatmul.mubr.msk.bf16.gmra.mxu0 %vm441_vm1, %v14063_v62  ;;  %2813 = vmatprep.subr.bf16.mxu1 %v12529_v61 }
 0x12c   :  { %11192 = vmatmul.mubr.msk.bf16.gmra.mxu1 %vm441_vm1, %v14063_v62  ;;  %1169 = vmatprep.mubr.bf16.mxu0 %v17278_v0  ;;  %v12524_v62 = vld [vmem:[#allocation7 + $0x4a0] ss:$16 sps:$4 sm:$0xff]   ;;  %17462 = vst [vmem:[#allocation24_spill] sm:$0xff] %v14317_v40  ;;  %v17274_v47 = vsub.s32 2, %v14317_v40  ;;  %v17275_v51 = vsub.s32 3, %v14317_v40 }
 0x12d   :  { %1342 = vmatprep.mubr.bf16.mxu1 %v17278_v0  ;;  %2703 = vmatpush2.bf16.msra.mxu0 %v12500_v42 }
 0x12e   :  { %2704 = vmatprep.subr.bf16.mxu0 %v12508_v44  ;;  %v14345_v55 = vrot.slane %v239_v45, %v17274_v47 }
 0x131   :  { %2705 = vmatpush2.bf16.msra.mxu0 %v12506_v46  ;;  %v17277_v46 = vsub.s32 0, %v14317_v40 }
 0x132   :  { %2706 = vmatprep.subr.bf16.mxu0 %v12514_v48  ;;  %v17276_v48 = vsub.s32 1, %v14317_v40 }
 0x133   :  { %11178 = vmatmul.mubr.msk.bf16.gmra.mxu0 %vm441_vm1, %v14074_v63 }
 0x134   :  { %11193 = vmatmul.mubr.msk.bf16.gmra.mxu1 %vm441_vm1, %v14074_v63  ;;  %1179 = vmatprep.mubr.bf16.mxu0 %v17278_v0  ;;  %v12527_v63 = vld [vmem:[#allocation7 + $0x6a0] ss:$16 sps:$4 sm:$0xff]  }
 0x135   :  { %1352 = vmatprep.mubr.bf16.mxu1 %v17278_v0  ;;  %2707 = vmatpush2.bf16.msra.mxu0 %v12512_v50 }
 0x136   :  { %2708 = vmatprep.subr.bf16.mxu0 %v12520_v52  ;;  %2814 = vmatpush2.bf16.msra.mxu1 %v12527_v63  ;;  %v14357_v63 = vrot.slane %v239_v45, %v17275_v51 }
 0x137   :  { %2815 = vmatprep.subr.bf16.mxu1 %v12535_v9 }
 0x139   :  { %2709 = vmatpush2.bf16.msra.mxu0 %v12518_v54  ;;  %v14341_v54 = vrot.slane %v239_v45, %v17277_v46 }
 0x13a   :  { %2710 = vmatprep.subr.bf16.mxu0 %v12526_v60  ;;  %2816 = vmatpush2.bf16.msra.mxu1 %v12533_v11  ;;  %v14349_v60 = vrot.slane %v239_v45, %v17276_v48 }
 0x13b   :  { %11179 = vmatmul.mubr.msk.bf16.gmra.mxu0 %vm441_vm1, %v14085_v1 }
 0x13c   :  { %11194 = vmatmul.mubr.msk.bf16.gmra.mxu1 %vm441_vm1, %v14085_v1  ;;  %1189 = vmatprep.mubr.bf16.mxu0 %v17278_v0 }
 0x13d   :  { %1362 = vmatprep.mubr.bf16.mxu1 %v17278_v0  ;;  %2711 = vmatpush2.bf16.msra.mxu0 %v12524_v62 }
 0x13e   :  { %2712 = vmatprep.subr.bf16.mxu0 %v12532_v8 }
 0x141   :  { %2713 = vmatpush2.bf16.msra.mxu0 %v12530_v10 }
 0x143   :  { %11180 = vmatmul.mubr.msk.bf16.gmra.mxu0 %vm441_vm1, %v14096_v2 }
 0x144   :  { %11195 = vmatmul.mubr.msk.bf16.gmra.mxu1 %vm441_vm1, %v14096_v2  ;;  %1199 = vmatprep.mubr.bf16.mxu0 %v17278_v0 }
 0x145   :  { %1372 = vmatprep.mubr.bf16.mxu1 %v17278_v0 }
 0x14b   :  { %11181 = vmatmul.mubr.msk.bf16.gmra.mxu0 %vm441_vm1, %v14107_v3 }
 0x14c   :  { %11196 = vmatmul.mubr.msk.bf16.gmra.mxu1 %vm441_vm1, %v14107_v3  ;;  %1209 = vmatprep.mubr.bf16.mxu0 %v17278_v0 }
 0x14d   :  { %1382 = vmatprep.mubr.bf16.mxu1 %v17278_v0 }
 0x153   :  { %v14219_v56 = vpop.f32.mrf.mxu0  ;;  %11182 = vmatmul.mubr.msk.bf16.gmra.mxu0 %vm441_vm1, %v14118_v4 }
 0x154   :  { %v14221_v57 = vpop.f32.mrf.mxu1  ;;  %11197 = vmatmul.mubr.msk.bf16.gmra.mxu1 %vm441_vm1, %v14118_v4  ;;  %1219 = vmatprep.mubr.bf16.mxu0 %v17278_v0  ;;  %v14365_v10 = vadd.f32 %v14219_v56, %v14341_v54 }
 0x155   :  { %1392 = vmatprep.mubr.bf16.mxu1 %v17278_v0  ;;  %v14229_v58 = vpop.f32.mrf.mxu0  ;;  %v14369_v11 = vadd.f32 %v14221_v57, %v14345_v55 }
 0x156   :  { %v14231_v59 = vpop.f32.mrf.mxu1  ;;  %v14373_v36 = vadd.f32 %v14229_v58, %v14349_v60 }
 0x157   :  { %v14233_v1 = vpop.f32.mrf.mxu0  ;;  %v14381_v51 = vadd.f32 %v14231_v59, %v14357_v63 }
 0x158   :  { %v14235_v2 = vpop.f32.mrf.mxu1  ;;  %17463 = vst [vmem:[#allocation25_spill] sm:$0xff] %v14373_v36  ;;  %v14385_v56 = vadd.f32 %v14233_v1, %v14341_v54 }
 0x159   :  { %v14237_v3 = vpop.f32.mrf.mxu0  ;;  %17466 = vst [vmem:[#allocation28_spill] sm:$0xff] %v14381_v51  ;;  %v14389_v57 = vadd.f32 %v14235_v2, %v14345_v55 }
 0x15a   :  { %v14239_v4 = vpop.f32.mrf.mxu1  ;;  %v14393_v58 = vadd.f32 %v14237_v3, %v14349_v60 }
 0x15b   :  { %v14241_v12 = vpop.f32.mrf.mxu0  ;;  %11183 = vmatmul.mubr.msk.bf16.gmra.mxu0 %vm441_vm1, %v14129_v5  ;;  %v14397_v48 = vadd.f32 %v14239_v4, %v14357_v63 }
 0x15c   :  { %v14243_v13 = vpop.f32.mrf.mxu1  ;;  %11198 = vmatmul.mubr.msk.bf16.gmra.mxu1 %vm441_vm1, %v14129_v5  ;;  %1229 = vmatprep.mubr.bf16.mxu0 %v17278_v0  ;;  %17467 = vst [vmem:[#allocation29_spill] sm:$0xff] %v14393_v58 }
 0x15d   :  { %1402 = vmatprep.mubr.bf16.mxu1 %v17278_v0  ;;  %v14251_v14 = vpop.f32.mrf.mxu0  ;;  %17468 = vst [vmem:[#allocation30_spill] sm:$0xff] %v14397_v48  ;;  %v14419_v40 = vadd.f32 %v14243_v13, %v14345_v55 }
 0x15e   :  { %v14253_v15 = vpop.f32.mrf.mxu1  ;;  %v14425_v1 = vadd.f32 %v14251_v14, %v14349_v60 }
 0x15f   :  { %v14255_v16 = vpop.f32.mrf.mxu0  ;;  %17472 = vst [vmem:[#allocation34_spill] sm:$0xff] %v14419_v40 }
 0x160   :  { %v14257_v17 = vpop.f32.mrf.mxu1  ;;  %17473 = vst [vmem:[#allocation35_spill] sm:$0xff] %v14425_v1  ;;  %v14437_v13 = vadd.f32 %v14255_v16, %v14341_v54 }
 0x161   :  { %v14259_v18 = vpop.f32.mrf.mxu0  ;;  %v14441_v2 = vadd.f32 %v14257_v17, %v14345_v55 }
 0x162   :  { %v14261_v19 = vpop.f32.mrf.mxu1  ;;  %v14445_v14 = vadd.f32 %v14259_v18, %v14349_v60 }
 0x163   :  { %v14263_v5 = vpop.f32.mrf.mxu0  ;;  %11184 = vmatmul.mubr.msk.bf16.gmra.mxu0 %vm441_vm1, %v14140_v6 }
 0x164   :  { %v14265_v20 = vpop.f32.mrf.mxu1  ;;  %11199 = vmatmul.mubr.msk.bf16.gmra.mxu1 %vm441_vm1, %v14140_v6  ;;  %1239 = vmatprep.mubr.bf16.mxu0 %v17278_v0 }
 0x165   :  { %1412 = vmatprep.mubr.bf16.mxu1 %v17278_v0  ;;  %v14273_v21 = vpop.f32.mrf.mxu0  ;;  %v12538_v0 = vld [vmem:[#allocation7 + $0x46c] ss:$16 sps:$4 sm:$0xff]   ;;  %v14458_v16 = vadd.f32 %v14265_v20, %v14345_v55 }
 0x166   :  { %v14275_v22 = vpop.f32.mrf.mxu1  ;;  %2888 = vmatprep.subr.bf16.mxu0 %v12538_v0  ;;  %v14429_v0 = vadd.f32 %v14253_v15, %v14357_v63  ;;  %v14449_v15 = vadd.f32 %v14261_v19, %v14357_v63  ;;  %v14462_v17 = vadd.f32 %v14273_v21, %v14349_v60 }
 0x167   :  { %v14277_v23 = vpop.f32.mrf.mxu0 }
 0x168   :  { %v14279_v24 = vpop.f32.mrf.mxu1  ;;  %17474 = vst [vmem:[#allocation36_spill] sm:$0xff] %v14429_v0  ;;  %17475 = vst [vmem:[#allocation37_spill] sm:$0xff] %v14462_v17 }
 0x169   :  { %v14281_v25 = vpop.f32.mrf.mxu0  ;;  %v14479_v20 = vadd.f32 %v14279_v24, %v14345_v55 }
 0x16a   :  { %v14283_v26 = vpop.f32.mrf.mxu1  ;;  %v14485_v36 = vadd.f32 %v14281_v25, %v14349_v60  ;;  %v12547_v25 = vld [vmem:[#allocation7 + $0x66c] ss:$16 sps:$4 sm:$0xff]  }
 0x16b   :  { %v14285_v27 = vpop.f32.mrf.mxu0  ;;  %11185 = vmatmul.mubr.msk.bf16.gmra.mxu0 %vm441_vm1, %v14151_v7  ;;  %17477 = vst [vmem:[#allocation39_spill] sm:$0xff] %v14479_v20  ;;  %2991 = vmatprep.subr.bf16.mxu1 %v12547_v25 }
 0x16c   :  { %v14287_v28 = vpop.f32.mrf.mxu1  ;;  %11200 = vmatmul.mubr.msk.bf16.gmra.mxu1 %vm441_vm1, %v14151_v7  ;;  %17478 = vst [vmem:[#allocation40_spill] sm:$0xff] %v14485_v36 }
 0x16d   :  { %v14293_v6 = vpop.f32.mrf.mxu0  ;;  %v14517_v1 = vadd.f32 %v14287_v28, %v14345_v55 }
 0x16e   :  { %v14295_v29 = vpop.f32.mrf.mxu1 }
 0x16f   :  { %v14297_v30 = vpop.f32.mrf.mxu0  ;;  %17481 = vst [vmem:[#allocation43_spill] sm:$0xff] %v14517_v1  ;;  %v14529_v21 = vadd.f32 %v14295_v29, %v14357_v63 }
 0x170   :  { %v14299_v31 = vpop.f32.mrf.mxu1  ;;  %v14533_v0 = vadd.f32 %v14297_v30, %v14341_v54 }
 0x171   :  { %v14301_v32 = vpop.f32.mrf.mxu0  ;;  %v14537_v28 = vadd.f32 %v14299_v31, %v14345_v55 }
 0x172   :  { %v14303_v33 = vpop.f32.mrf.mxu1 }
 0x173   :  { %v14305_v34 = vpop.f32.mrf.mxu0  ;;  %v14546_v24 = vadd.f32 %v14303_v33, %v14357_v63 }
 0x174   :  { %v14307_v35 = vpop.f32.mrf.mxu1  ;;  %v14550_v29 = vadd.f32 %v14305_v34, %v14341_v54 }
 0x175   :  { %v14309_v37 = vpop.f32.mrf.mxu0  ;;  %v14554_v30 = vadd.f32 %v14307_v35, %v14345_v55 }
 0x176   :  { %v14311_v7 = vpop.f32.mrf.mxu1  ;;  %17483 = vst [vmem:[#allocation45_spill] sm:$0xff] %v14550_v29 }
 0x177   :  { %v14313_v38 = vpop.f32.mrf.mxu0  ;;  %17484 = vst [vmem:[#allocation46_spill] sm:$0xff] %v14554_v30  ;;  %v14566_v33 = vadd.f32 %v14311_v7, %v14357_v63 }
 0x178   :  { %v14315_v39 = vpop.f32.mrf.mxu1  ;;  %v14570_v34 = vadd.f32 %v14313_v38, %v14341_v54 }
 0x179   :  { %v14319_v41 = vpop.f32.mrf.mxu0  ;;  %17486 = vst [vmem:[#allocation48_spill] sm:$0xff] %v14566_v33  ;;  %v14574_v35 = vadd.f32 %v14315_v39, %v14345_v55 }
 0x17a   :  { %v14321_v42 = vpop.f32.mrf.mxu1  ;;  %17487 = vst [vmem:[#allocation49_spill] sm:$0xff] %v14570_v34 }
 0x17b   :  { %v14323_v43 = vpop.f32.mrf.mxu0  ;;  %17488 = vst [vmem:[#allocation50_spill] sm:$0xff] %v14574_v35  ;;  %v14584_v7 = vadd.f32 %v14321_v42, %v14357_v63 }
 0x17c   :  { %v14325_v44 = vpop.f32.mrf.mxu1 }
 0x17d   :  { %v14330_v49 = vpop.f32.mrf.mxu0  ;;  %17490 = vst [vmem:[#allocation52_spill] sm:$0xff] %v14584_v7  ;;  %v14613_v1 = vadd.f32 %v14325_v44, %v14345_v55 }
 0x17e   :  { %v14332_v50 = vpop.f32.mrf.mxu1  ;;  %v14621_v39 = vadd.f32 %v14330_v49, %v14349_v60 }
 0x17f   :  { %v14335_v52 = vpop.f32.mrf.mxu0  ;;  %17492 = vst [vmem:[#allocation54_spill] sm:$0xff] %v14613_v1 }
 0x180   :  { %v14337_v53 = vpop.f32.mrf.mxu1 }
 0x181   :  { %v14351_v61 = vpop.f32.mrf.mxu0  ;;  %v14633_v44 = vadd.f32 %v14337_v53, %v14345_v55 }
 0x182   :  { %v14353_v62 = vpop.f32.mrf.mxu1  ;;  %v14641_v49 = vadd.f32 %v14351_v61, %v14349_v60 }
 0x183   :  { %v14359_v8 = vpop.f32.mrf.mxu0  ;;  %17495 = vst [vmem:[#allocation57_spill] sm:$0xff] %v14633_v44 }
 0x184   :  { %v14361_v9 = vpop.f32.mrf.mxu1  ;;  %17496 = vst [vmem:[#allocation58_spill] sm:$0xff] %v14641_v49 }
 0x185   :  { %v14375_v47 = vpop.f32.mrf.mxu0  ;;  %v14653_v53 = vadd.f32 %v14361_v9, %v14345_v55 }
 0x186   :  { %17464 = vst [vmem:[#allocation26_spill] sm:$0xff] %v14375_v47  ;;  %v14377_v45 = vpop.f32.mrf.mxu1 }
 0x187   :  { %17465 = vst [vmem:[#allocation27_spill] sm:$0xff] %v14377_v45  ;;  %v14399_v46 = vpop.f32.mrf.mxu0  ;;  %v14408_v45 = vadd.f32 %v14241_v12, %v14341_v54  ;;  %v14471_v12 = vadd.f32 %v14275_v22, %v14357_v63  ;;  %v14489_v22 = vadd.f32 %v14283_v26, %v14357_v63  ;;  %v14504_v26 = vadd.f32 %v14285_v27, %v14341_v54 }
 0x188   :  { %17469 = vst [vmem:[#allocation31_spill] sm:$0xff] %v14399_v46  ;;  %v14401_v59 = vpop.f32.mrf.mxu1  ;;  %v14454_v46 = vadd.f32 %v14263_v5, %v14341_v54  ;;  %v14475_v5 = vadd.f32 %v14277_v23, %v14341_v54  ;;  %v14521_v27 = vadd.f32 %v14293_v6, %v14349_v60  ;;  %v14541_v6 = vadd.f32 %v14301_v32, %v14349_v60 }
 0x189   :  { %17470 = vst [vmem:[#allocation32_spill] sm:$0xff] %v14401_v59  ;;  %17471 = vst [vmem:[#allocation33_spill] sm:$0xff] %v14408_v45  ;;  %v14410_v3 = vpop.f32.mrf.mxu0  ;;  %v14562_v32 = vadd.f32 %v14309_v37, %v14349_v60  ;;  %v14580_v37 = vadd.f32 %v14319_v41, %v14349_v60  ;;  %v14609_v41 = vadd.f32 %v14323_v43, %v14341_v54 }
 0x18a   :  { %v14412_v47 = vpop.f32.mrf.mxu1  ;;  %17476 = vst [vmem:[#allocation38_spill] sm:$0xff] %v14475_v5  ;;  %17479 = vst [vmem:[#allocation41_spill] sm:$0xff] %v14489_v22  ;;  %v14629_v43 = vadd.f32 %v14335_v52, %v14341_v54  ;;  %v14649_v52 = vadd.f32 %v14359_v8, %v14341_v54 }
 0x18b   :  { %v14431_v4 = vpop.f32.mrf.mxu0  ;;  %17480 = vst [vmem:[#allocation42_spill] sm:$0xff] %v14504_v26  ;;  %17482 = vst [vmem:[#allocation44_spill] sm:$0xff] %v14521_v27  ;;  %v14625_v26 = vadd.f32 %v14332_v50, %v14357_v63  ;;  %v14645_v50 = vadd.f32 %v14353_v62, %v14357_v63  ;;  %v14701_v34 = vadd.f32 %v14412_v47, %v14357_v63 }
 0x18c   :  { %v14433_v59 = vpop.f32.mrf.mxu1  ;;  %17485 = vst [vmem:[#allocation47_spill] sm:$0xff] %v14562_v32  ;;  %17489 = vst [vmem:[#allocation51_spill] sm:$0xff] %v14580_v37  ;;  %v14697_v32 = vadd.f32 %v14410_v3, %v14349_v60 }
 0x18d   :  { %v14464_v18 = vpop.f32.mrf.mxu0  ;;  %17491 = vst [vmem:[#allocation53_spill] sm:$0xff] %v14609_v41  ;;  %17493 = vst [vmem:[#allocation55_spill] sm:$0xff] %v14625_v26  ;;  %v17500_v37 = vld [vmem:[#allocation26_spill] sm:$0xff] }
 0x18e   :  { %v14466_v51 = vpop.f32.mrf.mxu1  ;;  %17494 = vst [vmem:[#allocation56_spill] sm:$0xff] %v14629_v43  ;;  %17497 = vst [vmem:[#allocation59_spill] sm:$0xff] %v14645_v50  ;;  %v14659_v61 = vadd.f32 %v17500_v37, %v14349_v60  ;;  %v17502_v33 = vld [vmem:[#allocation27_spill] sm:$0xff]  ;;  %v14717_v3 = vadd.f32 %v14464_v18, %v14349_v60 }
 0x18f   :  { %v14491_v19 = vpop.f32.mrf.mxu0  ;;  %17498 = vst [vmem:[#allocation60_spill] sm:$0xff] %v14649_v52  ;;  %17499 = vst [vmem:[#allocation61_spill] sm:$0xff] %v14653_v53  ;;  %v14663_v62 = vadd.f32 %v17502_v33, %v14357_v63  ;;  %v17504_v25 = vld [vmem:[#allocation31_spill] sm:$0xff]  ;;  %v14721_v47 = vadd.f32 %v14466_v51, %v14357_v63 }
 0x190   :  { %v14493_v23 = vpop.f32.mrf.mxu1  ;;  %17501 = vst [vmem:[#allocation26_spill] sm:$0xff] %v14659_v61  ;;  %v14685_v26 = vadd.f32 %v17504_v25, %v14341_v54  ;;  %v17506_v7 = vld [vmem:[#allocation32_spill] sm:$0xff]  ;;  %v14705_v25 = vadd.f32 %v14431_v4, %v14341_v54  ;;  %17508 = vst [vmem:[#allocation62_spill] sm:$0xff] %v14717_v3  ;;  %v14725_v4 = vadd.f32 %v14491_v19, %v14341_v54 }
 0x191   :  { %v14506_v48 = vpop.f32.mrf.mxu0  ;;  %17503 = vst [vmem:[#allocation27_spill] sm:$0xff] %v14663_v62  ;;  %v14689_v44 = vadd.f32 %v17506_v7, %v14345_v55  ;;  %v14709_v7 = vadd.f32 %v14433_v59, %v14345_v55  ;;  %17509 = vst [vmem:[#allocation63_spill] sm:$0xff] %v14721_v47  ;;  %v14729_v59 = vadd.f32 %v14493_v23, %v14345_v55 }
 0x192   :  { %v14508_v58 = vpop.f32.mrf.mxu1  ;;  %17505 = vst [vmem:[#allocation31_spill] sm:$0xff] %v14685_v26  ;;  %17510 = vst [vmem:[#allocation64_spill] sm:$0xff] %v14725_v4  ;;  %v14735_v18 = vadd.f32 %v14506_v48, %v14349_v60 }
 0x193   :  { %v14523_v40 = vpop.f32.mrf.mxu0  ;;  %17507 = vst [vmem:[#allocation32_spill] sm:$0xff] %v14689_v44  ;;  %17511 = vst [vmem:[#allocation65_spill] sm:$0xff] %v14729_v59  ;;  %v14739_v51 = vadd.f32 %v14508_v58, %v14357_v63 }
 0x194   :  { %v14525_v17 = vpop.f32.mrf.mxu1  ;;  %17512 = vst [vmem:[#allocation66_spill] sm:$0xff] %v14735_v18  ;;  %v14753_v52 = vadd.f32 %v14523_v40, %v14341_v54 }
 0x195   :  { %v14556_v31 = vpop.f32.mrf.mxu0  ;;  %17513 = vst [vmem:[#allocation67_spill] sm:$0xff] %v14739_v51  ;;  %v14757_v33 = vadd.f32 %v14525_v17, %v14345_v55 }
 0x196   :  { %v14558_v22 = vpop.f32.mrf.mxu1  ;;  %17514 = vst [vmem:[#allocation68_spill] sm:$0xff] %v14753_v52  ;;  %v14761_v48 = vadd.f32 %v14556_v31, %v14349_v60 }
 0x197   :  { %v14586_v36 = vpop.f32.mrf.mxu0  ;;  %17515 = vst [vmem:[#allocation69_spill] sm:$0xff] %v14757_v33  ;;  %v14765_v58 = vadd.f32 %v14558_v22, %v14357_v63 }
 0x198   :  { %v14588_v38 = vpop.f32.mrf.mxu1  ;;  %v14769_v19 = vadd.f32 %v14586_v36, %v14341_v54 }
 0x199   :  { %v14597_v42 = vpop.f32.mrf.mxu0  ;;  %v14773_v40 = vadd.f32 %v14588_v38, %v14345_v55 }
 0x19a   :  { %v14599_v20 = vpop.f32.mrf.mxu1  ;;  %v14777_v50 = vadd.f32 %v14597_v42, %v14349_v60 }
 0x19b   :  { %v14615_v30 = vpop.f32.mrf.mxu0  ;;  %v14781_v31 = vadd.f32 %v14599_v20, %v14357_v63 }
 0x19c   :  { %v14617_v5 = vpop.f32.mrf.mxu1  ;;  %17516 = vst [vmem:[#allocation70_spill] sm:$0xff] %v14777_v50  ;;  %v14785_v22 = vadd.f32 %v14615_v30, %v14341_v54 }
 0x19d   :  { %v14635_v27 = vpop.f32.mrf.mxu0  ;;  %17517 = vst [vmem:[#allocation71_spill] sm:$0xff] %v14781_v31  ;;  %v14789_v36 = vadd.f32 %v14617_v5, %v14345_v55 }
 0x19e   :  { %v14637_v45 = vpop.f32.mrf.mxu1  ;;  %17518 = vst [vmem:[#allocation72_spill] sm:$0xff] %v14785_v22  ;;  %v14795_v42 = vadd.f32 %v14635_v27, %v14349_v60 }
 0x19f   :  { %v14665_v35 = vpop.f32.mrf.mxu0  ;;  %17519 = vst [vmem:[#allocation73_spill] sm:$0xff] %v14789_v36  ;;  %v14799_v20 = vadd.f32 %v14637_v45, %v14357_v63 }
 0x1a0   :  { %v14667_v8 = vpop.f32.mrf.mxu1  ;;  %17520 = vst [vmem:[#allocation74_spill] sm:$0xff] %v14795_v42  ;;  %v14813_v59 = vadd.f32 %v14665_v35, %v14341_v54 }
 0x1a1   :  { %v14673_v1 = vpop.f32.mrf.mxu0  ;;  %17521 = vst [vmem:[#allocation75_spill] sm:$0xff] %v14799_v20  ;;  %v14817_v38 = vadd.f32 %v14667_v8, %v14345_v55 }
 0x1a2   :  { %v14675_v37 = vpop.f32.mrf.mxu1  ;;  %17522 = vst [vmem:[#allocation76_spill] sm:$0xff] %v14813_v59  ;;  %v14821_v27 = vadd.f32 %v14673_v1, %v14349_v60 }
 0x1a3   :  { %v14691_v43 = vpop.f32.mrf.mxu0  ;;  %17523 = vst [vmem:[#allocation77_spill] sm:$0xff] %v14817_v38  ;;  %v14825_v45 = vadd.f32 %v14675_v37, %v14357_v63 }
 0x1a4   :  { %v14693_v41 = vpop.f32.mrf.mxu1  ;;  %v14829_v30 = vadd.f32 %v14691_v43, %v14341_v54 }
 0x1a5   :  { %v14711_v9 = vpop.f32.mrf.mxu0  ;;  %v14833_v35 = vadd.f32 %v14693_v41, %v14345_v55 }
 0x1a6   :  { %v14713_v29 = vpop.f32.mrf.mxu1  ;;  %v14837_v4 = vadd.f32 %v14711_v9, %v14349_v60 }
 0x1a7   :  { %v635_v61 = vpop.f32.mrf.mxu0  ;;  %17524 = vst [vmem:[#allocation78_spill] sm:$0xff] %v14833_v35  ;;  %v14841_v1 = vadd.f32 %v14713_v29, %v14357_v63 }
 0x1a8   :  { %v808_v53 = vpop.f32.mrf.mxu1  ;;  %v14844_v37 = vadd.f32 %v635_v61, %v14341_v54 }
 0x1a9   :  { %v637_v26 = vpop.f32.mrf.mxu0  ;;  %17525 = vst [vmem:[#allocation79_spill] sm:$0xff] %v14841_v1  ;;  %v14847_v43 = vadd.f32 %v808_v53, %v14345_v55 }
 0x1aa   :  { %v810_v62 = vpop.f32.mrf.mxu1  ;;  %v14852_v42 = vadd.f32 %v637_v26, %v14349_v60 }
 0x1ab   :  { %v641_v23 = vpop.f32.mrf.mxu0  ;;  %17526 = vst [vmem:[#allocation80_spill] sm:$0xff] %v14847_v43  ;;  %v14855_v9 = vadd.f32 %v810_v62, %v14357_v63 }
 0x1ac   :  { %v814_v44 = vpop.f32.mrf.mxu1  ;;  %17527 = vst [vmem:[#allocation81_spill] sm:$0xff] %v14852_v42  ;;  %v14868_v61 = vadd.f32 %v641_v23, %v14341_v54 }
 0x1ad   :  { %v643_v17 = vpop.f32.mrf.mxu0  ;;  %17528 = vst [vmem:[#allocation82_spill] sm:$0xff] %v14855_v9  ;;  %v14871_v31 = vadd.f32 %v814_v44, %v14345_v55 }
 0x1ae   :  { %v816_v49 = vpop.f32.mrf.mxu1  ;;  %17529 = vst [vmem:[#allocation83_spill] sm:$0xff] %v14868_v61  ;;  %v14874_v41 = vadd.f32 %v643_v17, %v14349_v60 }
 0x1af   :  { %v645_v18 = vpop.f32.mrf.mxu0  ;;  %17530 = vst [vmem:[#allocation84_spill] sm:$0xff] %v14871_v31  ;;  %v14877_v26 = vadd.f32 %v816_v49, %v14357_v63 }
 0x1b0   :  { %v818_v47 = vpop.f32.mrf.mxu1  ;;  %17531 = vst [vmem:[#allocation85_spill] sm:$0xff] %v14874_v41  ;;  %v14880_v62 = vadd.f32 %v645_v18, %v14341_v54 }
 0x1b1   :  { %v647_v52 = vpop.f32.mrf.mxu0  ;;  %17532 = vst [vmem:[#allocation86_spill] sm:$0xff] %v14877_v26  ;;  %v14883_v59 = vadd.f32 %v818_v47, %v14345_v55 }
 0x1b2   :  { %v820_v51 = vpop.f32.mrf.mxu1  ;;  %v14886_v23 = vadd.f32 %v647_v52, %v14349_v60 }
 0x1b3   :  { %v651_v5 = vpop.f32.mrf.mxu0  ;;  %17533 = vst [vmem:[#allocation87_spill] sm:$0xff] %v14883_v59  ;;  %v14889_v44 = vadd.f32 %v820_v51, %v14357_v63 }
 0x1b4   :  { %v824_v33 = vpop.f32.mrf.mxu1  ;;  %17534 = vst [vmem:[#allocation88_spill] sm:$0xff] %v14886_v23  ;;  %v14892_v29 = vadd.f32 %v651_v5, %v14341_v54 }
 0x1b5   :  { %v653_v8 = vpop.f32.mrf.mxu0  ;;  %17535 = vst [vmem:[#allocation89_spill] sm:$0xff] %v14889_v44  ;;  %v14895_v17 = vadd.f32 %v824_v33, %v14345_v55 }
 0x1b6   :  { %v826_v3 = vpop.f32.mrf.mxu1  ;;  %17536 = vst [vmem:[#allocation90_spill] sm:$0xff] %v14892_v29  ;;  %v14898_v18 = vadd.f32 %v653_v8, %v14349_v60 }
 0x1b7   :  { %v655_v36 = vpop.f32.mrf.mxu0  ;;  %17537 = vst [vmem:[#allocation91_spill] sm:$0xff] %v14895_v17  ;;  %v14901_v47 = vadd.f32 %v826_v3, %v14357_v63 }
 0x1b8   :  { %v828_v22 = vpop.f32.mrf.mxu1  ;;  %17538 = vst [vmem:[#allocation92_spill] sm:$0xff] %v14898_v18  ;;  %v14904_v52 = vadd.f32 %v655_v36, %v14341_v54 }
 0x1b9   :  { %v657_v50 = vpop.f32.mrf.mxu0  ;;  %17539 = vst [vmem:[#allocation93_spill] sm:$0xff] %v14901_v47  ;;  %v14907_v51 = vadd.f32 %v828_v22, %v14345_v55 }
 0x1ba   :  { %v830_v20 = vpop.f32.mrf.mxu1  ;;  %17540 = vst [vmem:[#allocation94_spill] sm:$0xff] %v14904_v52  ;;  %v14912_v33 = vadd.f32 %v657_v50, %v14349_v60 }
 0x1bb   :  { %v661_v53 = vpop.f32.mrf.mxu0  ;;  %17541 = vst [vmem:[#allocation95_spill] sm:$0xff] %v14907_v51  ;;  %v14915_v42 = vadd.f32 %v830_v20, %v14357_v63 }
 0x1bc   :  { %v834_v35 = vpop.f32.mrf.mxu1  ;;  %17542 = vst [vmem:[#allocation96_spill] sm:$0xff] %v14912_v33  ;;  %v14940_v20 = vadd.f32 %v661_v53, %v14341_v54 }
 0x1bd   :  { %v663_v49 = vpop.f32.mrf.mxu0  ;;  %17543 = vst [vmem:[#allocation97_spill] sm:$0xff] %v14915_v42  ;;  %v14943_v17 = vadd.f32 %v834_v35, %v14345_v55  ;;  %v17550_v35 = vmax.f32 %v14365_v10, 0.0  ;;  %v17553_v10 = vmax.f32 %v14389_v57, 0.0 }
 0x1be   :  { %v836_v38 = vpop.f32.mrf.mxu1  ;;  %17546 = vst [vmem:[#allocation100_spill] sm:$0xff] %v14940_v20  ;;  %v14948_v5 = vadd.f32 %v663_v49, %v14349_v60 }
 0x1bf   :  { %v14917_v8 = vpop.f32.mrf.mxu0  ;;  %17547 = vst [vmem:[#allocation101_spill] sm:$0xff] %v14943_v17  ;;  %v14951_v9 = vadd.f32 %v836_v38, %v14357_v63 }
 0x1c0   :  { %v14919_v3 = vpop.f32.mrf.mxu1  ;;  %17548 = vst [vmem:[#allocation102_spill] sm:$0xff] %v14948_v5 }
 0x1c1   :  { %v14929_v61 = vpop.f32.mrf.mxu0  ;;  %17549 = vst [vmem:[#allocation103_spill] sm:$0xff] %v14951_v9 }
 0x1c2   :  { %17544 = vst [vmem:[#allocation98_spill] sm:$0xff] %v14929_v61  ;;  %v14931_v1 = vpop.f32.mrf.mxu1 }
 0x1c3   :  { %17545 = vst [vmem:[#allocation99_spill] sm:$0xff] %v14931_v1  ;;  %v1111_v44 = vpop.f32.mrf.mxu0 }
 0x1c4   :  { %v1284_v31 = vpop.f32.mrf.mxu1  ;;  %v1112_v36 = vadd.f32 %v1111_v44, %v14341_v54 }
 0x1c5   :  { %v1285_v43 = vadd.f32 %v1284_v31, %v14345_v55  ;;  %v1113_v1 = vpop.f32.mrf.mxu0 }
 0x1c6   :  { %v1286_v22 = vpop.f32.mrf.mxu1  ;;  %v1423_v50 = vmax.f32 %v1112_v36, 0.0  ;;  %v1114_v44 = vadd.f32 %v1113_v1, %v14349_v60  ;;  %v17551_v1 = vmax.f32 %v14369_v11, 0.0 }
 0x1c7   :  { %v1425_v42 = vmax.f32 %v1285_v43, 0.0  ;;  %v1115_v33 = vpop.f32.mrf.mxu0  ;;  %v1287_v31 = vadd.f32 %v1286_v22, %v14357_v63 }
 0x1c8   :  { %v1288_v53 = vpop.f32.mrf.mxu1  ;;  %v1116_v47 = vadd.f32 %v1115_v33, %v14341_v54  ;;  %v1535_v17 = vmax.f32 %v17550_v35, %v1423_v50  ;;  %v1424_v9 = vmax.f32 %v1114_v44, 0.0 }
 0x1c9   :  { %v1289_v49 = vadd.f32 %v1288_v53, %v14345_v55  ;;  %v1117_v52 = vpop.f32.mrf.mxu0  ;;  %v1537_v22 = vmax.f32 %v17551_v1, %v1425_v42  ;;  %v17556_v1 = vld [vmem:[#allocation30_spill] sm:$0xff] }
 0x1ca   :  { %v1290_v18 = vpop.f32.mrf.mxu1  ;;  %v1118_v36 = vadd.f32 %v1117_v52, %v14349_v60  ;;  %v1427_v20 = vmax.f32 %v1116_v47, 0.0  ;;  %v1426_v52 = vmax.f32 %v1287_v31, 0.0  ;;  %v17554_v47 = vld [vmem:[#allocation29_spill] sm:$0xff] }
 0x1cb   :  { %v1291_v51 = vadd.f32 %v1290_v18, %v14357_v63  ;;  %v1429_v33 = vmax.f32 %v1289_v49, 0.0  ;;  %v1121_v29 = vpop.f32.mrf.mxu0  ;;  %v17552_v18 = vmax.f32 %v14385_v56, 0.0  ;;  %v17555_v35 = vmax.f32 %v17554_v47, 0.0 }
 0x1cc   :  { %v1294_v53 = vpop.f32.mrf.mxu1  ;;  %v1428_v23 = vmax.f32 %v1118_v36, 0.0  ;;  %v1122_v38 = vadd.f32 %v1121_v29, %v14341_v54  ;;  %v17557_v36 = vmax.f32 %v17556_v1, 0.0 }
 0x1cd   :  { %v1430_v26 = vmax.f32 %v1291_v51, 0.0  ;;  %v1295_v43 = vadd.f32 %v1294_v53, %v14345_v55  ;;  %v1539_v5 = vmax.f32 %v17552_v18, %v1427_v20  ;;  %v1541_v50 = vmax.f32 %v17553_v10, %v1429_v33  ;;  %v1123_v11 = vpop.f32.mrf.mxu0  ;;  %v17560_v33 = vld [vmem:[#allocation25_spill] sm:$0xff]  ;;  %v17562_v10 = vld [vmem:[#allocation28_spill] sm:$0xff] }
 0x1ce   :  { %v1296_v42 = vpop.f32.mrf.mxu1  ;;  %v1540_v49 = vmax.f32 %v17555_v35, %v1428_v23  ;;  %v1431_v41 = vmax.f32 %v1122_v38, 0.0  ;;  %v1124_v56 = vadd.f32 %v1123_v11, %v14349_v60  ;;  %v17561_v53 = vmax.f32 %v17560_v33, 0.0 }
 0x1cf   :  { %v1542_v51 = vmax.f32 %v17557_v36, %v1430_v26  ;;  %v1433_v29 = vmax.f32 %v1295_v43, 0.0  ;;  %v14977_v61 = vmax.f32 %v1535_v17, %v1539_v5  ;;  %v14979_v44 = vmax.f32 %v1537_v22, %v1541_v50  ;;  %v1125_v57 = vpop.f32.mrf.mxu0 }
 0x1d0   :  { %v1297_v20 = vadd.f32 %v1296_v42, %v14357_v63  ;;  %v1298_v31 = vpop.f32.mrf.mxu1  ;;  %v1536_v18 = vmax.f32 %v17561_v53, %v1424_v9  ;;  %v17563_v23 = vmax.f32 %v17562_v10, 0.0  ;;  %v1432_v35 = vmax.f32 %v1124_v56, 0.0  ;;  %v17566_v9 = vld [vmem:[#allocation33_spill] sm:$0xff] }
 0x1d1   :  { %17558 = vst [vmem:[#allocation29_spill] sm:$0xff] %v14977_v61  ;;  %17559 = vst [vmem:[#allocation30_spill] sm:$0xff] %v14979_v44  ;;  %v1127_v38 = vpop.f32.mrf.mxu0  ;;  %v1126_v17 = vadd.f32 %v1125_v57, %v14341_v54  ;;  %v1299_v5 = vadd.f32 %v1298_v31, %v14345_v55  ;;  %v17567_v1 = vmax.f32 %v17566_v9, 0.0 }
 0x1d2   :  { %v1538_v47 = vmax.f32 %v17563_v23, %v1426_v52  ;;  %v1434_v26 = vmax.f32 %v1297_v20, 0.0  ;;  %v1300_v43 = vpop.f32.mrf.mxu1  ;;  %v1128_v22 = vadd.f32 %v1127_v38, %v14349_v60  ;;  %v14991_v11 = vmax.f32 %v1536_v18, %v1540_v49  ;;  %v17568_v52 = vld [vmem:[#allocation34_spill] sm:$0xff]  ;;  %v17570_v38 = vld [vmem:[#allocation35_spill] sm:$0xff]  ;;  %v17572_v49 = vld [vmem:[#allocation36_spill] sm:$0xff] }
 0x1d3   :  { %v1301_v50 = vadd.f32 %v1300_v43, %v14357_v63  ;;  %v1543_v36 = vmax.f32 %v17567_v1, %v1431_v41  ;;  %v17569_v56 = vmax.f32 %v17568_v52, 0.0  ;;  %v1131_v33 = vpop.f32.mrf.mxu0  ;;  %v1435_v10 = vmax.f32 %v1126_v17, 0.0 }
 0x1d4   :  { %17564 = vst [vmem:[#allocation25_spill] sm:$0xff] %v14991_v11  ;;  %v14993_v42 = vmax.f32 %v1538_v47, %v1542_v51  ;;  %v1304_v53 = vpop.f32.mrf.mxu1  ;;  %v1437_v57 = vmax.f32 %v1299_v5, 0.0  ;;  %v1436_v23 = vmax.f32 %v1128_v22, 0.0  ;;  %v17571_v59 = vmax.f32 %v17570_v38, 0.0 }
 0x1d5   :  { %v1545_v20 = vmax.f32 %v17569_v56, %v1433_v29  ;;  %v1438_v31 = vmax.f32 %v1301_v50, 0.0  ;;  %v17573_v18 = vmax.f32 %v17572_v49, 0.0  ;;  %v1132_v47 = vadd.f32 %v1131_v33, %v14341_v54  ;;  %v1133_v9 = vpop.f32.mrf.mxu0 }
 0x1d6   :  { %17565 = vst [vmem:[#allocation28_spill] sm:$0xff] %v14993_v42  ;;  %v1544_v43 = vmax.f32 %v17571_v59, %v1432_v35  ;;  %v1305_v41 = vadd.f32 %v1304_v53, %v14345_v55  ;;  %v1306_v1 = vpop.f32.mrf.mxu1  ;;  %v17574_v29 = vmax.f32 %v14437_v13, 0.0  ;;  %v17575_v17 = vmax.f32 %v14441_v2, 0.0 }
 0x1d7   :  { %v1546_v51 = vmax.f32 %v17573_v18, %v1434_v26  ;;  %v17576_v22 = vmax.f32 %v14445_v14, 0.0  ;;  %v17577_v59 = vmax.f32 %v14449_v15, 0.0  ;;  %v1439_v56 = vmax.f32 %v1132_v47, 0.0  ;;  %v1135_v38 = vpop.f32.mrf.mxu0 }
 0x1d8   :  { %v1547_v52 = vmax.f32 %v17574_v29, %v1435_v10  ;;  %v1549_v5 = vmax.f32 %v17575_v17, %v1437_v57  ;;  %v1441_v26 = vmax.f32 %v1305_v41, 0.0  ;;  %v1134_v33 = vadd.f32 %v1133_v9, %v14349_v60  ;;  %v1308_v49 = vpop.f32.mrf.mxu1 }
 0x1d9   :  { %v1548_v50 = vmax.f32 %v17576_v22, %v1436_v23  ;;  %v1550_v35 = vmax.f32 %v17577_v59, %v1438_v31  ;;  %v1307_v53 = vadd.f32 %v1306_v1, %v14357_v63  ;;  %v17578_v14 = vmax.f32 %v14454_v46, 0.0  ;;  %v1137_v41 = vpop.f32.mrf.mxu0  ;;  %v12536_v59 = vld [vmem:[#allocation7 + $0x468] ss:$16 sps:$4 sm:$0xff]  }
 0x1da   :  { %v1651_v18 = vmax.f32 %v1543_v36, %v1547_v52  ;;  %v1653_v13 = vmax.f32 %v1545_v20, %v1549_v5  ;;  %v17579_v15 = vmax.f32 %v14458_v16, 0.0  ;;  %v1440_v31 = vmax.f32 %v1134_v33, 0.0  ;;  %v1310_v9 = vpop.f32.mrf.mxu1 }
 0x1db   :  { %v15015_v10 = vmax.f32 %v1544_v43, %v1548_v50  ;;  %v15017_v2 = vmax.f32 %v1546_v51, %v1550_v35  ;;  %v1551_v57 = vmax.f32 %v17578_v14, %v1439_v56  ;;  %v1442_v47 = vmax.f32 %v1307_v53, 0.0  ;;  %v17582_v51 = vld [vmem:[#allocation37_spill] sm:$0xff]  ;;  %v1141_v22 = vpop.f32.mrf.mxu0 }
 0x1dc   :  { %v1553_v23 = vmax.f32 %v17579_v15, %v1441_v26  ;;  %v15024_v1 = vpack.c.bf16 %v1651_v18, %v14977_v61  ;;  %v15027_v36 = vpack.c.bf16 %v1653_v13, %v14979_v44  ;;  %v1136_v20 = vadd.f32 %v1135_v38, %v14341_v54  ;;  %v1314_v50 = vpop.f32.mrf.mxu1  ;;  %v17591_v44 = vld [vmem:[#allocation41_spill] sm:$0xff] }
 0x1dd   :  { %v1309_v43 = vadd.f32 %v1308_v49, %v14345_v55  ;;  %v17583_v46 = vmax.f32 %v17582_v51, 0.0  ;;  %v17584_v16 = vmax.f32 %v14471_v12, 0.0  ;;  %v1138_v17 = vadd.f32 %v1137_v41, %v14349_v60  ;;  %v1143_v14 = vpop.f32.mrf.mxu0  ;;  %v17585_v41 = vld [vmem:[#allocation38_spill] sm:$0xff] }
 0x1de   :  { %17580 = vst [vmem:[#allocation33_spill] sm:$0xff] %v15024_v1  ;;  %17581 = vst [vmem:[#allocation34_spill] sm:$0xff] %v15027_v36  ;;  %v1311_v5 = vadd.f32 %v1310_v9, %v14357_v63  ;;  %v1443_v35 = vmax.f32 %v1136_v20, 0.0  ;;  %v1142_v26 = vadd.f32 %v1141_v22, %v14341_v54  ;;  %v1315_v33 = vadd.f32 %v1314_v50, %v14345_v55  ;;  %v1316_v15 = vpop.f32.mrf.mxu1  ;;  %v17589_v22 = vld [vmem:[#allocation40_spill] sm:$0xff] }
 0x1df   :  { %v1552_v29 = vmax.f32 %v17583_v46, %v1440_v31  ;;  %v1554_v52 = vmax.f32 %v17584_v16, %v1442_v47  ;;  %v1445_v56 = vmax.f32 %v1309_v43, 0.0  ;;  %v1444_v53 = vmax.f32 %v1138_v17, 0.0  ;;  %v12541_v31 = vld [vmem:[#allocation7 + $0x44c] ss:$16 sps:$4 sm:$0xff]   ;;  %v12545_v47 = vld [vmem:[#allocation7 + $0x668] ss:$16 sps:$4 sm:$0xff]  }
 0x1e0   :  { %v1446_v38 = vmax.f32 %v1311_v5, 0.0  ;;  %v15041_v49 = vpack.c.bf16 %v15015_v10, %v14991_v11  ;;  %v15045_v12 = vpack.c.bf16 %v15017_v2, %v14993_v42  ;;  %v17586_v9 = vmax.f32 %v17585_v41, 0.0  ;;  %v17587_v43 = vld [vmem:[#allocation39_spill] sm:$0xff]  ;;  %v12553_v5 = vld [vmem:[#allocation7 + $0x64c] ss:$16 sps:$4 sm:$0xff]  }
 0x1e1   :  { %v17588_v51 = vmax.f32 %v17587_v43, 0.0  ;;  %v1447_v16 = vmax.f32 %v1142_v26, 0.0  ;;  %v1449_v17 = vmax.f32 %v1315_v33, 0.0  ;;  %v17590_v50 = vmax.f32 %v17589_v22, 0.0  ;;  %v17593_v26 = vld [vmem:[#allocation42_spill] sm:$0xff] }
 0x1e2   :  { %v1555_v20 = vmax.f32 %v17586_v9, %v1443_v35  ;;  %v17592_v11 = vmax.f32 %v17591_v44, 0.0  ;;  %2714 = vmatprep.mubr.bf16.mxu0 %v15041_v49  ;;  %11313 = vmatprep.mubr.msk.bf16.mxu1 %vm2660_vm2, %v15045_v12  ;;  %v1144_v41 = vadd.f32 %v1143_v14, %v14349_v60  ;;  %v1145_v35 = vpop.f32.mrf.mxu0  ;;  %v1318_v9 = vpop.f32.mrf.mxu1  ;;  %v17594_v33 = vmax.f32 %v17593_v26, 0.0 }
 0x1e3   :  { %v1557_v46 = vmax.f32 %v17588_v51, %v1445_v56  ;;  %v1556_v61 = vmax.f32 %v17590_v50, %v1444_v53  ;;  %2715 = vmatmul.mubr.bf16.vlgmr.msra.gmra.mxu0 %v15024_v1  ;;  %2818 = vmatmul.mubr.bf16.vlgmr.msra.gmra.mxu1 %v15027_v36  ;;  %v12548_v36 = vld [vmem:[#allocation7 + $0x408] ss:$16 sps:$4 sm:$0xff]  }
 0x1e4   :  { %v1558_v42 = vmax.f32 %v17592_v11, %v1446_v38  ;;  %v15059_v43 = vmax.f32 %v1551_v57, %v1555_v20  ;;  %v1559_v51 = vmax.f32 %v17594_v33, %v1447_v16  ;;  %v1448_v53 = vmax.f32 %v1144_v41, 0.0  ;;  %v1147_v14 = vpop.f32.mrf.mxu0  ;;  %v1320_v22 = vpop.f32.mrf.mxu1  ;;  %2889 = vmatpush1.bf16.msra.mxu0 %v12536_v59  ;;  %v12539_v57 = vld [vmem:[#allocation7 + $0x448] ss:$16 sps:$4 sm:$0xff]   ;;  %2992 = vmatpush1.bf16.msra.mxu1 %v12545_v47 }
 0x1e5   :  { %v15061_v56 = vmax.f32 %v1553_v23, %v1557_v46  ;;  %v15066_v44 = vmax.f32 %v1552_v29, %v1556_v61  ;;  %v1317_v38 = vadd.f32 %v1316_v15, %v14357_v63  ;;  %v12544_v23 = vld [vmem:[#allocation7 + $0x42c] ss:$16 sps:$4 sm:$0xff]   ;;  %v1146_v61 = vadd.f32 %v1145_v35, %v14341_v54  ;;  %2890 = vmatprep.subr.bf16.mxu0 %v12541_v31  ;;  %v12551_v29 = vld [vmem:[#allocation7 + $0x648] ss:$16 sps:$4 sm:$0xff]  }
 0x1e6   :  { %v15068_v11 = vmax.f32 %v1554_v52, %v1558_v42  ;;  %v15073_v20 = vpack.c.bf16 %v15059_v43, %v1651_v18  ;;  %v1319_v42 = vadd.f32 %v1318_v9, %v14345_v55  ;;  %v12559_v52 = vld [vmem:[#allocation7 + $0x62c] ss:$16 sps:$4 sm:$0xff]   ;;  %v17599_v18 = vld [vmem:[#allocation43_spill] sm:$0xff]  ;;  %v1151_v41 = vpop.f32.mrf.mxu0  ;;  %v1324_v26 = vpop.f32.mrf.mxu1  ;;  %v1148_v31 = vadd.f32 %v1147_v14, %v14349_v60  ;;  %2993 = vmatprep.subr.bf16.mxu1 %v12553_v5  ;;  %v12542_v47 = vld [vmem:[#allocation7 + $0x428] ss:$16 sps:$4 sm:$0xff]  }
 0x1e7   :  { %v15076_v46 = vpack.c.bf16 %v15061_v56, %v1653_v13  ;;  %v15082_v15 = vpack.c.bf16 %v15066_v44, %v15015_v10  ;;  %v17600_v16 = vmax.f32 %v17599_v18, 0.0  ;;  %v1450_v13 = vmax.f32 %v1317_v38, 0.0  ;;  %v17601_v10 = vld [vmem:[#allocation44_spill] sm:$0xff] }
 0x1e8   :  { %17595 = vst [vmem:[#allocation35_spill] sm:$0xff] %v15073_v20  ;;  %v15086_v59 = vpack.c.bf16 %v15068_v11, %v15017_v2  ;;  %v1451_v35 = vmax.f32 %v1146_v61, 0.0  ;;  %v1453_v9 = vmax.f32 %v1319_v42, 0.0  ;;  %v1321_v33 = vadd.f32 %v1320_v22, %v14357_v63  ;;  %v1153_v38 = vpop.f32.mrf.mxu0  ;;  %2891 = vmatpush1.bf16.msra.mxu0 %v12539_v57  ;;  %v12550_v61 = vld [vmem:[#allocation7 + $0x40c] ss:$16 sps:$4 sm:$0xff]   ;;  %2994 = vmatpush1.bf16.msra.mxu1 %v12551_v29  ;;  %v17608_v29 = vld [vmem:[#allocation45_spill] sm:$0xff] }
 0x1e9   :  { %17596 = vst [vmem:[#allocation36_spill] sm:$0xff] %v15076_v46  ;;  %17597 = vst [vmem:[#allocation37_spill] sm:$0xff] %v15082_v15  ;;  %v1561_v50 = vmax.f32 %v17600_v16, %v1449_v17  ;;  %v17602_v20 = vmax.f32 %v17601_v10, 0.0  ;;  %v17603_v2 = vmax.f32 %v14529_v21, 0.0  ;;  %v1152_v18 = vadd.f32 %v1151_v41, %v14341_v54  ;;  %v1326_v16 = vpop.f32.mrf.mxu1  ;;  %2892 = vmatprep.subr.bf16.mxu0 %v12544_v23  ;;  %v12557_v21 = vld [vmem:[#allocation7 + $0x628] ss:$16 sps:$4 sm:$0xff]  }
 0x1ea   :  { %17598 = vst [vmem:[#allocation38_spill] sm:$0xff] %v15086_v59  ;;  %v1325_v17 = vadd.f32 %v1324_v26, %v14345_v55  ;;  %v17604_v14 = vmax.f32 %v14533_v0, 0.0  ;;  %v17605_v5 = vmax.f32 %v14537_v28, 0.0  ;;  %v1452_v10 = vmax.f32 %v1148_v31, 0.0  ;;  %v1155_v57 = vpop.f32.mrf.mxu0  ;;  %2995 = vmatprep.subr.bf16.mxu1 %v12559_v52 }
 0x1eb   :  { %v1560_v15 = vmax.f32 %v17602_v20, %v1448_v53  ;;  %v1562_v46 = vmax.f32 %v17603_v2, %v1450_v13  ;;  %v1454_v53 = vmax.f32 %v1321_v33, 0.0  ;;  %v12565_v20 = vld [vmem:[#allocation7 + $0x60c] ss:$16 sps:$4 sm:$0xff]   ;;  %v1455_v13 = vmax.f32 %v1152_v18, 0.0  ;;  %v1328_v59 = vpop.f32.mrf.mxu1 }
 0x1ec   :  { %v1563_v42 = vmax.f32 %v17604_v14, %v1451_v35  ;;  %v1565_v22 = vmax.f32 %v17605_v5, %v1453_v9  ;;  %v1457_v41 = vmax.f32 %v1325_v17, 0.0  ;;  %v1154_v26 = vadd.f32 %v1153_v38, %v14349_v60  ;;  %v1157_v38 = vpop.f32.mrf.mxu0  ;;  %2893 = vmatpush1.bf16.msra.mxu0 %v12542_v47  ;;  %v17610_v14 = vld [vmem:[#allocation46_spill] sm:$0xff]  ;;  %2996 = vmatpush1.bf16.msra.mxu1 %v12557_v21 }
 0x1ed   :  { %v1327_v2 = vadd.f32 %v1326_v16, %v14357_v63  ;;  %v17606_v28 = vmax.f32 %v14541_v6, 0.0  ;;  %v17607_v23 = vmax.f32 %v14546_v24, 0.0  ;;  %v15114_v33 = vadd.f32 %v14917_v8, %v14341_v54  ;;  %v1330_v16 = vpop.f32.mrf.mxu1  ;;  %2894 = vmatprep.subr.bf16.mxu0 %v12550_v61  ;;  %2997 = vmatprep.subr.bf16.mxu1 %v12565_v20 }
 0x1ee   :  { %v15104_v0 = vmax.f32 %v1559_v51, %v1563_v42  ;;  %v15106_v35 = vmax.f32 %v1561_v50, %v1565_v22  ;;  %v15118_v18 = vadd.f32 %v14919_v3, %v14345_v55  ;;  %v17609_v51 = vmax.f32 %v17608_v29, 0.0  ;;  %v12556_v3 = vld [vmem:[#allocation7 + $0x3ec] ss:$16 sps:$4 sm:$0xff]  }
 0x1ef   :  { %v1564_v9 = vmax.f32 %v17606_v28, %v1452_v10  ;;  %v1566_v31 = vmax.f32 %v17607_v23, %v1454_v53  ;;  %v1456_v50 = vmax.f32 %v1154_v26, 0.0  ;;  %v17611_v42 = vmax.f32 %v17610_v14, 0.0  ;;  %v1334_v53 = vpop.f32.mrf.mxu1  ;;  %v12562_v28 = vld [vmem:[#allocation7 + $0x3cc] ss:$16 sps:$4 sm:$0xff]   ;;  %v17614_v23 = vld [vmem:[#allocation47_spill] sm:$0xff]  ;;  %v17616_v14 = vld [vmem:[#allocation49_spill] sm:$0xff] }
 0x1f0   :  { %v1567_v17 = vmax.f32 %v17609_v51, %v1455_v13  ;;  %v15124_v24 = vpack.c.bf16 %v15104_v0, %v15059_v43  ;;  %v15128_v6 = vpack.c.bf16 %v15106_v35, %v15061_v56  ;;  %v1458_v22 = vmax.f32 %v1327_v2, 0.0  ;;  %v1161_v43 = vpop.f32.mrf.mxu0  ;;  %v12554_v13 = vld [vmem:[#allocation7 + $0x3e8] ss:$16 sps:$4 sm:$0xff]   ;;  %2895 = vmatpush1.bf16.msra.mxu0 %v12548_v36 }
 0x1f1   :  { %v15130_v8 = vmax.f32 %v1560_v15, %v1564_v9  ;;  %v15132_v52 = vmax.f32 %v1562_v46, %v1566_v31  ;;  %v1569_v5 = vmax.f32 %v17611_v42, %v1457_v41  ;;  %v1156_v47 = vadd.f32 %v1155_v57, %v14341_v54  ;;  %v1336_v57 = vpop.f32.mrf.mxu1  ;;  %v12563_v9 = vld [vmem:[#allocation7 + $0x608] ss:$16 sps:$4 sm:$0xff]   ;;  %2896 = vmatprep.subr.bf16.mxu0 %v12556_v3 }
 0x1f2   :  { %v1329_v10 = vadd.f32 %v1328_v59, %v14345_v55  ;;  %v1158_v56 = vadd.f32 %v1157_v38, %v14349_v60  ;;  %v1331_v15 = vadd.f32 %v1330_v16, %v14357_v63  ;;  %v1162_v46 = vadd.f32 %v1161_v43, %v14341_v54  ;;  %v1163_v21 = vpop.f32.mrf.mxu0  ;;  %v12571_v16 = vld [vmem:[#allocation7 + $0x5ec] ss:$16 sps:$4 sm:$0xff]   ;;  %2998 = vmatpush1.bf16.msra.mxu1 %v12563_v9 }
 0x1f3   :  { %v1335_v61 = vadd.f32 %v1334_v53, %v14345_v55  ;;  %v1459_v26 = vmax.f32 %v1156_v47, 0.0  ;;  %v15144_v2 = vpack.c.bf16 %v15130_v8, %v15066_v44  ;;  %v15148_v59 = vpack.c.bf16 %v15132_v52, %v15068_v11  ;;  %v17618_v47 = vld [vmem:[#allocation50_spill] sm:$0xff]  ;;  %v1338_v53 = vpop.f32.mrf.mxu1  ;;  %2999 = vmatprep.subr.bf16.mxu1 %v12571_v16 }
 0x1f4   :  { %v1461_v41 = vmax.f32 %v1329_v10, 0.0  ;;  %v17615_v31 = vmax.f32 %v17614_v23, 0.0  ;;  %v1460_v51 = vmax.f32 %v1158_v56, 0.0  ;;  %v1462_v20 = vmax.f32 %v1331_v15, 0.0  ;;  %v12560_v56 = vld [vmem:[#allocation7 + $0x3c8] ss:$16 sps:$4 sm:$0xff]   ;;  %2897 = vmatpush1.bf16.msra.mxu0 %v12554_v13 }
 0x1f5   :  { %17612 = vst [vmem:[#allocation39_spill] sm:$0xff] %v15144_v2  ;;  %17613 = vst [vmem:[#allocation40_spill] sm:$0xff] %v15148_v59  ;;  %v1463_v38 = vmax.f32 %v1162_v46, 0.0  ;;  %v17617_v44 = vmax.f32 %v17616_v14, 0.0  ;;  %v17619_v10 = vmax.f32 %v17618_v47, 0.0  ;;  %v1465_v43 = vmax.f32 %v1335_v61, 0.0  ;;  %2724 = vmatprep.mubr.bf16.mxu0 %v15144_v2  ;;  %11314 = vmatprep.mubr.msk.bf16.mxu1 %vm2660_vm2, %v15148_v59 }
 0x1f6   :  { %v1568_v29 = vmax.f32 %v17615_v31, %v1456_v50  ;;  %v1164_v36 = vadd.f32 %v1163_v21, %v14349_v60  ;;  %v1165_v50 = vpop.f32.mrf.mxu0  ;;  %v17620_v15 = vld [vmem:[#allocation48_spill] sm:$0xff]  ;;  %v17622_v23 = vld [vmem:[#allocation51_spill] sm:$0xff]  ;;  %v17626_v61 = vld [vmem:[#allocation53_spill] sm:$0xff]  ;;  %2725 = vmatmul.mubr.bf16.gmra.mxu0 %v15124_v24  ;;  %v1337_v1 = vadd.f32 %v1336_v57, %v14357_v63  ;;  %2828 = vmatmul.mubr.bf16.gmra.mxu1 %v15128_v6 }
 0x1f7   :  { %v1571_v42 = vmax.f32 %v17617_v44, %v1459_v26  ;;  %v1573_v11 = vmax.f32 %v17619_v10, %v1461_v41  ;;  %v17621_v3 = vmax.f32 %v17620_v15, 0.0  ;;  %v17623_v31 = vmax.f32 %v17622_v23, 0.0  ;;  %v17624_v14 = vld [vmem:[#allocation52_spill] sm:$0xff]  ;;  %v1340_v15 = vpop.f32.mrf.mxu1  ;;  %2898 = vmatprep.subr.bf16.mxu0 %v12562_v28 }
 0x1f8   :  { %v17625_v44 = vmax.f32 %v17624_v14, 0.0  ;;  %v17627_v47 = vmax.f32 %v17626_v61, 0.0  ;;  %v1464_v2 = vmax.f32 %v1164_v36, 0.0  ;;  %v12569_v28 = vld [vmem:[#allocation7 + $0x5e8] ss:$16 sps:$4 sm:$0xff]   ;;  %2899 = vmatpush1.bf16.msra.mxu0 %v12560_v56 }
 0x1f9   :  { %v1570_v46 = vmax.f32 %v17621_v3, %v1458_v22  ;;  %v1572_v26 = vmax.f32 %v17623_v31, %v1460_v51  ;;  %v15169_v59 = vmax.f32 %v1567_v17, %v1571_v42  ;;  %v15171_v21 = vmax.f32 %v1569_v5, %v1573_v11  ;;  %v1167_v22 = vpop.f32.mrf.mxu0  ;;  %v12568_v17 = vld [vmem:[#allocation7 + $0x3ac] ss:$16 sps:$4 sm:$0xff]   ;;  %v12578_v16 = vld [vmem:[#allocation7 + $0x5c8] ss:$16 sps:$4 sm:$0xff]   ;;  %3000 = vmatpush1.bf16.msra.mxu1 %v12569_v28 }
 0x1fa   :  { %v1574_v41 = vmax.f32 %v17625_v44, %v1462_v20  ;;  %v1575_v10 = vmax.f32 %v17627_v47, %v1463_v38  ;;  %v1166_v38 = vadd.f32 %v1165_v50, %v14341_v54  ;;  %v1339_v3 = vadd.f32 %v1338_v53, %v14345_v55  ;;  %v17630_v42 = vld [vmem:[#allocation54_spill] sm:$0xff]  ;;  %v1344_v50 = vpop.f32.mrf.mxu1  ;;  %2900 = vmatprep.subr.bf16.mxu0 %v12568_v17 }
 0x1fb   :  { %v15175_v51 = vmax.f32 %v1568_v29, %v1572_v26  ;;  %v15183_v5 = vpack.c.bf16 %v15169_v59, %v15104_v0  ;;  %v15187_v57 = vpack.c.bf16 %v15171_v21, %v15106_v35  ;;  %v17631_v13 = vmax.f32 %v17630_v42, 0.0  ;;  %v12566_v53 = vld [vmem:[#allocation7 + $0x3a8] ss:$16 sps:$4 sm:$0xff]   ;;  %v12580_v23 = vld [vmem:[#allocation7 + $0x5cc] ss:$16 sps:$4 sm:$0xff]   ;;  %v17637_v42 = vld [vmem:[#allocation57_spill] sm:$0xff] }
 0x1fc   :  { %v15177_v20 = vmax.f32 %v1570_v46, %v1574_v41  ;;  %v17632_v11 = vmax.f32 %v14621_v39, 0.0  ;;  %v1171_v46 = vpop.f32.mrf.mxu0  ;;  %v1467_v31 = vmax.f32 %v1166_v38, 0.0  ;;  %v1469_v26 = vmax.f32 %v1339_v3, 0.0  ;;  %v1346_v44 = vpop.f32.mrf.mxu1  ;;  %v12574_v41 = vld [vmem:[#allocation7 + $0x38c] ss:$16 sps:$4 sm:$0xff]   ;;  %3001 = vmatprep.subr.bf16.mxu1 %v12580_v23  ;;  %2901 = vmatpush1.bf16.msra.mxu0 %v12566_v53 }
 0x1fd   :  { %17628 = vst [vmem:[#allocation41_spill] sm:$0xff] %v15183_v5  ;;  %17629 = vst [vmem:[#allocation42_spill] sm:$0xff] %v15187_v57  ;;  %v1577_v29 = vmax.f32 %v17631_v13, %v1465_v43  ;;  %v15195_v0 = vpack.c.bf16 %v15175_v51, %v15130_v8  ;;  %v1466_v43 = vmax.f32 %v1337_v1, 0.0  ;;  %v1168_v39 = vadd.f32 %v1167_v22, %v14349_v60  ;;  %v17635_v8 = vld [vmem:[#allocation56_spill] sm:$0xff]  ;;  %v17649_v53 = vld [vmem:[#allocation26_spill] sm:$0xff] }
 0x1fe   :  { %v1576_v36 = vmax.f32 %v17632_v11, %v1464_v2  ;;  %v15199_v35 = vpack.c.bf16 %v15177_v20, %v15132_v52  ;;  %v1341_v2 = vadd.f32 %v1340_v15, %v14357_v63  ;;  %v1172_v9 = vadd.f32 %v1171_v46, %v14341_v54  ;;  %v1173_v14 = vpop.f32.mrf.mxu0  ;;  %v12586_v22 = vld [vmem:[#allocation7 + $0x5ac] ss:$16 sps:$4 sm:$0xff]   ;;  %v1348_v5 = vpop.f32.mrf.mxu1  ;;  %2902 = vmatprep.subr.bf16.mxu0 %v12574_v41 }
 0x1ff   :  { %17633 = vst [vmem:[#allocation43_spill] sm:$0xff] %v15195_v0  ;;  %v17636_v61 = vmax.f32 %v17635_v8, 0.0  ;;  %v17638_v52 = vmax.f32 %v17637_v42, 0.0  ;;  %v1345_v38 = vadd.f32 %v1344_v50, %v14345_v55  ;;  %v1174_v1 = vadd.f32 %v1173_v14, %v14349_v60  ;;  %v17639_v50 = vld [vmem:[#allocation55_spill] sm:$0xff]  ;;  %v17641_v42 = vld [vmem:[#allocation58_spill] sm:$0xff]  ;;  %3002 = vmatpush1.bf16.msra.mxu1 %v12578_v16 }
 0x200   :  { %17634 = vst [vmem:[#allocation44_spill] sm:$0xff] %v15199_v35  ;;  %v1468_v15 = vmax.f32 %v1168_v39, 0.0  ;;  %v1470_v3 = vmax.f32 %v1341_v2, 0.0  ;;  %v1471_v11 = vmax.f32 %v1172_v9, 0.0  ;;  %v1347_v46 = vadd.f32 %v1346_v44, %v14357_v63  ;;  %v1175_v56 = vpop.f32.mrf.mxu0  ;;  %v17643_v2 = vld [vmem:[#allocation59_spill] sm:$0xff]  ;;  %v17645_v44 = vld [vmem:[#allocation60_spill] sm:$0xff]  ;;  %3003 = vmatprep.subr.bf16.mxu1 %v12586_v22 }
 0x201   :  { %v1579_v47 = vmax.f32 %v17636_v61, %v1467_v31  ;;  %v1581_v13 = vmax.f32 %v17638_v52, %v1469_v26  ;;  %v1473_v26 = vmax.f32 %v1345_v38, 0.0  ;;  %v1472_v61 = vmax.f32 %v1174_v1, 0.0 }
 0x202   :  { %v17640_v14 = vmax.f32 %v17639_v50, 0.0  ;;  %v17642_v52 = vmax.f32 %v17641_v42, 0.0  ;;  %v17644_v9 = vmax.f32 %v17643_v2, 0.0  ;;  %v17646_v57 = vmax.f32 %v17645_v44, 0.0  ;;  %v1177_v28 = vpop.f32.mrf.mxu0  ;;  %v12584_v44 = vld [vmem:[#allocation7 + $0x5a8] ss:$16 sps:$4 sm:$0xff]  }
 0x203   :  { %v15211_v8 = vmax.f32 %v1575_v10, %v1579_v47  ;;  %v15213_v31 = vmax.f32 %v1577_v29, %v1581_v13  ;;  %v1350_v10 = vpop.f32.mrf.mxu1  ;;  %v12572_v29 = vld [vmem:[#allocation7 + $0x388] ss:$16 sps:$4 sm:$0xff]   ;;  %v1474_v1 = vmax.f32 %v1347_v46, 0.0  ;;  %3004 = vmatpush1.bf16.msra.mxu1 %v12584_v44 }
 0x204   :  { %v1578_v17 = vmax.f32 %v17640_v14, %v1466_v43  ;;  %v1580_v39 = vmax.f32 %v17642_v52, %v1468_v15  ;;  %v1582_v0 = vmax.f32 %v17644_v9, %v1470_v3  ;;  %v1583_v35 = vmax.f32 %v17646_v57, %v1471_v11  ;;  %v17647_v43 = vld [vmem:[#allocation61_spill] sm:$0xff]  ;;  %v12577_v15 = vld [vmem:[#allocation7 + $0x56c] ss:$16 sps:$4 sm:$0xff]   ;;  %v1181_v14 = vpop.f32.mrf.mxu0  ;;  %2903 = vmatpush1.bf16.msra.mxu0 %v12572_v29 }
 0x205   :  { %v15225_v47 = vpack.c.bf16 %v15211_v8, %v15169_v59  ;;  %v15229_v23 = vpack.c.bf16 %v15213_v31, %v15171_v21  ;;  %v17648_v13 = vmax.f32 %v17647_v43, 0.0  ;;  %v17650_v11 = vmax.f32 %v17649_v53, 0.0  ;;  %v1354_v42 = vpop.f32.mrf.mxu1  ;;  %2904 = vmatprep.subr.bf16.mxu0 %v12577_v15 }
 0x206   :  { %v15233_v3 = vmax.f32 %v1576_v36, %v1580_v39  ;;  %v15235_v57 = vmax.f32 %v1578_v17, %v1582_v0  ;;  %v1176_v59 = vadd.f32 %v1175_v56, %v14341_v54  ;;  %v1349_v21 = vadd.f32 %v1348_v5, %v14345_v55  ;;  %v1183_v16 = vpop.f32.mrf.mxu0  ;;  %v12583_v17 = vld [vmem:[#allocation7 + $0x54c] ss:$16 sps:$4 sm:$0xff]  }
 0x207   :  { %v1585_v38 = vmax.f32 %v17648_v13, %v1473_v26  ;;  %v1584_v50 = vmax.f32 %v17650_v11, %v1472_v61  ;;  %v1178_v52 = vadd.f32 %v1177_v28, %v14349_v60  ;;  %v1351_v46 = vadd.f32 %v1350_v10, %v14357_v63  ;;  %v1356_v5 = vpop.f32.mrf.mxu1  ;;  %v12575_v61 = vld [vmem:[#allocation7 + $0x568] ss:$16 sps:$4 sm:$0xff]   ;;  %v17652_v28 = vld [vmem:[#allocation31_spill] sm:$0xff] }
 0x208   :  { %v1182_v41 = vadd.f32 %v1181_v14, %v14341_v54  ;;  %v1475_v36 = vmax.f32 %v1176_v59, 0.0  ;;  %v1355_v0 = vadd.f32 %v1354_v42, %v14345_v55  ;;  %v15247_v26 = vpack.c.bf16 %v15233_v3, %v15175_v51  ;;  %v1185_v13 = vpop.f32.mrf.mxu0  ;;  %v12581_v11 = vld [vmem:[#allocation7 + $0x548] ss:$16 sps:$4 sm:$0xff]   ;;  %v12592_v59 = vld [vmem:[#allocation7 + $0x58c] ss:$16 sps:$4 sm:$0xff]   ;;  %v17654_v14 = vld [vmem:[#allocation27_spill] sm:$0xff]  ;;  %2905 = vmatpush2.bf16.msra.mxu0 %v12575_v61 }
 0x209   :  { %v15251_v56 = vpack.c.bf16 %v15235_v57, %v15177_v20  ;;  %v1477_v39 = vmax.f32 %v1349_v21, 0.0  ;;  %v1476_v2 = vmax.f32 %v1178_v52, 0.0  ;;  %v1478_v9 = vmax.f32 %v1351_v46, 0.0  ;;  %v1358_v53 = vpop.f32.mrf.mxu1  ;;  %v17656_v21 = vld [vmem:[#allocation32_spill] sm:$0xff]  ;;  %2906 = vmatprep.subr.bf16.mxu0 %v12583_v17  ;;  %3005 = vmatprep.subr.bf16.mxu1 %v12592_v59 }
 0x20a   :  { %v1479_v22 = vmax.f32 %v1182_v41, 0.0  ;;  %v17653_v10 = vmax.f32 %v17652_v28, 0.0  ;;  %v1481_v51 = vmax.f32 %v1355_v0, 0.0  ;;  %2734 = vmatprep.mubr.bf16.mxu0 %v15247_v26  ;;  %v1184_v20 = vadd.f32 %v1183_v16, %v14349_v60  ;;  %v12595_v59 = vld [vmem:[#allocation7 + $0x50c] ss:$16 sps:$4 sm:$0xff]  }
 0x20b   :  { %17651 = vst [vmem:[#allocation45_spill] sm:$0xff] %v15251_v56  ;;  %11315 = vmatprep.mubr.msk.bf16.mxu1 %vm2660_vm2, %v15251_v56  ;;  %v1357_v29 = vadd.f32 %v1356_v5, %v14357_v63  ;;  %v17655_v15 = vmax.f32 %v17654_v14, 0.0  ;;  %v17657_v52 = vmax.f32 %v17656_v21, 0.0  ;;  %v17658_v41 = vmax.f32 %v14697_v32, 0.0  ;;  %2735 = vmatmul.mubr.bf16.gmra.mxu0 %v15225_v47 }
 0x20c   :  { %v1587_v43 = vmax.f32 %v17653_v10, %v1475_v36  ;;  %v17659_v0 = vmax.f32 %v14701_v34, 0.0  ;;  %v17660_v5 = vmax.f32 %v14705_v25, 0.0  ;;  %v17661_v56 = vmax.f32 %v14709_v7, 0.0  ;;  %2838 = vmatmul.mubr.bf16.gmra.mxu1 %v15229_v23  ;;  %v12590_v25 = vld [vmem:[#allocation7 + $0x588] ss:$16 sps:$4 sm:$0xff]   ;;  %2907 = vmatpush2.bf16.msra.mxu0 %v12581_v11 }
 0x20d   :  { %v1586_v42 = vmax.f32 %v17655_v15, %v1474_v1  ;;  %v1589_v46 = vmax.f32 %v17657_v52, %v1477_v39  ;;  %v1588_v36 = vmax.f32 %v17658_v41, %v1476_v2  ;;  %v1480_v1 = vmax.f32 %v1184_v20, 0.0  ;;  %v1187_v39 = vpop.f32.mrf.mxu0  ;;  %v1360_v15 = vpop.f32.mrf.mxu1  ;;  %v17668_v41 = vld [vmem:[#allocation64_spill] sm:$0xff]  ;;  %3006 = vmatpush1.bf16.msra.mxu1 %v12590_v25 }
 0x20e   :  { %v1590_v28 = vmax.f32 %v17659_v0, %v1478_v9  ;;  %v15269_v16 = vmax.f32 %v1583_v35, %v1587_v43  ;;  %v1591_v10 = vmax.f32 %v17660_v5, %v1479_v22  ;;  %v1593_v14 = vmax.f32 %v17661_v56, %v1481_v51  ;;  %v12589_v9 = vld [vmem:[#allocation7 + $0x52c] ss:$16 sps:$4 sm:$0xff]   ;;  %v17670_v5 = vld [vmem:[#allocation65_spill] sm:$0xff] }
 0x20f   :  { %v1673_v32 = vmax.f32 %v1585_v38, %v1589_v46  ;;  %v15276_v2 = vmax.f32 %v1584_v50, %v1588_v36  ;;  %v1186_v35 = vadd.f32 %v1185_v13, %v14341_v54  ;;  %v12598_v22 = vld [vmem:[#allocation7 + $0x6ec] ss:$16 sps:$4 sm:$0xff]   ;;  %v1482_v20 = vmax.f32 %v1357_v29, 0.0  ;;  %v1191_v50 = vpop.f32.mrf.mxu0  ;;  %v1364_v61 = vpop.f32.mrf.mxu1  ;;  %2908 = vmatprep.subr.bf16.mxu0 %v12589_v9 }
 0x210   :  { %v15278_v34 = vmax.f32 %v1586_v42, %v1590_v28  ;;  %v15283_v7 = vpack.c.bf16 %v15269_v16, %v15211_v8  ;;  %v17663_v56 = vld [vmem:[#allocation62_spill] sm:$0xff]  ;;  %v1359_v38 = vadd.f32 %v1358_v53, %v14345_v55  ;;  %v1188_v53 = vadd.f32 %v1187_v39, %v14349_v60  ;;  %3015 = vmatprep.subr.bf16.mxu1 %v12598_v22 }
 0x211   :  { %v17664_v43 = vmax.f32 %v17663_v56, 0.0  ;;  %v12587_v42 = vld [vmem:[#allocation7 + $0x528] ss:$16 sps:$4 sm:$0xff]   ;;  %v15289_v13 = vpack.c.bf16 %v1673_v32, %v15213_v31  ;;  %v15293_v17 = vpack.c.bf16 %v15276_v2, %v15233_v3  ;;  %v1483_v21 = vmax.f32 %v1186_v35, 0.0  ;;  %v1193_v46 = vpop.f32.mrf.mxu0  ;;  %v1366_v31 = vpop.f32.mrf.mxu1  ;;  %v12604_v9 = vld [vmem:[#allocation7 + $0x6cc] ss:$16 sps:$4 sm:$0xff]  }
 0x212   :  { %17662 = vst [vmem:[#allocation46_spill] sm:$0xff] %v15283_v7  ;;  %v15297_v8 = vpack.c.bf16 %v15278_v34, %v15235_v57  ;;  %v1485_v29 = vmax.f32 %v1359_v38, 0.0  ;;  %v1361_v52 = vadd.f32 %v1360_v15, %v14357_v63  ;;  %v1192_v44 = vadd.f32 %v1191_v50, %v14341_v54  ;;  %v12596_v38 = vld [vmem:[#allocation7 + $0x6e8] ss:$16 sps:$4 sm:$0xff]   ;;  %v17672_v50 = vld [vmem:[#allocation63_spill] sm:$0xff]  ;;  %2909 = vmatpush2.bf16.msra.mxu0 %v12587_v42 }
 0x213   :  { %v1592_v51 = vmax.f32 %v17664_v43, %v1480_v1  ;;  %17665 = vst [vmem:[#allocation47_spill] sm:$0xff] %v15289_v13  ;;  %17666 = vst [vmem:[#allocation49_spill] sm:$0xff] %v15293_v17  ;;  %v17669_v36 = vmax.f32 %v17668_v41, 0.0  ;;  %v1365_v0 = vadd.f32 %v1364_v61, %v14345_v55  ;;  %v1194_v57 = vadd.f32 %v1193_v46, %v14349_v60  ;;  %v1195_v43 = vpop.f32.mrf.mxu0  ;;  %v1368_v11 = vpop.f32.mrf.mxu1  ;;  %v17692_v13 = vld [vmem:[#allocation73_spill] sm:$0xff] }
 0x214   :  { %17667 = vst [vmem:[#allocation50_spill] sm:$0xff] %v15297_v8  ;;  %v15307_v28 = vadd.f32 %v1366_v31, %v14357_v63  ;;  %v17671_v1 = vmax.f32 %v17670_v5, 0.0  ;;  %v1484_v15 = vmax.f32 %v1188_v53, 0.0  ;;  %v1486_v35 = vmax.f32 %v1361_v52, 0.0  ;;  %2910 = vmatprep.subr.bf16.mxu0 %v12595_v59  ;;  %3016 = vmatpush2.bf16.msra.mxu1 %v12596_v38 }
 0x215   :  { %v1595_v3 = vmax.f32 %v17669_v36, %v1483_v21  ;;  %v1487_v56 = vmax.f32 %v1192_v44, 0.0  ;;  %v17673_v21 = vmax.f32 %v17672_v50, 0.0  ;;  %v1489_v46 = vmax.f32 %v1365_v0, 0.0  ;;  %v12593_v36 = vld [vmem:[#allocation7 + $0x508] ss:$16 sps:$4 sm:$0xff]   ;;  %v17676_v44 = vld [vmem:[#allocation67_spill] sm:$0xff]  ;;  %v1197_v17 = vpop.f32.mrf.mxu0  ;;  %v1370_v50 = vpop.f32.mrf.mxu1  ;;  %3017 = vmatprep.subr.bf16.mxu1 %v12604_v9 }
 0x216   :  { %v1597_v39 = vmax.f32 %v17671_v1, %v1485_v29  ;;  %v1488_v31 = vmax.f32 %v1194_v57, 0.0  ;;  %v17674_v29 = vld [vmem:[#allocation66_spill] sm:$0xff]  ;;  %v17677_v5 = vmax.f32 %v17676_v44, 0.0  ;;  %v1490_v25 = vmax.f32 %v15307_v28, 0.0  ;;  %2911 = vmatpush2.bf16.msra.mxu0 %v12593_v36 }
 0x217   :  { %v1594_v61 = vmax.f32 %v17673_v21, %v1482_v20  ;;  %v15313_v41 = vmax.f32 %v1591_v10, %v1595_v3  ;;  %v17675_v53 = vmax.f32 %v17674_v29, 0.0  ;;  %v17678_v20 = vld [vmem:[#allocation68_spill] sm:$0xff]  ;;  %v1201_v29 = vpop.f32.mrf.mxu0  ;;  %v17693_v8 = vmax.f32 %v17692_v13, 0.0 }
 0x218   :  { %v15315_v7 = vmax.f32 %v1593_v14, %v1597_v39  ;;  %v1598_v1 = vmax.f32 %v17677_v5, %v1486_v35  ;;  %v17679_v22 = vmax.f32 %v17678_v20, 0.0  ;;  %v17680_v14 = vld [vmem:[#allocation69_spill] sm:$0xff]  ;;  %v17682_v39 = vmax.f32 %v14761_v48, 0.0  ;;  %v12601_v35 = vld [vmem:[#allocation7 + $0x4ec] ss:$16 sps:$4 sm:$0xff]  }
 0x219   :  { %v1596_v52 = vmax.f32 %v17675_v53, %v1484_v15  ;;  %v15324_v10 = vpack.c.bf16 %v15313_v41, %v15269_v16  ;;  %v17681_v0 = vmax.f32 %v17680_v14, 0.0  ;;  %v1196_v16 = vadd.f32 %v1195_v43, %v14341_v54  ;;  %v1374_v53 = vpop.f32.mrf.mxu1  ;;  %v1203_v38 = vpop.f32.mrf.mxu0  ;;  %2912 = vmatprep.subr.bf16.mxu0 %v12601_v35 }
 0x21a   :  { %v1599_v3 = vmax.f32 %v17679_v22, %v1487_v56  ;;  %v1600_v15 = vmax.f32 %v17682_v39, %v1488_v31  ;;  %v15333_v28 = vpack.c.bf16 %v15315_v7, %v1673_v32  ;;  %v15337_v42 = vmax.f32 %v1594_v61, %v1598_v1  ;;  %v12602_v31 = vld [vmem:[#allocation7 + $0x6c8] ss:$16 sps:$4 sm:$0xff]   ;;  %v12607_v1 = vld [vmem:[#allocation7 + $0x4cc] ss:$16 sps:$4 sm:$0xff]  }
 0x21b   :  { %v1601_v57 = vmax.f32 %v17681_v0, %v1489_v46  ;;  %v15335_v21 = vmax.f32 %v1592_v51, %v1596_v52  ;;  %v1369_v56 = vadd.f32 %v1368_v11, %v14345_v55  ;;  %v1198_v46 = vadd.f32 %v1197_v17, %v14349_v60  ;;  %v1376_v11 = vpop.f32.mrf.mxu1  ;;  %v12599_v17 = vld [vmem:[#allocation7 + $0x4e8] ss:$16 sps:$4 sm:$0xff]   ;;  %v1205_v22 = vpop.f32.mrf.mxu0  ;;  %v12610_v39 = vld [vmem:[#allocation7 + $0x6ac] ss:$16 sps:$4 sm:$0xff]   ;;  %3018 = vmatpush2.bf16.msra.mxu1 %v12602_v31 }
 0x21c   :  { %v1371_v48 = vadd.f32 %v1370_v50, %v14357_v63  ;;  %v1202_v59 = vadd.f32 %v1201_v29, %v14341_v54  ;;  %v1491_v32 = vmax.f32 %v1196_v16, 0.0  ;;  %v1375_v51 = vadd.f32 %v1374_v53, %v14345_v55  ;;  %v12605_v0 = vld [vmem:[#allocation7 + $0x4c8] ss:$16 sps:$4 sm:$0xff]   ;;  %2913 = vmatpush2.bf16.msra.mxu0 %v12599_v17  ;;  %3019 = vmatprep.subr.bf16.mxu1 %v12610_v39 }
 0x21d   :  { %v15347_v61 = vpack.c.bf16 %v15335_v21, %v15276_v2  ;;  %v15351_v43 = vpack.c.bf16 %v15337_v42, %v15278_v34  ;;  %v1493_v52 = vmax.f32 %v1369_v56, 0.0  ;;  %v1492_v44 = vmax.f32 %v1198_v46, 0.0  ;;  %v1378_v14 = vpop.f32.mrf.mxu1  ;;  %v17686_v53 = vld [vmem:[#allocation70_spill] sm:$0xff]  ;;  %2914 = vmatprep.subr.bf16.mxu0 %v12607_v1 }
 0x21e   :  { %v1494_v5 = vmax.f32 %v1371_v48, 0.0  ;;  %v1495_v9 = vmax.f32 %v1202_v59, 0.0  ;;  %v17683_v50 = vmax.f32 %v14769_v19, 0.0  ;;  %v1497_v2 = vmax.f32 %v1375_v51, 0.0  ;;  %v17688_v48 = vld [vmem:[#allocation71_spill] sm:$0xff] }
 0x21f   :  { %2744 = vmatprep.mubr.bf16.mxu0 %v15347_v61  ;;  %11316 = vmatprep.mubr.msk.bf16.mxu1 %vm2660_vm2, %v15351_v43  ;;  %v1204_v34 = vadd.f32 %v1203_v38, %v14349_v60  ;;  %v15360_v36 = vadd.f32 %v1376_v11, %v14357_v63  ;;  %v17684_v35 = vmax.f32 %v14765_v58, 0.0  ;;  %v17685_v19 = vmax.f32 %v14773_v40, 0.0  ;;  %v17690_v38 = vld [vmem:[#allocation72_spill] sm:$0xff]  ;;  %v1207_v40 = vpop.f32.mrf.mxu0 }
 0x220   :  { %v1603_v20 = vmax.f32 %v17683_v50, %v1491_v32  ;;  %v17687_v56 = vmax.f32 %v17686_v53, 0.0  ;;  %v17689_v59 = vmax.f32 %v17688_v48, 0.0  ;;  %2745 = vmatmul.mubr.bf16.gmra.mxu0 %v15324_v10  ;;  %v17691_v11 = vmax.f32 %v17690_v38, 0.0  ;;  %2848 = vmatmul.mubr.bf16.gmra.mxu1 %v15333_v28  ;;  %v12614_v48 = vld [vmem:[#allocation7 + $0x688] ss:$16 sps:$4 sm:$0xff]  }
 0x221   :  { %v1602_v16 = vmax.f32 %v17684_v35, %v1490_v25  ;;  %v1605_v29 = vmax.f32 %v17685_v19, %v1493_v52  ;;  %v1609_v58 = vmax.f32 %v17693_v8, %v1497_v2  ;;  %v1496_v25 = vmax.f32 %v1204_v34, 0.0  ;;  %v1380_v52 = vpop.f32.mrf.mxu1  ;;  %v12613_v19 = vld [vmem:[#allocation7 + $0x4ac] ss:$16 sps:$4 sm:$0xff]   ;;  %2915 = vmatpush2.bf16.msra.mxu0 %v12605_v0 }
 0x222   :  { %v1604_v46 = vmax.f32 %v17687_v56, %v1492_v44  ;;  %v1606_v32 = vmax.f32 %v17689_v59, %v1494_v5  ;;  %v15371_v51 = vmax.f32 %v1599_v3, %v1603_v20  ;;  %v1607_v50 = vmax.f32 %v17691_v11, %v1495_v9  ;;  %v12608_v20 = vld [vmem:[#allocation7 + $0x6a8] ss:$16 sps:$4 sm:$0xff]   ;;  %v12616_v9 = vld [vmem:[#allocation7 + $0x68c] ss:$16 sps:$4 sm:$0xff]   ;;  %2916 = vmatprep.subr.bf16.mxu0 %v12613_v19  ;;  %v17704_v19 = vld [vmem:[#allocation75_spill] sm:$0xff] }
 0x223   :  { %v1681_v44 = vmax.f32 %v1601_v57, %v1605_v29  ;;  %v1206_v3 = vadd.f32 %v1205_v22, %v14341_v54  ;;  %v17695_v8 = vld [vmem:[#allocation74_spill] sm:$0xff]  ;;  %v1498_v17 = vmax.f32 %v15360_v36, 0.0  ;;  %v1379_v57 = vadd.f32 %v1378_v14, %v14345_v55  ;;  %3020 = vmatpush2.bf16.msra.mxu1 %v12608_v20 }
 0x224   :  { %v15378_v35 = vmax.f32 %v1600_v15, %v1604_v46  ;;  %v15380_v5 = vmax.f32 %v1602_v16, %v1606_v32  ;;  %v15385_v13 = vpack.c.bf16 %v15371_v51, %v15313_v41  ;;  %v17696_v2 = vmax.f32 %v17695_v8, 0.0  ;;  %v1211_v15 = vpop.f32.mrf.mxu0  ;;  %v1384_v16 = vpop.f32.mrf.mxu1  ;;  %v12611_v46 = vld [vmem:[#allocation7 + $0x4a8] ss:$16 sps:$4 sm:$0xff]   ;;  %v12619_v11 = vld [vmem:[#allocation7 + $0x48c] ss:$16 sps:$4 sm:$0xff]   ;;  %3021 = vmatprep.subr.bf16.mxu1 %v12616_v9 }
 0x225   :  { %v15392_v22 = vpack.c.bf16 %v1681_v44, %v15315_v7  ;;  %v1499_v29 = vmax.f32 %v1206_v3, 0.0  ;;  %v1501_v53 = vmax.f32 %v1379_v57, 0.0  ;;  %v1208_v36 = vadd.f32 %v1207_v40, %v14349_v60  ;;  %2917 = vmatpush2.bf16.msra.mxu0 %v12611_v46 }
 0x226   :  { %17694 = vst [vmem:[#allocation48_spill] sm:$0xff] %v15385_v13  ;;  %v1608_v34 = vmax.f32 %v17696_v2, %v1496_v25  ;;  %v15396_v31 = vpack.c.bf16 %v15378_v35, %v15335_v21  ;;  %v15400_v41 = vpack.c.bf16 %v15380_v5, %v15337_v42  ;;  %v1381_v14 = vadd.f32 %v1380_v52, %v14357_v63  ;;  %v1213_v56 = vpop.f32.mrf.mxu0  ;;  %v1386_v7 = vpop.f32.mrf.mxu1  ;;  %v17700_v21 = vld [vmem:[#allocation76_spill] sm:$0xff]  ;;  %v17702_v25 = vld [vmem:[#allocation77_spill] sm:$0xff] }
 0x227   :  { %17697 = vst [vmem:[#allocation51_spill] sm:$0xff] %v15392_v22  ;;  %v1212_v1 = vadd.f32 %v1211_v15, %v14341_v54  ;;  %v17701_v59 = vmax.f32 %v17700_v21, 0.0  ;;  %v1385_v42 = vadd.f32 %v1384_v16, %v14345_v55  ;;  %v1214_v38 = vadd.f32 %v1213_v56, %v14349_v60  ;;  %v12617_v15 = vld [vmem:[#allocation7 + $0x488] ss:$16 sps:$4 sm:$0xff]   ;;  %2918 = vmatprep.subr.bf16.mxu0 %v12619_v11 }
 0x228   :  { %17698 = vst [vmem:[#allocation52_spill] sm:$0xff] %v15396_v31  ;;  %17699 = vst [vmem:[#allocation53_spill] sm:$0xff] %v15400_v41  ;;  %v15410_v39 = vadd.f32 %v1386_v7, %v14357_v63  ;;  %v17703_v40 = vmax.f32 %v17702_v25, 0.0  ;;  %v1500_v3 = vmax.f32 %v1208_v36, 0.0  ;;  %v1502_v8 = vmax.f32 %v1381_v14, 0.0  ;;  %v1215_v2 = vpop.f32.mrf.mxu0  ;;  %v1388_v57 = vpop.f32.mrf.mxu1  ;;  %3022 = vmatpush2.bf16.msra.mxu1 %v12614_v48 }
 0x229   :  { %v1611_v32 = vmax.f32 %v17701_v59, %v1499_v29  ;;  %v1503_v0 = vmax.f32 %v1212_v1, 0.0  ;;  %v12622_v29 = vld [vmem:[#allocation7 + $0xe4] ss:$16 sps:$4 sm:$0xff]   ;;  %v1505_v16 = vmax.f32 %v1385_v42, 0.0  ;;  %v1504_v56 = vmax.f32 %v1214_v38, 0.0  ;;  %v17710_v42 = vld [vmem:[#allocation78_spill] sm:$0xff]  ;;  %2919 = vmatpush2.bf16.msra.mxu0 %v12617_v15 }
 0x22a   :  { %v1613_v52 = vmax.f32 %v17703_v40, %v1501_v53  ;;  %v1506_v7 = vmax.f32 %v15410_v39, 0.0  ;;  %v17705_v59 = vmax.f32 %v17704_v19, 0.0  ;;  %v17706_v53 = vmax.f32 %v14821_v27, 0.0  ;;  %v1217_v1 = vpop.f32.mrf.mxu0  ;;  %v1390_v40 = vpop.f32.mrf.mxu1  ;;  %v12625_v39 = vld [vmem:[#allocation7 + $0x2e4] ss:$16 sps:$4 sm:$0xff]   ;;  %3675 = vmatprep.subr.bf16.mxu1 %v12622_v29 }
 0x22b   :  { %v15414_v21 = vmax.f32 %v1607_v50, %v1611_v32  ;;  %v17707_v14 = vmax.f32 %v14825_v45, 0.0  ;;  %v17709_v9 = vmax.f32 %v14829_v30, 0.0  ;;  %v17712_v38 = vmax.f32 %v14837_v4, 0.0  ;;  %3778 = vmatprep.subr.bf16.mxu0 %v12625_v39 }
 0x22c   :  { %v1610_v13 = vmax.f32 %v17705_v59, %v1498_v17  ;;  %v15419_v25 = vmax.f32 %v1609_v58, %v1613_v52  ;;  %v1612_v36 = vmax.f32 %v17706_v53, %v1500_v3  ;;  %v17711_v17 = vmax.f32 %v17710_v42, 0.0 }
 0x22d   :  { %v1614_v20 = vmax.f32 %v17707_v14, %v1502_v8  ;;  %v15427_v50 = vpack.c.bf16 %v15414_v21, %v15371_v51  ;;  %v1615_v32 = vmax.f32 %v17709_v9, %v1503_v0  ;;  %v1616_v27 = vmax.f32 %v17712_v38, %v1504_v56  ;;  %v1221_v51 = vpop.f32.mrf.mxu0  ;;  %v1394_v8 = vpop.f32.mrf.mxu1  ;;  %v17716_v9 = vld [vmem:[#allocation80_spill] sm:$0xff] }
 0x22e   :  { %v1617_v58 = vmax.f32 %v17711_v17, %v1505_v16  ;;  %v15436_v45 = vpack.c.bf16 %v15419_v25, %v1681_v44  ;;  %v1684_v52 = vmax.f32 %v1608_v34, %v1612_v36  ;;  %v1216_v3 = vadd.f32 %v1215_v2, %v14341_v54 }
 0x22f   :  { %17708 = vst [vmem:[#allocation54_spill] sm:$0xff] %v15427_v50  ;;  %v1686_v46 = vmax.f32 %v1610_v13, %v1614_v20  ;;  %v1389_v30 = vadd.f32 %v1388_v57, %v14345_v55  ;;  %v1218_v0 = vadd.f32 %v1217_v1, %v14349_v60  ;;  %v1391_v16 = vadd.f32 %v1390_v40, %v14357_v63  ;;  %v1223_v2 = vpop.f32.mrf.mxu0  ;;  %v1396_v48 = vpop.f32.mrf.mxu1  ;;  %v17714_v20 = vld [vmem:[#allocation79_spill] sm:$0xff] }
 0x230   :  { %v1222_v4 = vadd.f32 %v1221_v51, %v14341_v54  ;;  %v1507_v11 = vmax.f32 %v1216_v3, 0.0  ;;  %v1395_v44 = vadd.f32 %v1394_v8, %v14345_v55  ;;  %v15445_v34 = vpack.c.bf16 %v1684_v52, %v15378_v35  ;;  %v17720_v3 = vld [vmem:[#allocation82_spill] sm:$0xff] }
 0x231   :  { %v15448_v13 = vpack.c.bf16 %v1686_v46, %v15380_v5  ;;  %v1509_v57 = vmax.f32 %v1389_v30, 0.0  ;;  %v1508_v56 = vmax.f32 %v1218_v0, 0.0  ;;  %v1510_v19 = vmax.f32 %v1391_v16, 0.0  ;;  %v1225_v14 = vpop.f32.mrf.mxu0  ;;  %v1398_v15 = vpop.f32.mrf.mxu1  ;;  %v17722_v16 = vld [vmem:[#allocation83_spill] sm:$0xff] }
 0x232   :  { %v1511_v59 = vmax.f32 %v1222_v4, 0.0  ;;  %v17713_v53 = vmax.f32 %v14844_v37, 0.0  ;;  %v1513_v36 = vmax.f32 %v1395_v44, 0.0  ;;  %2754 = vmatprep.mubr.bf16.mxu0 %v15445_v34  ;;  %v1224_v35 = vadd.f32 %v1223_v2, %v14349_v60  ;;  %v17718_v37 = vld [vmem:[#allocation81_spill] sm:$0xff]  ;;  %v17724_v44 = vld [vmem:[#allocation84_spill] sm:$0xff] }
 0x233   :  { %11317 = vmatprep.mubr.msk.bf16.mxu1 %vm2660_vm2, %v15448_v13  ;;  %v1397_v5 = vadd.f32 %v1396_v48, %v14357_v63  ;;  %v17715_v1 = vmax.f32 %v17714_v20, 0.0  ;;  %v17717_v42 = vmax.f32 %v17716_v9, 0.0  ;;  %v17719_v38 = vmax.f32 %v17718_v37, 0.0  ;;  %2755 = vmatmul.mubr.bf16.gmra.mxu0 %v15427_v50  ;;  %v1227_v48 = vpop.f32.mrf.mxu0 }
 0x234   :  { %v1619_v29 = vmax.f32 %v17713_v53, %v1507_v11  ;;  %v17721_v51 = vmax.f32 %v17720_v3, 0.0  ;;  %v17723_v4 = vmax.f32 %v17722_v16, 0.0  ;;  %v17725_v2 = vmax.f32 %v17724_v44, 0.0  ;;  %2858 = vmatmul.mubr.bf16.gmra.mxu1 %v15436_v45 }
 0x235   :  { %v1618_v40 = vmax.f32 %v17715_v1, %v1506_v7  ;;  %v1621_v17 = vmax.f32 %v17717_v42, %v1509_v57  ;;  %v1620_v39 = vmax.f32 %v17719_v38, %v1508_v56  ;;  %v1400_v57 = vpop.f32.mrf.mxu1  ;;  %v1512_v9 = vmax.f32 %v1224_v35, 0.0 }
 0x236   :  { %v1622_v8 = vmax.f32 %v17721_v51, %v1510_v19  ;;  %v1687_v0 = vmax.f32 %v1615_v32, %v1619_v29  ;;  %v1623_v11 = vmax.f32 %v17723_v4, %v1511_v59  ;;  %v1625_v7 = vmax.f32 %v17725_v2, %v1513_v36  ;;  %v1231_v59 = vpop.f32.mrf.mxu0 }
 0x237   :  { %v1689_v53 = vmax.f32 %v1617_v58, %v1621_v17  ;;  %v1688_v56 = vmax.f32 %v1616_v27, %v1620_v39  ;;  %v1226_v19 = vadd.f32 %v1225_v14, %v14341_v54  ;;  %v1514_v32 = vmax.f32 %v1397_v5, 0.0  ;;  %v1404_v42 = vpop.f32.mrf.mxu1  ;;  %v17731_v39 = vld [vmem:[#allocation87_spill] sm:$0xff] }
 0x238   :  { %v1690_v20 = vmax.f32 %v1618_v40, %v1622_v8  ;;  %v15474_v1 = vpack.c.bf16 %v1687_v0, %v15414_v21  ;;  %v1399_v29 = vadd.f32 %v1398_v15, %v14345_v55  ;;  %v1228_v14 = vadd.f32 %v1227_v48, %v14349_v60  ;;  %v1233_v5 = vpop.f32.mrf.mxu0  ;;  %v17733_v48 = vld [vmem:[#allocation98_spill] sm:$0xff] }
 0x239   :  { %v15478_v36 = vpack.c.bf16 %v1689_v53, %v15419_v25  ;;  %v15480_v37 = vpack.c.bf16 %v1688_v56, %v1684_v52  ;;  %v1515_v58 = vmax.f32 %v1226_v19, 0.0  ;;  %v1401_v21 = vadd.f32 %v1400_v57, %v14357_v63  ;;  %v1406_v40 = vpop.f32.mrf.mxu1 }
 0x23a   :  { %17726 = vst [vmem:[#allocation56_spill] sm:$0xff] %v15474_v1  ;;  %v15482_v38 = vpack.c.bf16 %v1690_v20, %v1686_v46  ;;  %v1517_v27 = vmax.f32 %v1399_v29, 0.0  ;;  %v1232_v35 = vadd.f32 %v1231_v59, %v14341_v54  ;;  %v17730_v15 = vmax.f32 %v14880_v62, 0.0  ;;  %v1235_v44 = vpop.f32.mrf.mxu0  ;;  %v17734_v62 = vld [vmem:[#allocation85_spill] sm:$0xff] }
 0x23b   :  { %17727 = vst [vmem:[#allocation57_spill] sm:$0xff] %v15478_v36  ;;  %17728 = vst [vmem:[#allocation55_spill] sm:$0xff] %v15480_v37  ;;  %v1405_v25 = vadd.f32 %v1404_v42, %v14345_v55  ;;  %v1234_v52 = vadd.f32 %v1233_v5, %v14349_v60  ;;  %v1407_v46 = vadd.f32 %v1406_v40, %v14357_v63  ;;  %v17732_v3 = vmax.f32 %v17731_v39, 0.0  ;;  %v1408_v2 = vpop.f32.mrf.mxu1  ;;  %v17738_v39 = vld [vmem:[#allocation88_spill] sm:$0xff] }
 0x23c   :  { %17729 = vst [vmem:[#allocation58_spill] sm:$0xff] %v15482_v38  ;;  %v1627_v17 = vmax.f32 %v17730_v15, %v1515_v58  ;;  %v1516_v8 = vmax.f32 %v1228_v14, 0.0  ;;  %v1518_v16 = vmax.f32 %v1401_v21, 0.0  ;;  %v1519_v4 = vmax.f32 %v1232_v35, 0.0  ;;  %v17736_v58 = vld [vmem:[#allocation86_spill] sm:$0xff]  ;;  %v17740_v21 = vld [vmem:[#allocation89_spill] sm:$0xff]  ;;  %v1237_v30 = vpop.f32.mrf.mxu0 }
 0x23d   :  { %v1629_v51 = vmax.f32 %v17732_v3, %v1517_v27  ;;  %v15496_v57 = vadd.f32 %v17733_v48, %v14349_v60  ;;  %v17735_v19 = vmax.f32 %v17734_v62, 0.0  ;;  %v1521_v42 = vmax.f32 %v1405_v25, 0.0  ;;  %v1410_v1 = vpop.f32.mrf.mxu1  ;;  %v17743_v48 = vld [vmem:[#allocation90_spill] sm:$0xff] }
 0x23e   :  { %v1691_v59 = vmax.f32 %v1623_v11, %v1627_v17  ;;  %v17737_v5 = vmax.f32 %v17736_v58, 0.0  ;;  %v17739_v27 = vmax.f32 %v17738_v39, 0.0  ;;  %v17741_v35 = vmax.f32 %v17740_v21, 0.0 }
 0x23f   :  { %v1624_v29 = vmax.f32 %v17735_v19, %v1512_v9  ;;  %v1693_v15 = vmax.f32 %v1625_v7, %v1629_v51  ;;  %v17744_v36 = vmax.f32 %v17743_v48, 0.0  ;;  %v1520_v9 = vmax.f32 %v1234_v52, 0.0  ;;  %v1241_v51 = vpop.f32.mrf.mxu0  ;;  %v17746_v19 = vld [vmem:[#allocation91_spill] sm:$0xff] }
 0x240   :  { %v1626_v40 = vmax.f32 %v17737_v5, %v1514_v32  ;;  %v1628_v14 = vmax.f32 %v17739_v27, %v1516_v8  ;;  %v1630_v3 = vmax.f32 %v17741_v35, %v1518_v16  ;;  %v15506_v37 = vpack.c.bf16 %v1691_v59, %v1687_v0  ;;  %v1414_v8 = vpop.f32.mrf.mxu1 }
 0x241   :  { %v1631_v62 = vmax.f32 %v17744_v36, %v1519_v4  ;;  %v1522_v11 = vmax.f32 %v1407_v46, 0.0  ;;  %v15510_v17 = vpack.c.bf16 %v1693_v15, %v1689_v53  ;;  %v1236_v7 = vadd.f32 %v1235_v44, %v14341_v54  ;;  %v1243_v4 = vpop.f32.mrf.mxu0 }
 0x242   :  { %17742 = vst [vmem:[#allocation59_spill] sm:$0xff] %v15506_v37  ;;  %v1692_v25 = vmax.f32 %v1624_v29, %v1628_v14  ;;  %v1694_v32 = vmax.f32 %v1626_v40, %v1630_v3  ;;  %v17747_v58 = vmax.f32 %v17746_v19, 0.0  ;;  %v1409_v5 = vadd.f32 %v1408_v2, %v14345_v55  ;;  %v1416_v44 = vpop.f32.mrf.mxu1  ;;  %v17750_v29 = vld [vmem:[#allocation92_spill] sm:$0xff]  ;;  %v17756_v19 = vld [vmem:[#allocation95_spill] sm:$0xff] }
 0x243   :  { %17745 = vst [vmem:[#allocation60_spill] sm:$0xff] %v15510_v17  ;;  %v1238_v0 = vadd.f32 %v1237_v30, %v14349_v60  ;;  %v1411_v39 = vadd.f32 %v1410_v1, %v14357_v63  ;;  %v1523_v36 = vmax.f32 %v1236_v7, 0.0  ;;  %v1242_v52 = vadd.f32 %v1241_v51, %v14341_v54  ;;  %v17752_v30 = vld [vmem:[#allocation94_spill] sm:$0xff] }
 0x244   :  { %v1633_v16 = vmax.f32 %v17747_v58, %v1521_v42  ;;  %v15519_v53 = vpack.c.bf16 %v1692_v25, %v1688_v56  ;;  %v15521_v46 = vpack.c.bf16 %v1694_v32, %v1690_v20  ;;  %v17751_v40 = vmax.f32 %v17750_v29, 0.0  ;;  %v1245_v20 = vpop.f32.mrf.mxu0  ;;  %v1418_v48 = vpop.f32.mrf.mxu1 }
 0x245   :  { %v1525_v14 = vmax.f32 %v1409_v5, 0.0  ;;  %v1524_v42 = vmax.f32 %v1238_v0, 0.0  ;;  %v1526_v21 = vmax.f32 %v1411_v39, 0.0  ;;  %v953_v2 = vmax.f32 %v15118_v18, 0.0  ;;  %v17758_v5 = vld [vmem:[#allocation96_spill] sm:$0xff] }
 0x246   :  { %17748 = vst [vmem:[#allocation61_spill] sm:$0xff] %v15519_v53  ;;  %17749 = vst [vmem:[#allocation26_spill] sm:$0xff] %v15521_v46  ;;  %v1632_v27 = vmax.f32 %v17751_v40, %v1520_v9  ;;  %v17753_v35 = vmax.f32 %v17752_v30, 0.0  ;;  %v1415_v3 = vadd.f32 %v1414_v8, %v14345_v55  ;;  %2764 = vmatprep.mubr.bf16.mxu0 %v15519_v53  ;;  %11318 = vmatprep.mubr.msk.bf16.mxu1 %vm2660_vm2, %v15521_v46  ;;  %v17754_v9 = vld [vmem:[#allocation93_spill] sm:$0xff]  ;;  %v17762_v40 = vld [vmem:[#allocation99_spill] sm:$0xff] }
 0x247   :  { %v1244_v56 = vadd.f32 %v1243_v4, %v14349_v60  ;;  %v17755_v7 = vmax.f32 %v17754_v9, 0.0  ;;  %v17757_v58 = vmax.f32 %v17756_v19, 0.0  ;;  %v17759_v0 = vmax.f32 %v17758_v5, 0.0  ;;  %2765 = vmatmul.mubr.bf16.gmra.mxu0 %v15506_v37  ;;  %2868 = vmatmul.mubr.bf16.gmra.mxu1 %v15510_v17  ;;  %v1420_v19 = vpop.f32.mrf.mxu1 }
 0x248   :  { %v1635_v1 = vmax.f32 %v17753_v35, %v1523_v36  ;;  %v17760_v36 = vld [vmem:[#allocation97_spill] sm:$0xff]  ;;  %v841_v30 = vadd.f32 %v17762_v40, %v14357_v63  ;;  %v1527_v35 = vmax.f32 %v1242_v52, 0.0  ;;  %v1417_v38 = vadd.f32 %v1416_v44, %v14357_v63 }
 0x249   :  { %v1634_v51 = vmax.f32 %v17755_v7, %v1522_v11  ;;  %v1637_v18 = vmax.f32 %v17757_v58, %v1525_v14  ;;  %v1636_v39 = vmax.f32 %v17759_v0, %v1524_v42  ;;  %v17761_v8 = vmax.f32 %v17760_v36, 0.0  ;;  %v1247_v42 = vpop.f32.mrf.mxu0 }
 0x24a   :  { %v1695_v4 = vmax.f32 %v1631_v62, %v1635_v1  ;;  %v1246_v7 = vadd.f32 %v1245_v20, %v14341_v54  ;;  %v1528_v5 = vmax.f32 %v1244_v56, 0.0  ;;  %v1419_v0 = vadd.f32 %v1418_v48, %v14345_v55 }
 0x24b   :  { %v1638_v29 = vmax.f32 %v17761_v8, %v1526_v21  ;;  %v1697_v11 = vmax.f32 %v1633_v16, %v1637_v18  ;;  %v1696_v9 = vmax.f32 %v1632_v27, %v1636_v39  ;;  %v1529_v21 = vmax.f32 %v1415_v3, 0.0  ;;  %v17767_v3 = vld [vmem:[#allocation100_spill] sm:$0xff]  ;;  %v17772_v8 = vld [vmem:[#allocation102_spill] sm:$0xff] }
 0x24c   :  { %v15547_v58 = vpack.c.bf16 %v1695_v4, %v1691_v59  ;;  %v1531_v44 = vmax.f32 %v1246_v7, 0.0  ;;  %v1530_v16 = vmax.f32 %v1417_v38, 0.0  ;;  %v1533_v27 = vmax.f32 %v1419_v0, 0.0 }
 0x24d   :  { %v1698_v14 = vmax.f32 %v1634_v51, %v1638_v29  ;;  %v15550_v36 = vpack.c.bf16 %v1697_v11, %v1693_v15  ;;  %v15552_v62 = vpack.c.bf16 %v1696_v9, %v1692_v25  ;;  %v1248_v1 = vadd.f32 %v1247_v42, %v14349_v60  ;;  %v17770_v25 = vld [vmem:[#allocation101_spill] sm:$0xff] }
 0x24e   :  { %17763 = vst [vmem:[#allocation31_spill] sm:$0xff] %v15547_v58  ;;  %v1421_v54 = vadd.f32 %v1420_v19, %v14357_v63  ;;  %v952_v59 = vmax.f32 %v15496_v57, 0.0  ;;  %v954_v20 = vmax.f32 %v841_v30, 0.0  ;;  %v17768_v56 = vmax.f32 %v17767_v3, 0.0  ;;  %v17775_v63 = vld [vmem:[#allocation103_spill] sm:$0xff] }
 0x24f   :  { %17764 = vst [vmem:[#allocation27_spill] sm:$0xff] %v15550_v36  ;;  %17765 = vst [vmem:[#allocation32_spill] sm:$0xff] %v15552_v62  ;;  %v15554_v52 = vpack.c.bf16 %v1698_v14, %v1694_v32  ;;  %v17769_v55 = vmax.f32 %v15114_v33, 0.0  ;;  %v17771_v48 = vmax.f32 %v17770_v25, 0.0  ;;  %v1645_v18 = vmax.f32 %v953_v2, %v1533_v27  ;;  %v17785_v27 = vld [vmem:[#allocation34_spill] sm:$0xff] }
 0x250   :  { %v1639_v51 = vmax.f32 %v17768_v56, %v1527_v35  ;;  %v1532_v39 = vmax.f32 %v1248_v1, 0.0  ;;  %v1534_v38 = vmax.f32 %v1421_v54, 0.0  ;;  %v17773_v29 = vmax.f32 %v17772_v8, 0.0  ;;  %v17786_v1 = vld [vmem:[#allocation39_spill] sm:$0xff]  ;;  %v17787_v54 = vld [vmem:[#allocation40_spill] sm:$0xff] }
 0x251   :  { %17766 = vst [vmem:[#allocation62_spill] sm:$0xff] %v15554_v52  ;;  %v1643_v15 = vmax.f32 %v17769_v55, %v1531_v44  ;;  %v1641_v32 = vmax.f32 %v17771_v48, %v1529_v21  ;;  %v17776_v57 = vmax.f32 %v17775_v63, 0.0  ;;  %v12626_v44 = vld [vmem:[#allocation7 + $0xc0] ss:$16 sps:$4 sm:$0xff]   ;;  %v12637_v3 = vld [vmem:[#allocation7 + $0x2a4] ss:$16 sps:$4 sm:$0xff]  }
 0x252   :  { %v1640_v60 = vmax.f32 %v17773_v29, %v1528_v5  ;;  %v1644_v35 = vmax.f32 %v952_v59, %v1532_v39  ;;  %v1646_v42 = vmax.f32 %v954_v20, %v1534_v38  ;;  %v12629_v59 = vld [vmem:[#allocation7 + $0x2c0] ss:$16 sps:$4 sm:$0xff]   ;;  %v12634_v20 = vld [vmem:[#allocation7 + $0xa4] ss:$16 sps:$4 sm:$0xff]  }
 0x253   :  { %v15567_v40 = vmax.f32 %v1639_v51, %v1643_v15  ;;  %v1642_v30 = vmax.f32 %v17776_v57, %v1530_v16  ;;  %v15571_v7 = vmax.f32 %v1641_v32, %v1645_v18  ;;  %v17784_v16 = vld [vmem:[#allocation33_spill] sm:$0xff] }
 0x254   :  { %v15579_v2 = vmax.f32 %v1640_v60, %v1644_v35  ;;  %v12632_v56 = vld [vmem:[#allocation7 + $0xa0] ss:$16 sps:$4 sm:$0xff]   ;;  %v12640_v55 = vld [vmem:[#allocation7 + $0x84] ss:$16 sps:$4 sm:$0xff]  }
 0x255   :  { %17774 = vst [vmem:[#allocation64_spill] sm:$0xff] %v15567_v40  ;;  %17777 = vst [vmem:[#allocation65_spill] sm:$0xff] %v15571_v7  ;;  %v15574_v33 = vpack.c.bf16 %v15567_v40, %v1695_v4  ;;  %v15577_v19 = vpack.c.bf16 %v15571_v7, %v1697_v11  ;;  %v15581_v21 = vmax.f32 %v1642_v30, %v1646_v42  ;;  %v12620_v4 = vld [vmem:[#allocation7 + $0xe0] ss:$16 sps:$4 sm:$0xff]   ;;  %v12643_v15 = vld [vmem:[#allocation7 + $0x284] ss:$16 sps:$4 sm:$0xff]  }
 0x256   :  { %17780 = vst [vmem:[#allocation67_spill] sm:$0xff] %v15579_v2  ;;  %v15584_v5 = vpack.c.bf16 %v15579_v2, %v1696_v9  ;;  %v12623_v11 = vld [vmem:[#allocation7 + $0x2e0] ss:$16 sps:$4 sm:$0xff]   ;;  %v12628_v9 = vld [vmem:[#allocation7 + $0xc4] ss:$16 sps:$4 sm:$0xff]  }
 0x257   :  { %17778 = vst [vmem:[#allocation63_spill] sm:$0xff] %v15574_v33  ;;  %17779 = vst [vmem:[#allocation66_spill] sm:$0xff] %v15577_v19  ;;  %v15587_v0 = vpack.c.bf16 %v15581_v21, %v1698_v14  ;;  %v12631_v14 = vld [vmem:[#allocation7 + $0x2c4] ss:$16 sps:$4 sm:$0xff]   ;;  %v12635_v51 = vld [vmem:[#allocation7 + $0x2a0] ss:$16 sps:$4 sm:$0xff]  }
 0x258   :  { %17781 = vst [vmem:[#allocation68_spill] sm:$0xff] %v15581_v21  ;;  %17782 = vst [vmem:[#allocation69_spill] sm:$0xff] %v15584_v5  ;;  %2774 = vmatprep.mubr.bf16.mxu0 %v15584_v5  ;;  %v12638_v25 = vld [vmem:[#allocation7 + $0x80] ss:$16 sps:$4 sm:$0xff]   ;;  %v12646_v32 = vld [vmem:[#allocation7 + $0x64] ss:$16 sps:$4 sm:$0xff]  }
 0x259   :  { %17783 = vst [vmem:[#allocation70_spill] sm:$0xff] %v15587_v0  ;;  %11319 = vmatprep.mubr.msk.bf16.mxu1 %vm2660_vm2, %v15587_v0  ;;  %2775 = vmatmul.mubr.bf16.gmra.mxu0 %v15574_v33  ;;  %v17788_v48 = vld [vmem:[#allocation45_spill] sm:$0xff] }
 0x25a   :  { %2878 = vmatmul.mubr.bf16.gmra.mxu1 %v15577_v19  ;;  %2920 = vmatprep.mubr.bf16.mxu0 %v15041_v49  ;;  %v12641_v18 = vld [vmem:[#allocation7 + $0x280] ss:$16 sps:$4 sm:$0xff]   ;;  %v12649_v38 = vld [vmem:[#allocation7 + $0x44] ss:$16 sps:$4 sm:$0xff]  }
 0x25b   :  { %11320 = vmatprep.mubr.msk.bf16.mxu1 %vm2660_vm2, %v15045_v12  ;;  %v12644_v39 = vld [vmem:[#allocation7 + $0x60] ss:$16 sps:$4 sm:$0xff]   ;;  %v12652_v29 = vld [vmem:[#allocation7 + $0x264] ss:$16 sps:$4 sm:$0xff]  }
 0x25c   :  { %v12650_v8 = vld [vmem:[#allocation7 + $0x260] ss:$16 sps:$4 sm:$0xff]   ;;  %v12658_v63 = vld [vmem:[#allocation7 + $0x244] ss:$16 sps:$4 sm:$0xff]  }
 0x25d   :  { %v12647_v60 = vld [vmem:[#allocation7 + $0x40] ss:$16 sps:$4 sm:$0xff]   ;;  %v12655_v57 = vld [vmem:[#allocation7 + $0x24] ss:$16 sps:$4 sm:$0xff]  }
 0x25e   :  { %v12653_v30 = vld [vmem:[#allocation7 + $0x20] ss:$16 sps:$4 sm:$0xff]   ;;  %v12661_v42 = vld [vmem:[#allocation7 + $0x4] ss:$16 sps:$4 sm:$0xff]  }
 0x25f   :  { %v12656_v35 = vld [vmem:[#allocation7 + $0x240] ss:$16 sps:$4 sm:$0xff]  }
 0x260   :  { %v17807_v40 = vld [vmem:[#allocation49_spill] sm:$0xff] }
 0x261   :  { %2921 = vmatmul.mubr.bf16.vlgmr.msra.gmra.mxu0 %v17784_v16 }
 0x262   :  { %3024 = vmatmul.mubr.bf16.vlgmr.msra.gmra.mxu1 %v17785_v27  ;;  %2930 = vmatprep.mubr.bf16.mxu0 %v17786_v1 }
 0x263   :  { %3676 = vmatpush1.bf16.msra.mxu1 %v12620_v4  ;;  %11321 = vmatprep.mubr.msk.bf16.mxu1 %vm2660_vm2, %v17787_v54  ;;  %v12664_v4 = vld [vmem:[#allocation7 + $0x224] ss:$16 sps:$4 sm:$0xff]  }
 0x264   :  { %3779 = vmatpush1.bf16.msra.mxu0 %v12623_v11  ;;  %3677 = vmatprep.subr.bf16.mxu1 %v12628_v9  ;;  %v12659_v11 = vld [vmem:[#allocation7] ss:$16 sps:$4 sm:$0xff]  }
 0x265   :  { %3780 = vmatprep.subr.bf16.mxu0 %v12631_v14  ;;  %v12662_v9 = vld [vmem:[#allocation7 + $0x220] ss:$16 sps:$4 sm:$0xff]  }
 0x266   :  { %v12665_v14 = vld [vmem:[#allocation7 + $0x1e0] ss:$16 sps:$4 sm:$0xff]  }
 0x267   :  { %3678 = vmatpush1.bf16.msra.mxu1 %v12626_v44  ;;  %v12667_v44 = vld [vmem:[#allocation7 + $0x1e4] ss:$16 sps:$4 sm:$0xff]  }
 0x268   :  { %3781 = vmatpush1.bf16.msra.mxu0 %v12629_v59  ;;  %3679 = vmatprep.subr.bf16.mxu1 %v12634_v20  ;;  %v12670_v59 = vld [vmem:[#allocation7 + $0x204] ss:$16 sps:$4 sm:$0xff]   ;;  %v12668_v20 = vld [vmem:[#allocation7 + $0x200] ss:$16 sps:$4 sm:$0xff]  }
 0x269   :  { %3782 = vmatprep.subr.bf16.mxu0 %v12637_v3  ;;  %2931 = vmatmul.mubr.bf16.gmra.mxu0 %v15124_v24  ;;  %v12673_v3 = vld [vmem:[#allocation7 + $0x1c4] ss:$16 sps:$4 sm:$0xff]  }
 0x26a   :  { %3034 = vmatmul.mubr.bf16.gmra.mxu1 %v15128_v6  ;;  %2940 = vmatprep.mubr.bf16.mxu0 %v15247_v26 }
 0x26b   :  { %3680 = vmatpush1.bf16.msra.mxu1 %v12632_v56  ;;  %11322 = vmatprep.mubr.msk.bf16.mxu1 %vm2660_vm2, %v17788_v48  ;;  %v12671_v56 = vld [vmem:[#allocation7 + $0x1c0] ss:$16 sps:$4 sm:$0xff]  }
 0x26c   :  { %3681 = vmatprep.subr.bf16.mxu1 %v12640_v55  ;;  %3783 = vmatpush1.bf16.msra.mxu0 %v12635_v51  ;;  %v12676_v51 = vld [vmem:[#allocation7 + $0x364] ss:$16 sps:$4 sm:$0xff]   ;;  %v12674_v55 = vld [vmem:[#allocation7 + $0x360] ss:$16 sps:$4 sm:$0xff]  }
 0x26d   :  { %3784 = vmatprep.subr.bf16.mxu0 %v12643_v15  ;;  %v12679_v15 = vld [vmem:[#allocation7 + $0x1a4] ss:$16 sps:$4 sm:$0xff]  }
 0x26f   :  { %3682 = vmatpush1.bf16.msra.mxu1 %v12638_v25  ;;  %v12682_v25 = vld [vmem:[#allocation7 + $0x344] ss:$16 sps:$4 sm:$0xff]  }
 0x270   :  { %3683 = vmatprep.subr.bf16.mxu1 %v12646_v32  ;;  %3785 = vmatpush1.bf16.msra.mxu0 %v12641_v18  ;;  %v12677_v32 = vld [vmem:[#allocation7 + $0x1a0] ss:$16 sps:$4 sm:$0xff]  }
 0x271   :  { %2941 = vmatmul.mubr.bf16.gmra.mxu0 %v15225_v47  ;;  %3786 = vmatprep.subr.bf16.mxu0 %v12652_v29  ;;  %v12680_v18 = vld [vmem:[#allocation7 + $0x340] ss:$16 sps:$4 sm:$0xff]   ;;  %v12688_v29 = vld [vmem:[#allocation7 + $0x164] ss:$16 sps:$4 sm:$0xff]  }
 0x272   :  { %3044 = vmatmul.mubr.bf16.gmra.mxu1 %v15229_v23  ;;  %2950 = vmatprep.mubr.bf16.mxu0 %v15347_v61 }
 0x273   :  { %3684 = vmatpush1.bf16.msra.mxu1 %v12644_v39  ;;  %11323 = vmatprep.mubr.msk.bf16.mxu1 %vm2660_vm2, %v15351_v43  ;;  %v12685_v39 = vld [vmem:[#allocation7 + $0x184] ss:$16 sps:$4 sm:$0xff]  }
 0x274   :  { %3685 = vmatprep.subr.bf16.mxu1 %v12649_v38  ;;  %3787 = vmatpush1.bf16.msra.mxu0 %v12650_v8  ;;  %v12691_v38 = vld [vmem:[#allocation7 + $0x324] ss:$16 sps:$4 sm:$0xff]   ;;  %v12683_v8 = vld [vmem:[#allocation7 + $0x180] ss:$16 sps:$4 sm:$0xff]  }
 0x275   :  { %3788 = vmatprep.subr.bf16.mxu0 %v12658_v63  ;;  %v12689_v63 = vld [vmem:[#allocation7 + $0x320] ss:$16 sps:$4 sm:$0xff]  }
 0x277   :  { %3686 = vmatpush1.bf16.msra.mxu1 %v12647_v60  ;;  %v12686_v60 = vld [vmem:[#allocation7 + $0x160] ss:$16 sps:$4 sm:$0xff]  }
 0x278   :  { %3687 = vmatprep.subr.bf16.mxu1 %v12655_v57  ;;  %3789 = vmatpush1.bf16.msra.mxu0 %v12656_v35  ;;  %v12694_v57 = vld [vmem:[#allocation7 + $0x144] ss:$16 sps:$4 sm:$0xff]   ;;  %v17390_v35 = vmov 0.0  }
 0x279   :  { %2951 = vmatmul.mubr.bf16.gmra.mxu0 %v15324_v10  ;;  %3790 = vmatprep.subr.bf16.mxu0 %v12664_v4 }
 0x27a   :  { %3054 = vmatmul.mubr.bf16.gmra.mxu1 %v15333_v28  ;;  %2960 = vmatprep.mubr.bf16.mxu0 %v15445_v34 }
 0x27b   :  { %3688 = vmatpush1.bf16.msra.mxu1 %v12653_v30  ;;  %11324 = vmatprep.mubr.msk.bf16.mxu1 %vm2660_vm2, %v15448_v13  ;;  %v12695_v30 = vld [vmem:[#allocation7 + $0x300] ss:$16 sps:$4 sm:$0xff]  }
 0x27c   :  { %3689 = vmatprep.subr.bf16.mxu1 %v12661_v42  ;;  %3791 = vmatpush1.bf16.msra.mxu0 %v12662_v9  ;;  %v17789_v42 = vld [vmem:[#allocation25_spill] sm:$0xff] }
 0x27d   :  { %3792 = vmatprep.subr.bf16.mxu0 %v12670_v59  ;;  %v15629_v4 = vpack.c.bf16 %v17789_v42, %v17390_v35  ;;  %v12697_v9 = vld [vmem:[#allocation7 + $0x304] ss:$16 sps:$4 sm:$0xff]   ;;  %v12716_v42 = vld [vmem:[#allocation7 + $0x88] ss:$16 sps:$4 sm:$0xff]  }
 0x27f   :  { %3690 = vmatpush1.bf16.msra.mxu1 %v12659_v11  ;;  %17790 = vst [vmem:[#allocation71_spill] sm:$0xff] %v15629_v4  ;;  %v12692_v11 = vld [vmem:[#allocation7 + $0x140] ss:$16 sps:$4 sm:$0xff]  }
 0x280   :  { %3691 = vmatprep.subr.bf16.mxu1 %v12667_v44  ;;  %3793 = vmatpush1.bf16.msra.mxu0 %v12668_v20  ;;  %v12703_v44 = vld [vmem:[#allocation7 + $0xec] ss:$16 sps:$4 sm:$0xff]   ;;  %v12700_v20 = vld [vmem:[#allocation7 + $0x124] ss:$16 sps:$4 sm:$0xff]  }
 0x281   :  { %2961 = vmatmul.mubr.bf16.gmra.mxu0 %v15427_v50  ;;  %3802 = vmatprep.subr.bf16.mxu0 %v12676_v51  ;;  %v17793_v51 = vld [vmem:[#allocation30_spill] sm:$0xff] }
 0x282   :  { %3064 = vmatmul.mubr.bf16.gmra.mxu1 %v15436_v45  ;;  %2970 = vmatprep.mubr.bf16.mxu0 %v15519_v53  ;;  %v17815_v53 = vld [vmem:[#allocation55_spill] sm:$0xff] }
 0x283   :  { %3692 = vmatpush2.bf16.msra.mxu1 %v12665_v14  ;;  %11325 = vmatprep.mubr.msk.bf16.mxu1 %vm2660_vm2, %v15521_v46  ;;  %v17791_v14 = vld [vmem:[#allocation28_spill] sm:$0xff] }
 0x284   :  { %3693 = vmatprep.subr.bf16.mxu1 %v12673_v3  ;;  %3803 = vmatpush2.bf16.msra.mxu0 %v12674_v55  ;;  %v15635_v59 = vpack.c.bf16 %v17791_v14, %v17390_v35  ;;  %v12698_v3 = vld [vmem:[#allocation7 + $0x120] ss:$16 sps:$4 sm:$0xff]   ;;  %v15642_v55 = vpack.c.bf16 %v17793_v51, %v17390_v35  ;;  %v17800_v14 = vld [vmem:[#allocation44_spill] sm:$0xff] }
 0x285   :  { %3804 = vmatprep.subr.bf16.mxu0 %v12682_v25  ;;  %v12704_v25 = vld [vmem:[#allocation7 + $0x100] ss:$16 sps:$4 sm:$0xff]   ;;  %v12722_v51 = vld [vmem:[#allocation7 + $0x68] ss:$16 sps:$4 sm:$0xff]  }
 0x286   :  { %17792 = vst [vmem:[#allocation72_spill] sm:$0xff] %v15635_v59  ;;  %17794 = vst [vmem:[#allocation73_spill] sm:$0xff] %v15642_v55  ;;  %v12779_v46 = vld [vmem:[#allocation7 + $0x128] ss:$16 sps:$4 sm:$0xff]  }
 0x287   :  { %3694 = vmatpush2.bf16.msra.mxu1 %v12671_v56  ;;  %v12701_v56 = vld [vmem:[#allocation7 + $0xe8] ss:$16 sps:$4 sm:$0xff]  }
 0x288   :  { %3695 = vmatprep.subr.bf16.mxu1 %v12679_v15  ;;  %3805 = vmatpush2.bf16.msra.mxu0 %v12680_v18  ;;  %v12706_v15 = vld [vmem:[#allocation7 + $0x104] ss:$16 sps:$4 sm:$0xff]   ;;  %v12707_v18 = vld [vmem:[#allocation7 + $0xc8] ss:$16 sps:$4 sm:$0xff]  }
 0x289   :  { %2971 = vmatmul.mubr.bf16.gmra.mxu0 %v15506_v37  ;;  %3806 = vmatprep.subr.bf16.mxu0 %v12691_v38  ;;  %v17795_v38 = vld [vmem:[#allocation38_spill] sm:$0xff] }
 0x28a   :  { %3074 = vmatmul.mubr.bf16.gmra.mxu1 %v15510_v17  ;;  %2980 = vmatprep.mubr.bf16.mxu0 %v15584_v5  ;;  %v12755_v37 = vld [vmem:[#allocation7 + $0x1a8] ss:$16 sps:$4 sm:$0xff]  }
 0x28b   :  { %3696 = vmatpush2.bf16.msra.mxu1 %v12677_v32  ;;  %11326 = vmatprep.mubr.msk.bf16.mxu1 %vm2660_vm2, %v15587_v0  ;;  %v12709_v32 = vld [vmem:[#allocation7 + $0xcc] ss:$16 sps:$4 sm:$0xff]  }
 0x28c   :  { %3697 = vmatprep.subr.bf16.mxu1 %v12685_v39  ;;  %3807 = vmatpush2.bf16.msra.mxu0 %v12689_v63  ;;  %v12712_v39 = vld [vmem:[#allocation7 + $0xac] ss:$16 sps:$4 sm:$0xff]   ;;  %v17796_v63 = vld [vmem:[#allocation29_spill] sm:$0xff] }
 0x28d   :  { %3808 = vmatprep.subr.bf16.mxu0 %v12697_v9  ;;  %v17798_v9 = vld [vmem:[#allocation36_spill] sm:$0xff] }
 0x28e   :  { %v17813_v0 = vld [vmem:[#allocation48_spill] sm:$0xff] }
 0x28f   :  { %3698 = vmatpush2.bf16.msra.mxu1 %v12683_v8  ;;  %v12715_v8 = vld [vmem:[#allocation7 + $0x2ec] ss:$16 sps:$4 sm:$0xff]  }
 0x290   :  { %3699 = vmatprep.subr.bf16.mxu1 %v12688_v29  ;;  %3809 = vmatpush2.bf16.msra.mxu0 %v12695_v30  ;;  %v12710_v29 = vld [vmem:[#allocation7 + $0xa8] ss:$16 sps:$4 sm:$0xff]   ;;  %v12718_v30 = vld [vmem:[#allocation7 + $0x8c] ss:$16 sps:$4 sm:$0xff]  }
 0x291   :  { %2981 = vmatmul.mubr.bf16.gmra.mxu0 %v15574_v33  ;;  %3881 = vmatprep.subr.bf16.mxu0 %v12703_v44  ;;  %v17799_v44 = vld [vmem:[#allocation37_spill] sm:$0xff] }
 0x292   :  { %3084 = vmatmul.mubr.bf16.gmra.mxu1 %v15577_v19  ;;  %11439 = vmatprep.mubr.msk.bf16.mxu0 %vm2660_vm2, %v15635_v59 }
 0x293   :  { %3700 = vmatpush2.bf16.msra.mxu1 %v12686_v60  ;;  %3707 = vmatprep.mubr.bf16.mxu1 %v15629_v4  ;;  %v12713_v60 = vld [vmem:[#allocation7 + $0x2e8] ss:$16 sps:$4 sm:$0xff]  }
 0x294   :  { %3701 = vmatprep.subr.bf16.mxu1 %v12694_v57  ;;  %v15649_v57 = vpack.c.bf16 %v17796_v63, %v17390_v35  ;;  %v12731_v63 = vld [vmem:[#allocation7 + $0x288] ss:$16 sps:$4 sm:$0xff]   ;;  %v12748_v35 = vld [vmem:[#allocation7 + $0x24c] ss:$16 sps:$4 sm:$0xff]  }
 0x296   :  { %17797 = vst [vmem:[#allocation74_spill] sm:$0xff] %v15649_v57 }
 0x297   :  { %3702 = vmatpush2.bf16.msra.mxu1 %v12692_v11  ;;  %v12721_v11 = vld [vmem:[#allocation7 + $0x2cc] ss:$16 sps:$4 sm:$0xff]  }
 0x298   :  { %3703 = vmatprep.subr.bf16.mxu1 %v12700_v20  ;;  %v12719_v20 = vld [vmem:[#allocation7 + $0x2c8] ss:$16 sps:$4 sm:$0xff]  }
 0x299   :  { %3811 = vmatmul.mubr.bf16.vlgmr.msra.gmra.mxu0 %v15642_v55 }
 0x29a   :  { %3882 = vmatpush1.bf16.msra.mxu0 %v12701_v56  ;;  %11440 = vmatprep.mubr.msk.bf16.mxu0 %vm2660_vm2, %v17795_v38  ;;  %v12727_v56 = vld [vmem:[#allocation7 + $0x2ac] ss:$16 sps:$4 sm:$0xff]  }
 0x29b   :  { %3704 = vmatpush2.bf16.msra.mxu1 %v12698_v3  ;;  %3883 = vmatprep.subr.bf16.mxu0 %v12709_v32  ;;  %v12724_v3 = vld [vmem:[#allocation7 + $0x6c] ss:$16 sps:$4 sm:$0xff]  }
 0x29c   :  { %3705 = vmatprep.subr.bf16.mxu1 %v12706_v15  ;;  %v12725_v15 = vld [vmem:[#allocation7 + $0x2a8] ss:$16 sps:$4 sm:$0xff]   ;;  %v12733_v32 = vld [vmem:[#allocation7 + $0x28c] ss:$16 sps:$4 sm:$0xff]  }
 0x29e   :  { %3884 = vmatpush1.bf16.msra.mxu0 %v12707_v18  ;;  %v17801_v18 = vld [vmem:[#allocation35_spill] sm:$0xff] }
 0x29f   :  { %3706 = vmatpush2.bf16.msra.mxu1 %v12704_v25  ;;  %3885 = vmatprep.subr.bf16.mxu0 %v12712_v39  ;;  %v12730_v25 = vld [vmem:[#allocation7 + $0x4c] ss:$16 sps:$4 sm:$0xff]  }
 0x2a0   :  { %3984 = vmatprep.subr.bf16.mxu1 %v12715_v8  ;;  %v17802_v39 = vld [vmem:[#allocation42_spill] sm:$0xff]  ;;  %v17803_v8 = vld [vmem:[#allocation43_spill] sm:$0xff] }
 0x2a1   :  { %3821 = vmatmul.mubr.bf16.gmra.mxu0 %v17798_v9 }
 0x2a2   :  { %3708 = vmatmul.mubr.bf16.vlgmr.msra.gmra.mxu1 %v15649_v57  ;;  %3886 = vmatpush1.bf16.msra.mxu0 %v12710_v29  ;;  %v12728_v29 = vld [vmem:[#allocation7 + $0x48] ss:$16 sps:$4 sm:$0xff]  }
 0x2a3   :  { %3717 = vmatprep.mubr.bf16.mxu1 %v17799_v44  ;;  %3985 = vmatpush1.bf16.msra.mxu1 %v12713_v60  ;;  %v17804_v60 = vld [vmem:[#allocation50_spill] sm:$0xff]  ;;  %v2716_v2 = vpop.f32.mrf.mxu0  ;;  %v2819_v7 = vpop.f32.mrf.mxu1 }
 0x2a4   :  { %11441 = vmatprep.mubr.msk.bf16.mxu0 %vm2660_vm2, %v17800_v14  ;;  %3887 = vmatprep.subr.bf16.mxu0 %v12718_v30  ;;  %v12736_v30 = vld [vmem:[#allocation7 + $0x2c] ss:$16 sps:$4 sm:$0xff]   ;;  %v15669_v21 = vadd.f32 %v2819_v7, %v2716_v2  ;;  %v12758_v7 = vld [vmem:[#allocation7 + $0x208] ss:$16 sps:$4 sm:$0xff]  }
 0x2a5   :  { %3986 = vmatprep.subr.bf16.mxu1 %v12721_v11  ;;  %v12734_v11 = vld [vmem:[#allocation7 + $0x28] ss:$16 sps:$4 sm:$0xff]   ;;  %v12763_v2 = vld [vmem:[#allocation7 + $0x18c] ss:$16 sps:$4 sm:$0xff]  }
 0x2a6   :  { %3888 = vmatpush1.bf16.msra.mxu0 %v12716_v42  ;;  %v12739_v42 = vld [vmem:[#allocation7 + $0x26c] ss:$16 sps:$4 sm:$0xff]   ;;  %17809 = vst [vmem:[#allocation76_spill] sm:$0xff] %v15669_v21 }
 0x2a7   :  { %3987 = vmatpush1.bf16.msra.mxu1 %v12719_v20  ;;  %3889 = vmatprep.subr.bf16.mxu0 %v12724_v3  ;;  %v12742_v20 = vld [vmem:[#allocation7 + $0xc] ss:$16 sps:$4 sm:$0xff]   ;;  %v12737_v3 = vld [vmem:[#allocation7 + $0x268] ss:$16 sps:$4 sm:$0xff]  }
 0x2a8   :  { %3988 = vmatprep.subr.bf16.mxu1 %v12727_v56  ;;  %v17805_v56 = vld [vmem:[#allocation41_spill] sm:$0xff]  ;;  %v12766_v21 = vld [vmem:[#allocation7 + $0x36c] ss:$16 sps:$4 sm:$0xff]  }
 0x2a9   :  { %3831 = vmatmul.mubr.bf16.gmra.mxu0 %v17802_v39 }
 0x2aa   :  { %3718 = vmatmul.mubr.bf16.gmra.mxu1 %v17801_v18  ;;  %3890 = vmatpush1.bf16.msra.mxu0 %v12722_v51  ;;  %v17806_v51 = vld [vmem:[#allocation47_spill] sm:$0xff] }
 0x2ab   :  { %3727 = vmatprep.mubr.bf16.mxu1 %v17803_v8  ;;  %11442 = vmatprep.mubr.msk.bf16.mxu0 %vm2660_vm2, %v17804_v60 }
 0x2ac   :  { %3989 = vmatpush1.bf16.msra.mxu1 %v12725_v15  ;;  %3891 = vmatprep.subr.bf16.mxu0 %v12730_v25  ;;  %v12740_v15 = vld [vmem:[#allocation7 + $0x8] ss:$16 sps:$4 sm:$0xff]   ;;  %v12745_v25 = vld [vmem:[#allocation7 + $0x1ec] ss:$16 sps:$4 sm:$0xff]  }
 0x2ad   :  { %3990 = vmatprep.subr.bf16.mxu1 %v12733_v32  ;;  %v12746_v32 = vld [vmem:[#allocation7 + $0x248] ss:$16 sps:$4 sm:$0xff]  }
 0x2ae   :  { %3892 = vmatpush1.bf16.msra.mxu0 %v12728_v29  ;;  %v12743_v29 = vld [vmem:[#allocation7 + $0x1e8] ss:$16 sps:$4 sm:$0xff]  }
 0x2af   :  { %3893 = vmatprep.subr.bf16.mxu0 %v12736_v30  ;;  %v12754_v30 = vld [vmem:[#allocation7 + $0x22c] ss:$16 sps:$4 sm:$0xff]  }
 0x2b0   :  { %3991 = vmatpush1.bf16.msra.mxu1 %v12731_v63  ;;  %v12751_v63 = vld [vmem:[#allocation7 + $0x1cc] ss:$16 sps:$4 sm:$0xff]  }
 0x2b1   :  { %3992 = vmatprep.subr.bf16.mxu1 %v12739_v42  ;;  %3841 = vmatmul.mubr.bf16.gmra.mxu0 %v17806_v51  ;;  %v17808_v42 = vld [vmem:[#allocation46_spill] sm:$0xff] }
 0x2b2   :  { %3728 = vmatmul.mubr.bf16.gmra.mxu1 %v17805_v56  ;;  %3894 = vmatpush1.bf16.msra.mxu0 %v12734_v11  ;;  %v12752_v11 = vld [vmem:[#allocation7 + $0x228] ss:$16 sps:$4 sm:$0xff]  }
 0x2b3   :  { %3737 = vmatprep.mubr.bf16.mxu1 %v17807_v40  ;;  %11443 = vmatprep.mubr.msk.bf16.mxu0 %vm2660_vm2, %v15400_v41 }
 0x2b4   :  { %3895 = vmatprep.subr.bf16.mxu0 %v12742_v20  ;;  %3993 = vmatpush1.bf16.msra.mxu1 %v12737_v3  ;;  %v12749_v20 = vld [vmem:[#allocation7 + $0x1c8] ss:$16 sps:$4 sm:$0xff]   ;;  %v12760_v3 = vld [vmem:[#allocation7 + $0x20c] ss:$16 sps:$4 sm:$0xff]  }
 0x2b5   :  { %3994 = vmatprep.subr.bf16.mxu1 %v12748_v35  ;;  %v17810_v35 = vld [vmem:[#allocation58_spill] sm:$0xff] }
 0x2b6   :  { %3896 = vmatpush1.bf16.msra.mxu0 %v12740_v15  ;;  %v2718_v15 = vpop.f32.mrf.mxu0 }
 0x2b7   :  { %3897 = vmatprep.subr.bf16.mxu0 %v12745_v25  ;;  %v12757_v25 = vld [vmem:[#allocation7 + $0x1ac] ss:$16 sps:$4 sm:$0xff]  }
 0x2b8   :  { %3995 = vmatpush1.bf16.msra.mxu1 %v12746_v32  ;;  %v2821_v32 = vpop.f32.mrf.mxu1  ;;  %v2720_v5 = vpop.f32.mrf.mxu0 }
 0x2b9   :  { %3851 = vmatmul.mubr.bf16.gmra.mxu0 %v15392_v22  ;;  %3996 = vmatprep.subr.bf16.mxu1 %v12754_v30  ;;  %v15673_v33 = vadd.f32 %v2821_v32, %v2718_v15  ;;  %v12761_v30 = vld [vmem:[#allocation7 + $0x188] ss:$16 sps:$4 sm:$0xff]   ;;  %v12778_v32 = vld [vmem:[#allocation7 + $0x32c] ss:$16 sps:$4 sm:$0xff]  }
 0x2ba   :  { %3738 = vmatmul.mubr.bf16.gmra.mxu1 %v17808_v42  ;;  %3898 = vmatpush2.bf16.msra.mxu0 %v12743_v29  ;;  %v2823_v19 = vpop.f32.mrf.mxu1  ;;  %v12770_v15 = vld [vmem:[#allocation7 + $0x348] ss:$16 sps:$4 sm:$0xff]  }
 0x2bb   :  { %3747 = vmatprep.mubr.bf16.mxu1 %v15396_v31  ;;  %11444 = vmatprep.mubr.msk.bf16.mxu0 %vm2660_vm2, %v17810_v35  ;;  %17811 = vst [vmem:[#allocation77_spill] sm:$0xff] %v15673_v33  ;;  %v15675_v29 = vadd.f32 %v2823_v19, %v2720_v5  ;;  %v12772_v19 = vld [vmem:[#allocation7 + $0x34c] ss:$16 sps:$4 sm:$0xff]   ;;  %v12767_v5 = vld [vmem:[#allocation7 + $0x168] ss:$16 sps:$4 sm:$0xff]  }
 0x2bc   :  { %3899 = vmatprep.subr.bf16.mxu0 %v12751_v63  ;;  %3997 = vmatpush1.bf16.msra.mxu1 %v12752_v11  ;;  %v17814_v63 = vld [vmem:[#allocation57_spill] sm:$0xff]  ;;  %v12764_v11 = vld [vmem:[#allocation7 + $0x368] ss:$16 sps:$4 sm:$0xff]  }
 0x2bd   :  { %3998 = vmatprep.subr.bf16.mxu1 %v12760_v3  ;;  %17812 = vst [vmem:[#allocation75_spill] sm:$0xff] %v15675_v29  ;;  %v15682_v3 = vpop.f32.mrf.mxu0  ;;  %v17818_v29 = vld [vmem:[#allocation56_spill] sm:$0xff] }
 0x2be   :  { %3900 = vmatpush2.bf16.msra.mxu0 %v12749_v20  ;;  %v12769_v20 = vld [vmem:[#allocation7 + $0x16c] ss:$16 sps:$4 sm:$0xff]   ;;  %17816 = vst [vmem:[#allocation78_spill] sm:$0xff] %v15682_v3 }
 0x2bf   :  { %3901 = vmatprep.subr.bf16.mxu0 %v12757_v25  ;;  %v15684_v25 = vpop.f32.mrf.mxu1  ;;  %v12784_v3 = vld [vmem:[#allocation7 + $0x30c] ss:$16 sps:$4 sm:$0xff]  }
 0x2c0   :  { %3999 = vmatpush1.bf16.msra.mxu1 %v12758_v7  ;;  %17817 = vst [vmem:[#allocation79_spill] sm:$0xff] %v15684_v25  ;;  %v2726_v7 = vpop.f32.mrf.mxu0 }
 0x2c1   :  { %3861 = vmatmul.mubr.bf16.gmra.mxu0 %v17814_v63  ;;  %4008 = vmatprep.subr.bf16.mxu1 %v12766_v21  ;;  %v12773_v21 = vld [vmem:[#allocation7 + $0x148] ss:$16 sps:$4 sm:$0xff]  }
 0x2c2   :  { %3748 = vmatmul.mubr.bf16.gmra.mxu1 %v17813_v0  ;;  %3902 = vmatpush2.bf16.msra.mxu0 %v12755_v37  ;;  %v12775_v37 = vld [vmem:[#allocation7 + $0x14c] ss:$16 sps:$4 sm:$0xff]  }
 0x2c3   :  { %3757 = vmatprep.mubr.bf16.mxu1 %v17815_v53  ;;  %11445 = vmatprep.mubr.msk.bf16.mxu0 %vm2660_vm2, %v15554_v52 }
 0x2c4   :  { %3903 = vmatprep.subr.bf16.mxu0 %v12763_v2  ;;  %4009 = vmatpush2.bf16.msra.mxu1 %v12764_v11  ;;  %v2829_v2 = vpop.f32.mrf.mxu1  ;;  %v2728_v11 = vpop.f32.mrf.mxu0 }
 0x2c5   :  { %4010 = vmatprep.subr.bf16.mxu1 %v12772_v19  ;;  %v12781_v19 = vld [vmem:[#allocation7 + $0x12c] ss:$16 sps:$4 sm:$0xff]  }
 0x2c6   :  { %3904 = vmatpush2.bf16.msra.mxu0 %v12761_v30  ;;  %v15689_v30 = vadd.f32 %v2829_v2, %v2726_v7  ;;  %v2831_v25 = vpop.f32.mrf.mxu1  ;;  %v2730_v17 = vpop.f32.mrf.mxu0  ;;  %v12782_v7 = vld [vmem:[#allocation7 + $0x308] ss:$16 sps:$4 sm:$0xff]   ;;  %v12787_v2 = vld [vmem:[#allocation7 + $0x10c] ss:$16 sps:$4 sm:$0xff]  }
 0x2c7   :  { %3905 = vmatprep.subr.bf16.mxu0 %v12769_v20  ;;  %v12776_v20 = vld [vmem:[#allocation7 + $0x328] ss:$16 sps:$4 sm:$0xff]   ;;  %v15692_v33 = vadd.f32 %v2831_v25, %v2728_v11  ;;  %v12799_v11 = vld [vmem:[#allocation9 + $0x644] ss:$16 sps:$4 sm:$0xff]  }
 0x2c8   :  { %4011 = vmatpush2.bf16.msra.mxu1 %v12770_v15  ;;  %v2833_v50 = vpop.f32.mrf.mxu1  ;;  %v12790_v15 = vld [vmem:[#allocation9 + $0x464] ss:$16 sps:$4 sm:$0xff]   ;;  %v12785_v25 = vld [vmem:[#allocation7 + $0x108] ss:$16 sps:$4 sm:$0xff]  }
 0x2c9   :  { %3871 = vmatmul.mubr.bf16.gmra.mxu0 %v15550_v36  ;;  %4012 = vmatprep.subr.bf16.mxu1 %v12778_v32  ;;  %v12791_v32 = vld [vmem:[#allocation9 + $0x660] ss:$16 sps:$4 sm:$0xff]  }
 0x2ca   :  { %3758 = vmatmul.mubr.bf16.gmra.mxu1 %v17818_v29  ;;  %3906 = vmatpush2.bf16.msra.mxu0 %v12767_v5  ;;  %v15694_v5 = vadd.f32 %v2833_v50, %v2730_v17  ;;  %v12788_v50 = vld [vmem:[#allocation9 + $0x460] ss:$16 sps:$4 sm:$0xff]   ;;  %v15699_v17 = vpop.f32.mrf.mxu0 }
 0x2cb   :  { %3767 = vmatprep.mubr.bf16.mxu1 %v15552_v62  ;;  %3913 = vmatprep.mubr.bf16.mxu0 %v15629_v4 }
 0x2cc   :  { %3907 = vmatprep.subr.bf16.mxu0 %v12775_v37  ;;  %4013 = vmatpush2.bf16.msra.mxu1 %v12776_v20  ;;  %v12793_v37 = vld [vmem:[#allocation9 + $0x664] ss:$16 sps:$4 sm:$0xff]  }
 0x2cd   :  { %4014 = vmatprep.subr.bf16.mxu1 %v12784_v3  ;;  %v12796_v3 = vld [vmem:[#allocation9 + $0x444] ss:$16 sps:$4 sm:$0xff]  }
 0x2ce   :  { %3908 = vmatpush2.bf16.msra.mxu0 %v12773_v21  ;;  %v15701_v21 = vpop.f32.mrf.mxu1 }
 0x2cf   :  { %3909 = vmatprep.subr.bf16.mxu0 %v12781_v19  ;;  %v12794_v19 = vld [vmem:[#allocation9 + $0x440] ss:$16 sps:$4 sm:$0xff]  }
 0x2d0   :  { %4015 = vmatpush2.bf16.msra.mxu1 %v12782_v7  ;;  %v2839_v20 = vpop.f32.mrf.mxu1 }
 0x2d1   :  { %4760 = vmatprep.subr.bf16.mxu1 %v12790_v15  ;;  %v12797_v15 = vld [vmem:[#allocation9 + $0x640] ss:$16 sps:$4 sm:$0xff]  }
 0x2d2   :  { %3768 = vmatmul.mubr.bf16.gmra.mxu1 %v15547_v58  ;;  %3910 = vmatpush2.bf16.msra.mxu0 %v12779_v46  ;;  %v2736_v46 = vpop.f32.mrf.mxu0 }
 0x2d3   :  { %11446 = vmatprep.mubr.msk.bf16.mxu1 %vm2660_vm2, %v15635_v59  ;;  %3911 = vmatprep.subr.bf16.mxu0 %v12787_v2  ;;  %v15706_v7 = vadd.f32 %v2839_v20, %v2736_v46  ;;  %v12808_v46 = vld [vmem:[#allocation9 + $0x404] ss:$16 sps:$4 sm:$0xff]   ;;  %v12803_v20 = vld [vmem:[#allocation9 + $0x620] ss:$16 sps:$4 sm:$0xff]  }
 0x2d4   :  { %v2738_v2 = vpop.f32.mrf.mxu0 }
 0x2d6   :  { %3912 = vmatpush2.bf16.msra.mxu0 %v12785_v25  ;;  %v12802_v25 = vld [vmem:[#allocation9 + $0x424] ss:$16 sps:$4 sm:$0xff]  }
 0x2d7   :  { %4863 = vmatprep.subr.bf16.mxu0 %v12793_v37  ;;  %v2841_v37 = vpop.f32.mrf.mxu1 }
 0x2d9   :  { %3914 = vmatmul.mubr.bf16.vlgmr.msra.gmra.mxu0 %v15649_v57  ;;  %v12805_v57 = vld [vmem:[#allocation9 + $0x624] ss:$16 sps:$4 sm:$0xff]   ;;  %v2843_v59 = vpop.f32.mrf.mxu1 }
 0x2da   :  { %4017 = vmatmul.mubr.bf16.vlgmr.msra.gmra.mxu1 %v15642_v55  ;;  %3923 = vmatprep.mubr.bf16.mxu0 %v17799_v44  ;;  %v15710_v55 = vadd.f32 %v2841_v37, %v2738_v2  ;;  %v12800_v44 = vld [vmem:[#allocation9 + $0x420] ss:$16 sps:$4 sm:$0xff]   ;;  %v12817_v2 = vld [vmem:[#allocation9 + $0x3c4] ss:$16 sps:$4 sm:$0xff]  }
 0x2db   :  { %4761 = vmatpush1.bf16.msra.mxu1 %v12788_v50  ;;  %11447 = vmatprep.mubr.msk.bf16.mxu1 %vm2660_vm2, %v17795_v38  ;;  %v2740_v50 = vpop.f32.mrf.mxu0  ;;  %v12818_v37 = vld [vmem:[#allocation9 + $0x5e0] ss:$16 sps:$4 sm:$0xff]  }
 0x2dc   :  { %4864 = vmatpush1.bf16.msra.mxu0 %v12791_v32  ;;  %4762 = vmatprep.subr.bf16.mxu1 %v12796_v3  ;;  %v15712_v4 = vadd.f32 %v2843_v59, %v2740_v50  ;;  %v12811_v32 = vld [vmem:[#allocation9 + $0x604] ss:$16 sps:$4 sm:$0xff]   ;;  %v12806_v3 = vld [vmem:[#allocation9 + $0x400] ss:$16 sps:$4 sm:$0xff]  }
 0x2dd   :  { %4865 = vmatprep.subr.bf16.mxu0 %v12799_v11  ;;  %v12814_v59 = vld [vmem:[#allocation9 + $0x3e4] ss:$16 sps:$4 sm:$0xff]   ;;  %v12809_v11 = vld [vmem:[#allocation9 + $0x600] ss:$16 sps:$4 sm:$0xff]  }
 0x2df   :  { %4763 = vmatpush1.bf16.msra.mxu1 %v12794_v19  ;;  %v12812_v19 = vld [vmem:[#allocation9 + $0x3e0] ss:$16 sps:$4 sm:$0xff]  }
 0x2e0   :  { %4866 = vmatpush1.bf16.msra.mxu0 %v12797_v15  ;;  %4764 = vmatprep.subr.bf16.mxu1 %v12802_v25  ;;  %v15721_v15 = vpop.f32.mrf.mxu1 }
 0x2e1   :  { %4867 = vmatprep.subr.bf16.mxu0 %v12805_v57  ;;  %3924 = vmatmul.mubr.bf16.gmra.mxu0 %v17801_v18  ;;  %v15719_v57 = vpop.f32.mrf.mxu0 }
 0x2e2   :  { %4027 = vmatmul.mubr.bf16.gmra.mxu1 %v17798_v9  ;;  %3933 = vmatprep.mubr.bf16.mxu0 %v17803_v8  ;;  %v2849_v50 = vpop.f32.mrf.mxu1 }
 0x2e3   :  { %4765 = vmatpush1.bf16.msra.mxu1 %v12800_v44  ;;  %11448 = vmatprep.mubr.msk.bf16.mxu1 %vm2660_vm2, %v17800_v14  ;;  %v12820_v44 = vld [vmem:[#allocation9 + $0x5e4] ss:$16 sps:$4 sm:$0xff]   ;;  %v2746_v25 = vpop.f32.mrf.mxu0 }
 0x2e4   :  { %4766 = vmatprep.subr.bf16.mxu1 %v12808_v46  ;;  %4868 = vmatpush1.bf16.msra.mxu0 %v12803_v20  ;;  %v12815_v46 = vld [vmem:[#allocation9 + $0x3c0] ss:$16 sps:$4 sm:$0xff]   ;;  %v12826_v20 = vld [vmem:[#allocation9 + $0x5c4] ss:$16 sps:$4 sm:$0xff]  }
 0x2e5   :  { %4869 = vmatprep.subr.bf16.mxu0 %v12811_v32  ;;  %v15726_v32 = vadd.f32 %v2849_v50, %v2746_v25  ;;  %v12824_v50 = vld [vmem:[#allocation9 + $0x5c0] ss:$16 sps:$4 sm:$0xff]   ;;  %v12832_v14 = vld [vmem:[#allocation9 + $0x5a4] ss:$16 sps:$4 sm:$0xff]  }
 0x2e7   :  { %4767 = vmatpush1.bf16.msra.mxu1 %v12806_v3  ;;  %v2748_v3 = vpop.f32.mrf.mxu0 }
 0x2e8   :  { %4768 = vmatprep.subr.bf16.mxu1 %v12814_v59  ;;  %4870 = vmatpush1.bf16.msra.mxu0 %v12809_v11  ;;  %v12823_v59 = vld [vmem:[#allocation9 + $0x3a4] ss:$16 sps:$4 sm:$0xff]   ;;  %v2851_v11 = vpop.f32.mrf.mxu1 }
 0x2e9   :  { %3934 = vmatmul.mubr.bf16.gmra.mxu0 %v17805_v56  ;;  %4871 = vmatprep.subr.bf16.mxu0 %v12820_v44  ;;  %v15730_v56 = vadd.f32 %v2851_v11, %v2748_v3  ;;  %v2750_v8 = vpop.f32.mrf.mxu0  ;;  %v12827_v44 = vld [vmem:[#allocation9 + $0x380] ss:$16 sps:$4 sm:$0xff]   ;;  %v12841_v3 = vld [vmem:[#allocation9 + $0x544] ss:$16 sps:$4 sm:$0xff]  }
 0x2ea   :  { %4037 = vmatmul.mubr.bf16.gmra.mxu1 %v17802_v39  ;;  %3943 = vmatprep.mubr.bf16.mxu0 %v17807_v40  ;;  %v12821_v39 = vld [vmem:[#allocation9 + $0x3a0] ss:$16 sps:$4 sm:$0xff]  }
 0x2eb   :  { %4769 = vmatpush1.bf16.msra.mxu1 %v12812_v19  ;;  %11449 = vmatprep.mubr.msk.bf16.mxu1 %vm2660_vm2, %v17804_v60  ;;  %v2853_v19 = vpop.f32.mrf.mxu1  ;;  %v2752_v25 = vpop.f32.mrf.mxu0  ;;  %v12829_v60 = vld [vmem:[#allocation9 + $0x384] ss:$16 sps:$4 sm:$0xff]  }
 0x2ec   :  { %4770 = vmatprep.subr.bf16.mxu1 %v12817_v2  ;;  %4872 = vmatpush1.bf16.msra.mxu0 %v12818_v37  ;;  %v15732_v40 = vadd.f32 %v2853_v19, %v2750_v8  ;;  %v12830_v8 = vld [vmem:[#allocation9 + $0x5a0] ss:$16 sps:$4 sm:$0xff]   ;;  %v12835_v37 = vld [vmem:[#allocation9 + $0x564] ss:$16 sps:$4 sm:$0xff]  }
 0x2ed   :  { %4873 = vmatprep.subr.bf16.mxu0 %v12826_v20  ;;  %v2855_v18 = vpop.f32.mrf.mxu1  ;;  %v12836_v20 = vld [vmem:[#allocation9 + $0x580] ss:$16 sps:$4 sm:$0xff]  }
 0x2ee   :  { %v15734_v2 = vadd.f32 %v2855_v18, %v2752_v25  ;;  %v12833_v18 = vld [vmem:[#allocation9 + $0x560] ss:$16 sps:$4 sm:$0xff]  }
 0x2ef   :  { %4771 = vmatpush1.bf16.msra.mxu1 %v12815_v46  ;;  %v12838_v46 = vld [vmem:[#allocation9 + $0x584] ss:$16 sps:$4 sm:$0xff]   ;;  %v12842_v25 = vld [vmem:[#allocation9 + $0x6e0] ss:$16 sps:$4 sm:$0xff]  }
 0x2f0   :  { %4772 = vmatprep.subr.bf16.mxu1 %v12823_v59  ;;  %4874 = vmatpush1.bf16.msra.mxu0 %v12824_v50  ;;  %v12847_v50 = vld [vmem:[#allocation9 + $0x524] ss:$16 sps:$4 sm:$0xff]  }
 0x2f1   :  { %3944 = vmatmul.mubr.bf16.gmra.mxu0 %v17808_v42  ;;  %4875 = vmatprep.subr.bf16.mxu0 %v12832_v14  ;;  %v12898_v42 = vld [vmem:[#allocation9 + $0x3cc] ss:$16 sps:$4 sm:$0xff]  }
 0x2f2   :  { %4047 = vmatmul.mubr.bf16.gmra.mxu1 %v17806_v51  ;;  %3953 = vmatprep.mubr.bf16.mxu0 %v15396_v31 }
 0x2f3   :  { %4773 = vmatpush1.bf16.msra.mxu1 %v12821_v39  ;;  %11450 = vmatprep.mubr.msk.bf16.mxu1 %vm2660_vm2, %v15400_v41  ;;  %v12844_v39 = vld [vmem:[#allocation9 + $0x6e4] ss:$16 sps:$4 sm:$0xff]   ;;  %v2756_v59 = vpop.f32.mrf.mxu0 }
 0x2f4   :  { %4774 = vmatprep.subr.bf16.mxu1 %v12829_v60  ;;  %4876 = vmatpush1.bf16.msra.mxu0 %v12830_v8  ;;  %v2859_v11 = vpop.f32.mrf.mxu1  ;;  %v12839_v60 = vld [vmem:[#allocation9 + $0x540] ss:$16 sps:$4 sm:$0xff]   ;;  %v12850_v8 = vld [vmem:[#allocation9 + $0x6c4] ss:$16 sps:$4 sm:$0xff]  }
 0x2f5   :  { %4877 = vmatprep.subr.bf16.mxu0 %v12838_v46  ;;  %v15744_v14 = vadd.f32 %v2859_v11, %v2756_v59  ;;  %v2758_v19 = vpop.f32.mrf.mxu0  ;;  %v12853_v11 = vld [vmem:[#allocation9 + $0x504] ss:$16 sps:$4 sm:$0xff]  }
 0x2f7   :  { %4775 = vmatpush1.bf16.msra.mxu1 %v12827_v44  ;;  %v2861_v44 = vpop.f32.mrf.mxu1  ;;  %v2760_v46 = vpop.f32.mrf.mxu0 }
 0x2f8   :  { %4776 = vmatprep.subr.bf16.mxu1 %v12835_v37  ;;  %4878 = vmatpush1.bf16.msra.mxu0 %v12836_v20  ;;  %v15748_v37 = vadd.f32 %v2861_v44, %v2758_v19  ;;  %v12857_v19 = vld [vmem:[#allocation9 + $0x6a0] ss:$16 sps:$4 sm:$0xff]   ;;  %v12865_v44 = vld [vmem:[#allocation9 + $0x684] ss:$16 sps:$4 sm:$0xff]  }
 0x2f9   :  { %3954 = vmatmul.mubr.bf16.gmra.mxu0 %v17813_v0  ;;  %4887 = vmatprep.subr.bf16.mxu0 %v12844_v39  ;;  %v2762_v59 = vpop.f32.mrf.mxu0  ;;  %v12851_v39 = vld [vmem:[#allocation9 + $0x500] ss:$16 sps:$4 sm:$0xff]  }
 0x2fa   :  { %4057 = vmatmul.mubr.bf16.gmra.mxu1 %v15392_v22  ;;  %3963 = vmatprep.mubr.bf16.mxu0 %v17815_v53  ;;  %v12845_v53 = vld [vmem:[#allocation9 + $0x520] ss:$16 sps:$4 sm:$0xff]  }
 0x2fb   :  { %4777 = vmatpush2.bf16.msra.mxu1 %v12833_v18  ;;  %11451 = vmatprep.mubr.msk.bf16.mxu1 %vm2660_vm2, %v17810_v35  ;;  %v2863_v18 = vpop.f32.mrf.mxu1  ;;  %v12848_v35 = vld [vmem:[#allocation9 + $0x6c0] ss:$16 sps:$4 sm:$0xff]  }
 0x2fc   :  { %4778 = vmatprep.subr.bf16.mxu1 %v12841_v3  ;;  %v15750_v0 = vadd.f32 %v2863_v18, %v2760_v46  ;;  %4888 = vmatpush2.bf16.msra.mxu0 %v12842_v25  ;;  %v12859_v3 = vld [vmem:[#allocation9 + $0x6a4] ss:$16 sps:$4 sm:$0xff]   ;;  %v12854_v25 = vld [vmem:[#allocation9 + $0x4e0] ss:$16 sps:$4 sm:$0xff]  }
 0x2fd   :  { %v2865_v20 = vpop.f32.mrf.mxu1  ;;  %4889 = vmatprep.subr.bf16.mxu0 %v12850_v8  ;;  %v12863_v8 = vld [vmem:[#allocation9 + $0x680] ss:$16 sps:$4 sm:$0xff]  }
 0x2fe   :  { %v15752_v31 = vadd.f32 %v2865_v20, %v2762_v59  ;;  %v12860_v18 = vld [vmem:[#allocation9 + $0x4c0] ss:$16 sps:$4 sm:$0xff]   ;;  %v12868_v20 = vld [vmem:[#allocation9 + $0x4a4] ss:$16 sps:$4 sm:$0xff]  }
 0x2ff   :  { %4779 = vmatpush2.bf16.msra.mxu1 %v12839_v60  ;;  %v12856_v60 = vld [vmem:[#allocation9 + $0x4e4] ss:$16 sps:$4 sm:$0xff]  }
 0x300   :  { %4780 = vmatprep.subr.bf16.mxu1 %v12847_v50  ;;  %4890 = vmatpush2.bf16.msra.mxu0 %v12848_v35  ;;  %v12862_v50 = vld [vmem:[#allocation9 + $0x4c4] ss:$16 sps:$4 sm:$0xff]   ;;  %v12871_v35 = vld [vmem:[#allocation9 + $0x46c] ss:$16 sps:$4 sm:$0xff]  }
 0x301   :  { %3964 = vmatmul.mubr.bf16.gmra.mxu0 %v17818_v29  ;;  %4891 = vmatprep.subr.bf16.mxu0 %v12859_v3  ;;  %v12877_v29 = vld [vmem:[#allocation9 + $0x44c] ss:$16 sps:$4 sm:$0xff]  }
 0x302   :  { %4067 = vmatmul.mubr.bf16.gmra.mxu1 %v17814_v63  ;;  %3973 = vmatprep.mubr.bf16.mxu0 %v15552_v62  ;;  %v12893_v63 = vld [vmem:[#allocation9 + $0x628] ss:$16 sps:$4 sm:$0xff]  }
 0x303   :  { %4781 = vmatpush2.bf16.msra.mxu1 %v12845_v53  ;;  %11452 = vmatprep.mubr.msk.bf16.mxu1 %vm2660_vm2, %v15554_v52 }
 0x304   :  { %4782 = vmatprep.subr.bf16.mxu1 %v12853_v11  ;;  %4892 = vmatpush2.bf16.msra.mxu0 %v12857_v19 }
 0x305   :  { %4893 = vmatprep.subr.bf16.mxu0 %v12865_v44  ;;  %v12872_v44 = vld [vmem:[#allocation9 + $0x480] ss:$16 sps:$4 sm:$0xff]  }
 0x307   :  { %4783 = vmatpush2.bf16.msra.mxu1 %v12851_v39  ;;  %v2766_v53 = vpop.f32.mrf.mxu0  ;;  %v2869_v46 = vpop.f32.mrf.mxu1 }
 0x308   :  { %4784 = vmatprep.subr.bf16.mxu1 %v12856_v60  ;;  %v15762_v59 = vadd.f32 %v2869_v46, %v2766_v53  ;;  %4894 = vmatpush2.bf16.msra.mxu0 %v12863_v8  ;;  %v12874_v46 = vld [vmem:[#allocation9 + $0x484] ss:$16 sps:$4 sm:$0xff]   ;;  %v12875_v8 = vld [vmem:[#allocation9 + $0x448] ss:$16 sps:$4 sm:$0xff]  }
 0x309   :  { %3974 = vmatmul.mubr.bf16.gmra.mxu0 %v15547_v58  ;;  %v2768_v11 = vpop.f32.mrf.mxu0  ;;  %v2871_v3 = vpop.f32.mrf.mxu1  ;;  %v12869_v58 = vld [vmem:[#allocation9 + $0x468] ss:$16 sps:$4 sm:$0xff]   ;;  %4966 = vmatprep.subr.bf16.mxu0 %v12871_v35  ;;  %v12883_v35 = vld [vmem:[#allocation9 + $0x66c] ss:$16 sps:$4 sm:$0xff]  }
 0x30a   :  { %4077 = vmatmul.mubr.bf16.gmra.mxu1 %v15550_v36  ;;  %11565 = vmatprep.mubr.msk.bf16.mxu0 %vm2660_vm2, %v15045_v12  ;;  %v15766_v39 = vadd.f32 %v2871_v3, %v2768_v11  ;;  %v12878_v11 = vld [vmem:[#allocation9 + $0x428] ss:$16 sps:$4 sm:$0xff]   ;;  %v12889_v3 = vld [vmem:[#allocation9 + $0x64c] ss:$16 sps:$4 sm:$0xff]  }
 0x30b   :  { %4785 = vmatpush2.bf16.msra.mxu1 %v12854_v25  ;;  %4792 = vmatprep.mubr.bf16.mxu1 %v15041_v49  ;;  %v2770_v60 = vpop.f32.mrf.mxu0  ;;  %v2873_v19 = vpop.f32.mrf.mxu1  ;;  %v12866_v25 = vld [vmem:[#allocation9 + $0x4a0] ss:$16 sps:$4 sm:$0xff]  }
 0x30c   :  { %4786 = vmatprep.subr.bf16.mxu1 %v12862_v50  ;;  %17819 = vst [vmem:[#allocation80_spill] sm:$0xff] %v15766_v39  ;;  %v15768_v62 = vadd.f32 %v2873_v19, %v2770_v60 }
 0x30d   :  { %v2772_v53 = vpop.f32.mrf.mxu0  ;;  %v2875_v36 = vpop.f32.mrf.mxu1 }
 0x30e   :  { %17820 = vst [vmem:[#allocation81_spill] sm:$0xff] %v15768_v62  ;;  %v15770_v50 = vadd.f32 %v2875_v36, %v2772_v53  ;;  %v12886_v36 = vld [vmem:[#allocation9 + $0x40c] ss:$16 sps:$4 sm:$0xff]  }
 0x30f   :  { %4787 = vmatpush2.bf16.msra.mxu1 %v12860_v18  ;;  %v12880_v18 = vld [vmem:[#allocation9 + $0x42c] ss:$16 sps:$4 sm:$0xff]  }
 0x310   :  { %4788 = vmatprep.subr.bf16.mxu1 %v12868_v20  ;;  %17821 = vst [vmem:[#allocation82_spill] sm:$0xff] %v15770_v50  ;;  %v12881_v20 = vld [vmem:[#allocation9 + $0x668] ss:$16 sps:$4 sm:$0xff]   ;;  %v12943_v50 = vld [vmem:[#allocation9 + $0x4cc] ss:$16 sps:$4 sm:$0xff]  }
 0x311   :  { %4896 = vmatmul.mubr.bf16.vlgmr.msra.gmra.mxu0 %v17785_v27 }
 0x312   :  { %4967 = vmatpush1.bf16.msra.mxu0 %v12869_v58  ;;  %11566 = vmatprep.mubr.msk.bf16.mxu0 %vm2660_vm2, %v17787_v54 }
 0x313   :  { %4789 = vmatpush2.bf16.msra.mxu1 %v12866_v25  ;;  %4968 = vmatprep.subr.bf16.mxu0 %v12877_v29  ;;  %v12884_v29 = vld [vmem:[#allocation9 + $0x408] ss:$16 sps:$4 sm:$0xff]  }
 0x314   :  { %4790 = vmatprep.subr.bf16.mxu1 %v12874_v46  ;;  %v12887_v46 = vld [vmem:[#allocation9 + $0x648] ss:$16 sps:$4 sm:$0xff]  }
 0x316   :  { %4969 = vmatpush1.bf16.msra.mxu0 %v12875_v8 }
 0x317   :  { %4791 = vmatpush2.bf16.msra.mxu1 %v12872_v44  ;;  %4970 = vmatprep.subr.bf16.mxu0 %v12880_v18  ;;  %v12892_v44 = vld [vmem:[#allocation9 + $0x3ec] ss:$16 sps:$4 sm:$0xff]  }
 0x318   :  { %5069 = vmatprep.subr.bf16.mxu1 %v12883_v35  ;;  %v12895_v18 = vld [vmem:[#allocation9 + $0x62c] ss:$16 sps:$4 sm:$0xff]  }
 0x319   :  { %4906 = vmatmul.mubr.bf16.gmra.mxu0 %v15128_v6  ;;  %v2776_v58 = vpop.f32.mrf.mxu0 }
 0x31a   :  { %4793 = vmatmul.mubr.bf16.vlgmr.msra.gmra.mxu1 %v17784_v16  ;;  %v2879_v60 = vpop.f32.mrf.mxu1  ;;  %4971 = vmatpush1.bf16.msra.mxu0 %v12878_v11 }
 0x31b   :  { %4802 = vmatprep.mubr.bf16.mxu1 %v17786_v1  ;;  %v15778_v19 = vadd.f32 %v2879_v60, %v2776_v58  ;;  %5070 = vmatpush1.bf16.msra.mxu1 %v12881_v20  ;;  %v2778_v25 = vpop.f32.mrf.mxu0  ;;  %v12890_v58 = vld [vmem:[#allocation9 + $0x3e8] ss:$16 sps:$4 sm:$0xff]  }
 0x31c   :  { %11567 = vmatprep.mubr.msk.bf16.mxu0 %vm2660_vm2, %v17788_v48  ;;  %v2881_v53 = vpop.f32.mrf.mxu1  ;;  %4972 = vmatprep.subr.bf16.mxu0 %v12886_v36 }
 0x31d   :  { %17822 = vst [vmem:[#allocation83_spill] sm:$0xff] %v15778_v19  ;;  %v15782_v8 = vadd.f32 %v2881_v53, %v2778_v25  ;;  %5071 = vmatprep.subr.bf16.mxu1 %v12889_v3  ;;  %v2780_v35 = vpop.f32.mrf.mxu0  ;;  %v12901_v25 = vld [vmem:[#allocation9 + $0x60c] ss:$16 sps:$4 sm:$0xff]  }
 0x31e   :  { %v2883_v52 = vpop.f32.mrf.mxu1  ;;  %4973 = vmatpush1.bf16.msra.mxu0 %v12884_v29  ;;  %v12896_v29 = vld [vmem:[#allocation9 + $0x3c8] ss:$16 sps:$4 sm:$0xff]  }
 0x31f   :  { %17823 = vst [vmem:[#allocation84_spill] sm:$0xff] %v15782_v8  ;;  %v15784_v11 = vadd.f32 %v2883_v52, %v2780_v35  ;;  %5072 = vmatpush1.bf16.msra.mxu1 %v12887_v46  ;;  %v2782_v20 = vpop.f32.mrf.mxu0  ;;  %4974 = vmatprep.subr.bf16.mxu0 %v12892_v44  ;;  %v12899_v44 = vld [vmem:[#allocation9 + $0x608] ss:$16 sps:$4 sm:$0xff]  }
 0x320   :  { %v2885_v60 = vpop.f32.mrf.mxu1  ;;  %5073 = vmatprep.subr.bf16.mxu1 %v12895_v18  ;;  %v12904_v18 = vld [vmem:[#allocation9 + $0x3ac] ss:$16 sps:$4 sm:$0xff]  }
 0x321   :  { %17824 = vst [vmem:[#allocation87_spill] sm:$0xff] %v15784_v11  ;;  %v15786_v22 = vadd.f32 %v2885_v60, %v2782_v20  ;;  %4916 = vmatmul.mubr.bf16.gmra.mxu0 %v15229_v23  ;;  %v2922_v36 = vpop.f32.mrf.mxu0  ;;  %v12907_v20 = vld [vmem:[#allocation9 + $0x5ec] ss:$16 sps:$4 sm:$0xff]  }
 0x322   :  { %4803 = vmatmul.mubr.bf16.gmra.mxu1 %v15124_v24  ;;  %v3025_v3 = vpop.f32.mrf.mxu1  ;;  %4975 = vmatpush1.bf16.msra.mxu0 %v12890_v58  ;;  %v12931_v11 = vld [vmem:[#allocation9 + $0x50c] ss:$16 sps:$4 sm:$0xff]  }
 0x323   :  { %17825 = vst [vmem:[#allocation98_spill] sm:$0xff] %v15786_v22  ;;  %4812 = vmatprep.mubr.bf16.mxu1 %v15247_v26  ;;  %v15791_v52 = vadd.f32 %v3025_v3, %v2922_v36  ;;  %11568 = vmatprep.mubr.msk.bf16.mxu0 %vm2660_vm2, %v15351_v43  ;;  %v2924_v53 = vpop.f32.mrf.mxu0  ;;  %v12902_v36 = vld [vmem:[#allocation9 + $0x3a8] ss:$16 sps:$4 sm:$0xff]  }
 0x324   :  { %5074 = vmatpush1.bf16.msra.mxu1 %v12893_v63  ;;  %v3027_v46 = vpop.f32.mrf.mxu1  ;;  %4976 = vmatprep.subr.bf16.mxu0 %v12898_v42  ;;  %v12910_v63 = vld [vmem:[#allocation9 + $0x38c] ss:$16 sps:$4 sm:$0xff]   ;;  %v12905_v22 = vld [vmem:[#allocation9 + $0x5e8] ss:$16 sps:$4 sm:$0xff]  }
 0x325   :  { %17826 = vst [vmem:[#allocation85_spill] sm:$0xff] %v15791_v52  ;;  %v15795_v35 = vadd.f32 %v3027_v46, %v2924_v53  ;;  %5075 = vmatprep.subr.bf16.mxu1 %v12901_v25  ;;  %v2926_v60 = vpop.f32.mrf.mxu0  ;;  %v12916_v53 = vld [vmem:[#allocation9 + $0x5cc] ss:$16 sps:$4 sm:$0xff]  }
 0x326   :  { %v3029_v41 = vpop.f32.mrf.mxu1  ;;  %4977 = vmatpush1.bf16.msra.mxu0 %v12896_v29  ;;  %v12908_v29 = vld [vmem:[#allocation9 + $0x388] ss:$16 sps:$4 sm:$0xff]  }
 0x327   :  { %17827 = vst [vmem:[#allocation86_spill] sm:$0xff] %v15795_v35  ;;  %v15797_v58 = vadd.f32 %v3029_v41, %v2926_v60  ;;  %v2928_v3 = vpop.f32.mrf.mxu0  ;;  %4978 = vmatprep.subr.bf16.mxu0 %v12904_v18  ;;  %v17839_v8 = vld [vmem:[#allocation54_spill] sm:$0xff] }
 0x328   :  { %5076 = vmatpush1.bf16.msra.mxu1 %v12899_v44  ;;  %v3031_v51 = vpop.f32.mrf.mxu1  ;;  %v12913_v44 = vld [vmem:[#allocation9 + $0x56c] ss:$16 sps:$4 sm:$0xff]  }
 0x329   :  { %17828 = vst [vmem:[#allocation88_spill] sm:$0xff] %v15797_v58  ;;  %v15799_v52 = vadd.f32 %v3031_v51, %v2928_v3  ;;  %5077 = vmatprep.subr.bf16.mxu1 %v12907_v20  ;;  %4926 = vmatmul.mubr.bf16.gmra.mxu0 %v15333_v28  ;;  %v2932_v42 = vpop.f32.mrf.mxu0  ;;  %v12914_v20 = vld [vmem:[#allocation9 + $0x5c8] ss:$16 sps:$4 sm:$0xff]  }
 0x32a   :  { %4813 = vmatmul.mubr.bf16.gmra.mxu1 %v15225_v47  ;;  %v3035_v25 = vpop.f32.mrf.mxu1  ;;  %4979 = vmatpush1.bf16.msra.mxu0 %v12902_v36  ;;  %v12911_v36 = vld [vmem:[#allocation9 + $0x568] ss:$16 sps:$4 sm:$0xff]  }
 0x32b   :  { %17829 = vst [vmem:[#allocation89_spill] sm:$0xff] %v15799_v52  ;;  %4822 = vmatprep.mubr.bf16.mxu1 %v15347_v61  ;;  %v15804_v41 = vadd.f32 %v3035_v25, %v2932_v42  ;;  %11569 = vmatprep.mubr.msk.bf16.mxu0 %vm2660_vm2, %v15448_v13  ;;  %v2934_v51 = vpop.f32.mrf.mxu0 }
 0x32c   :  { %v3037_v46 = vpop.f32.mrf.mxu1  ;;  %4980 = vmatprep.subr.bf16.mxu0 %v12910_v63  ;;  %5078 = vmatpush1.bf16.msra.mxu1 %v12905_v22  ;;  %v12922_v63 = vld [vmem:[#allocation9 + $0x5ac] ss:$16 sps:$4 sm:$0xff]  }
 0x32d   :  { %17830 = vst [vmem:[#allocation90_spill] sm:$0xff] %v15804_v41  ;;  %v15808_v18 = vadd.f32 %v3037_v46, %v2934_v51  ;;  %v2936_v60 = vpop.f32.mrf.mxu0  ;;  %5079 = vmatprep.subr.bf16.mxu1 %v12916_v53  ;;  %v12919_v41 = vld [vmem:[#allocation9 + $0x54c] ss:$16 sps:$4 sm:$0xff]   ;;  %v12920_v46 = vld [vmem:[#allocation9 + $0x5a8] ss:$16 sps:$4 sm:$0xff]  }
 0x32e   :  { %v3039_v3 = vpop.f32.mrf.mxu1  ;;  %4981 = vmatpush1.bf16.msra.mxu0 %v12908_v29  ;;  %v12917_v29 = vld [vmem:[#allocation9 + $0x548] ss:$16 sps:$4 sm:$0xff]  }
 0x32f   :  { %17831 = vst [vmem:[#allocation91_spill] sm:$0xff] %v15808_v18  ;;  %v15810_v52 = vadd.f32 %v3039_v3, %v2936_v60  ;;  %v2938_v42 = vpop.f32.mrf.mxu0  ;;  %4982 = vmatprep.subr.bf16.mxu0 %v12913_v44  ;;  %v12928_v60 = vld [vmem:[#allocation9 + $0x58c] ss:$16 sps:$4 sm:$0xff]  }
 0x330   :  { %v3041_v25 = vpop.f32.mrf.mxu1  ;;  %5080 = vmatpush1.bf16.msra.mxu1 %v12914_v20  ;;  %v17835_v44 = vld [vmem:[#allocation26_spill] sm:$0xff] }
 0x331   :  { %17832 = vst [vmem:[#allocation92_spill] sm:$0xff] %v15810_v52  ;;  %v15812_v58 = vadd.f32 %v3041_v25, %v2938_v42  ;;  %4936 = vmatmul.mubr.bf16.gmra.mxu0 %v15436_v45  ;;  %v2942_v22 = vpop.f32.mrf.mxu0  ;;  %v12925_v42 = vld [vmem:[#allocation9 + $0x52c] ss:$16 sps:$4 sm:$0xff]   ;;  %5081 = vmatprep.subr.bf16.mxu1 %v12922_v63 }
 0x332   :  { %4823 = vmatmul.mubr.bf16.gmra.mxu1 %v15324_v10  ;;  %v3045_v51 = vpop.f32.mrf.mxu1  ;;  %4983 = vmatpush2.bf16.msra.mxu0 %v12911_v36  ;;  %v12923_v36 = vld [vmem:[#allocation9 + $0x528] ss:$16 sps:$4 sm:$0xff]  }
 0x333   :  { %17833 = vst [vmem:[#allocation94_spill] sm:$0xff] %v15812_v58  ;;  %4832 = vmatprep.mubr.bf16.mxu1 %v15445_v34  ;;  %v15817_v53 = vadd.f32 %v3045_v51, %v2942_v22  ;;  %11570 = vmatprep.mubr.msk.bf16.mxu0 %vm2660_vm2, %v17835_v44  ;;  %v2944_v3 = vpop.f32.mrf.mxu0 }
 0x334   :  { %v3047_v20 = vpop.f32.mrf.mxu1  ;;  %4984 = vmatprep.subr.bf16.mxu0 %v12919_v41  ;;  %5082 = vmatpush1.bf16.msra.mxu1 %v12920_v46  ;;  %v12934_v41 = vld [vmem:[#allocation9 + $0x6ec] ss:$16 sps:$4 sm:$0xff]  }
 0x335   :  { %17834 = vst [vmem:[#allocation93_spill] sm:$0xff] %v15817_v53  ;;  %v15821_v25 = vadd.f32 %v3047_v20, %v2944_v3  ;;  %v2946_v58 = vpop.f32.mrf.mxu0  ;;  %5083 = vmatprep.subr.bf16.mxu1 %v12928_v60  ;;  %v12926_v53 = vld [vmem:[#allocation9 + $0x588] ss:$16 sps:$4 sm:$0xff]   ;;  %v17841_v20 = vld [vmem:[#allocation61_spill] sm:$0xff] }
 0x336   :  { %v3049_v52 = vpop.f32.mrf.mxu1  ;;  %4985 = vmatpush2.bf16.msra.mxu0 %v12917_v29  ;;  %v17840_v3 = vld [vmem:[#allocation60_spill] sm:$0xff]  ;;  %v17843_v29 = vld [vmem:[#allocation70_spill] sm:$0xff] }
 0x337   :  { %17836 = vst [vmem:[#allocation95_spill] sm:$0xff] %v15821_v25  ;;  %v15823_v18 = vadd.f32 %v3049_v52, %v2946_v58  ;;  %v2948_v22 = vpop.f32.mrf.mxu0  ;;  %4986 = vmatprep.subr.bf16.mxu0 %v12925_v42  ;;  %v12929_v58 = vld [vmem:[#allocation9 + $0x508] ss:$16 sps:$4 sm:$0xff]  }
 0x338   :  { %v3051_v51 = vpop.f32.mrf.mxu1  ;;  %5084 = vmatpush1.bf16.msra.mxu1 %v12926_v53  ;;  %v12938_v53 = vld [vmem:[#allocation9 + $0x6c8] ss:$16 sps:$4 sm:$0xff]  }
 0x339   :  { %17837 = vst [vmem:[#allocation96_spill] sm:$0xff] %v15823_v18  ;;  %v15825_v35 = vadd.f32 %v3051_v51, %v2948_v22  ;;  %4946 = vmatmul.mubr.bf16.gmra.mxu0 %v17840_v3  ;;  %v2952_v63 = vpop.f32.mrf.mxu0  ;;  %v12932_v22 = vld [vmem:[#allocation9 + $0x6e8] ss:$16 sps:$4 sm:$0xff]   ;;  %v12937_v51 = vld [vmem:[#allocation9 + $0x4ec] ss:$16 sps:$4 sm:$0xff]   ;;  %5093 = vmatprep.subr.bf16.mxu1 %v12934_v41 }
 0x33a   :  { %4833 = vmatmul.mubr.bf16.gmra.mxu1 %v17839_v8  ;;  %v3055_v46 = vpop.f32.mrf.mxu1  ;;  %4987 = vmatpush2.bf16.msra.mxu0 %v12923_v36  ;;  %v12940_v18 = vld [vmem:[#allocation9 + $0x6cc] ss:$16 sps:$4 sm:$0xff]  }
 0x33b   :  { %17838 = vst [vmem:[#allocation97_spill] sm:$0xff] %v15825_v35  ;;  %4842 = vmatprep.mubr.bf16.mxu1 %v17841_v20  ;;  %v15830_v52 = vadd.f32 %v3055_v46, %v2952_v63  ;;  %11571 = vmatprep.mubr.msk.bf16.mxu0 %vm2660_vm2, %v17843_v29  ;;  %v2954_v60 = vpop.f32.mrf.mxu0  ;;  %v12935_v63 = vld [vmem:[#allocation9 + $0x4e8] ss:$16 sps:$4 sm:$0xff]  }
 0x33c   :  { %v3057_v42 = vpop.f32.mrf.mxu1  ;;  %4988 = vmatprep.subr.bf16.mxu0 %v12931_v11  ;;  %5094 = vmatpush2.bf16.msra.mxu1 %v12932_v22  ;;  %v17848_v11 = vld [vmem:[#allocation66_spill] sm:$0xff] }
 0x33d   :  { %17842 = vst [vmem:[#allocation99_spill] sm:$0xff] %v15830_v52  ;;  %v15834_v35 = vadd.f32 %v3057_v42, %v2954_v60  ;;  %v2956_v25 = vpop.f32.mrf.mxu0  ;;  %5095 = vmatprep.subr.bf16.mxu1 %v12940_v18  ;;  %v12946_v60 = vld [vmem:[#allocation9 + $0x6ac] ss:$16 sps:$4 sm:$0xff]   ;;  %v17847_v42 = vld [vmem:[#allocation59_spill] sm:$0xff]  ;;  %v12944_v18 = vld [vmem:[#allocation9 + $0x6a8] ss:$16 sps:$4 sm:$0xff]  }
 0x33e   :  { %v3059_v19 = vpop.f32.mrf.mxu1  ;;  %4989 = vmatpush2.bf16.msra.mxu0 %v12929_v58  ;;  %v17849_v58 = vld [vmem:[#allocation69_spill] sm:$0xff] }
 0x33f   :  { %17844 = vst [vmem:[#allocation100_spill] sm:$0xff] %v15834_v35  ;;  %v15836_v36 = vadd.f32 %v3059_v19, %v2956_v25  ;;  %v2958_v46 = vpop.f32.mrf.mxu0  ;;  %4990 = vmatprep.subr.bf16.mxu0 %v12937_v51  ;;  %v12941_v25 = vld [vmem:[#allocation9 + $0x4c8] ss:$16 sps:$4 sm:$0xff]   ;;  %v12949_v51 = vld [vmem:[#allocation9 + $0x4ac] ss:$16 sps:$4 sm:$0xff]  }
 0x340   :  { %v3061_v52 = vpop.f32.mrf.mxu1  ;;  %5096 = vmatpush2.bf16.msra.mxu1 %v12938_v53  ;;  %v12955_v53 = vld [vmem:[#allocation9 + $0x48c] ss:$16 sps:$4 sm:$0xff]  }
 0x341   :  { %17845 = vst [vmem:[#allocation101_spill] sm:$0xff] %v15836_v36  ;;  %v15838_v9 = vadd.f32 %v3061_v52, %v2958_v46  ;;  %4956 = vmatmul.mubr.bf16.gmra.mxu0 %v17848_v11  ;;  %v2962_v41 = vpop.f32.mrf.mxu0  ;;  %5097 = vmatprep.subr.bf16.mxu1 %v12946_v60 }
 0x342   :  { %4843 = vmatmul.mubr.bf16.gmra.mxu1 %v17847_v42  ;;  %v3065_v35 = vpop.f32.mrf.mxu1  ;;  %4991 = vmatpush2.bf16.msra.mxu0 %v12935_v63 }
 0x343   :  { %17846 = vst [vmem:[#allocation102_spill] sm:$0xff] %v15838_v9  ;;  %4852 = vmatprep.mubr.bf16.mxu1 %v17849_v58  ;;  %v15843_v19 = vadd.f32 %v3065_v35, %v2962_v41  ;;  %4998 = vmatprep.mubr.bf16.mxu0 %v15041_v49  ;;  %v2964_v52 = vpop.f32.mrf.mxu0  ;;  %v12952_v9 = vld [vmem:[#allocation9 + $0x68c] ss:$16 sps:$4 sm:$0xff]   ;;  %v12947_v35 = vld [vmem:[#allocation9 + $0x4a8] ss:$16 sps:$4 sm:$0xff]  }
 0x344   :  { %v3067_v22 = vpop.f32.mrf.mxu1  ;;  %4992 = vmatprep.subr.bf16.mxu0 %v12943_v50  ;;  %5098 = vmatpush2.bf16.msra.mxu1 %v12944_v18  ;;  %v12950_v49 = vld [vmem:[#allocation9 + $0x688] ss:$16 sps:$4 sm:$0xff]   ;;  %v12961_v18 = vld [vmem:[#allocation9 + $0x2e4] ss:$16 sps:$4 sm:$0xff]  }
 0x345   :  { %17850 = vst [vmem:[#allocation103_spill] sm:$0xff] %v15843_v19  ;;  %v15846_v46 = vadd.f32 %v3067_v22, %v2964_v52  ;;  %v2966_v36 = vpop.f32.mrf.mxu0  ;;  %5099 = vmatprep.subr.bf16.mxu1 %v12952_v9  ;;  %v12958_v52 = vld [vmem:[#allocation9 + $0xe4] ss:$16 sps:$4 sm:$0xff]  }
 0x346   :  { %v3069_v62 = vpop.f32.mrf.mxu1  ;;  %4993 = vmatpush2.bf16.msra.mxu0 %v12941_v25  ;;  %v17854_v22 = vld [vmem:[#allocation63_spill] sm:$0xff] }
 0x347   :  { %17851 = vst [vmem:[#allocation33_spill] sm:$0xff] %v15846_v46  ;;  %v15848_v39 = vadd.f32 %v3069_v62, %v2966_v36  ;;  %v2968_v63 = vpop.f32.mrf.mxu0  ;;  %4994 = vmatprep.subr.bf16.mxu0 %v12949_v51  ;;  %v12953_v36 = vld [vmem:[#allocation9 + $0x488] ss:$16 sps:$4 sm:$0xff]  }
 0x348   :  { %v3071_v41 = vpop.f32.mrf.mxu1  ;;  %5100 = vmatpush2.bf16.msra.mxu1 %v12950_v49 }
 0x349   :  { %17852 = vst [vmem:[#allocation34_spill] sm:$0xff] %v15848_v39  ;;  %v15850_v19 = vadd.f32 %v3071_v41, %v2968_v63  ;;  %v2972_v50 = vpop.f32.mrf.mxu0  ;;  %5732 = vmatprep.subr.bf16.mxu1 %v12958_v52 }
 0x34a   :  { %4853 = vmatmul.mubr.bf16.gmra.mxu1 %v17854_v22  ;;  %v3075_v60 = vpop.f32.mrf.mxu1  ;;  %4995 = vmatpush2.bf16.msra.mxu0 %v12947_v35  ;;  %v12956_v35 = vld [vmem:[#allocation9 + $0xe0] ss:$16 sps:$4 sm:$0xff]  }
 0x34b   :  { %17853 = vst [vmem:[#allocation39_spill] sm:$0xff] %v15850_v19  ;;  %11572 = vmatprep.mubr.msk.bf16.mxu1 %vm2660_vm2, %v15045_v12  ;;  %v15855_v62 = vadd.f32 %v3075_v60, %v2972_v50  ;;  %v2974_v25 = vpop.f32.mrf.mxu0  ;;  %4996 = vmatprep.subr.bf16.mxu0 %v12955_v53  ;;  %v12959_v12 = vld [vmem:[#allocation9 + $0x2e0] ss:$16 sps:$4 sm:$0xff]   ;;  %v12964_v60 = vld [vmem:[#allocation9 + $0xc4] ss:$16 sps:$4 sm:$0xff]  }
 0x34c   :  { %v3077_v51 = vpop.f32.mrf.mxu1 }
 0x34d   :  { %17855 = vst [vmem:[#allocation40_spill] sm:$0xff] %v15855_v62  ;;  %v15857_v63 = vadd.f32 %v3077_v51, %v2974_v25  ;;  %v2976_v9 = vpop.f32.mrf.mxu0  ;;  %v12967_v62 = vld [vmem:[#allocation9 + $0x2c4] ss:$16 sps:$4 sm:$0xff]   ;;  %v12965_v25 = vld [vmem:[#allocation9 + $0x2c0] ss:$16 sps:$4 sm:$0xff]  }
 0x34e   :  { %v3079_v41 = vpop.f32.mrf.mxu1  ;;  %4997 = vmatpush2.bf16.msra.mxu0 %v12953_v36  ;;  %v12962_v36 = vld [vmem:[#allocation9 + $0xc0] ss:$16 sps:$4 sm:$0xff]   ;;  %v12970_v51 = vld [vmem:[#allocation9 + $0xa4] ss:$16 sps:$4 sm:$0xff]  }
 0x34f   :  { %v15859_v19 = vadd.f32 %v3079_v41, %v2976_v9  ;;  %v2978_v39 = vpop.f32.mrf.mxu0  ;;  %5835 = vmatprep.subr.bf16.mxu0 %v12961_v18  ;;  %v12968_v41 = vld [vmem:[#allocation9 + $0xa0] ss:$16 sps:$4 sm:$0xff]  }
 0x350   :  { %v3081_v46 = vpop.f32.mrf.mxu1 }
 0x351   :  { %v15861_v50 = vadd.f32 %v3081_v46, %v2978_v39  ;;  %4999 = vmatmul.mubr.bf16.vlgmr.msra.gmra.mxu0 %v17784_v16  ;;  %v2982_v49 = vpop.f32.mrf.mxu0 }
 0x352   :  { %5102 = vmatmul.mubr.bf16.vlgmr.msra.gmra.mxu1 %v17785_v27  ;;  %v3085_v53 = vpop.f32.mrf.mxu1  ;;  %5008 = vmatprep.mubr.bf16.mxu0 %v17786_v1  ;;  %v12973_v27 = vld [vmem:[#allocation9 + $0x2a4] ss:$16 sps:$4 sm:$0xff]  }
 0x353   :  { %5733 = vmatpush1.bf16.msra.mxu1 %v12956_v35  ;;  %v15866_v52 = vadd.f32 %v3085_v53, %v2982_v49  ;;  %11573 = vmatprep.mubr.msk.bf16.mxu1 %vm2660_vm2, %v17787_v54  ;;  %v2984_v39 = vpop.f32.mrf.mxu0  ;;  %v12971_v53 = vld [vmem:[#allocation9 + $0x2a0] ss:$16 sps:$4 sm:$0xff]  }
 0x354   :  { %5836 = vmatpush1.bf16.msra.mxu0 %v12959_v12  ;;  %v3087_v46 = vpop.f32.mrf.mxu1  ;;  %5734 = vmatprep.subr.bf16.mxu1 %v12964_v60  ;;  %v12976_v12 = vld [vmem:[#allocation9 + $0x84] ss:$16 sps:$4 sm:$0xff]  }
 0x355   :  { %v15870_v16 = vadd.f32 %v3087_v46, %v2984_v39  ;;  %5837 = vmatprep.subr.bf16.mxu0 %v12967_v62  ;;  %v2986_v18 = vpop.f32.mrf.mxu0  ;;  %v12979_v60 = vld [vmem:[#allocation9 + $0x284] ss:$16 sps:$4 sm:$0xff]  }
 0x356   :  { %v3089_v9 = vpop.f32.mrf.mxu1  ;;  %v12982_v46 = vld [vmem:[#allocation9 + $0x64] ss:$16 sps:$4 sm:$0xff]  }
 0x357   :  { %17856 = vst [vmem:[#allocation45_spill] sm:$0xff] %v15870_v16  ;;  %5735 = vmatpush1.bf16.msra.mxu1 %v12962_v36  ;;  %v15872_v1 = vadd.f32 %v3089_v9, %v2986_v18  ;;  %v2988_v35 = vpop.f32.mrf.mxu0  ;;  %v12974_v36 = vld [vmem:[#allocation9 + $0x80] ss:$16 sps:$4 sm:$0xff]   ;;  %v12988_v18 = vld [vmem:[#allocation9 + $0x264] ss:$16 sps:$4 sm:$0xff]  }
 0x358   :  { %5838 = vmatpush1.bf16.msra.mxu0 %v12965_v25  ;;  %5736 = vmatprep.subr.bf16.mxu1 %v12970_v51  ;;  %v3091_v54 = vpop.f32.mrf.mxu1  ;;  %v12977_v25 = vld [vmem:[#allocation9 + $0x280] ss:$16 sps:$4 sm:$0xff]  }
 0x359   :  { %17857 = vst [vmem:[#allocation25_spill] sm:$0xff] %v15872_v1  ;;  %v15874_v49 = vadd.f32 %v3091_v54, %v2988_v35  ;;  %5839 = vmatprep.subr.bf16.mxu0 %v12973_v27  ;;  %5009 = vmatmul.mubr.bf16.gmra.mxu0 %v15124_v24  ;;  %v3812_v62 = vpop.f32.mrf.mxu0  ;;  %v12980_v24 = vld [vmem:[#allocation9 + $0x60] ss:$16 sps:$4 sm:$0xff]   ;;  %v12985_v27 = vld [vmem:[#allocation9 + $0x44] ss:$16 sps:$4 sm:$0xff]  }
 0x35a   :  { %5112 = vmatmul.mubr.bf16.gmra.mxu1 %v15128_v6  ;;  %5018 = vmatprep.mubr.bf16.mxu0 %v15247_v26  ;;  %v12986_v9 = vld [vmem:[#allocation9 + $0x260] ss:$16 sps:$4 sm:$0xff]  }
 0x35b   :  { %17858 = vst [vmem:[#allocation28_spill] sm:$0xff] %v15874_v49  ;;  %5737 = vmatpush1.bf16.msra.mxu1 %v12968_v41  ;;  %11574 = vmatprep.mubr.msk.bf16.mxu1 %vm2660_vm2, %v17788_v48  ;;  %v3814_v39 = vpop.f32.mrf.mxu0  ;;  %v17859_v41 = vld [vmem:[#allocation76_spill] sm:$0xff]  ;;  %v12983_v54 = vld [vmem:[#allocation9 + $0x40] ss:$16 sps:$4 sm:$0xff]  }
 0x35c   :  { %5738 = vmatprep.subr.bf16.mxu1 %v12976_v12  ;;  %5840 = vmatpush1.bf16.msra.mxu0 %v12971_v53  ;;  %v12994_v12 = vld [vmem:[#allocation9 + $0x244] ss:$16 sps:$4 sm:$0xff]   ;;  %v12989_v16 = vld [vmem:[#allocation9 + $0x20] ss:$16 sps:$4 sm:$0xff]  }
 0x35d   :  { %v3816_v51 = vpop.f32.mrf.mxu0  ;;  %5841 = vmatprep.subr.bf16.mxu0 %v12979_v60  ;;  %v17865_v1 = vld [vmem:[#allocation75_spill] sm:$0xff] }
 0x35f   :  { %5739 = vmatpush1.bf16.msra.mxu1 %v12974_v36  ;;  %v3818_v6 = vpop.f32.mrf.mxu0  ;;  %v12991_v36 = vld [vmem:[#allocation9 + $0x24] ss:$16 sps:$4 sm:$0xff]  }
 0x360   :  { %5740 = vmatprep.subr.bf16.mxu1 %v12982_v46  ;;  %5842 = vmatpush1.bf16.msra.mxu0 %v12977_v25 }
 0x361   :  { %5019 = vmatmul.mubr.bf16.gmra.mxu0 %v15225_v47  ;;  %v3822_v48 = vpop.f32.mrf.mxu0  ;;  %5843 = vmatprep.subr.bf16.mxu0 %v12988_v18 }
 0x362   :  { %5122 = vmatmul.mubr.bf16.gmra.mxu1 %v15229_v23  ;;  %v3709_v26 = vpop.f32.mrf.mxu1  ;;  %5028 = vmatprep.mubr.bf16.mxu0 %v15347_v61  ;;  %v17861_v23 = vld [vmem:[#allocation77_spill] sm:$0xff] }
 0x363   :  { %5741 = vmatpush1.bf16.msra.mxu1 %v12980_v24  ;;  %v3710_v35 = vadd.f32 %v3709_v26, %v17859_v41  ;;  %11575 = vmatprep.mubr.msk.bf16.mxu1 %vm2660_vm2, %v15351_v43  ;;  %v3824_v60 = vpop.f32.mrf.mxu0  ;;  %v17862_v26 = vld [vmem:[#allocation78_spill] sm:$0xff]  ;;  %v17863_v41 = vld [vmem:[#allocation79_spill] sm:$0xff] }
 0x364   :  { %v3711_v53 = vpop.f32.mrf.mxu1  ;;  %5742 = vmatprep.subr.bf16.mxu1 %v12985_v27  ;;  %5844 = vmatpush1.bf16.msra.mxu0 %v12986_v9  ;;  %v2826_v61 = vadd.f32 %v17863_v41, %v17862_v26  ;;  %v12997_v9 = vld [vmem:[#allocation9 + $0x4] ss:$16 sps:$4 sm:$0xff]   ;;  %v13001_v41 = vld [vmem:[#allocation9 + $0x1e0] ss:$16 sps:$4 sm:$0xff]  }
 0x365   :  { %v15887_v47 = vadd.f32 %v3812_v62, %v3710_v35  ;;  %v3712_v46 = vadd.f32 %v3711_v53, %v17861_v23  ;;  %v3826_v24 = vpop.f32.mrf.mxu0  ;;  %5845 = vmatprep.subr.bf16.mxu0 %v12994_v12  ;;  %v12992_v35 = vld [vmem:[#allocation9 + $0x240] ss:$16 sps:$4 sm:$0xff]   ;;  %v13000_v53 = vld [vmem:[#allocation9 + $0x224] ss:$16 sps:$4 sm:$0xff]  }
 0x366   :  { %v3713_v25 = vpop.f32.mrf.mxu1  ;;  %v12995_v12 = vld [vmem:[#allocation9] ss:$16 sps:$4 sm:$0xff]  }
 0x367   :  { %17860 = vst [vmem:[#allocation30_spill] sm:$0xff] %v15887_v47  ;;  %v15892_v49 = vadd.f32 %v3814_v39, %v3712_v46  ;;  %5743 = vmatpush1.bf16.msra.mxu1 %v12983_v54  ;;  %v3714_v43 = vadd.f32 %v3713_v25, %v17865_v1  ;;  %v3828_v62 = vpop.f32.mrf.mxu0  ;;  %v12998_v46 = vld [vmem:[#allocation9 + $0x220] ss:$16 sps:$4 sm:$0xff]  }
 0x368   :  { %v3715_v27 = vpop.f32.mrf.mxu1  ;;  %5744 = vmatprep.subr.bf16.mxu1 %v12991_v36  ;;  %5846 = vmatpush1.bf16.msra.mxu0 %v12992_v35  ;;  %v13009_v35 = vld [vmem:[#allocation9 + $0x1c4] ss:$16 sps:$4 sm:$0xff]  }
 0x369   :  { %17864 = vst [vmem:[#allocation38_spill] sm:$0xff] %v15892_v49  ;;  %v15895_v47 = vadd.f32 %v3816_v51, %v3714_v43  ;;  %v3716_v18 = vadd.f32 %v3715_v27, %v2826_v61  ;;  %5029 = vmatmul.mubr.bf16.gmra.mxu0 %v15324_v10  ;;  %v3832_v23 = vpop.f32.mrf.mxu0  ;;  %v13003_v10 = vld [vmem:[#allocation9 + $0x1e4] ss:$16 sps:$4 sm:$0xff]   ;;  %5847 = vmatprep.subr.bf16.mxu0 %v13000_v53  ;;  %v13004_v43 = vld [vmem:[#allocation9 + $0x200] ss:$16 sps:$4 sm:$0xff]  }
 0x36a   :  { %5132 = vmatmul.mubr.bf16.gmra.mxu1 %v15333_v28  ;;  %v3719_v39 = vpop.f32.mrf.mxu1  ;;  %5038 = vmatprep.mubr.bf16.mxu0 %v15445_v34  ;;  %v2836_v34 = vadd.f32 %v15701_v21, %v15699_v17 }
 0x36b   :  { %17866 = vst [vmem:[#allocation29_spill] sm:$0xff] %v15895_v47  ;;  %v15899_v54 = vadd.f32 %v3818_v6, %v3716_v18  ;;  %5745 = vmatpush1.bf16.msra.mxu1 %v12989_v16  ;;  %v3720_v1 = vadd.f32 %v3719_v39, %v15689_v30  ;;  %11576 = vmatprep.mubr.msk.bf16.mxu1 %vm2660_vm2, %v15448_v13  ;;  %v3834_v36 = vpop.f32.mrf.mxu0  ;;  %v13006_v16 = vld [vmem:[#allocation9 + $0x204] ss:$16 sps:$4 sm:$0xff]   ;;  %v13010_v39 = vld [vmem:[#allocation9 + $0x360] ss:$16 sps:$4 sm:$0xff]  }
 0x36c   :  { %v3721_v51 = vpop.f32.mrf.mxu1  ;;  %5746 = vmatprep.subr.bf16.mxu1 %v12997_v9  ;;  %5848 = vmatpush1.bf16.msra.mxu0 %v12998_v46  ;;  %v13012_v18 = vld [vmem:[#allocation9 + $0x364] ss:$16 sps:$4 sm:$0xff]   ;;  %v13007_v9 = vld [vmem:[#allocation9 + $0x1c0] ss:$16 sps:$4 sm:$0xff]  }
 0x36d   :  { %17867 = vst [vmem:[#allocation26_spill] sm:$0xff] %v15899_v54  ;;  %v15905_v25 = vadd.f32 %v3822_v48, %v3720_v1  ;;  %v3722_v28 = vadd.f32 %v3721_v51, %v15692_v33  ;;  %v3836_v30 = vpop.f32.mrf.mxu0  ;;  %5849 = vmatprep.subr.bf16.mxu0 %v13006_v16  ;;  %v13013_v46 = vld [vmem:[#allocation9 + $0x1a0] ss:$16 sps:$4 sm:$0xff]  }
 0x36e   :  { %v3723_v6 = vpop.f32.mrf.mxu1 }
 0x36f   :  { %17868 = vst [vmem:[#allocation54_spill] sm:$0xff] %v15905_v25  ;;  %v15910_v26 = vadd.f32 %v3824_v60, %v3722_v28  ;;  %5747 = vmatpush1.bf16.msra.mxu1 %v12995_v12  ;;  %v3724_v13 = vadd.f32 %v3723_v6, %v15694_v5  ;;  %v3838_v48 = vpop.f32.mrf.mxu0  ;;  %v13021_v28 = vld [vmem:[#allocation9 + $0x184] ss:$16 sps:$4 sm:$0xff]   ;;  %v13016_v6 = vld [vmem:[#allocation9 + $0x340] ss:$16 sps:$4 sm:$0xff]  }
 0x370   :  { %v3725_v61 = vpop.f32.mrf.mxu1  ;;  %5748 = vmatprep.subr.bf16.mxu1 %v13003_v10  ;;  %5850 = vmatpush1.bf16.msra.mxu0 %v13004_v43  ;;  %v13210_v25 = vld [vmem:[#allocation7 + $0x804] ss:$16 sps:$4 sm:$0xff]  }
 0x371   :  { %17869 = vst [vmem:[#allocation60_spill] sm:$0xff] %v15910_v26  ;;  %v15913_v33 = vadd.f32 %v3826_v24, %v3724_v13  ;;  %v3726_v27 = vadd.f32 %v3725_v61, %v2836_v34  ;;  %5039 = vmatmul.mubr.bf16.gmra.mxu0 %v17839_v8  ;;  %v3842_v21 = vpop.f32.mrf.mxu0  ;;  %v13015_v8 = vld [vmem:[#allocation9 + $0x1a4] ss:$16 sps:$4 sm:$0xff]   ;;  %5859 = vmatprep.subr.bf16.mxu0 %v13012_v18  ;;  %v13019_v13 = vld [vmem:[#allocation9 + $0x180] ss:$16 sps:$4 sm:$0xff]  }
 0x372   :  { %5142 = vmatmul.mubr.bf16.gmra.mxu1 %v15436_v45  ;;  %v3729_v17 = vpop.f32.mrf.mxu1  ;;  %5048 = vmatprep.mubr.bf16.mxu0 %v17841_v20  ;;  %v2846_v20 = vadd.f32 %v15721_v15, %v15719_v57 }
 0x373   :  { %17870 = vst [vmem:[#allocation61_spill] sm:$0xff] %v15913_v33  ;;  %v15917_v60 = vadd.f32 %v3828_v62, %v3726_v27  ;;  %5749 = vmatpush2.bf16.msra.mxu1 %v13001_v41  ;;  %v3730_v5 = vadd.f32 %v3729_v17, %v15706_v7  ;;  %11577 = vmatprep.mubr.msk.bf16.mxu1 %vm2660_vm2, %v17835_v44  ;;  %v3844_v53 = vpop.f32.mrf.mxu0  ;;  %v13018_v62 = vld [vmem:[#allocation9 + $0x344] ss:$16 sps:$4 sm:$0xff]  }
 0x374   :  { %v3731_v24 = vpop.f32.mrf.mxu1  ;;  %5750 = vmatprep.subr.bf16.mxu1 %v13009_v35  ;;  %5860 = vmatpush2.bf16.msra.mxu0 %v13010_v39  ;;  %v13022_v35 = vld [vmem:[#allocation9 + $0x160] ss:$16 sps:$4 sm:$0xff]   ;;  %v13030_v17 = vld [vmem:[#allocation9 + $0x144] ss:$16 sps:$4 sm:$0xff]  }
 0x375   :  { %17871 = vst [vmem:[#allocation70_spill] sm:$0xff] %v15917_v60  ;;  %v15923_v1 = vadd.f32 %v3832_v23, %v3730_v5  ;;  %v3732_v45 = vadd.f32 %v3731_v24, %v15710_v55  ;;  %v3846_v7 = vpop.f32.mrf.mxu0  ;;  %5861 = vmatprep.subr.bf16.mxu0 %v13018_v62  ;;  %v13039_v62 = vld [vmem:[#allocation9 + $0xec] ss:$16 sps:$4 sm:$0xff]   ;;  %v13079_v60 = vld [vmem:[#allocation9 + $0x1e8] ss:$16 sps:$4 sm:$0xff]  }
 0x376   :  { %v3733_v12 = vpop.f32.mrf.mxu1 }
 0x377   :  { %17872 = vst [vmem:[#allocation59_spill] sm:$0xff] %v15923_v1  ;;  %v15928_v51 = vadd.f32 %v3834_v36, %v3732_v45  ;;  %5751 = vmatpush2.bf16.msra.mxu1 %v13007_v9  ;;  %v3734_v44 = vadd.f32 %v3733_v12, %v15712_v4  ;;  %v3848_v23 = vpop.f32.mrf.mxu0  ;;  %v13027_v36 = vld [vmem:[#allocation9 + $0x324] ss:$16 sps:$4 sm:$0xff]   ;;  %v13028_v45 = vld [vmem:[#allocation9 + $0x140] ss:$16 sps:$4 sm:$0xff]   ;;  %v17881_v12 = vld [vmem:[#allocation72_spill] sm:$0xff] }
 0x378   :  { %v3735_v10 = vpop.f32.mrf.mxu1  ;;  %5752 = vmatprep.subr.bf16.mxu1 %v13015_v8  ;;  %5862 = vmatpush2.bf16.msra.mxu0 %v13016_v6  ;;  %v17880_v8 = vld [vmem:[#allocation71_spill] sm:$0xff] }
 0x379   :  { %17873 = vst [vmem:[#allocation66_spill] sm:$0xff] %v15928_v51  ;;  %v15931_v55 = vadd.f32 %v3836_v30, %v3734_v44  ;;  %v3736_v16 = vadd.f32 %v3735_v10, %v2846_v20  ;;  %5049 = vmatmul.mubr.bf16.gmra.mxu0 %v17847_v42  ;;  %v3852_v15 = vpop.f32.mrf.mxu0  ;;  %v13024_v42 = vld [vmem:[#allocation9 + $0x164] ss:$16 sps:$4 sm:$0xff]   ;;  %5863 = vmatprep.subr.bf16.mxu0 %v13027_v36  ;;  %v13045_v36 = vld [vmem:[#allocation9 + $0xcc] ss:$16 sps:$4 sm:$0xff]  }
 0x37a   :  { %5152 = vmatmul.mubr.bf16.gmra.mxu1 %v17840_v3  ;;  %v3739_v57 = vpop.f32.mrf.mxu1  ;;  %5058 = vmatprep.mubr.bf16.mxu0 %v17849_v58 }
 0x37b   :  { %17874 = vst [vmem:[#allocation69_spill] sm:$0xff] %v15931_v55  ;;  %v15935_v34 = vadd.f32 %v3838_v48, %v3736_v16  ;;  %5753 = vmatpush2.bf16.msra.mxu1 %v13013_v46  ;;  %v3740_v4 = vadd.f32 %v3739_v57, %v15726_v32  ;;  %11578 = vmatprep.mubr.msk.bf16.mxu1 %vm2660_vm2, %v17843_v29  ;;  %v3854_v41 = vpop.f32.mrf.mxu0  ;;  %v13025_v48 = vld [vmem:[#allocation9 + $0x320] ss:$16 sps:$4 sm:$0xff]   ;;  %v13042_v57 = vld [vmem:[#allocation9 + $0x104] ss:$16 sps:$4 sm:$0xff]  }
 0x37c   :  { %v3741_v30 = vpop.f32.mrf.mxu1  ;;  %5754 = vmatprep.subr.bf16.mxu1 %v13021_v28  ;;  %5864 = vmatpush2.bf16.msra.mxu0 %v13025_v48  ;;  %v13037_v28 = vld [vmem:[#allocation9 + $0xe8] ss:$16 sps:$4 sm:$0xff]   ;;  %v13198_v55 = vld [vmem:[#allocation7 + $0x844] ss:$16 sps:$4 sm:$0xff]  }
 0x37d   :  { %17875 = vst [vmem:[#allocation63_spill] sm:$0xff] %v15935_v34  ;;  %v15941_v61 = vadd.f32 %v3842_v21, %v3740_v4  ;;  %v3742_v3 = vadd.f32 %v3741_v30, %v15730_v56  ;;  %v3856_v27 = vpop.f32.mrf.mxu0  ;;  %v13033_v56 = vld [vmem:[#allocation9 + $0x304] ss:$16 sps:$4 sm:$0xff]  }
 0x37e   :  { %v3743_v43 = vpop.f32.mrf.mxu1  ;;  %5865 = vmatprep.subr.bf16.mxu0 %v13033_v56  ;;  %v17885_v4 = vld [vmem:[#allocation73_spill] sm:$0xff] }
 0x37f   :  { %17876 = vst [vmem:[#allocation76_spill] sm:$0xff] %v15941_v61  ;;  %v15944_v32 = vadd.f32 %v3844_v53, %v3742_v3  ;;  %5755 = vmatpush2.bf16.msra.mxu1 %v13019_v13  ;;  %v3744_v58 = vadd.f32 %v3743_v43, %v15732_v40  ;;  %v3858_v18 = vpop.f32.mrf.mxu0  ;;  %v13031_v53 = vld [vmem:[#allocation9 + $0x300] ss:$16 sps:$4 sm:$0xff]   ;;  %v13048_v43 = vld [vmem:[#allocation9 + $0xac] ss:$16 sps:$4 sm:$0xff]  }
 0x380   :  { %v3745_v29 = vpop.f32.mrf.mxu1  ;;  %5756 = vmatprep.subr.bf16.mxu1 %v13024_v42  ;;  %5866 = vmatpush2.bf16.msra.mxu0 %v13031_v53  ;;  %v13043_v42 = vld [vmem:[#allocation9 + $0xc8] ss:$16 sps:$4 sm:$0xff]  }
 0x381   :  { %17877 = vst [vmem:[#allocation77_spill] sm:$0xff] %v15944_v32  ;;  %v15947_v5 = vadd.f32 %v3846_v7, %v3744_v58  ;;  %v3746_v21 = vadd.f32 %v3745_v29, %v15734_v2  ;;  %5059 = vmatmul.mubr.bf16.gmra.mxu0 %v17854_v22  ;;  %v3862_v24 = vpop.f32.mrf.mxu0  ;;  %v13036_v7 = vld [vmem:[#allocation9 + $0x124] ss:$16 sps:$4 sm:$0xff]   ;;  %5938 = vmatprep.subr.bf16.mxu0 %v13039_v62  ;;  %v17888_v58 = vld [vmem:[#allocation80_spill] sm:$0xff]  ;;  %v13184_v32 = vld [vmem:[#allocation7 + $0xa40] ss:$16 sps:$4 sm:$0xff]  }
 0x382   :  { %5162 = vmatmul.mubr.bf16.gmra.mxu1 %v17848_v11  ;;  %v3749_v9 = vpop.f32.mrf.mxu1  ;;  %11691 = vmatprep.mubr.msk.bf16.mxu0 %vm2660_vm2, %v17881_v12  ;;  %v13049_v53 = vld [vmem:[#allocation9 + $0x2e8] ss:$16 sps:$4 sm:$0xff]   ;;  %v13054_v62 = vld [vmem:[#allocation9 + $0x8c] ss:$16 sps:$4 sm:$0xff]  }
 0x383   :  { %17878 = vst [vmem:[#allocation78_spill] sm:$0xff] %v15947_v5  ;;  %v15952_v39 = vadd.f32 %v3848_v23, %v3746_v21  ;;  %5757 = vmatpush2.bf16.msra.mxu1 %v13022_v35  ;;  %v3750_v40 = vadd.f32 %v3749_v9, %v15744_v14  ;;  %5764 = vmatprep.mubr.bf16.mxu1 %v17880_v8  ;;  %v3864_v22 = vpop.f32.mrf.mxu0  ;;  %v13034_v23 = vld [vmem:[#allocation9 + $0x120] ss:$16 sps:$4 sm:$0xff]   ;;  %v13046_v21 = vld [vmem:[#allocation9 + $0xa8] ss:$16 sps:$4 sm:$0xff]  }
 0x384   :  { %v3751_v2 = vpop.f32.mrf.mxu1  ;;  %5758 = vmatprep.subr.bf16.mxu1 %v13030_v17 }
 0x385   :  { %17879 = vst [vmem:[#allocation79_spill] sm:$0xff] %v15952_v39  ;;  %v15958_v11 = vadd.f32 %v3852_v15, %v3750_v40  ;;  %v3752_v20 = vadd.f32 %v3751_v2, %v15748_v37  ;;  %v3866_v46 = vpop.f32.mrf.mxu0  ;;  %v13057_v2 = vld [vmem:[#allocation9 + $0x2cc] ss:$16 sps:$4 sm:$0xff]  }
 0x386   :  { %v3753_v44 = vpop.f32.mrf.mxu1 }
 0x387   :  { %17882 = vst [vmem:[#allocation75_spill] sm:$0xff] %v15958_v11  ;;  %v15961_v14 = vadd.f32 %v3854_v41, %v3752_v20  ;;  %5759 = vmatpush2.bf16.msra.mxu1 %v13028_v45  ;;  %v3754_v10 = vadd.f32 %v3753_v44, %v15750_v0  ;;  %v3868_v6 = vpop.f32.mrf.mxu0  ;;  %v13040_v41 = vld [vmem:[#allocation9 + $0x100] ss:$16 sps:$4 sm:$0xff]  }
 0x388   :  { %v3755_v16 = vpop.f32.mrf.mxu1  ;;  %5760 = vmatprep.subr.bf16.mxu1 %v13036_v7  ;;  %v17893_v7 = vld [vmem:[#allocation74_spill] sm:$0xff] }
 0x389   :  { %17883 = vst [vmem:[#allocation71_spill] sm:$0xff] %v15961_v14  ;;  %v15964_v15 = vadd.f32 %v3856_v27, %v3754_v10  ;;  %v3756_v37 = vadd.f32 %v3755_v16, %v15752_v31  ;;  %5868 = vmatmul.mubr.bf16.vlgmr.msra.gmra.mxu0 %v17885_v4  ;;  %v3872_v3 = vpop.f32.mrf.mxu0  ;;  %v13051_v31 = vld [vmem:[#allocation9 + $0x2ec] ss:$16 sps:$4 sm:$0xff]   ;;  %v17896_v10 = vld [vmem:[#allocation37_spill] sm:$0xff]  ;;  %v13052_v16 = vld [vmem:[#allocation9 + $0x88] ss:$16 sps:$4 sm:$0xff]  }
 0x38a   :  { %v3759_v13 = vpop.f32.mrf.mxu1  ;;  %5939 = vmatpush1.bf16.msra.mxu0 %v13037_v28  ;;  %11692 = vmatprep.mubr.msk.bf16.mxu0 %vm2660_vm2, %v17795_v38  ;;  %v13118_v14 = vld [vmem:[#allocation9 + $0x308] ss:$16 sps:$4 sm:$0xff]  }
 0x38b   :  { %17884 = vst [vmem:[#allocation72_spill] sm:$0xff] %v15964_v15  ;;  %v15968_v30 = vadd.f32 %v3858_v18, %v3756_v37  ;;  %5761 = vmatpush2.bf16.msra.mxu1 %v13034_v23  ;;  %v3760_v0 = vadd.f32 %v3759_v13, %v15762_v59  ;;  %5940 = vmatprep.subr.bf16.mxu0 %v13045_v36  ;;  %v17890_v59 = vld [vmem:[#allocation81_spill] sm:$0xff]  ;;  %v3874_v56 = vpop.f32.mrf.mxu0  ;;  %v17897_v23 = vld [vmem:[#allocation83_spill] sm:$0xff]  ;;  %v13055_v36 = vld [vmem:[#allocation9 + $0x2c8] ss:$16 sps:$4 sm:$0xff]  }
 0x38c   :  { %v3761_v48 = vpop.f32.mrf.mxu1  ;;  %5762 = vmatprep.subr.bf16.mxu1 %v13042_v57  ;;  %v13060_v13 = vld [vmem:[#allocation9 + $0x6c] ss:$16 sps:$4 sm:$0xff]  }
 0x38d   :  { %17886 = vst [vmem:[#allocation73_spill] sm:$0xff] %v15968_v30  ;;  %v15973_v27 = vadd.f32 %v3862_v24, %v3760_v0  ;;  %v3762_v35 = vadd.f32 %v3761_v48, %v17888_v58  ;;  %v17892_v24 = vld [vmem:[#allocation82_spill] sm:$0xff]  ;;  %v3876_v57 = vpop.f32.mrf.mxu0  ;;  %v17924_v30 = vld [vmem:[#allocation91_spill] sm:$0xff] }
 0x38e   :  { %v3763_v29 = vpop.f32.mrf.mxu1  ;;  %5941 = vmatpush1.bf16.msra.mxu0 %v13043_v42 }
 0x38f   :  { %17887 = vst [vmem:[#allocation104_spill] sm:$0xff] %v15973_v27  ;;  %v15976_v18 = vadd.f32 %v3864_v22, %v3762_v35  ;;  %5763 = vmatpush2.bf16.msra.mxu1 %v13040_v41  ;;  %v3764_v17 = vadd.f32 %v3763_v29, %v17890_v59  ;;  %5942 = vmatprep.subr.bf16.mxu0 %v13048_v43  ;;  %v17894_v22 = vld [vmem:[#allocation36_spill] sm:$0xff]  ;;  %v3878_v29 = vpop.f32.mrf.mxu0 }
 0x390   :  { %v3765_v9 = vpop.f32.mrf.mxu1  ;;  %6041 = vmatprep.subr.bf16.mxu1 %v13051_v31  ;;  %v17900_v41 = vld [vmem:[#allocation84_spill] sm:$0xff]  ;;  %v17902_v31 = vld [vmem:[#allocation87_spill] sm:$0xff] }
 0x391   :  { %17889 = vst [vmem:[#allocation80_spill] sm:$0xff] %v15976_v18  ;;  %v15979_v40 = vadd.f32 %v3866_v46, %v3764_v17  ;;  %v3766_v45 = vadd.f32 %v3765_v9, %v17892_v24  ;;  %5878 = vmatmul.mubr.bf16.gmra.mxu0 %v17894_v22  ;;  %v17898_v46 = vld [vmem:[#allocation44_spill] sm:$0xff] }
 0x392   :  { %5765 = vmatmul.mubr.bf16.vlgmr.msra.gmra.mxu1 %v17893_v7  ;;  %v3769_v20 = vpop.f32.mrf.mxu1  ;;  %5943 = vmatpush1.bf16.msra.mxu0 %v13046_v21  ;;  %v13058_v35 = vld [vmem:[#allocation9 + $0x68] ss:$16 sps:$4 sm:$0xff]   ;;  %v13069_v24 = vld [vmem:[#allocation9 + $0x28c] ss:$16 sps:$4 sm:$0xff]  }
 0x393   :  { %17891 = vst [vmem:[#allocation81_spill] sm:$0xff] %v15979_v40  ;;  %v15984_v44 = vadd.f32 %v3868_v6, %v3766_v45  ;;  %5774 = vmatprep.mubr.bf16.mxu1 %v17896_v10  ;;  %v3770_v28 = vadd.f32 %v3769_v20, %v17897_v23  ;;  %6042 = vmatpush1.bf16.msra.mxu1 %v13049_v53  ;;  %v13063_v6 = vld [vmem:[#allocation9 + $0x2ac] ss:$16 sps:$4 sm:$0xff]   ;;  %v13061_v17 = vld [vmem:[#allocation9 + $0x2a8] ss:$16 sps:$4 sm:$0xff]   ;;  %v17905_v45 = vld [vmem:[#allocation35_spill] sm:$0xff] }
 0x394   :  { %11693 = vmatprep.mubr.msk.bf16.mxu0 %vm2660_vm2, %v17898_v46  ;;  %v3771_v37 = vpop.f32.mrf.mxu1  ;;  %5944 = vmatprep.subr.bf16.mxu0 %v13054_v62  ;;  %v13066_v53 = vld [vmem:[#allocation9 + $0x4c] ss:$16 sps:$4 sm:$0xff]   ;;  %v17908_v23 = vld [vmem:[#allocation43_spill] sm:$0xff]  ;;  %v13103_v40 = vld [vmem:[#allocation9 + $0x168] ss:$16 sps:$4 sm:$0xff]  }
 0x395   :  { %17895 = vst [vmem:[#allocation82_spill] sm:$0xff] %v15984_v44  ;;  %v15990_v0 = vadd.f32 %v3872_v3, %v3770_v28  ;;  %v3772_v42 = vadd.f32 %v3771_v37, %v17900_v41  ;;  %6043 = vmatprep.subr.bf16.mxu1 %v13057_v2  ;;  %v17904_v3 = vld [vmem:[#allocation98_spill] sm:$0xff]  ;;  %v17909_v28 = vld [vmem:[#allocation85_spill] sm:$0xff] }
 0x396   :  { %v3773_v48 = vpop.f32.mrf.mxu1  ;;  %5945 = vmatpush1.bf16.msra.mxu0 %v13052_v16  ;;  %v17910_v37 = vld [vmem:[#allocation50_spill] sm:$0xff] }
 0x397   :  { %17899 = vst [vmem:[#allocation74_spill] sm:$0xff] %v15990_v0  ;;  %v15993_v43 = vadd.f32 %v3874_v56, %v3772_v42  ;;  %v3774_v58 = vadd.f32 %v3773_v48, %v17902_v31  ;;  %6044 = vmatpush1.bf16.msra.mxu1 %v13055_v36  ;;  %5946 = vmatprep.subr.bf16.mxu0 %v13060_v13  ;;  %v17906_v56 = vld [vmem:[#allocation42_spill] sm:$0xff] }
 0x398   :  { %v3775_v59 = vpop.f32.mrf.mxu1  ;;  %6045 = vmatprep.subr.bf16.mxu1 %v13063_v6  ;;  %v13067_v41 = vld [vmem:[#allocation9 + $0x288] ss:$16 sps:$4 sm:$0xff]   ;;  %v13072_v42 = vld [vmem:[#allocation9 + $0x2c] ss:$16 sps:$4 sm:$0xff]  }
 0x399   :  { %17901 = vst [vmem:[#allocation36_spill] sm:$0xff] %v15993_v43  ;;  %v15996_v21 = vadd.f32 %v3876_v57, %v3774_v58  ;;  %v3776_v9 = vadd.f32 %v3775_v59, %v17904_v3  ;;  %5888 = vmatmul.mubr.bf16.gmra.mxu0 %v17906_v56  ;;  %v3915_v62 = vpop.f32.mrf.mxu0  ;;  %v13064_v57 = vld [vmem:[#allocation9 + $0x48] ss:$16 sps:$4 sm:$0xff]   ;;  %v13075_v58 = vld [vmem:[#allocation9 + $0x26c] ss:$16 sps:$4 sm:$0xff]  }
 0x39a   :  { %5775 = vmatmul.mubr.bf16.gmra.mxu1 %v17905_v45  ;;  %v4018_v2 = vpop.f32.mrf.mxu1  ;;  %5947 = vmatpush1.bf16.msra.mxu0 %v13058_v35  ;;  %v3916_v16 = vadd.f32 %v3915_v62, %v17909_v28  ;;  %v17912_v48 = vld [vmem:[#allocation86_spill] sm:$0xff]  ;;  %v17914_v3 = vld [vmem:[#allocation88_spill] sm:$0xff] }
 0x39b   :  { %17903 = vst [vmem:[#allocation37_spill] sm:$0xff] %v15996_v21  ;;  %v16001_v20 = vadd.f32 %v3878_v29, %v3776_v9  ;;  %5784 = vmatprep.mubr.bf16.mxu1 %v17908_v23  ;;  %11694 = vmatprep.mubr.msk.bf16.mxu0 %vm2660_vm2, %v17910_v37  ;;  %v3917_v36 = vpop.f32.mrf.mxu0  ;;  %v13070_v62 = vld [vmem:[#allocation9 + $0x28] ss:$16 sps:$4 sm:$0xff]  }
 0x39c   :  { %6046 = vmatpush1.bf16.msra.mxu1 %v13061_v17  ;;  %v4020_v13 = vpop.f32.mrf.mxu1  ;;  %v16007_v6 = vadd.f32 %v4018_v2, %v3916_v16  ;;  %v3918_v31 = vadd.f32 %v3917_v36, %v17912_v48  ;;  %5948 = vmatprep.subr.bf16.mxu0 %v13066_v53  ;;  %v17916_v16 = vld [vmem:[#allocation89_spill] sm:$0xff]  ;;  %v13073_v53 = vld [vmem:[#allocation9 + $0x268] ss:$16 sps:$4 sm:$0xff]   ;;  %v17918_v48 = vld [vmem:[#allocation47_spill] sm:$0xff] }
 0x39d   :  { %17907 = vst [vmem:[#allocation83_spill] sm:$0xff] %v16001_v20  ;;  %6047 = vmatprep.subr.bf16.mxu1 %v13069_v24  ;;  %v3919_v29 = vpop.f32.mrf.mxu0  ;;  %v13078_v20 = vld [vmem:[#allocation9 + $0xc] ss:$16 sps:$4 sm:$0xff]   ;;  %v17917_v24 = vld [vmem:[#allocation41_spill] sm:$0xff]  ;;  %v13106_v27 = vld [vmem:[#allocation9 + $0x348] ss:$16 sps:$4 sm:$0xff]  }
 0x39e   :  { %17911 = vst [vmem:[#allocation44_spill] sm:$0xff] %v16007_v6  ;;  %v4022_v35 = vpop.f32.mrf.mxu1  ;;  %v16010_v59 = vadd.f32 %v4020_v13, %v3918_v31  ;;  %5949 = vmatpush1.bf16.msra.mxu0 %v13064_v57  ;;  %v3920_v9 = vadd.f32 %v3919_v29, %v17914_v3  ;;  %v13084_v31 = vld [vmem:[#allocation9 + $0x24c] ss:$16 sps:$4 sm:$0xff]  }
 0x39f   :  { %v3921_v17 = vpop.f32.mrf.mxu0  ;;  %5950 = vmatprep.subr.bf16.mxu0 %v13072_v42  ;;  %v17921_v42 = vld [vmem:[#allocation90_spill] sm:$0xff] }
 0x3a0   :  { %17913 = vst [vmem:[#allocation84_spill] sm:$0xff] %v16010_v59  ;;  %6048 = vmatpush1.bf16.msra.mxu1 %v13067_v41  ;;  %v4024_v28 = vpop.f32.mrf.mxu1  ;;  %v16013_v2 = vadd.f32 %v4022_v35, %v3920_v9  ;;  %v3922_v36 = vadd.f32 %v3921_v17, %v17916_v16  ;;  %v17920_v41 = vld [vmem:[#allocation49_spill] sm:$0xff]  ;;  %v13076_v35 = vld [vmem:[#allocation9 + $0x8] ss:$16 sps:$4 sm:$0xff]   ;;  %v13081_v16 = vld [vmem:[#allocation9 + $0x1ec] ss:$16 sps:$4 sm:$0xff]  }
 0x3a1   :  { %6049 = vmatprep.subr.bf16.mxu1 %v13075_v58  ;;  %5898 = vmatmul.mubr.bf16.gmra.mxu0 %v17918_v48  ;;  %v3925_v13 = vpop.f32.mrf.mxu0  ;;  %v17922_v9 = vld [vmem:[#allocation53_spill] sm:$0xff] }
 0x3a2   :  { %17915 = vst [vmem:[#allocation87_spill] sm:$0xff] %v16013_v2  ;;  %5785 = vmatmul.mubr.bf16.gmra.mxu1 %v17917_v24  ;;  %v4028_v57 = vpop.f32.mrf.mxu1  ;;  %v16018_v29 = vadd.f32 %v4024_v28, %v3922_v36  ;;  %5951 = vmatpush1.bf16.msra.mxu0 %v13070_v62  ;;  %v3926_v3 = vadd.f32 %v3925_v13, %v17921_v42  ;;  %v13082_v28 = vld [vmem:[#allocation9 + $0x248] ss:$16 sps:$4 sm:$0xff]  }
 0x3a3   :  { %5794 = vmatprep.mubr.bf16.mxu1 %v17920_v41  ;;  %11695 = vmatprep.mubr.msk.bf16.mxu0 %vm2660_vm2, %v17922_v9  ;;  %v3927_v17 = vpop.f32.mrf.mxu0  ;;  %v17926_v13 = vld [vmem:[#allocation92_spill] sm:$0xff] }
 0x3a4   :  { %17919 = vst [vmem:[#allocation98_spill] sm:$0xff] %v16018_v29  ;;  %v4030_v58 = vpop.f32.mrf.mxu1  ;;  %5952 = vmatprep.subr.bf16.mxu0 %v13078_v20  ;;  %v16024_v44 = vadd.f32 %v4028_v57, %v3926_v3  ;;  %v3928_v39 = vadd.f32 %v3927_v17, %v17924_v30  ;;  %6050 = vmatpush1.bf16.msra.mxu1 %v13073_v53  ;;  %v13087_v20 = vld [vmem:[#allocation9 + $0x1cc] ss:$16 sps:$4 sm:$0xff]   ;;  %v17930_v17 = vld [vmem:[#allocation51_spill] sm:$0xff] }
 0x3a5   :  { %v3929_v36 = vpop.f32.mrf.mxu0  ;;  %6051 = vmatprep.subr.bf16.mxu1 %v13084_v31  ;;  %v17928_v57 = vld [vmem:[#allocation94_spill] sm:$0xff] }
 0x3a6   :  { %17923 = vst [vmem:[#allocation35_spill] sm:$0xff] %v16024_v44  ;;  %v4032_v34 = vpop.f32.mrf.mxu1  ;;  %v16027_v62 = vadd.f32 %v4030_v58, %v3928_v39  ;;  %5953 = vmatpush1.bf16.msra.mxu0 %v13076_v35  ;;  %v3930_v42 = vadd.f32 %v3929_v36, %v17926_v13  ;;  %v13090_v30 = vld [vmem:[#allocation9 + $0x22c] ss:$16 sps:$4 sm:$0xff]   ;;  %v13088_v35 = vld [vmem:[#allocation9 + $0x228] ss:$16 sps:$4 sm:$0xff]   ;;  %v17936_v44 = vld [vmem:[#allocation95_spill] sm:$0xff] }
 0x3a7   :  { %v3931_v54 = vpop.f32.mrf.mxu0  ;;  %5954 = vmatprep.subr.bf16.mxu0 %v13081_v16  ;;  %v17929_v53 = vld [vmem:[#allocation46_spill] sm:$0xff]  ;;  %v17932_v36 = vld [vmem:[#allocation52_spill] sm:$0xff]  ;;  %v17933_v16 = vld [vmem:[#allocation93_spill] sm:$0xff] }
 0x3a8   :  { %17925 = vst [vmem:[#allocation42_spill] sm:$0xff] %v16027_v62  ;;  %v4034_v29 = vpop.f32.mrf.mxu1  ;;  %v16030_v2 = vadd.f32 %v4032_v34, %v3930_v42  ;;  %v3932_v3 = vadd.f32 %v3931_v54, %v17928_v57  ;;  %6052 = vmatpush1.bf16.msra.mxu1 %v13082_v28  ;;  %v13085_v34 = vld [vmem:[#allocation9 + $0x1c8] ss:$16 sps:$4 sm:$0xff]   ;;  %v13096_v42 = vld [vmem:[#allocation9 + $0x20c] ss:$16 sps:$4 sm:$0xff]  }
 0x3a9   :  { %5908 = vmatmul.mubr.bf16.gmra.mxu0 %v17930_v17  ;;  %v3935_v39 = vpop.f32.mrf.mxu0  ;;  %v13093_v57 = vld [vmem:[#allocation9 + $0x1ac] ss:$16 sps:$4 sm:$0xff]   ;;  %6053 = vmatprep.subr.bf16.mxu1 %v13090_v30 }
 0x3aa   :  { %17927 = vst [vmem:[#allocation43_spill] sm:$0xff] %v16030_v2  ;;  %5795 = vmatmul.mubr.bf16.gmra.mxu1 %v17929_v53  ;;  %v4038_v31 = vpop.f32.mrf.mxu1  ;;  %v16035_v58 = vadd.f32 %v4034_v29, %v3932_v3  ;;  %5955 = vmatpush2.bf16.msra.mxu0 %v13079_v60  ;;  %v3936_v13 = vadd.f32 %v3935_v39, %v17933_v16  ;;  %v17934_v2 = vld [vmem:[#allocation58_spill] sm:$0xff]  ;;  %v17938_v39 = vld [vmem:[#allocation96_spill] sm:$0xff] }
 0x3ab   :  { %5804 = vmatprep.mubr.bf16.mxu1 %v17932_v36  ;;  %11696 = vmatprep.mubr.msk.bf16.mxu0 %vm2660_vm2, %v17934_v2  ;;  %v3937_v54 = vpop.f32.mrf.mxu0  ;;  %v13102_v30 = vld [vmem:[#allocation9 + $0x36c] ss:$16 sps:$4 sm:$0xff]  }
 0x3ac   :  { %17931 = vst [vmem:[#allocation85_spill] sm:$0xff] %v16035_v58  ;;  %v4040_v28 = vpop.f32.mrf.mxu1  ;;  %5956 = vmatprep.subr.bf16.mxu0 %v13087_v20  ;;  %v16041_v62 = vadd.f32 %v4038_v31, %v3936_v13  ;;  %v3938_v59 = vadd.f32 %v3937_v54, %v17936_v44  ;;  %6054 = vmatpush1.bf16.msra.mxu1 %v13088_v35  ;;  %v13091_v58 = vld [vmem:[#allocation9 + $0x1a8] ss:$16 sps:$4 sm:$0xff]   ;;  %v17940_v31 = vld [vmem:[#allocation97_spill] sm:$0xff]  ;;  %v13099_v44 = vld [vmem:[#allocation9 + $0x18c] ss:$16 sps:$4 sm:$0xff]  }
 0x3ad   :  { %v3939_v29 = vpop.f32.mrf.mxu0  ;;  %6055 = vmatprep.subr.bf16.mxu1 %v13096_v42  ;;  %v13094_v20 = vld [vmem:[#allocation9 + $0x208] ss:$16 sps:$4 sm:$0xff]   ;;  %v17942_v54 = vld [vmem:[#allocation57_spill] sm:$0xff]  ;;  %v17945_v42 = vld [vmem:[#allocation99_spill] sm:$0xff] }
 0x3ae   :  { %17935 = vst [vmem:[#allocation50_spill] sm:$0xff] %v16041_v62  ;;  %v4042_v3 = vpop.f32.mrf.mxu1  ;;  %v16044_v60 = vadd.f32 %v4040_v28, %v3938_v59  ;;  %5957 = vmatpush2.bf16.msra.mxu0 %v13085_v34  ;;  %v3940_v16 = vadd.f32 %v3939_v29, %v17938_v39  ;;  %v17941_v35 = vld [vmem:[#allocation48_spill] sm:$0xff]  ;;  %v17944_v29 = vld [vmem:[#allocation55_spill] sm:$0xff] }
 0x3af   :  { %v3941_v6 = vpop.f32.mrf.mxu0  ;;  %5958 = vmatprep.subr.bf16.mxu0 %v13093_v57  ;;  %v13097_v39 = vld [vmem:[#allocation9 + $0x188] ss:$16 sps:$4 sm:$0xff]  }
 0x3b0   :  { %17937 = vst [vmem:[#allocation86_spill] sm:$0xff] %v16044_v60  ;;  %v4044_v21 = vpop.f32.mrf.mxu1  ;;  %v16047_v43 = vadd.f32 %v4042_v3, %v3940_v16  ;;  %v3942_v13 = vadd.f32 %v3941_v6, %v17940_v31  ;;  %v17946_v3 = vld [vmem:[#allocation62_spill] sm:$0xff]  ;;  %6056 = vmatpush1.bf16.msra.mxu1 %v13094_v20  ;;  %v17948_v62 = vld [vmem:[#allocation100_spill] sm:$0xff] }
 0x3b1   :  { %5918 = vmatmul.mubr.bf16.gmra.mxu0 %v17942_v54  ;;  %v3945_v59 = vpop.f32.mrf.mxu0  ;;  %v13100_v31 = vld [vmem:[#allocation9 + $0x368] ss:$16 sps:$4 sm:$0xff]   ;;  %6065 = vmatprep.subr.bf16.mxu1 %v13102_v30  ;;  %v13114_v30 = vld [vmem:[#allocation9 + $0x32c] ss:$16 sps:$4 sm:$0xff]  }
 0x3b2   :  { %17939 = vst [vmem:[#allocation88_spill] sm:$0xff] %v16047_v43  ;;  %5805 = vmatmul.mubr.bf16.gmra.mxu1 %v17941_v35  ;;  %v4048_v34 = vpop.f32.mrf.mxu1  ;;  %v16052_v28 = vadd.f32 %v4044_v21, %v3942_v13  ;;  %5959 = vmatpush2.bf16.msra.mxu0 %v13091_v58  ;;  %v3946_v57 = vadd.f32 %v3945_v59, %v17945_v42  ;;  %v13105_v43 = vld [vmem:[#allocation9 + $0x16c] ss:$16 sps:$4 sm:$0xff]   ;;  %v17950_v59 = vld [vmem:[#allocation101_spill] sm:$0xff] }
 0x3b3   :  { %5814 = vmatprep.mubr.bf16.mxu1 %v17944_v29  ;;  %11697 = vmatprep.mubr.msk.bf16.mxu0 %vm2660_vm2, %v17946_v3  ;;  %v3947_v6 = vpop.f32.mrf.mxu0  ;;  %v13108_v21 = vld [vmem:[#allocation9 + $0x34c] ss:$16 sps:$4 sm:$0xff]  }
 0x3b4   :  { %17943 = vst [vmem:[#allocation89_spill] sm:$0xff] %v16052_v28  ;;  %v4050_v16 = vpop.f32.mrf.mxu1  ;;  %v16058_v60 = vadd.f32 %v4048_v34, %v3946_v57  ;;  %v3948_v0 = vadd.f32 %v3947_v6, %v17948_v62  ;;  %5960 = vmatprep.subr.bf16.mxu0 %v13099_v44  ;;  %6066 = vmatpush2.bf16.msra.mxu1 %v13100_v31  ;;  %v17952_v57 = vld [vmem:[#allocation102_spill] sm:$0xff]  ;;  %v17953_v6 = vld [vmem:[#allocation56_spill] sm:$0xff] }
 0x3b5   :  { %v3949_v13 = vpop.f32.mrf.mxu0  ;;  %6067 = vmatprep.subr.bf16.mxu1 %v13108_v21  ;;  %v13111_v44 = vld [vmem:[#allocation9 + $0x14c] ss:$16 sps:$4 sm:$0xff]  }
 0x3b6   :  { %17947 = vst [vmem:[#allocation41_spill] sm:$0xff] %v16058_v60  ;;  %v4052_v58 = vpop.f32.mrf.mxu1  ;;  %v16061_v28 = vadd.f32 %v4050_v16, %v3948_v0  ;;  %5961 = vmatpush2.bf16.msra.mxu0 %v13097_v39  ;;  %v3950_v42 = vadd.f32 %v3949_v13, %v17950_v59  ;;  %v17954_v0 = vld [vmem:[#allocation27_spill] sm:$0xff]  ;;  %v17956_v31 = vld [vmem:[#allocation32_spill] sm:$0xff] }
 0x3b7   :  { %v3951_v20 = vpop.f32.mrf.mxu0  ;;  %5962 = vmatprep.subr.bf16.mxu0 %v13105_v43  ;;  %v17957_v43 = vld [vmem:[#allocation103_spill] sm:$0xff] }
 0x3b8   :  { %17949 = vst [vmem:[#allocation90_spill] sm:$0xff] %v16061_v28  ;;  %v4054_v18 = vpop.f32.mrf.mxu1  ;;  %v16064_v34 = vadd.f32 %v4052_v58, %v3950_v42  ;;  %v3952_v62 = vadd.f32 %v3951_v20, %v17952_v57  ;;  %v13109_v58 = vld [vmem:[#allocation9 + $0x148] ss:$16 sps:$4 sm:$0xff]   ;;  %6068 = vmatpush2.bf16.msra.mxu1 %v13106_v27  ;;  %v13117_v57 = vld [vmem:[#allocation9 + $0x12c] ss:$16 sps:$4 sm:$0xff]   ;;  %v17959_v28 = vld [vmem:[#allocation33_spill] sm:$0xff] }
 0x3b9   :  { %5928 = vmatmul.mubr.bf16.gmra.mxu0 %v17954_v0  ;;  %v3955_v39 = vpop.f32.mrf.mxu0  ;;  %v13112_v20 = vld [vmem:[#allocation9 + $0x328] ss:$16 sps:$4 sm:$0xff]   ;;  %6069 = vmatprep.subr.bf16.mxu1 %v13114_v30  ;;  %v13126_v30 = vld [vmem:[#allocation7 + $0x7e4] ss:$16 sps:$4 sm:$0xff]  }
 0x3ba   :  { %17951 = vst [vmem:[#allocation91_spill] sm:$0xff] %v16064_v34  ;;  %5815 = vmatmul.mubr.bf16.gmra.mxu1 %v17953_v6  ;;  %v4058_v16 = vpop.f32.mrf.mxu1  ;;  %v16069_v13 = vadd.f32 %v4054_v18, %v3952_v62  ;;  %5963 = vmatpush2.bf16.msra.mxu0 %v13103_v40  ;;  %v3956_v59 = vadd.f32 %v3955_v39, %v17957_v43  ;;  %v13120_v18 = vld [vmem:[#allocation9 + $0x30c] ss:$16 sps:$4 sm:$0xff]  }
 0x3bb   :  { %5824 = vmatprep.mubr.bf16.mxu1 %v17956_v31  ;;  %5970 = vmatprep.mubr.bf16.mxu0 %v17880_v8  ;;  %v3957_v21 = vpop.f32.mrf.mxu0  ;;  %v17961_v39 = vld [vmem:[#allocation34_spill] sm:$0xff] }
 0x3bc   :  { %17955 = vst [vmem:[#allocation92_spill] sm:$0xff] %v16069_v13  ;;  %v4060_v42 = vpop.f32.mrf.mxu1  ;;  %v16074_v34 = vadd.f32 %v4058_v16, %v3956_v59  ;;  %v3958_v60 = vadd.f32 %v3957_v21, %v17959_v28  ;;  %5964 = vmatprep.subr.bf16.mxu0 %v13111_v44  ;;  %v13115_v8 = vld [vmem:[#allocation9 + $0x128] ss:$16 sps:$4 sm:$0xff]   ;;  %6070 = vmatpush2.bf16.msra.mxu1 %v13112_v20  ;;  %v13123_v16 = vld [vmem:[#allocation9 + $0x10c] ss:$16 sps:$4 sm:$0xff]   ;;  %v17963_v28 = vld [vmem:[#allocation39_spill] sm:$0xff] }
 0x3bd   :  { %v3959_v62 = vpop.f32.mrf.mxu0  ;;  %6071 = vmatprep.subr.bf16.mxu1 %v13120_v18  ;;  %v17964_v21 = vld [vmem:[#allocation31_spill] sm:$0xff] }
 0x3be   :  { %17958 = vst [vmem:[#allocation94_spill] sm:$0xff] %v16074_v34  ;;  %v4062_v13 = vpop.f32.mrf.mxu1  ;;  %v16077_v40 = vadd.f32 %v4060_v42, %v3958_v60  ;;  %5965 = vmatpush2.bf16.msra.mxu0 %v13109_v58  ;;  %v3960_v43 = vadd.f32 %v3959_v62, %v17961_v39  ;;  %v13121_v62 = vld [vmem:[#allocation9 + $0x108] ss:$16 sps:$4 sm:$0xff]  }
 0x3bf   :  { %v3961_v27 = vpop.f32.mrf.mxu0  ;;  %5966 = vmatprep.subr.bf16.mxu0 %v13117_v57  ;;  %v17966_v57 = vld [vmem:[#allocation40_spill] sm:$0xff] }
 0x3c0   :  { %17960 = vst [vmem:[#allocation51_spill] sm:$0xff] %v16077_v40  ;;  %v4064_v15 = vpop.f32.mrf.mxu1  ;;  %v16080_v59 = vadd.f32 %v4062_v13, %v3960_v43  ;;  %v3962_v44 = vadd.f32 %v3961_v27, %v17963_v28  ;;  %6072 = vmatpush2.bf16.msra.mxu1 %v13118_v14  ;;  %v13129_v43 = vld [vmem:[#allocation7 + $0x9e4] ss:$16 sps:$4 sm:$0xff]  }
 0x3c1   :  { %v3965_v60 = vpop.f32.mrf.mxu0  ;;  %6820 = vmatprep.subr.bf16.mxu1 %v13126_v30  ;;  %v13177_v40 = vld [vmem:[#allocation7 + $0x8c4] ss:$16 sps:$4 sm:$0xff]  }
 0x3c2   :  { %17962 = vst [vmem:[#allocation93_spill] sm:$0xff] %v16080_v59  ;;  %5825 = vmatmul.mubr.bf16.gmra.mxu1 %v17964_v21  ;;  %v4068_v42 = vpop.f32.mrf.mxu1  ;;  %v16084_v58 = vadd.f32 %v4064_v15, %v3962_v44  ;;  %5967 = vmatpush2.bf16.msra.mxu0 %v13115_v8  ;;  %v3966_v20 = vadd.f32 %v3965_v60, %v17966_v57  ;;  %v13124_v8 = vld [vmem:[#allocation7 + $0x7e0] ss:$16 sps:$4 sm:$0xff]  }
 0x3c3   :  { %11698 = vmatprep.mubr.msk.bf16.mxu1 %vm2660_vm2, %v17881_v12  ;;  %v3967_v39 = vpop.f32.mrf.mxu0  ;;  %5968 = vmatprep.subr.bf16.mxu0 %v13123_v16 }
 0x3c4   :  { %17965 = vst [vmem:[#allocation58_spill] sm:$0xff] %v16084_v58  ;;  %v4070_v13 = vpop.f32.mrf.mxu1  ;;  %v16089_v18 = vadd.f32 %v4068_v42, %v3966_v20  ;;  %v3968_v27 = vadd.f32 %v3967_v39, %v15857_v63  ;;  %v13127_v58 = vld [vmem:[#allocation7 + $0x9e0] ss:$16 sps:$4 sm:$0xff]   ;;  %v13132_v42 = vld [vmem:[#allocation7 + $0x7c4] ss:$16 sps:$4 sm:$0xff]  }
 0x3c5   :  { %v3969_v28 = vpop.f32.mrf.mxu0  ;;  %v13135_v20 = vld [vmem:[#allocation7 + $0x9c4] ss:$16 sps:$4 sm:$0xff]   ;;  %v13130_v39 = vld [vmem:[#allocation7 + $0x7c0] ss:$16 sps:$4 sm:$0xff]  }
 0x3c6   :  { %17967 = vst [vmem:[#allocation95_spill] sm:$0xff] %v16089_v18  ;;  %v4072_v15 = vpop.f32.mrf.mxu1  ;;  %v16092_v44 = vadd.f32 %v4070_v13, %v3968_v27  ;;  %5969 = vmatpush2.bf16.msra.mxu0 %v13121_v62  ;;  %v3970_v12 = vadd.f32 %v3969_v28, %v15859_v19 }
 0x3c7   :  { %v3971_v60 = vpop.f32.mrf.mxu0  ;;  %6923 = vmatprep.subr.bf16.mxu0 %v13129_v43  ;;  %v13133_v43 = vld [vmem:[#allocation7 + $0x9c0] ss:$16 sps:$4 sm:$0xff]  }
 0x3c8   :  { %17968 = vst [vmem:[#allocation96_spill] sm:$0xff] %v16092_v44  ;;  %v4074_v57 = vpop.f32.mrf.mxu1  ;;  %v16095_v16 = vadd.f32 %v4072_v15, %v3970_v12  ;;  %v3972_v14 = vadd.f32 %v3971_v60, %v15861_v50  ;;  %v13141_v15 = vld [vmem:[#allocation7 + $0x9a4] ss:$16 sps:$4 sm:$0xff]  }
 0x3c9   :  { %5971 = vmatmul.mubr.bf16.vlgmr.msra.gmra.mxu0 %v17893_v7  ;;  %v3975_v63 = vpop.f32.mrf.mxu0  ;;  %v13138_v7 = vld [vmem:[#allocation7 + $0x7a4] ss:$16 sps:$4 sm:$0xff]  }
 0x3ca   :  { %17969 = vst [vmem:[#allocation97_spill] sm:$0xff] %v16095_v16  ;;  %6074 = vmatmul.mubr.bf16.vlgmr.msra.gmra.mxu1 %v17885_v4  ;;  %v4078_v30 = vpop.f32.mrf.mxu1  ;;  %v16100_v62 = vadd.f32 %v4074_v57, %v3972_v14  ;;  %5980 = vmatprep.mubr.bf16.mxu0 %v17896_v10  ;;  %v3976_v19 = vadd.f32 %v3975_v63, %v15866_v52  ;;  %v17972_v4 = vld [vmem:[#allocation45_spill] sm:$0xff] }
 0x3cb   :  { %6821 = vmatpush1.bf16.msra.mxu1 %v13124_v8  ;;  %11699 = vmatprep.mubr.msk.bf16.mxu1 %vm2660_vm2, %v17795_v38  ;;  %v3977_v50 = vpop.f32.mrf.mxu0  ;;  %v17974_v52 = vld [vmem:[#allocation25_spill] sm:$0xff] }
 0x3cc   :  { %17970 = vst [vmem:[#allocation48_spill] sm:$0xff] %v16100_v62  ;;  %6924 = vmatpush1.bf16.msra.mxu0 %v13127_v58  ;;  %v4080_v13 = vpop.f32.mrf.mxu1  ;;  %v16106_v27 = vadd.f32 %v4078_v30, %v3976_v19  ;;  %6822 = vmatprep.subr.bf16.mxu1 %v13132_v42  ;;  %v3978_v28 = vadd.f32 %v3977_v50, %v17972_v4  ;;  %v13136_v14 = vld [vmem:[#allocation7 + $0x7a0] ss:$16 sps:$4 sm:$0xff]   ;;  %v13144_v63 = vld [vmem:[#allocation7 + $0x784] ss:$16 sps:$4 sm:$0xff]   ;;  %v17976_v30 = vld [vmem:[#allocation28_spill] sm:$0xff] }
 0x3cd   :  { %6925 = vmatprep.subr.bf16.mxu0 %v13135_v20  ;;  %v3979_v12 = vpop.f32.mrf.mxu0  ;;  %v13139_v19 = vld [vmem:[#allocation7 + $0x9a0] ss:$16 sps:$4 sm:$0xff]   ;;  %v13150_v4 = vld [vmem:[#allocation7 + $0x764] ss:$16 sps:$4 sm:$0xff]  }
 0x3ce   :  { %17971 = vst [vmem:[#allocation57_spill] sm:$0xff] %v16106_v27  ;;  %v4082_v8 = vpop.f32.mrf.mxu1  ;;  %v16109_v60 = vadd.f32 %v4080_v13, %v3978_v28  ;;  %v3980_v57 = vadd.f32 %v3979_v12, %v17974_v52  ;;  %v13145_v28 = vld [vmem:[#allocation7 + $0x980] ss:$16 sps:$4 sm:$0xff]   ;;  %v13153_v52 = vld [vmem:[#allocation7 + $0x744] ss:$16 sps:$4 sm:$0xff]  }
 0x3cf   :  { %6823 = vmatpush1.bf16.msra.mxu1 %v13130_v39  ;;  %v3981_v58 = vpop.f32.mrf.mxu0  ;;  %v13147_v39 = vld [vmem:[#allocation7 + $0x984] ss:$16 sps:$4 sm:$0xff]   ;;  %v13148_v12 = vld [vmem:[#allocation7 + $0x760] ss:$16 sps:$4 sm:$0xff]  }
 0x3d0   :  { %17973 = vst [vmem:[#allocation55_spill] sm:$0xff] %v16109_v60  ;;  %6926 = vmatpush1.bf16.msra.mxu0 %v13133_v43  ;;  %6824 = vmatprep.subr.bf16.mxu1 %v13138_v7  ;;  %v16112_v62 = vadd.f32 %v4082_v8, %v3980_v57  ;;  %v3982_v42 = vadd.f32 %v3981_v58, %v17976_v30  ;;  %v4084_v20 = vpop.f32.mrf.mxu1  ;;  %v13142_v43 = vld [vmem:[#allocation7 + $0x780] ss:$16 sps:$4 sm:$0xff]   ;;  %v13156_v57 = vld [vmem:[#allocation7 + $0x964] ss:$16 sps:$4 sm:$0xff]  }
 0x3d1   :  { %6927 = vmatprep.subr.bf16.mxu0 %v13141_v15  ;;  %5981 = vmatmul.mubr.bf16.gmra.mxu0 %v17905_v45  ;;  %v4897_v50 = vpop.f32.mrf.mxu0  ;;  %v13160_v60 = vld [vmem:[#allocation7 + $0x940] ss:$16 sps:$4 sm:$0xff]   ;;  %v13168_v16 = vld [vmem:[#allocation7 + $0x924] ss:$16 sps:$4 sm:$0xff]  }
 0x3d2   :  { %17975 = vst [vmem:[#allocation99_spill] sm:$0xff] %v16112_v62  ;;  %6084 = vmatmul.mubr.bf16.gmra.mxu1 %v17894_v22  ;;  %v16117_v13 = vadd.f32 %v4084_v20, %v3982_v42  ;;  %5990 = vmatprep.mubr.bf16.mxu0 %v17908_v23  ;;  %v13151_v42 = vld [vmem:[#allocation7 + $0x740] ss:$16 sps:$4 sm:$0xff]  }
 0x3d3   :  { %6825 = vmatpush1.bf16.msra.mxu1 %v13136_v14  ;;  %11700 = vmatprep.mubr.msk.bf16.mxu1 %vm2660_vm2, %v17898_v46  ;;  %v4899_v7 = vpop.f32.mrf.mxu0 }
 0x3d4   :  { %17977 = vst [vmem:[#allocation62_spill] sm:$0xff] %v16117_v13  ;;  %6826 = vmatprep.subr.bf16.mxu1 %v13144_v63  ;;  %6928 = vmatpush1.bf16.msra.mxu0 %v13139_v19  ;;  %v13154_v63 = vld [vmem:[#allocation7 + $0x960] ss:$16 sps:$4 sm:$0xff]   ;;  %v13162_v19 = vld [vmem:[#allocation7 + $0x944] ss:$16 sps:$4 sm:$0xff]  }
 0x3d5   :  { %v4901_v15 = vpop.f32.mrf.mxu0  ;;  %6929 = vmatprep.subr.bf16.mxu0 %v13147_v39 }
 0x3d7   :  { %6827 = vmatpush1.bf16.msra.mxu1 %v13142_v43  ;;  %v4903_v8 = vpop.f32.mrf.mxu0  ;;  %v13159_v43 = vld [vmem:[#allocation7 + $0x724] ss:$16 sps:$4 sm:$0xff]  }
 0x3d8   :  { %6828 = vmatprep.subr.bf16.mxu1 %v13150_v4  ;;  %6930 = vmatpush1.bf16.msra.mxu0 %v13145_v28 }
 0x3d9   :  { %5991 = vmatmul.mubr.bf16.gmra.mxu0 %v17917_v24  ;;  %v4907_v58 = vpop.f32.mrf.mxu0  ;;  %6931 = vmatprep.subr.bf16.mxu0 %v13156_v57 }
 0x3da   :  { %6094 = vmatmul.mubr.bf16.gmra.mxu1 %v17906_v56  ;;  %v4794_v14 = vpop.f32.mrf.mxu1  ;;  %6000 = vmatprep.mubr.bf16.mxu0 %v17920_v41 }
 0x3db   :  { %6829 = vmatpush1.bf16.msra.mxu1 %v13148_v12  ;;  %v16124_v30 = vadd.f32 %v4897_v50, %v4794_v14  ;;  %11701 = vmatprep.mubr.msk.bf16.mxu1 %vm2660_vm2, %v17910_v37  ;;  %v4909_v39 = vpop.f32.mrf.mxu0  ;;  %v13157_v12 = vld [vmem:[#allocation7 + $0x720] ss:$16 sps:$4 sm:$0xff]  }
 0x3dc   :  { %v4796_v20 = vpop.f32.mrf.mxu1  ;;  %6830 = vmatprep.subr.bf16.mxu1 %v13153_v52  ;;  %6932 = vmatpush1.bf16.msra.mxu0 %v13154_v63  ;;  %v13165_v52 = vld [vmem:[#allocation7 + $0x704] ss:$16 sps:$4 sm:$0xff]  }
 0x3dd   :  { %v16129_v4 = vadd.f32 %v4899_v7, %v4796_v20  ;;  %v4911_v13 = vpop.f32.mrf.mxu0  ;;  %6933 = vmatprep.subr.bf16.mxu0 %v13162_v19  ;;  %v13166_v19 = vld [vmem:[#allocation7 + $0x920] ss:$16 sps:$4 sm:$0xff]   ;;  %v13171_v20 = vld [vmem:[#allocation7 + $0x8e4] ss:$16 sps:$4 sm:$0xff]  }
 0x3de   :  { %v4798_v28 = vpop.f32.mrf.mxu1 }
 0x3df   :  { %6831 = vmatpush1.bf16.msra.mxu1 %v13151_v42  ;;  %v16131_v50 = vadd.f32 %v4901_v15, %v4798_v28  ;;  %v4913_v62 = vpop.f32.mrf.mxu0  ;;  %v13163_v15 = vld [vmem:[#allocation7 + $0x700] ss:$16 sps:$4 sm:$0xff]   ;;  %v13174_v28 = vld [vmem:[#allocation7 + $0x904] ss:$16 sps:$4 sm:$0xff]  }
 0x3e0   :  { %v4800_v14 = vpop.f32.mrf.mxu1  ;;  %6832 = vmatprep.subr.bf16.mxu1 %v13159_v43  ;;  %6934 = vmatpush1.bf16.msra.mxu0 %v13160_v60  ;;  %v13172_v60 = vld [vmem:[#allocation7 + $0x900] ss:$16 sps:$4 sm:$0xff]  }
 0x3e1   :  { %v16133_v27 = vadd.f32 %v4903_v8, %v4800_v14  ;;  %6001 = vmatmul.mubr.bf16.gmra.mxu0 %v17929_v53  ;;  %v4917_v57 = vpop.f32.mrf.mxu0  ;;  %6935 = vmatprep.subr.bf16.mxu0 %v13168_v16 }
 0x3e2   :  { %6104 = vmatmul.mubr.bf16.gmra.mxu1 %v17918_v48  ;;  %v4804_v7 = vpop.f32.mrf.mxu1  ;;  %6010 = vmatprep.mubr.bf16.mxu0 %v17932_v36 }
 0x3e3   :  { %6833 = vmatpush1.bf16.msra.mxu1 %v13157_v12  ;;  %v16137_v63 = vadd.f32 %v4907_v58, %v4804_v7  ;;  %11702 = vmatprep.mubr.msk.bf16.mxu1 %vm2660_vm2, %v17922_v9  ;;  %v4919_v42 = vpop.f32.mrf.mxu0  ;;  %v13169_v7 = vld [vmem:[#allocation7 + $0x8e0] ss:$16 sps:$4 sm:$0xff]  }
 0x3e4   :  { %v4806_v8 = vpop.f32.mrf.mxu1  ;;  %6834 = vmatprep.subr.bf16.mxu1 %v13165_v52  ;;  %6936 = vmatpush1.bf16.msra.mxu0 %v13166_v19  ;;  %v13183_v19 = vld [vmem:[#allocation7 + $0x8a4] ss:$16 sps:$4 sm:$0xff]  }
 0x3e5   :  { %v16142_v43 = vadd.f32 %v4909_v39, %v4806_v8  ;;  %v4921_v12 = vpop.f32.mrf.mxu0  ;;  %6937 = vmatprep.subr.bf16.mxu0 %v13174_v28  ;;  %v13180_v39 = vld [vmem:[#allocation7 + $0xa64] ss:$16 sps:$4 sm:$0xff]   ;;  %v13178_v8 = vld [vmem:[#allocation7 + $0xa60] ss:$16 sps:$4 sm:$0xff]  }
 0x3e6   :  { %v4808_v14 = vpop.f32.mrf.mxu1  ;;  %v13186_v28 = vld [vmem:[#allocation7 + $0xa44] ss:$16 sps:$4 sm:$0xff]  }
 0x3e7   :  { %6835 = vmatpush1.bf16.msra.mxu1 %v13163_v15  ;;  %v16144_v58 = vadd.f32 %v4911_v13, %v4808_v14  ;;  %v4923_v18 = vpop.f32.mrf.mxu0  ;;  %v13175_v15 = vld [vmem:[#allocation7 + $0x8c0] ss:$16 sps:$4 sm:$0xff]  }
 0x3e8   :  { %v4810_v44 = vpop.f32.mrf.mxu1  ;;  %6836 = vmatprep.subr.bf16.mxu1 %v13171_v20  ;;  %6938 = vmatpush1.bf16.msra.mxu0 %v13172_v60  ;;  %v13189_v60 = vld [vmem:[#allocation7 + $0x884] ss:$16 sps:$4 sm:$0xff]  }
 0x3e9   :  { %v16146_v59 = vadd.f32 %v4913_v62, %v4810_v44  ;;  %6011 = vmatmul.mubr.bf16.gmra.mxu0 %v17941_v35  ;;  %v4927_v52 = vpop.f32.mrf.mxu0  ;;  %6947 = vmatprep.subr.bf16.mxu0 %v13180_v39  ;;  %v13195_v39 = vld [vmem:[#allocation7 + $0xa24] ss:$16 sps:$4 sm:$0xff]  }
 0x3ea   :  { %6114 = vmatmul.mubr.bf16.gmra.mxu1 %v17930_v17  ;;  %v4814_v16 = vpop.f32.mrf.mxu1  ;;  %6020 = vmatprep.mubr.bf16.mxu0 %v17944_v29 }
 0x3eb   :  { %6837 = vmatpush2.bf16.msra.mxu1 %v13169_v7  ;;  %v16150_v13 = vadd.f32 %v4917_v57, %v4814_v16  ;;  %11703 = vmatprep.mubr.msk.bf16.mxu1 %vm2660_vm2, %v17934_v2  ;;  %v4929_v62 = vpop.f32.mrf.mxu0  ;;  %v13181_v16 = vld [vmem:[#allocation7 + $0x8a0] ss:$16 sps:$4 sm:$0xff]  }
 0x3ec   :  { %v4816_v44 = vpop.f32.mrf.mxu1  ;;  %6838 = vmatprep.subr.bf16.mxu1 %v13177_v40  ;;  %6948 = vmatpush2.bf16.msra.mxu0 %v13178_v8 }
 0x3ed   :  { %v16155_v20 = vadd.f32 %v4919_v42, %v4816_v44  ;;  %v4931_v7 = vpop.f32.mrf.mxu0  ;;  %6949 = vmatprep.subr.bf16.mxu0 %v13186_v28  ;;  %v13192_v44 = vld [vmem:[#allocation7 + $0x864] ss:$16 sps:$4 sm:$0xff]  }
 0x3ee   :  { %v4818_v14 = vpop.f32.mrf.mxu1 }
 0x3ef   :  { %6839 = vmatpush2.bf16.msra.mxu1 %v13175_v15  ;;  %v16157_v57 = vadd.f32 %v4921_v12, %v4818_v14  ;;  %v4933_v11 = vpop.f32.mrf.mxu0  ;;  %v13187_v15 = vld [vmem:[#allocation7 + $0x880] ss:$16 sps:$4 sm:$0xff]  }
 0x3f0   :  { %v4820_v34 = vpop.f32.mrf.mxu1  ;;  %6840 = vmatprep.subr.bf16.mxu1 %v13183_v19  ;;  %6950 = vmatpush2.bf16.msra.mxu0 %v13184_v32  ;;  %v13193_v19 = vld [vmem:[#allocation7 + $0xa20] ss:$16 sps:$4 sm:$0xff]  }
 0x3f1   :  { %v16159_v5 = vadd.f32 %v4923_v18, %v4820_v34  ;;  %6021 = vmatmul.mubr.bf16.gmra.mxu0 %v17953_v6  ;;  %v4937_v42 = vpop.f32.mrf.mxu0  ;;  %6951 = vmatprep.subr.bf16.mxu0 %v13195_v39 }
 0x3f2   :  { %6124 = vmatmul.mubr.bf16.gmra.mxu1 %v17942_v54  ;;  %v4824_v40 = vpop.f32.mrf.mxu1  ;;  %6030 = vmatprep.mubr.bf16.mxu0 %v17956_v31 }
 0x3f3   :  { %6841 = vmatpush2.bf16.msra.mxu1 %v13181_v16  ;;  %v16163_v12 = vadd.f32 %v4927_v52, %v4824_v40  ;;  %11704 = vmatprep.mubr.msk.bf16.mxu1 %vm2660_vm2, %v17946_v3  ;;  %v4939_v18 = vpop.f32.mrf.mxu0  ;;  %v13190_v16 = vld [vmem:[#allocation7 + $0x860] ss:$16 sps:$4 sm:$0xff]  }
 0x3f4   :  { %v4826_v34 = vpop.f32.mrf.mxu1  ;;  %6842 = vmatprep.subr.bf16.mxu1 %v13189_v60  ;;  %6952 = vmatpush2.bf16.msra.mxu0 %v13193_v19  ;;  %v13201_v60 = vld [vmem:[#allocation7 + $0xa04] ss:$16 sps:$4 sm:$0xff]  }
 0x3f5   :  { %v16168_v8 = vadd.f32 %v4929_v62, %v4826_v34  ;;  %v4941_v14 = vpop.f32.mrf.mxu0  ;;  %v13199_v34 = vld [vmem:[#allocation7 + $0xa00] ss:$16 sps:$4 sm:$0xff]   ;;  %v13204_v19 = vld [vmem:[#allocation7 + $0x824] ss:$16 sps:$4 sm:$0xff]   ;;  %6953 = vmatprep.subr.bf16.mxu0 %v13201_v60 }
 0x3f6   :  { %v4828_v28 = vpop.f32.mrf.mxu1 }
 0x3f7   :  { %6843 = vmatpush2.bf16.msra.mxu1 %v13187_v15  ;;  %v16170_v52 = vadd.f32 %v4931_v7, %v4828_v28  ;;  %v4943_v61 = vpop.f32.mrf.mxu0  ;;  %v13196_v7 = vld [vmem:[#allocation7 + $0x840] ss:$16 sps:$4 sm:$0xff]   ;;  %v13207_v15 = vld [vmem:[#allocation7 + $0x7ec] ss:$16 sps:$4 sm:$0xff]  }
 0x3f8   :  { %v4830_v40 = vpop.f32.mrf.mxu1  ;;  %6844 = vmatprep.subr.bf16.mxu1 %v13192_v44  ;;  %6954 = vmatpush2.bf16.msra.mxu0 %v13199_v34  ;;  %v13208_v34 = vld [vmem:[#allocation7 + $0x800] ss:$16 sps:$4 sm:$0xff]  }
 0x3f9   :  { %v16172_v51 = vadd.f32 %v4933_v11, %v4830_v40  ;;  %6031 = vmatmul.mubr.bf16.gmra.mxu0 %v17964_v21  ;;  %v4947_v62 = vpop.f32.mrf.mxu0  ;;  %7026 = vmatprep.subr.bf16.mxu0 %v13207_v15 }
 0x3fa   :  { %6134 = vmatmul.mubr.bf16.gmra.mxu1 %v17954_v0  ;;  %v4834_v32 = vpop.f32.mrf.mxu1  ;;  %11817 = vmatprep.mubr.msk.bf16.mxu0 %vm2660_vm2, %v17795_v38 }
 0x3fb   :  { %6845 = vmatpush2.bf16.msra.mxu1 %v13190_v16  ;;  %v16176_v39 = vadd.f32 %v4937_v42, %v4834_v32  ;;  %6852 = vmatprep.mubr.bf16.mxu1 %v17896_v10  ;;  %v4949_v44 = vpop.f32.mrf.mxu0  ;;  %v13202_v16 = vld [vmem:[#allocation7 + $0x820] ss:$16 sps:$4 sm:$0xff]   ;;  %v13205_v32 = vld [vmem:[#allocation7 + $0x7e8] ss:$16 sps:$4 sm:$0xff]  }
 0x3fc   :  { %v4836_v11 = vpop.f32.mrf.mxu1  ;;  %6846 = vmatprep.subr.bf16.mxu1 %v13198_v55  ;;  %v13213_v55 = vld [vmem:[#allocation7 + $0x7cc] ss:$16 sps:$4 sm:$0xff]  }
 0x3fd   :  { %v16181_v28 = vadd.f32 %v4939_v18, %v4836_v11  ;;  %v4951_v1 = vpop.f32.mrf.mxu0  ;;  %v13216_v11 = vld [vmem:[#allocation7 + $0x7ac] ss:$16 sps:$4 sm:$0xff]  }
 0x3fe   :  { %v4838_v40 = vpop.f32.mrf.mxu1 }
 0x3ff   :  { %6847 = vmatpush2.bf16.msra.mxu1 %v13196_v7  ;;  %v16183_v42 = vadd.f32 %v4941_v14, %v4838_v40  ;;  %v4953_v26 = vpop.f32.mrf.mxu0  ;;  %v13211_v14 = vld [vmem:[#allocation7 + $0x7c8] ss:$16 sps:$4 sm:$0xff]  }
 0x400   :  { %v4840_v33 = vpop.f32.mrf.mxu1  ;;  %6848 = vmatprep.subr.bf16.mxu1 %v13204_v19  ;;  %v13219_v19 = vld [vmem:[#allocation7 + $0x9ec] ss:$16 sps:$4 sm:$0xff]  }
 0x401   :  { %17978 = vst [vmem:[#allocation100_spill] sm:$0xff] %v16183_v42  ;;  %v16185_v47 = vadd.f32 %v4943_v61, %v4840_v33  ;;  %6956 = vmatmul.mubr.bf16.vlgmr.msra.gmra.mxu0 %v17894_v22  ;;  %v4957_v7 = vpop.f32.mrf.mxu0  ;;  %v13286_v42 = vld [vmem:[#allocation7 + $0xa08] ss:$16 sps:$4 sm:$0xff]  }
 0x402   :  { %v4844_v18 = vpop.f32.mrf.mxu1  ;;  %7027 = vmatpush1.bf16.msra.mxu0 %v13205_v32  ;;  %11818 = vmatprep.mubr.msk.bf16.mxu0 %vm2660_vm2, %v17898_v46 }
 0x403   :  { %17979 = vst [vmem:[#allocation101_spill] sm:$0xff] %v16185_v47  ;;  %6849 = vmatpush2.bf16.msra.mxu1 %v13202_v16  ;;  %v16188_v60 = vadd.f32 %v4947_v62, %v4844_v18  ;;  %7028 = vmatprep.subr.bf16.mxu0 %v13213_v55  ;;  %v13214_v62 = vld [vmem:[#allocation7 + $0x7a8] ss:$16 sps:$4 sm:$0xff]   ;;  %v4959_v16 = vpop.f32.mrf.mxu0 }
 0x404   :  { %v4846_v15 = vpop.f32.mrf.mxu1  ;;  %6850 = vmatprep.subr.bf16.mxu1 %v13210_v25  ;;  %v13217_v18 = vld [vmem:[#allocation7 + $0x9e8] ss:$16 sps:$4 sm:$0xff]   ;;  %v13225_v25 = vld [vmem:[#allocation7 + $0x9cc] ss:$16 sps:$4 sm:$0xff]  }
 0x405   :  { %17980 = vst [vmem:[#allocation102_spill] sm:$0xff] %v16188_v60  ;;  %v16192_v33 = vadd.f32 %v4949_v44, %v4846_v15  ;;  %v13222_v60 = vld [vmem:[#allocation7 + $0x78c] ss:$16 sps:$4 sm:$0xff]   ;;  %v13220_v55 = vld [vmem:[#allocation7 + $0x788] ss:$16 sps:$4 sm:$0xff]  }
 0x406   :  { %v4848_v61 = vpop.f32.mrf.mxu1  ;;  %7029 = vmatpush1.bf16.msra.mxu0 %v13211_v14  ;;  %v13223_v14 = vld [vmem:[#allocation7 + $0x9c8] ss:$16 sps:$4 sm:$0xff]   ;;  %v13228_v15 = vld [vmem:[#allocation7 + $0x76c] ss:$16 sps:$4 sm:$0xff]  }
 0x407   :  { %17981 = vst [vmem:[#allocation56_spill] sm:$0xff] %v16192_v33  ;;  %6851 = vmatpush2.bf16.msra.mxu1 %v13208_v34  ;;  %v16194_v40 = vadd.f32 %v4951_v1, %v4848_v61  ;;  %7030 = vmatprep.subr.bf16.mxu0 %v13216_v11  ;;  %v4961_v34 = vpop.f32.mrf.mxu0  ;;  %v13274_v33 = vld [vmem:[#allocation7 + $0xa48] ss:$16 sps:$4 sm:$0xff]  }
 0x408   :  { %v4850_v32 = vpop.f32.mrf.mxu1  ;;  %7129 = vmatprep.subr.bf16.mxu1 %v13219_v19  ;;  %v13231_v19 = vld [vmem:[#allocation7 + $0x9ac] ss:$16 sps:$4 sm:$0xff]  }
 0x409   :  { %17982 = vst [vmem:[#allocation27_spill] sm:$0xff] %v16194_v40  ;;  %v16196_v49 = vadd.f32 %v4953_v26, %v4850_v32  ;;  %6966 = vmatmul.mubr.bf16.gmra.mxu0 %v17906_v56  ;;  %v13237_v40 = vld [vmem:[#allocation7 + $0x98c] ss:$16 sps:$4 sm:$0xff]  }
 0x40a   :  { %6853 = vmatmul.mubr.bf16.vlgmr.msra.gmra.mxu1 %v17905_v45  ;;  %v4854_v44 = vpop.f32.mrf.mxu1  ;;  %7031 = vmatpush1.bf16.msra.mxu0 %v13214_v62  ;;  %v4963_v62 = vpop.f32.mrf.mxu0 }
 0x40b   :  { %17983 = vst [vmem:[#allocation32_spill] sm:$0xff] %v16196_v49  ;;  %6862 = vmatprep.mubr.bf16.mxu1 %v17908_v23  ;;  %v16201_v1 = vadd.f32 %v4957_v7, %v4854_v44  ;;  %7130 = vmatpush1.bf16.msra.mxu1 %v13217_v18  ;;  %v13226_v7 = vld [vmem:[#allocation7 + $0x768] ss:$16 sps:$4 sm:$0xff]   ;;  %v13234_v49 = vld [vmem:[#allocation7 + $0x74c] ss:$16 sps:$4 sm:$0xff]  }
 0x40c   :  { %11819 = vmatprep.mubr.msk.bf16.mxu0 %vm2660_vm2, %v17910_v37  ;;  %v4856_v26 = vpop.f32.mrf.mxu1  ;;  %7032 = vmatprep.subr.bf16.mxu0 %v13222_v60  ;;  %v13229_v18 = vld [vmem:[#allocation7 + $0x9a8] ss:$16 sps:$4 sm:$0xff]  }
 0x40d   :  { %17984 = vst [vmem:[#allocation103_spill] sm:$0xff] %v16201_v1  ;;  %v16205_v11 = vadd.f32 %v4959_v16, %v4856_v26  ;;  %7131 = vmatprep.subr.bf16.mxu1 %v13225_v25 }
 0x40e   :  { %v4858_v61 = vpop.f32.mrf.mxu1  ;;  %7033 = vmatpush1.bf16.msra.mxu0 %v13220_v55  ;;  %v13232_v55 = vld [vmem:[#allocation7 + $0x748] ss:$16 sps:$4 sm:$0xff]  }
 0x40f   :  { %17985 = vst [vmem:[#allocation33_spill] sm:$0xff] %v16205_v11  ;;  %v16207_v32 = vadd.f32 %v4961_v34, %v4858_v61  ;;  %7132 = vmatpush1.bf16.msra.mxu1 %v13223_v14  ;;  %7034 = vmatprep.subr.bf16.mxu0 %v13228_v15  ;;  %v13235_v14 = vld [vmem:[#allocation7 + $0x988] ss:$16 sps:$4 sm:$0xff]   ;;  %v13240_v15 = vld [vmem:[#allocation7 + $0x72c] ss:$16 sps:$4 sm:$0xff]  }
 0x410   :  { %v4860_v44 = vpop.f32.mrf.mxu1  ;;  %7133 = vmatprep.subr.bf16.mxu1 %v13231_v19  ;;  %v13243_v61 = vld [vmem:[#allocation7 + $0x96c] ss:$16 sps:$4 sm:$0xff]  }
 0x411   :  { %17986 = vst [vmem:[#allocation34_spill] sm:$0xff] %v16207_v32  ;;  %v16209_v1 = vadd.f32 %v4963_v62, %v4860_v44  ;;  %6976 = vmatmul.mubr.bf16.gmra.mxu0 %v17918_v48  ;;  %v5000_v60 = vpop.f32.mrf.mxu0  ;;  %v13241_v32 = vld [vmem:[#allocation7 + $0x968] ss:$16 sps:$4 sm:$0xff]  }
 0x412   :  { %6863 = vmatmul.mubr.bf16.gmra.mxu1 %v17917_v24  ;;  %v5103_v16 = vpop.f32.mrf.mxu1  ;;  %7035 = vmatpush1.bf16.msra.mxu0 %v13226_v7 }
 0x413   :  { %17987 = vst [vmem:[#allocation39_spill] sm:$0xff] %v16209_v1  ;;  %6872 = vmatprep.mubr.bf16.mxu1 %v17920_v41  ;;  %v16214_v25 = vadd.f32 %v5103_v16, %v5000_v60  ;;  %11820 = vmatprep.mubr.msk.bf16.mxu0 %vm2660_vm2, %v17922_v9  ;;  %v5002_v34 = vpop.f32.mrf.mxu0  ;;  %v13238_v60 = vld [vmem:[#allocation7 + $0x728] ss:$16 sps:$4 sm:$0xff]  }
 0x414   :  { %7134 = vmatpush1.bf16.msra.mxu1 %v13229_v18  ;;  %v5105_v26 = vpop.f32.mrf.mxu1  ;;  %7036 = vmatprep.subr.bf16.mxu0 %v13234_v49  ;;  %v13246_v18 = vld [vmem:[#allocation7 + $0x70c] ss:$16 sps:$4 sm:$0xff]  }
 0x415   :  { %17988 = vst [vmem:[#allocation31_spill] sm:$0xff] %v16214_v25  ;;  %v16218_v19 = vadd.f32 %v5105_v26, %v5002_v34  ;;  %7135 = vmatprep.subr.bf16.mxu1 %v13237_v40  ;;  %v5004_v62 = vpop.f32.mrf.mxu0  ;;  %v13252_v34 = vld [vmem:[#allocation7 + $0x94c] ss:$16 sps:$4 sm:$0xff]   ;;  %v13244_v26 = vld [vmem:[#allocation7 + $0x708] ss:$16 sps:$4 sm:$0xff]  }
 0x416   :  { %v5107_v44 = vpop.f32.mrf.mxu1  ;;  %7037 = vmatpush1.bf16.msra.mxu0 %v13232_v55 }
 0x417   :  { %17989 = vst [vmem:[#allocation40_spill] sm:$0xff] %v16218_v19  ;;  %v16220_v7 = vadd.f32 %v5107_v44, %v5004_v62  ;;  %v5006_v16 = vpop.f32.mrf.mxu0  ;;  %7038 = vmatprep.subr.bf16.mxu0 %v13240_v15  ;;  %v13249_v15 = vld [vmem:[#allocation7 + $0x8ec] ss:$16 sps:$4 sm:$0xff]   ;;  %v13250_v62 = vld [vmem:[#allocation7 + $0x948] ss:$16 sps:$4 sm:$0xff]  }
 0x418   :  { %7136 = vmatpush1.bf16.msra.mxu1 %v13235_v14  ;;  %v5109_v25 = vpop.f32.mrf.mxu1  ;;  %v13267_v19 = vld [vmem:[#allocation7 + $0x88c] ss:$16 sps:$4 sm:$0xff]  }
 0x419   :  { %17990 = vst [vmem:[#allocation45_spill] sm:$0xff] %v16220_v7  ;;  %v16222_v1 = vadd.f32 %v5109_v25, %v5006_v16  ;;  %7137 = vmatprep.subr.bf16.mxu1 %v13243_v61  ;;  %6986 = vmatmul.mubr.bf16.gmra.mxu0 %v17930_v17  ;;  %v5010_v49 = vpop.f32.mrf.mxu0 }
 0x41a   :  { %6873 = vmatmul.mubr.bf16.gmra.mxu1 %v17929_v53  ;;  %v5113_v40 = vpop.f32.mrf.mxu1  ;;  %7039 = vmatpush1.bf16.msra.mxu0 %v13238_v60  ;;  %v13247_v60 = vld [vmem:[#allocation7 + $0x8e8] ss:$16 sps:$4 sm:$0xff]  }
 0x41b   :  { %17991 = vst [vmem:[#allocation25_spill] sm:$0xff] %v16222_v1  ;;  %6882 = vmatprep.mubr.bf16.mxu1 %v17932_v36  ;;  %v16227_v55 = vadd.f32 %v5113_v40, %v5010_v49  ;;  %11821 = vmatprep.mubr.msk.bf16.mxu0 %vm2660_vm2, %v17934_v2  ;;  %v5012_v25 = vpop.f32.mrf.mxu0 }
 0x41c   :  { %v5115_v14 = vpop.f32.mrf.mxu1  ;;  %7040 = vmatprep.subr.bf16.mxu0 %v13246_v18  ;;  %7138 = vmatpush1.bf16.msra.mxu1 %v13241_v32  ;;  %v13258_v18 = vld [vmem:[#allocation7 + $0x92c] ss:$16 sps:$4 sm:$0xff]  }
 0x41d   :  { %17992 = vst [vmem:[#allocation28_spill] sm:$0xff] %v16227_v55  ;;  %v16231_v61 = vadd.f32 %v5115_v14, %v5012_v25  ;;  %v5014_v44 = vpop.f32.mrf.mxu0  ;;  %7139 = vmatprep.subr.bf16.mxu1 %v13252_v34  ;;  %v13255_v55 = vld [vmem:[#allocation7 + $0x8cc] ss:$16 sps:$4 sm:$0xff]   ;;  %v13256_v14 = vld [vmem:[#allocation7 + $0x928] ss:$16 sps:$4 sm:$0xff]  }
 0x41e   :  { %v5117_v16 = vpop.f32.mrf.mxu1  ;;  %7041 = vmatpush1.bf16.msra.mxu0 %v13244_v26  ;;  %v13253_v26 = vld [vmem:[#allocation7 + $0x8c8] ss:$16 sps:$4 sm:$0xff]  }
 0x41f   :  { %17993 = vst [vmem:[#allocation105_spill] sm:$0xff] %v16231_v61  ;;  %v16233_v1 = vadd.f32 %v5117_v16, %v5014_v44  ;;  %v5016_v49 = vpop.f32.mrf.mxu0  ;;  %7042 = vmatprep.subr.bf16.mxu0 %v13249_v15  ;;  %v13264_v44 = vld [vmem:[#allocation7 + $0x90c] ss:$16 sps:$4 sm:$0xff]  }
 0x420   :  { %v5119_v40 = vpop.f32.mrf.mxu1  ;;  %7140 = vmatpush1.bf16.msra.mxu1 %v13250_v62  ;;  %v13261_v16 = vld [vmem:[#allocation7 + $0x8ac] ss:$16 sps:$4 sm:$0xff]  }
 0x421   :  { %17994 = vst [vmem:[#allocation106_spill] sm:$0xff] %v16233_v1  ;;  %v16235_v7 = vadd.f32 %v5119_v40, %v5016_v49  ;;  %6996 = vmatmul.mubr.bf16.gmra.mxu0 %v17942_v54  ;;  %v5020_v32 = vpop.f32.mrf.mxu0  ;;  %7141 = vmatprep.subr.bf16.mxu1 %v13258_v18 }
 0x422   :  { %6883 = vmatmul.mubr.bf16.gmra.mxu1 %v17941_v35  ;;  %v5123_v25 = vpop.f32.mrf.mxu1  ;;  %7043 = vmatpush2.bf16.msra.mxu0 %v13247_v60  ;;  %v13259_v60 = vld [vmem:[#allocation7 + $0x8a8] ss:$16 sps:$4 sm:$0xff]  }
 0x423   :  { %17995 = vst [vmem:[#allocation107_spill] sm:$0xff] %v16235_v7  ;;  %6892 = vmatprep.mubr.bf16.mxu1 %v17944_v29  ;;  %v16240_v34 = vadd.f32 %v5123_v25, %v5020_v32  ;;  %11822 = vmatprep.mubr.msk.bf16.mxu0 %vm2660_vm2, %v17946_v3  ;;  %v5022_v15 = vpop.f32.mrf.mxu0 }
 0x424   :  { %v5125_v62 = vpop.f32.mrf.mxu1  ;;  %7044 = vmatprep.subr.bf16.mxu0 %v13255_v55  ;;  %7142 = vmatpush1.bf16.msra.mxu1 %v13256_v14  ;;  %v13270_v55 = vld [vmem:[#allocation7 + $0xa6c] ss:$16 sps:$4 sm:$0xff]  }
 0x425   :  { %17996 = vst [vmem:[#allocation108_spill] sm:$0xff] %v16240_v34  ;;  %v16244_v49 = vadd.f32 %v5125_v62, %v5022_v15  ;;  %v5024_v40 = vpop.f32.mrf.mxu0  ;;  %7143 = vmatprep.subr.bf16.mxu1 %v13264_v44  ;;  %v13262_v34 = vld [vmem:[#allocation7 + $0x908] ss:$16 sps:$4 sm:$0xff]  }
 0x426   :  { %v5127_v7 = vpop.f32.mrf.mxu1  ;;  %7045 = vmatpush2.bf16.msra.mxu0 %v13253_v26  ;;  %v18000_v15 = vld [vmem:[#allocation68_spill] sm:$0xff]  ;;  %v18001_v26 = vmov 0.0  }
 0x427   :  { %17997 = vst [vmem:[#allocation109_spill] sm:$0xff] %v16244_v49  ;;  %v16246_v1 = vadd.f32 %v5127_v7, %v5024_v40  ;;  %v5026_v32 = vpop.f32.mrf.mxu0  ;;  %7046 = vmatprep.subr.bf16.mxu0 %v13261_v16  ;;  %v16254_v7 = vpack.c.bf16 %v18001_v26, %v18000_v15  ;;  %v13265_v62 = vld [vmem:[#allocation7 + $0x888] ss:$16 sps:$4 sm:$0xff]   ;;  %v13276_v15 = vld [vmem:[#allocation7 + $0xa4c] ss:$16 sps:$4 sm:$0xff]  }
 0x428   :  { %v5129_v25 = vpop.f32.mrf.mxu1  ;;  %7144 = vmatpush1.bf16.msra.mxu1 %v13262_v34 }
 0x429   :  { %17998 = vst [vmem:[#allocation110_spill] sm:$0xff] %v16246_v1  ;;  %v16248_v61 = vadd.f32 %v5129_v25, %v5026_v32  ;;  %7006 = vmatmul.mubr.bf16.gmra.mxu0 %v17954_v0  ;;  %v5030_v18 = vpop.f32.mrf.mxu0  ;;  %v13268_v32 = vld [vmem:[#allocation7 + $0xa68] ss:$16 sps:$4 sm:$0xff]   ;;  %v13273_v25 = vld [vmem:[#allocation7 + $0x86c] ss:$16 sps:$4 sm:$0xff]   ;;  %7153 = vmatprep.subr.bf16.mxu1 %v13270_v55 }
 0x42a   :  { %6893 = vmatmul.mubr.bf16.gmra.mxu1 %v17953_v6  ;;  %v5133_v14 = vpop.f32.mrf.mxu1  ;;  %7047 = vmatpush2.bf16.msra.mxu0 %v13259_v60 }
 0x42b   :  { %17999 = vst [vmem:[#allocation111_spill] sm:$0xff] %v16248_v61  ;;  %6902 = vmatprep.mubr.bf16.mxu1 %v17956_v31  ;;  %v16257_v44 = vadd.f32 %v5133_v14, %v5030_v18  ;;  %11823 = vmatprep.mubr.msk.bf16.mxu0 %vm2660_vm2, %v16254_v7  ;;  %v5032_v16 = vpop.f32.mrf.mxu0  ;;  %v13271_v18 = vld [vmem:[#allocation7 + $0x868] ss:$16 sps:$4 sm:$0xff]   ;;  %v18005_v14 = vld [vmem:[#allocation65_spill] sm:$0xff] }
 0x42c   :  { %v5135_v40 = vpop.f32.mrf.mxu1  ;;  %7048 = vmatprep.subr.bf16.mxu0 %v13267_v19  ;;  %7154 = vmatpush2.bf16.msra.mxu1 %v13268_v32  ;;  %v18007_v19 = vld [vmem:[#allocation67_spill] sm:$0xff] }
 0x42d   :  { %18002 = vst [vmem:[#allocation68_spill] sm:$0xff] %v16257_v44  ;;  %v16261_v61 = vadd.f32 %v5135_v40, %v5032_v16  ;;  %v5034_v1 = vpop.f32.mrf.mxu0  ;;  %v16267_v44 = vpack.c.bf16 %v18001_v26, %v18005_v14  ;;  %v16273_v55 = vpack.c.bf16 %v18001_v26, %v18007_v19  ;;  %7155 = vmatprep.subr.bf16.mxu1 %v13276_v15  ;;  %v13280_v15 = vld [vmem:[#allocation7 + $0xa28] ss:$16 sps:$4 sm:$0xff]  }
 0x42e   :  { %v5137_v49 = vpop.f32.mrf.mxu1  ;;  %7049 = vmatpush2.bf16.msra.mxu0 %v13265_v62  ;;  %v13279_v62 = vld [vmem:[#allocation7 + $0x84c] ss:$16 sps:$4 sm:$0xff]  }
 0x42f   :  { %18003 = vst [vmem:[#allocation112_spill] sm:$0xff] %v16261_v61  ;;  %v16263_v60 = vadd.f32 %v5137_v49, %v5034_v1  ;;  %v5036_v34 = vpop.f32.mrf.mxu0  ;;  %7050 = vmatprep.subr.bf16.mxu0 %v13273_v25  ;;  %v13282_v1 = vld [vmem:[#allocation7 + $0xa2c] ss:$16 sps:$4 sm:$0xff]  }
 0x430   :  { %v5139_v11 = vpop.f32.mrf.mxu1  ;;  %7156 = vmatpush2.bf16.msra.mxu1 %v13274_v33 }
 0x431   :  { %18004 = vst [vmem:[#allocation113_spill] sm:$0xff] %v16263_v60  ;;  %v16269_v16 = vadd.f32 %v5139_v11, %v5036_v34  ;;  %7016 = vmatmul.mubr.bf16.gmra.mxu0 %v16267_v44  ;;  %v5040_v49 = vpop.f32.mrf.mxu0  ;;  %v13277_v11 = vld [vmem:[#allocation7 + $0x848] ss:$16 sps:$4 sm:$0xff]   ;;  %v13285_v34 = vld [vmem:[#allocation7 + $0x82c] ss:$16 sps:$4 sm:$0xff]   ;;  %7157 = vmatprep.subr.bf16.mxu1 %v13282_v1 }
 0x432   :  { %6903 = vmatmul.mubr.bf16.gmra.mxu1 %v17964_v21  ;;  %v5143_v40 = vpop.f32.mrf.mxu1  ;;  %7051 = vmatpush2.bf16.msra.mxu0 %v13271_v18  ;;  %v13283_v18 = vld [vmem:[#allocation7 + $0x828] ss:$16 sps:$4 sm:$0xff]  }
 0x433   :  { %18006 = vst [vmem:[#allocation65_spill] sm:$0xff] %v16269_v16  ;;  %6912 = vmatprep.mubr.bf16.mxu1 %v16273_v55  ;;  %v16278_v32 = vadd.f32 %v5143_v40, %v5040_v49  ;;  %7058 = vmatprep.mubr.bf16.mxu0 %v17896_v10  ;;  %v5042_v25 = vpop.f32.mrf.mxu0  ;;  %v13288_v16 = vld [vmem:[#allocation7 + $0xa0c] ss:$16 sps:$4 sm:$0xff]  }
 0x434   :  { %v5145_v14 = vpop.f32.mrf.mxu1  ;;  %7052 = vmatprep.subr.bf16.mxu0 %v13279_v62  ;;  %v18011_v49 = vld [vmem:[#allocation64_spill] sm:$0xff]  ;;  %7158 = vmatpush2.bf16.msra.mxu1 %v13280_v15  ;;  %v13294_v62 = vld [vmem:[#allocation9 + $0x7e4] ss:$16 sps:$4 sm:$0xff]  }
 0x435   :  { %18008 = vst [vmem:[#allocation67_spill] sm:$0xff] %v16278_v32  ;;  %v16281_v19 = vadd.f32 %v5145_v14, %v5042_v25  ;;  %v5044_v60 = vpop.f32.mrf.mxu0  ;;  %v16287_v40 = vpack.c.bf16 %v18001_v26, %v18011_v49  ;;  %v13291_v25 = vld [vmem:[#allocation7 + $0x80c] ss:$16 sps:$4 sm:$0xff]   ;;  %7159 = vmatprep.subr.bf16.mxu1 %v13288_v16  ;;  %v13297_v15 = vld [vmem:[#allocation9 + $0x9e4] ss:$16 sps:$4 sm:$0xff]  }
 0x436   :  { %v5147_v61 = vpop.f32.mrf.mxu1  ;;  %7053 = vmatpush2.bf16.msra.mxu0 %v13277_v11  ;;  %v13289_v11 = vld [vmem:[#allocation7 + $0x808] ss:$16 sps:$4 sm:$0xff]  }
 0x437   :  { %18009 = vst [vmem:[#allocation114_spill] sm:$0xff] %v16281_v19  ;;  %v16283_v47 = vadd.f32 %v5147_v61, %v5044_v60  ;;  %v5046_v33 = vpop.f32.mrf.mxu0  ;;  %7054 = vmatprep.subr.bf16.mxu0 %v13285_v34  ;;  %v13295_v19 = vld [vmem:[#allocation9 + $0x9e0] ss:$16 sps:$4 sm:$0xff]  }
 0x438   :  { %v5149_v32 = vpop.f32.mrf.mxu1  ;;  %7160 = vmatpush2.bf16.msra.mxu1 %v13286_v42 }
 0x439   :  { %18010 = vst [vmem:[#allocation115_spill] sm:$0xff] %v16283_v47  ;;  %v16289_v14 = vadd.f32 %v5149_v32, %v5046_v33  ;;  %v5050_v1 = vpop.f32.mrf.mxu0  ;;  %7961 = vmatprep.subr.bf16.mxu1 %v13294_v62 }
 0x43a   :  { %6913 = vmatmul.mubr.bf16.gmra.mxu1 %v16287_v40  ;;  %v5153_v61 = vpop.f32.mrf.mxu1  ;;  %7055 = vmatpush2.bf16.msra.mxu0 %v13283_v18  ;;  %v13292_v18 = vld [vmem:[#allocation9 + $0x7e0] ss:$16 sps:$4 sm:$0xff]  }
 0x43b   :  { %18012 = vst [vmem:[#allocation64_spill] sm:$0xff] %v16289_v14  ;;  %11824 = vmatprep.mubr.msk.bf16.mxu1 %vm2660_vm2, %v17795_v38  ;;  %v16294_v60 = vadd.f32 %v5153_v61, %v5050_v1  ;;  %v5052_v49 = vpop.f32.mrf.mxu0  ;;  %7056 = vmatprep.subr.bf16.mxu0 %v13291_v25  ;;  %v13300_v61 = vld [vmem:[#allocation9 + $0x7c4] ss:$16 sps:$4 sm:$0xff]  }
 0x43c   :  { %v5155_v34 = vpop.f32.mrf.mxu1 }
 0x43d   :  { %18013 = vst [vmem:[#allocation116_spill] sm:$0xff] %v16294_v60  ;;  %v16296_v32 = vadd.f32 %v5155_v34, %v5052_v49  ;;  %v5054_v16 = vpop.f32.mrf.mxu0  ;;  %v13303_v60 = vld [vmem:[#allocation9 + $0x9c4] ss:$16 sps:$4 sm:$0xff]   ;;  %v13301_v49 = vld [vmem:[#allocation9 + $0x9c0] ss:$16 sps:$4 sm:$0xff]  }
 0x43e   :  { %v5157_v33 = vpop.f32.mrf.mxu1  ;;  %7057 = vmatpush2.bf16.msra.mxu0 %v13289_v11  ;;  %v13298_v11 = vld [vmem:[#allocation9 + $0x7c0] ss:$16 sps:$4 sm:$0xff]   ;;  %v13306_v34 = vld [vmem:[#allocation9 + $0x7a4] ss:$16 sps:$4 sm:$0xff]  }
 0x43f   :  { %18014 = vst [vmem:[#allocation117_spill] sm:$0xff] %v16296_v32  ;;  %v16298_v26 = vadd.f32 %v5157_v33, %v5054_v16  ;;  %v5056_v14 = vpop.f32.mrf.mxu0  ;;  %8064 = vmatprep.subr.bf16.mxu0 %v13297_v15  ;;  %v13309_v16 = vld [vmem:[#allocation9 + $0x9a4] ss:$16 sps:$4 sm:$0xff]   ;;  %v13307_v32 = vld [vmem:[#allocation9 + $0x9a0] ss:$16 sps:$4 sm:$0xff]  }
 0x440   :  { %v5159_v47 = vpop.f32.mrf.mxu1 }
 0x441   :  { %18015 = vst [vmem:[#allocation118_spill] sm:$0xff] %v16298_v26  ;;  %v16300_v1 = vadd.f32 %v5159_v47, %v5056_v14  ;;  %7059 = vmatmul.mubr.bf16.vlgmr.msra.gmra.mxu0 %v17905_v45  ;;  %v5060_v42 = vpop.f32.mrf.mxu0 }
 0x442   :  { %7162 = vmatmul.mubr.bf16.vlgmr.msra.gmra.mxu1 %v17894_v22  ;;  %v5163_v25 = vpop.f32.mrf.mxu1  ;;  %7068 = vmatprep.mubr.bf16.mxu0 %v17908_v23 }
 0x443   :  { %18016 = vst [vmem:[#allocation119_spill] sm:$0xff] %v16300_v1  ;;  %7962 = vmatpush1.bf16.msra.mxu1 %v13292_v18  ;;  %v16305_v62 = vadd.f32 %v5163_v25, %v5060_v42  ;;  %11825 = vmatprep.mubr.msk.bf16.mxu1 %vm2660_vm2, %v17898_v46  ;;  %v5062_v47 = vpop.f32.mrf.mxu0  ;;  %v13304_v42 = vld [vmem:[#allocation9 + $0x7a0] ss:$16 sps:$4 sm:$0xff]  }
 0x444   :  { %8065 = vmatpush1.bf16.msra.mxu0 %v13295_v19  ;;  %v5165_v14 = vpop.f32.mrf.mxu1  ;;  %7963 = vmatprep.subr.bf16.mxu1 %v13300_v61  ;;  %v13312_v19 = vld [vmem:[#allocation9 + $0x784] ss:$16 sps:$4 sm:$0xff]  }
 0x445   :  { %18017 = vst [vmem:[#allocation120_spill] sm:$0xff] %v16305_v62  ;;  %v16309_v15 = vadd.f32 %v5165_v14, %v5062_v47  ;;  %8066 = vmatprep.subr.bf16.mxu0 %v13303_v60  ;;  %v5064_v33 = vpop.f32.mrf.mxu0  ;;  %v13315_v61 = vld [vmem:[#allocation9 + $0x984] ss:$16 sps:$4 sm:$0xff]  }
 0x446   :  { %v5167_v18 = vpop.f32.mrf.mxu1  ;;  %v13318_v14 = vld [vmem:[#allocation9 + $0x764] ss:$16 sps:$4 sm:$0xff]  }
 0x447   :  { %18018 = vst [vmem:[#allocation121_spill] sm:$0xff] %v16309_v15  ;;  %7964 = vmatpush1.bf16.msra.mxu1 %v13298_v11  ;;  %v16311_v1 = vadd.f32 %v5167_v18, %v5064_v33  ;;  %v5066_v25 = vpop.f32.mrf.mxu0  ;;  %v13310_v11 = vld [vmem:[#allocation9 + $0x780] ss:$16 sps:$4 sm:$0xff]   ;;  %v13321_v33 = vld [vmem:[#allocation9 + $0x744] ss:$16 sps:$4 sm:$0xff]  }
 0x448   :  { %8067 = vmatpush1.bf16.msra.mxu0 %v13301_v49  ;;  %7965 = vmatprep.subr.bf16.mxu1 %v13306_v34  ;;  %v5169_v62 = vpop.f32.mrf.mxu1  ;;  %v13316_v34 = vld [vmem:[#allocation9 + $0x760] ss:$16 sps:$4 sm:$0xff]   ;;  %v13324_v18 = vld [vmem:[#allocation9 + $0x964] ss:$16 sps:$4 sm:$0xff]  }
 0x449   :  { %18019 = vst [vmem:[#allocation122_spill] sm:$0xff] %v16311_v1  ;;  %v16313_v26 = vadd.f32 %v5169_v62, %v5066_v25  ;;  %8068 = vmatprep.subr.bf16.mxu0 %v13309_v16  ;;  %7069 = vmatmul.mubr.bf16.gmra.mxu0 %v17917_v24  ;;  %v5869_v60 = vpop.f32.mrf.mxu0  ;;  %v13313_v62 = vld [vmem:[#allocation9 + $0x980] ss:$16 sps:$4 sm:$0xff]  }
 0x44a   :  { %7172 = vmatmul.mubr.bf16.gmra.mxu1 %v17906_v56  ;;  %7078 = vmatprep.mubr.bf16.mxu0 %v17920_v41  ;;  %v13328_v41 = vld [vmem:[#allocation9 + $0x940] ss:$16 sps:$4 sm:$0xff]  }
 0x44b   :  { %18020 = vst [vmem:[#allocation123_spill] sm:$0xff] %v16313_v26  ;;  %7966 = vmatpush1.bf16.msra.mxu1 %v13304_v42  ;;  %11826 = vmatprep.mubr.msk.bf16.mxu1 %vm2660_vm2, %v17910_v37  ;;  %v5871_v47 = vpop.f32.mrf.mxu0  ;;  %v13327_v26 = vld [vmem:[#allocation9 + $0x724] ss:$16 sps:$4 sm:$0xff]  }
 0x44c   :  { %7967 = vmatprep.subr.bf16.mxu1 %v13312_v19  ;;  %8069 = vmatpush1.bf16.msra.mxu0 %v13307_v32  ;;  %v13322_v19 = vld [vmem:[#allocation9 + $0x960] ss:$16 sps:$4 sm:$0xff]  }
 0x44d   :  { %v5873_v49 = vpop.f32.mrf.mxu0  ;;  %8070 = vmatprep.subr.bf16.mxu0 %v13315_v61  ;;  %v13319_v61 = vld [vmem:[#allocation9 + $0x740] ss:$16 sps:$4 sm:$0xff]  }
 0x44f   :  { %7968 = vmatpush1.bf16.msra.mxu1 %v13310_v11  ;;  %v5875_v16 = vpop.f32.mrf.mxu0  ;;  %v13330_v11 = vld [vmem:[#allocation9 + $0x944] ss:$16 sps:$4 sm:$0xff]  }
 0x450   :  { %7969 = vmatprep.subr.bf16.mxu1 %v13318_v14  ;;  %8071 = vmatpush1.bf16.msra.mxu0 %v13313_v62 }
 0x451   :  { %7079 = vmatmul.mubr.bf16.gmra.mxu0 %v17929_v53  ;;  %v5879_v25 = vpop.f32.mrf.mxu0  ;;  %8072 = vmatprep.subr.bf16.mxu0 %v13324_v18  ;;  %v13336_v18 = vld [vmem:[#allocation9 + $0x924] ss:$16 sps:$4 sm:$0xff]  }
 0x452   :  { %7182 = vmatmul.mubr.bf16.gmra.mxu1 %v17918_v48  ;;  %v5766_v42 = vpop.f32.mrf.mxu1  ;;  %7088 = vmatprep.mubr.bf16.mxu0 %v17932_v36  ;;  %v13325_v36 = vld [vmem:[#allocation9 + $0x720] ss:$16 sps:$4 sm:$0xff]  }
 0x453   :  { %7970 = vmatpush1.bf16.msra.mxu1 %v13316_v34  ;;  %v5767_v32 = vadd.f32 %v5766_v42, %v16124_v30  ;;  %11827 = vmatprep.mubr.msk.bf16.mxu1 %vm2660_vm2, %v17922_v9  ;;  %v5881_v62 = vpop.f32.mrf.mxu0 }
 0x454   :  { %v5768_v14 = vpop.f32.mrf.mxu1  ;;  %7971 = vmatprep.subr.bf16.mxu1 %v13321_v33  ;;  %8073 = vmatpush1.bf16.msra.mxu0 %v13322_v19 }
 0x455   :  { %v16326_v1 = vadd.f32 %v5869_v60, %v5767_v32  ;;  %v5769_v15 = vadd.f32 %v5768_v14, %v16129_v4  ;;  %v5883_v53 = vpop.f32.mrf.mxu0  ;;  %8074 = vmatprep.subr.bf16.mxu0 %v13330_v11  ;;  %v13333_v4 = vld [vmem:[#allocation9 + $0x704] ss:$16 sps:$4 sm:$0xff]  }
 0x456   :  { %v5770_v34 = vpop.f32.mrf.mxu1  ;;  %v13339_v32 = vld [vmem:[#allocation9 + $0x8e4] ss:$16 sps:$4 sm:$0xff]  }
 0x457   :  { %v16329_v30 = vadd.f32 %v5871_v47, %v5769_v15  ;;  %7972 = vmatpush1.bf16.msra.mxu1 %v13319_v61  ;;  %v5771_v42 = vadd.f32 %v5770_v34, %v16131_v50  ;;  %v5885_v33 = vpop.f32.mrf.mxu0 }
 0x458   :  { %v5772_v9 = vpop.f32.mrf.mxu1  ;;  %7973 = vmatprep.subr.bf16.mxu1 %v13327_v26  ;;  %v13331_v26 = vld [vmem:[#allocation9 + $0x700] ss:$16 sps:$4 sm:$0xff]   ;;  %8075 = vmatpush1.bf16.msra.mxu0 %v13328_v41 }
 0x459   :  { %v16332_v48 = vadd.f32 %v5873_v49, %v5771_v42  ;;  %v5773_v60 = vadd.f32 %v5772_v9, %v16133_v27  ;;  %7089 = vmatmul.mubr.bf16.gmra.mxu0 %v17941_v35  ;;  %v5889_v47 = vpop.f32.mrf.mxu0  ;;  %v13334_v49 = vld [vmem:[#allocation9 + $0x920] ss:$16 sps:$4 sm:$0xff]   ;;  %8076 = vmatprep.subr.bf16.mxu0 %v13336_v18  ;;  %v13348_v18 = vld [vmem:[#allocation9 + $0xa64] ss:$16 sps:$4 sm:$0xff]  }
 0x45a   :  { %7192 = vmatmul.mubr.bf16.gmra.mxu1 %v17930_v17  ;;  %v5776_v15 = vpop.f32.mrf.mxu1  ;;  %7098 = vmatprep.mubr.bf16.mxu0 %v17944_v29  ;;  %v13337_v42 = vld [vmem:[#allocation9 + $0x8e0] ss:$16 sps:$4 sm:$0xff]  }
 0x45b   :  { %v16337_v19 = vadd.f32 %v5875_v16, %v5773_v60  ;;  %7974 = vmatpush1.bf16.msra.mxu1 %v13325_v36  ;;  %v5777_v50 = vadd.f32 %v5776_v15, %v16137_v63  ;;  %11828 = vmatprep.mubr.msk.bf16.mxu1 %vm2660_vm2, %v17934_v2  ;;  %v5891_v27 = vpop.f32.mrf.mxu0  ;;  %v13342_v36 = vld [vmem:[#allocation9 + $0x904] ss:$16 sps:$4 sm:$0xff]   ;;  %v13340_v15 = vld [vmem:[#allocation9 + $0x900] ss:$16 sps:$4 sm:$0xff]  }
 0x45c   :  { %v5778_v9 = vpop.f32.mrf.mxu1  ;;  %7975 = vmatprep.subr.bf16.mxu1 %v13333_v4  ;;  %8077 = vmatpush1.bf16.msra.mxu0 %v13334_v49  ;;  %v13345_v4 = vld [vmem:[#allocation9 + $0x8c4] ss:$16 sps:$4 sm:$0xff]   ;;  %v13346_v49 = vld [vmem:[#allocation9 + $0xa60] ss:$16 sps:$4 sm:$0xff]  }
 0x45d   :  { %v16343_v61 = vadd.f32 %v5879_v25, %v5777_v50  ;;  %v5779_v11 = vadd.f32 %v5778_v9, %v16142_v43  ;;  %v5893_v63 = vpop.f32.mrf.mxu0  ;;  %8078 = vmatprep.subr.bf16.mxu0 %v13342_v36 }
 0x45e   :  { %v5780_v16 = vpop.f32.mrf.mxu1 }
 0x45f   :  { %v16346_v14 = vadd.f32 %v5881_v62, %v5779_v11  ;;  %7976 = vmatpush1.bf16.msra.mxu1 %v13331_v26  ;;  %v5781_v34 = vadd.f32 %v5780_v16, %v16144_v58  ;;  %v5895_v60 = vpop.f32.mrf.mxu0 }
 0x460   :  { %v5782_v41 = vpop.f32.mrf.mxu1  ;;  %7977 = vmatprep.subr.bf16.mxu1 %v13339_v32  ;;  %8079 = vmatpush1.bf16.msra.mxu0 %v13340_v15  ;;  %v13351_v32 = vld [vmem:[#allocation9 + $0x8a4] ss:$16 sps:$4 sm:$0xff]  }
 0x461   :  { %v16349_v25 = vadd.f32 %v5883_v53, %v5781_v34  ;;  %v5783_v43 = vadd.f32 %v5782_v41, %v16146_v59  ;;  %7099 = vmatmul.mubr.bf16.gmra.mxu0 %v17953_v6  ;;  %v5899_v50 = vpop.f32.mrf.mxu0  ;;  %v13343_v53 = vld [vmem:[#allocation9 + $0x8c0] ss:$16 sps:$4 sm:$0xff]   ;;  %8088 = vmatprep.subr.bf16.mxu0 %v13348_v18 }
 0x462   :  { %7202 = vmatmul.mubr.bf16.gmra.mxu1 %v17942_v54  ;;  %v5786_v62 = vpop.f32.mrf.mxu1  ;;  %7108 = vmatprep.mubr.bf16.mxu0 %v17956_v31  ;;  %v13349_v41 = vld [vmem:[#allocation9 + $0x8a0] ss:$16 sps:$4 sm:$0xff]  }
 0x463   :  { %v16354_v58 = vadd.f32 %v5885_v33, %v5783_v43  ;;  %7978 = vmatpush2.bf16.msra.mxu1 %v13337_v42  ;;  %v5787_v26 = vadd.f32 %v5786_v62, %v16150_v13  ;;  %11829 = vmatprep.mubr.msk.bf16.mxu1 %vm2660_vm2, %v17946_v3  ;;  %v5901_v9 = vpop.f32.mrf.mxu0  ;;  %v13354_v33 = vld [vmem:[#allocation9 + $0xa44] ss:$16 sps:$4 sm:$0xff]  }
 0x464   :  { %v5788_v59 = vpop.f32.mrf.mxu1  ;;  %7979 = vmatprep.subr.bf16.mxu1 %v13345_v4  ;;  %8089 = vmatpush2.bf16.msra.mxu0 %v13346_v49  ;;  %v13357_v62 = vld [vmem:[#allocation9 + $0x884] ss:$16 sps:$4 sm:$0xff]   ;;  %v13352_v4 = vld [vmem:[#allocation9 + $0xa40] ss:$16 sps:$4 sm:$0xff]  }
 0x465   :  { %v16360_v11 = vadd.f32 %v5889_v47, %v5787_v26  ;;  %v5789_v36 = vadd.f32 %v5788_v59, %v16155_v20  ;;  %v5903_v13 = vpop.f32.mrf.mxu0  ;;  %8090 = vmatprep.subr.bf16.mxu0 %v13354_v33  ;;  %v13363_v26 = vld [vmem:[#allocation9 + $0xa24] ss:$16 sps:$4 sm:$0xff]  }
 0x466   :  { %v5790_v16 = vpop.f32.mrf.mxu1  ;;  %v13360_v49 = vld [vmem:[#allocation9 + $0x864] ss:$16 sps:$4 sm:$0xff]  }
 0x467   :  { %v16363_v34 = vadd.f32 %v5891_v27, %v5789_v36  ;;  %7980 = vmatpush2.bf16.msra.mxu1 %v13343_v53  ;;  %v5791_v42 = vadd.f32 %v5790_v16, %v16157_v57  ;;  %v5905_v43 = vpop.f32.mrf.mxu0 }
 0x468   :  { %v5792_v15 = vpop.f32.mrf.mxu1  ;;  %7981 = vmatprep.subr.bf16.mxu1 %v13351_v32  ;;  %8091 = vmatpush2.bf16.msra.mxu0 %v13352_v4 }
 0x469   :  { %v16366_v47 = vadd.f32 %v5893_v63, %v5791_v42  ;;  %v5793_v20 = vadd.f32 %v5792_v15, %v16159_v5  ;;  %7109 = vmatmul.mubr.bf16.gmra.mxu0 %v17964_v21  ;;  %v5909_v18 = vpop.f32.mrf.mxu0  ;;  %v13355_v63 = vld [vmem:[#allocation9 + $0x880] ss:$16 sps:$4 sm:$0xff]   ;;  %8092 = vmatprep.subr.bf16.mxu0 %v13363_v26 }
 0x46a   :  { %7212 = vmatmul.mubr.bf16.gmra.mxu1 %v17954_v0  ;;  %v5796_v27 = vpop.f32.mrf.mxu1  ;;  %7118 = vmatprep.mubr.bf16.mxu0 %v16273_v55  ;;  %v13367_v26 = vld [vmem:[#allocation9 + $0xa00] ss:$16 sps:$4 sm:$0xff]  }
 0x46b   :  { %v16371_v57 = vadd.f32 %v5895_v60, %v5793_v20  ;;  %7982 = vmatpush2.bf16.msra.mxu1 %v13349_v41  ;;  %v5797_v53 = vadd.f32 %v5796_v27, %v16163_v12  ;;  %11830 = vmatprep.mubr.msk.bf16.mxu1 %vm2660_vm2, %v16254_v7  ;;  %v5911_v59 = vpop.f32.mrf.mxu0  ;;  %v13361_v60 = vld [vmem:[#allocation9 + $0xa20] ss:$16 sps:$4 sm:$0xff]   ;;  %v13366_v20 = vld [vmem:[#allocation9 + $0x844] ss:$16 sps:$4 sm:$0xff]  }
 0x46c   :  { %v5798_v5 = vpop.f32.mrf.mxu1  ;;  %7983 = vmatprep.subr.bf16.mxu1 %v13357_v62  ;;  %v13358_v41 = vld [vmem:[#allocation9 + $0x860] ss:$16 sps:$4 sm:$0xff]   ;;  %8093 = vmatpush2.bf16.msra.mxu0 %v13361_v60 }
 0x46d   :  { %v16377_v32 = vadd.f32 %v5899_v50, %v5797_v53  ;;  %v5799_v36 = vadd.f32 %v5798_v5, %v16168_v8  ;;  %v5913_v16 = vpop.f32.mrf.mxu0  ;;  %v13369_v8 = vld [vmem:[#allocation9 + $0xa04] ss:$16 sps:$4 sm:$0xff]  }
 0x46e   :  { %v5800_v33 = vpop.f32.mrf.mxu1  ;;  %8094 = vmatprep.subr.bf16.mxu0 %v13369_v8  ;;  %v13381_v8 = vld [vmem:[#allocation9 + $0x7cc] ss:$16 sps:$4 sm:$0xff]  }
 0x46f   :  { %v16380_v12 = vadd.f32 %v5901_v9, %v5799_v36  ;;  %7984 = vmatpush2.bf16.msra.mxu1 %v13355_v63  ;;  %v5801_v42 = vadd.f32 %v5800_v33, %v16170_v52  ;;  %v5915_v62 = vpop.f32.mrf.mxu0  ;;  %v13375_v63 = vld [vmem:[#allocation9 + $0x7ec] ss:$16 sps:$4 sm:$0xff]  }
 0x470   :  { %v5802_v15 = vpop.f32.mrf.mxu1  ;;  %7985 = vmatprep.subr.bf16.mxu1 %v13360_v49  ;;  %v13372_v49 = vld [vmem:[#allocation9 + $0x824] ss:$16 sps:$4 sm:$0xff]   ;;  %8095 = vmatpush2.bf16.msra.mxu0 %v13367_v26 }
 0x471   :  { %v16383_v27 = vadd.f32 %v5903_v13, %v5801_v42  ;;  %v5803_v50 = vadd.f32 %v5802_v15, %v16172_v51  ;;  %7119 = vmatmul.mubr.bf16.gmra.mxu0 %v16287_v40  ;;  %v5919_v4 = vpop.f32.mrf.mxu0  ;;  %v13364_v13 = vld [vmem:[#allocation9 + $0x840] ss:$16 sps:$4 sm:$0xff]   ;;  %v18025_v42 = vld [vmem:[#allocation100_spill] sm:$0xff]  ;;  %8167 = vmatprep.subr.bf16.mxu0 %v13375_v63 }
 0x472   :  { %7222 = vmatmul.mubr.bf16.gmra.mxu1 %v16267_v44  ;;  %v5806_v9 = vpop.f32.mrf.mxu1  ;;  %11943 = vmatprep.mubr.msk.bf16.mxu0 %vm2660_vm2, %v17795_v38  ;;  %v13370_v15 = vld [vmem:[#allocation9 + $0x820] ss:$16 sps:$4 sm:$0xff]   ;;  %v13379_v63 = vld [vmem:[#allocation9 + $0x7c8] ss:$16 sps:$4 sm:$0xff]  }
 0x473   :  { %18021 = vst [vmem:[#allocation124_spill] sm:$0xff] %v16383_v27  ;;  %v16388_v53 = vadd.f32 %v5905_v43, %v5803_v50  ;;  %7986 = vmatpush2.bf16.msra.mxu1 %v13358_v41  ;;  %v5807_v52 = vadd.f32 %v5806_v9, %v16176_v39  ;;  %7993 = vmatprep.mubr.bf16.mxu1 %v17896_v10  ;;  %v5921_v5 = vpop.f32.mrf.mxu0  ;;  %v13373_v50 = vld [vmem:[#allocation9 + $0x7e8] ss:$16 sps:$4 sm:$0xff]  }
 0x474   :  { %v5808_v51 = vpop.f32.mrf.mxu1  ;;  %7987 = vmatprep.subr.bf16.mxu1 %v13366_v20 }
 0x475   :  { %18022 = vst [vmem:[#allocation125_spill] sm:$0xff] %v16388_v53  ;;  %v16394_v36 = vadd.f32 %v5909_v18, %v5807_v52  ;;  %v5809_v60 = vadd.f32 %v5808_v51, %v16181_v28  ;;  %v5923_v33 = vpop.f32.mrf.mxu0  ;;  %v13378_v53 = vld [vmem:[#allocation9 + $0x804] ss:$16 sps:$4 sm:$0xff]  }
 0x476   :  { %v5810_v43 = vpop.f32.mrf.mxu1  ;;  %v18027_v52 = vld [vmem:[#allocation101_spill] sm:$0xff] }
 0x477   :  { %18023 = vst [vmem:[#allocation126_spill] sm:$0xff] %v16394_v36  ;;  %v16397_v39 = vadd.f32 %v5911_v59, %v5809_v60  ;;  %7988 = vmatpush2.bf16.msra.mxu1 %v13364_v13  ;;  %v5811_v41 = vadd.f32 %v5810_v43, %v18025_v42  ;;  %v5925_v20 = vpop.f32.mrf.mxu0  ;;  %v18029_v13 = vld [vmem:[#allocation102_spill] sm:$0xff]  ;;  %v13376_v60 = vld [vmem:[#allocation9 + $0x800] ss:$16 sps:$4 sm:$0xff]  }
 0x478   :  { %v5812_v9 = vpop.f32.mrf.mxu1  ;;  %7989 = vmatprep.subr.bf16.mxu1 %v13372_v49  ;;  %v13384_v43 = vld [vmem:[#allocation9 + $0x7ac] ss:$16 sps:$4 sm:$0xff]  }
 0x479   :  { %18024 = vst [vmem:[#allocation127_spill] sm:$0xff] %v16397_v39  ;;  %v16400_v18 = vadd.f32 %v5913_v16, %v5811_v41  ;;  %v5813_v28 = vadd.f32 %v5812_v9, %v18027_v52  ;;  %8097 = vmatmul.mubr.bf16.vlgmr.msra.gmra.mxu0 %v17894_v22  ;;  %v5929_v49 = vpop.f32.mrf.mxu0  ;;  %v13387_v42 = vld [vmem:[#allocation9 + $0x9ec] ss:$16 sps:$4 sm:$0xff]  }
 0x47a   :  { %v5816_v26 = vpop.f32.mrf.mxu1  ;;  %8168 = vmatpush1.bf16.msra.mxu0 %v13373_v50  ;;  %11944 = vmatprep.mubr.msk.bf16.mxu0 %vm2660_vm2, %v17898_v46  ;;  %v18031_v9 = vld [vmem:[#allocation56_spill] sm:$0xff]  ;;  %v18033_v50 = vld [vmem:[#allocation27_spill] sm:$0xff] }
 0x47b   :  { %18026 = vst [vmem:[#allocation100_spill] sm:$0xff] %v16400_v18  ;;  %v16404_v59 = vadd.f32 %v5915_v62, %v5813_v28  ;;  %7990 = vmatpush2.bf16.msra.mxu1 %v13370_v15  ;;  %v5817_v51 = vadd.f32 %v5816_v26, %v18029_v13  ;;  %8169 = vmatprep.subr.bf16.mxu0 %v13381_v8  ;;  %v13382_v26 = vld [vmem:[#allocation9 + $0x7a8] ss:$16 sps:$4 sm:$0xff]   ;;  %v5931_v13 = vpop.f32.mrf.mxu0  ;;  %v13414_v39 = vld [vmem:[#allocation9 + $0x70c] ss:$16 sps:$4 sm:$0xff]  }
 0x47c   :  { %v5818_v16 = vpop.f32.mrf.mxu1  ;;  %7991 = vmatprep.subr.bf16.mxu1 %v13378_v53  ;;  %v13385_v18 = vld [vmem:[#allocation9 + $0x9e8] ss:$16 sps:$4 sm:$0xff]  }
 0x47d   :  { %18028 = vst [vmem:[#allocation101_spill] sm:$0xff] %v16404_v59  ;;  %v16409_v41 = vadd.f32 %v5919_v4, %v5817_v51  ;;  %v5819_v52 = vadd.f32 %v5818_v16, %v18031_v9  ;;  %v18035_v4 = vld [vmem:[#allocation32_spill] sm:$0xff] }
 0x47e   :  { %v5820_v62 = vpop.f32.mrf.mxu1  ;;  %8170 = vmatpush1.bf16.msra.mxu0 %v13379_v63  ;;  %v13393_v16 = vld [vmem:[#allocation9 + $0x9cc] ss:$16 sps:$4 sm:$0xff]  }
 0x47f   :  { %18030 = vst [vmem:[#allocation102_spill] sm:$0xff] %v16409_v41  ;;  %v16412_v15 = vadd.f32 %v5921_v5, %v5819_v52  ;;  %7992 = vmatpush2.bf16.msra.mxu1 %v13376_v60  ;;  %v5821_v28 = vadd.f32 %v5820_v62, %v18033_v50  ;;  %8171 = vmatprep.subr.bf16.mxu0 %v13384_v43  ;;  %v13390_v41 = vld [vmem:[#allocation9 + $0x78c] ss:$16 sps:$4 sm:$0xff]   ;;  %v18037_v60 = vld [vmem:[#allocation103_spill] sm:$0xff]  ;;  %v13388_v43 = vld [vmem:[#allocation9 + $0x788] ss:$16 sps:$4 sm:$0xff]  }
 0x480   :  { %v5822_v59 = vpop.f32.mrf.mxu1  ;;  %8270 = vmatprep.subr.bf16.mxu1 %v13387_v42  ;;  %v5933_v42 = vpop.f32.mrf.mxu0  ;;  %v13396_v9 = vld [vmem:[#allocation9 + $0x76c] ss:$16 sps:$4 sm:$0xff]   ;;  %v18039_v62 = vld [vmem:[#allocation33_spill] sm:$0xff] }
 0x481   :  { %18032 = vst [vmem:[#allocation56_spill] sm:$0xff] %v16412_v15  ;;  %v16415_v53 = vadd.f32 %v5923_v33, %v5821_v28  ;;  %v5823_v51 = vadd.f32 %v5822_v59, %v18035_v4  ;;  %8107 = vmatmul.mubr.bf16.gmra.mxu0 %v17906_v56  ;;  %v13391_v59 = vld [vmem:[#allocation9 + $0x9c8] ss:$16 sps:$4 sm:$0xff]  }
 0x482   :  { %7994 = vmatmul.mubr.bf16.vlgmr.msra.gmra.mxu1 %v17905_v45  ;;  %v5826_v5 = vpop.f32.mrf.mxu1  ;;  %8172 = vmatpush1.bf16.msra.mxu0 %v13382_v26  ;;  %v18041_v4 = vld [vmem:[#allocation34_spill] sm:$0xff] }
 0x483   :  { %18034 = vst [vmem:[#allocation27_spill] sm:$0xff] %v16415_v53  ;;  %v16420_v8 = vadd.f32 %v5925_v20, %v5823_v51  ;;  %8003 = vmatprep.mubr.bf16.mxu1 %v17908_v23  ;;  %v5827_v63 = vadd.f32 %v5826_v5, %v18037_v60  ;;  %8271 = vmatpush1.bf16.msra.mxu1 %v13385_v18  ;;  %v13399_v20 = vld [vmem:[#allocation9 + $0x9ac] ss:$16 sps:$4 sm:$0xff]   ;;  %v13394_v18 = vld [vmem:[#allocation9 + $0x768] ss:$16 sps:$4 sm:$0xff]   ;;  %v5935_v5 = vpop.f32.mrf.mxu0 }
 0x484   :  { %11945 = vmatprep.mubr.msk.bf16.mxu0 %vm2660_vm2, %v17910_v37  ;;  %v5828_v33 = vpop.f32.mrf.mxu1  ;;  %8173 = vmatprep.subr.bf16.mxu0 %v13390_v41  ;;  %v13402_v41 = vld [vmem:[#allocation9 + $0x74c] ss:$16 sps:$4 sm:$0xff]  }
 0x485   :  { %18036 = vst [vmem:[#allocation32_spill] sm:$0xff] %v16420_v8  ;;  %v16426_v52 = vadd.f32 %v5929_v49, %v5827_v63  ;;  %v5829_v50 = vadd.f32 %v5828_v33, %v18039_v62  ;;  %8272 = vmatprep.subr.bf16.mxu1 %v13393_v16  ;;  %v13397_v8 = vld [vmem:[#allocation9 + $0x9a8] ss:$16 sps:$4 sm:$0xff]   ;;  %v18043_v49 = vld [vmem:[#allocation39_spill] sm:$0xff]  ;;  %v13405_v16 = vld [vmem:[#allocation9 + $0x98c] ss:$16 sps:$4 sm:$0xff]  }
 0x486   :  { %v5830_v28 = vpop.f32.mrf.mxu1  ;;  %8174 = vmatpush1.bf16.msra.mxu0 %v13388_v43 }
 0x487   :  { %18038 = vst [vmem:[#allocation103_spill] sm:$0xff] %v16426_v52  ;;  %v16429_v26 = vadd.f32 %v5931_v13, %v5829_v50  ;;  %v5831_v51 = vadd.f32 %v5830_v28, %v18041_v4  ;;  %8273 = vmatpush1.bf16.msra.mxu1 %v13391_v59  ;;  %8175 = vmatprep.subr.bf16.mxu0 %v13396_v9  ;;  %v18044_v13 = vld [vmem:[#allocation47_spill] sm:$0xff]  ;;  %v18046_v50 = vld [vmem:[#allocation49_spill] sm:$0xff]  ;;  %v13406_v52 = vld [vmem:[#allocation9 + $0x728] ss:$16 sps:$4 sm:$0xff]  }
 0x488   :  { %v5832_v60 = vpop.f32.mrf.mxu1  ;;  %8274 = vmatprep.subr.bf16.mxu1 %v13399_v20  ;;  %v18047_v59 = vld [vmem:[#allocation31_spill] sm:$0xff]  ;;  %v18048_v28 = vld [vmem:[#allocation53_spill] sm:$0xff] }
 0x489   :  { %18040 = vst [vmem:[#allocation33_spill] sm:$0xff] %v16429_v26  ;;  %v16432_v53 = vadd.f32 %v5933_v42, %v5831_v51  ;;  %v5833_v63 = vadd.f32 %v5832_v60, %v18043_v49  ;;  %8117 = vmatmul.mubr.bf16.gmra.mxu0 %v18044_v13  ;;  %v5972_v43 = vpop.f32.mrf.mxu0  ;;  %v13400_v42 = vld [vmem:[#allocation9 + $0x748] ss:$16 sps:$4 sm:$0xff]   ;;  %v13408_v60 = vld [vmem:[#allocation9 + $0x72c] ss:$16 sps:$4 sm:$0xff]  }
 0x48a   :  { %8004 = vmatmul.mubr.bf16.gmra.mxu1 %v17917_v24  ;;  %v6075_v33 = vpop.f32.mrf.mxu1  ;;  %8176 = vmatpush1.bf16.msra.mxu0 %v13394_v18  ;;  %v5973_v9 = vadd.f32 %v5972_v43, %v18047_v59  ;;  %v13403_v51 = vld [vmem:[#allocation9 + $0x988] ss:$16 sps:$4 sm:$0xff]   ;;  %v18052_v43 = vld [vmem:[#allocation45_spill] sm:$0xff] }
 0x48b   :  { %18042 = vst [vmem:[#allocation34_spill] sm:$0xff] %v16432_v53  ;;  %v16437_v62 = vadd.f32 %v5935_v5, %v5833_v63  ;;  %8013 = vmatprep.mubr.bf16.mxu1 %v18046_v50  ;;  %11946 = vmatprep.mubr.msk.bf16.mxu0 %vm2660_vm2, %v18048_v28  ;;  %v5974_v20 = vpop.f32.mrf.mxu0  ;;  %v18050_v53 = vld [vmem:[#allocation40_spill] sm:$0xff] }
 0x48c   :  { %8275 = vmatpush1.bf16.msra.mxu1 %v13397_v8  ;;  %v6077_v4 = vpop.f32.mrf.mxu1  ;;  %v16443_v49 = vadd.f32 %v6075_v33, %v5973_v9  ;;  %v5975_v26 = vadd.f32 %v5974_v20, %v18050_v53  ;;  %8177 = vmatprep.subr.bf16.mxu0 %v13402_v41  ;;  %v13411_v5 = vld [vmem:[#allocation9 + $0x96c] ss:$16 sps:$4 sm:$0xff]   ;;  %v18054_v9 = vld [vmem:[#allocation25_spill] sm:$0xff]  ;;  %v13409_v41 = vld [vmem:[#allocation9 + $0x968] ss:$16 sps:$4 sm:$0xff]  }
 0x48d   :  { %18045 = vst [vmem:[#allocation39_spill] sm:$0xff] %v16437_v62  ;;  %8276 = vmatprep.subr.bf16.mxu1 %v13405_v16  ;;  %v5976_v63 = vpop.f32.mrf.mxu0  ;;  %v18055_v16 = vld [vmem:[#allocation46_spill] sm:$0xff] }
 0x48e   :  { %18049 = vst [vmem:[#allocation47_spill] sm:$0xff] %v16443_v49  ;;  %v6079_v18 = vpop.f32.mrf.mxu1  ;;  %v16446_v62 = vadd.f32 %v6077_v4, %v5975_v26  ;;  %8178 = vmatpush1.bf16.msra.mxu0 %v13400_v42  ;;  %v5977_v59 = vadd.f32 %v5976_v63, %v18052_v43  ;;  %v13420_v20 = vld [vmem:[#allocation9 + $0x94c] ss:$16 sps:$4 sm:$0xff]  }
 0x48f   :  { %v5978_v8 = vpop.f32.mrf.mxu0  ;;  %8179 = vmatprep.subr.bf16.mxu0 %v13408_v60  ;;  %v18058_v60 = vld [vmem:[#allocation28_spill] sm:$0xff] }
 0x490   :  { %18051 = vst [vmem:[#allocation49_spill] sm:$0xff] %v16446_v62  ;;  %8277 = vmatpush1.bf16.msra.mxu1 %v13403_v51  ;;  %v6081_v15 = vpop.f32.mrf.mxu1  ;;  %v16449_v33 = vadd.f32 %v6079_v18, %v5977_v59  ;;  %v5979_v53 = vadd.f32 %v5978_v8, %v18054_v9  ;;  %v18057_v51 = vld [vmem:[#allocation52_spill] sm:$0xff]  ;;  %v18060_v9 = vld [vmem:[#allocation105_spill] sm:$0xff] }
 0x491   :  { %8278 = vmatprep.subr.bf16.mxu1 %v13411_v5  ;;  %8127 = vmatmul.mubr.bf16.gmra.mxu0 %v17930_v17  ;;  %v5982_v26 = vpop.f32.mrf.mxu0  ;;  %v13412_v18 = vld [vmem:[#allocation9 + $0x708] ss:$16 sps:$4 sm:$0xff]   ;;  %v13417_v59 = vld [vmem:[#allocation9 + $0x8ec] ss:$16 sps:$4 sm:$0xff]  }
 0x492   :  { %18053 = vst [vmem:[#allocation31_spill] sm:$0xff] %v16449_v33  ;;  %8014 = vmatmul.mubr.bf16.gmra.mxu1 %v18055_v16  ;;  %v6085_v42 = vpop.f32.mrf.mxu1  ;;  %v16454_v4 = vadd.f32 %v6081_v15, %v5979_v53  ;;  %8180 = vmatpush1.bf16.msra.mxu0 %v13406_v52  ;;  %v5983_v63 = vadd.f32 %v5982_v26, %v18058_v60  ;;  %v13418_v15 = vld [vmem:[#allocation9 + $0x948] ss:$16 sps:$4 sm:$0xff]  }
 0x493   :  { %8023 = vmatprep.mubr.bf16.mxu1 %v18057_v51  ;;  %11947 = vmatprep.mubr.msk.bf16.mxu0 %vm2660_vm2, %v17934_v2  ;;  %v5984_v43 = vpop.f32.mrf.mxu0  ;;  %v18062_v26 = vld [vmem:[#allocation106_spill] sm:$0xff] }
 0x494   :  { %18056 = vst [vmem:[#allocation53_spill] sm:$0xff] %v16454_v4  ;;  %v6087_v5 = vpop.f32.mrf.mxu1  ;;  %8181 = vmatprep.subr.bf16.mxu0 %v13414_v39  ;;  %v16460_v8 = vadd.f32 %v6085_v42, %v5983_v63  ;;  %v5985_v33 = vadd.f32 %v5984_v43, %v18060_v9  ;;  %8279 = vmatpush1.bf16.msra.mxu1 %v13409_v41  ;;  %v13415_v62 = vld [vmem:[#allocation9 + $0x8e8] ss:$16 sps:$4 sm:$0xff]   ;;  %v13423_v39 = vld [vmem:[#allocation9 + $0x8cc] ss:$16 sps:$4 sm:$0xff]   ;;  %v18064_v42 = vld [vmem:[#allocation107_spill] sm:$0xff] }
 0x495   :  { %v5986_v53 = vpop.f32.mrf.mxu0  ;;  %8280 = vmatprep.subr.bf16.mxu1 %v13420_v20  ;;  %v13426_v41 = vld [vmem:[#allocation9 + $0x92c] ss:$16 sps:$4 sm:$0xff]  }
 0x496   :  { %18059 = vst [vmem:[#allocation40_spill] sm:$0xff] %v16460_v8  ;;  %v6089_v4 = vpop.f32.mrf.mxu1  ;;  %v16463_v52 = vadd.f32 %v6087_v5, %v5985_v33  ;;  %8182 = vmatpush1.bf16.msra.mxu0 %v13412_v18  ;;  %v5987_v60 = vadd.f32 %v5986_v53, %v18062_v26  ;;  %v13424_v18 = vld [vmem:[#allocation9 + $0x928] ss:$16 sps:$4 sm:$0xff]   ;;  %v13432_v9 = vld [vmem:[#allocation9 + $0x90c] ss:$16 sps:$4 sm:$0xff]  }
 0x497   :  { %v5988_v49 = vpop.f32.mrf.mxu0  ;;  %8183 = vmatprep.subr.bf16.mxu0 %v13417_v59  ;;  %v18066_v5 = vld [vmem:[#allocation108_spill] sm:$0xff] }
 0x498   :  { %18061 = vst [vmem:[#allocation45_spill] sm:$0xff] %v16463_v52  ;;  %v6091_v36 = vpop.f32.mrf.mxu1  ;;  %v16466_v27 = vadd.f32 %v6089_v4, %v5987_v60  ;;  %v5989_v63 = vadd.f32 %v5988_v49, %v18064_v42  ;;  %8281 = vmatpush1.bf16.msra.mxu1 %v13418_v15  ;;  %v13421_v4 = vld [vmem:[#allocation9 + $0x8c8] ss:$16 sps:$4 sm:$0xff]   ;;  %v13429_v53 = vld [vmem:[#allocation9 + $0x8ac] ss:$16 sps:$4 sm:$0xff]   ;;  %v18068_v60 = vld [vmem:[#allocation109_spill] sm:$0xff] }
 0x499   :  { %8137 = vmatmul.mubr.bf16.gmra.mxu0 %v17942_v54  ;;  %v5992_v33 = vpop.f32.mrf.mxu0  ;;  %8282 = vmatprep.subr.bf16.mxu1 %v13426_v41  ;;  %v13438_v41 = vld [vmem:[#allocation9 + $0xa6c] ss:$16 sps:$4 sm:$0xff]  }
 0x49a   :  { %18063 = vst [vmem:[#allocation25_spill] sm:$0xff] %v16466_v27  ;;  %8024 = vmatmul.mubr.bf16.gmra.mxu1 %v17941_v35  ;;  %v6095_v20 = vpop.f32.mrf.mxu1  ;;  %v16471_v43 = vadd.f32 %v6091_v36, %v5989_v63  ;;  %8184 = vmatpush2.bf16.msra.mxu0 %v13415_v62  ;;  %v5993_v59 = vadd.f32 %v5992_v33, %v18066_v5  ;;  %v18070_v33 = vld [vmem:[#allocation110_spill] sm:$0xff] }
 0x49b   :  { %8033 = vmatprep.mubr.bf16.mxu1 %v17944_v29  ;;  %11948 = vmatprep.mubr.msk.bf16.mxu0 %vm2660_vm2, %v17946_v3  ;;  %v5994_v49 = vpop.f32.mrf.mxu0 }
 0x49c   :  { %18065 = vst [vmem:[#allocation46_spill] sm:$0xff] %v16471_v43  ;;  %v6097_v15 = vpop.f32.mrf.mxu1  ;;  %8185 = vmatprep.subr.bf16.mxu0 %v13423_v39  ;;  %v16477_v26 = vadd.f32 %v6095_v20, %v5993_v59  ;;  %v5995_v42 = vadd.f32 %v5994_v49, %v18068_v60  ;;  %8283 = vmatpush1.bf16.msra.mxu1 %v13424_v18  ;;  %v13427_v43 = vld [vmem:[#allocation9 + $0x8a8] ss:$16 sps:$4 sm:$0xff]   ;;  %v18072_v20 = vld [vmem:[#allocation111_spill] sm:$0xff]  ;;  %v13435_v49 = vld [vmem:[#allocation9 + $0x88c] ss:$16 sps:$4 sm:$0xff]  }
 0x49d   :  { %v5996_v36 = vpop.f32.mrf.mxu0  ;;  %8284 = vmatprep.subr.bf16.mxu1 %v13432_v9  ;;  %v13430_v39 = vld [vmem:[#allocation9 + $0x908] ss:$16 sps:$4 sm:$0xff]  }
 0x49e   :  { %18067 = vst [vmem:[#allocation52_spill] sm:$0xff] %v16477_v26  ;;  %v6099_v63 = vpop.f32.mrf.mxu1  ;;  %v16480_v62 = vadd.f32 %v6097_v15, %v5995_v42  ;;  %8186 = vmatpush2.bf16.msra.mxu0 %v13421_v4  ;;  %v5997_v5 = vadd.f32 %v5996_v36, %v18070_v33  ;;  %v18074_v9 = vld [vmem:[#allocation68_spill] sm:$0xff] }
 0x49f   :  { %v5998_v27 = vpop.f32.mrf.mxu0  ;;  %8187 = vmatprep.subr.bf16.mxu0 %v13429_v53  ;;  %v13433_v60 = vld [vmem:[#allocation9 + $0x888] ss:$16 sps:$4 sm:$0xff]  }
 0x4a0   :  { %18069 = vst [vmem:[#allocation28_spill] sm:$0xff] %v16480_v62  ;;  %v6101_v52 = vpop.f32.mrf.mxu1  ;;  %v16483_v8 = vadd.f32 %v6099_v63, %v5997_v5  ;;  %v5999_v59 = vadd.f32 %v5998_v27, %v18072_v20  ;;  %8285 = vmatpush1.bf16.msra.mxu1 %v13430_v39  ;;  %v13436_v36 = vld [vmem:[#allocation9 + $0xa68] ss:$16 sps:$4 sm:$0xff]   ;;  %v13441_v63 = vld [vmem:[#allocation9 + $0x86c] ss:$16 sps:$4 sm:$0xff]  }
 0x4a1   :  { %8147 = vmatmul.mubr.bf16.gmra.mxu0 %v17954_v0  ;;  %v6002_v18 = vpop.f32.mrf.mxu0  ;;  %v18076_v5 = vld [vmem:[#allocation112_spill] sm:$0xff]  ;;  %8294 = vmatprep.subr.bf16.mxu1 %v13438_v41 }
 0x4a2   :  { %18071 = vst [vmem:[#allocation105_spill] sm:$0xff] %v16483_v8  ;;  %8034 = vmatmul.mubr.bf16.gmra.mxu1 %v17953_v6  ;;  %v6105_v4 = vpop.f32.mrf.mxu1  ;;  %v16488_v15 = vadd.f32 %v6101_v52, %v5999_v59  ;;  %8188 = vmatpush2.bf16.msra.mxu0 %v13427_v43  ;;  %v6003_v53 = vadd.f32 %v6002_v18, %v18074_v9  ;;  %v13444_v52 = vld [vmem:[#allocation9 + $0xa4c] ss:$16 sps:$4 sm:$0xff]   ;;  %v18078_v18 = vld [vmem:[#allocation113_spill] sm:$0xff]  ;;  %v13439_v8 = vld [vmem:[#allocation9 + $0x868] ss:$16 sps:$4 sm:$0xff]  }
 0x4a3   :  { %8043 = vmatprep.mubr.bf16.mxu1 %v17956_v31  ;;  %11949 = vmatprep.mubr.msk.bf16.mxu0 %vm2660_vm2, %v16254_v7  ;;  %v6004_v27 = vpop.f32.mrf.mxu0  ;;  %v13442_v26 = vld [vmem:[#allocation9 + $0xa48] ss:$16 sps:$4 sm:$0xff]   ;;  %v13450_v41 = vld [vmem:[#allocation9 + $0xa2c] ss:$16 sps:$4 sm:$0xff]  }
 0x4a4   :  { %18073 = vst [vmem:[#allocation106_spill] sm:$0xff] %v16488_v15  ;;  %v6107_v42 = vpop.f32.mrf.mxu1  ;;  %v16494_v33 = vadd.f32 %v6105_v4, %v6003_v53  ;;  %v6005_v20 = vadd.f32 %v6004_v27, %v18076_v5  ;;  %8189 = vmatprep.subr.bf16.mxu0 %v13435_v49  ;;  %8295 = vmatpush2.bf16.msra.mxu1 %v13436_v36  ;;  %v18080_v53 = vld [vmem:[#allocation65_spill] sm:$0xff]  ;;  %v13447_v49 = vld [vmem:[#allocation9 + $0x84c] ss:$16 sps:$4 sm:$0xff]   ;;  %v18082_v36 = vld [vmem:[#allocation67_spill] sm:$0xff] }
 0x4a5   :  { %v6006_v59 = vpop.f32.mrf.mxu0  ;;  %8296 = vmatprep.subr.bf16.mxu1 %v13444_v52 }
 0x4a6   :  { %18075 = vst [vmem:[#allocation107_spill] sm:$0xff] %v16494_v33  ;;  %v6109_v43 = vpop.f32.mrf.mxu1  ;;  %v16497_v15 = vadd.f32 %v6107_v42, %v6005_v20  ;;  %8190 = vmatpush2.bf16.msra.mxu0 %v13433_v60  ;;  %v6007_v9 = vadd.f32 %v6006_v59, %v18078_v18  ;;  %v13445_v20 = vld [vmem:[#allocation9 + $0x848] ss:$16 sps:$4 sm:$0xff]   ;;  %v13453_v18 = vld [vmem:[#allocation9 + $0x82c] ss:$16 sps:$4 sm:$0xff]  }
 0x4a7   :  { %v6008_v39 = vpop.f32.mrf.mxu0  ;;  %8191 = vmatprep.subr.bf16.mxu0 %v13441_v63 }
 0x4a8   :  { %18077 = vst [vmem:[#allocation108_spill] sm:$0xff] %v16497_v15  ;;  %v6111_v62 = vpop.f32.mrf.mxu1  ;;  %v16500_v4 = vadd.f32 %v6109_v43, %v6007_v9  ;;  %v6009_v27 = vadd.f32 %v6008_v39, %v18080_v53  ;;  %8297 = vmatpush2.bf16.msra.mxu1 %v13442_v26  ;;  %v13448_v43 = vld [vmem:[#allocation9 + $0xa28] ss:$16 sps:$4 sm:$0xff]   ;;  %v13456_v15 = vld [vmem:[#allocation9 + $0x80c] ss:$16 sps:$4 sm:$0xff]  }
 0x4a9   :  { %8157 = vmatmul.mubr.bf16.gmra.mxu0 %v16267_v44  ;;  %v6012_v60 = vpop.f32.mrf.mxu0  ;;  %v18084_v39 = vld [vmem:[#allocation114_spill] sm:$0xff]  ;;  %8298 = vmatprep.subr.bf16.mxu1 %v13450_v41 }
 0x4aa   :  { %18079 = vst [vmem:[#allocation109_spill] sm:$0xff] %v16500_v4  ;;  %8044 = vmatmul.mubr.bf16.gmra.mxu1 %v17964_v21  ;;  %v6115_v42 = vpop.f32.mrf.mxu1  ;;  %v16505_v5 = vadd.f32 %v6111_v62, %v6009_v27  ;;  %8192 = vmatpush2.bf16.msra.mxu0 %v13439_v8  ;;  %v6013_v63 = vadd.f32 %v6012_v60, %v18082_v36  ;;  %v13459_v62 = vld [vmem:[#allocation9 + $0xa0c] ss:$16 sps:$4 sm:$0xff]   ;;  %v18086_v60 = vld [vmem:[#allocation115_spill] sm:$0xff] }
 0x4ab   :  { %8053 = vmatprep.mubr.bf16.mxu1 %v16273_v55  ;;  %8199 = vmatprep.mubr.bf16.mxu0 %v17896_v10  ;;  %v6014_v52 = vpop.f32.mrf.mxu0  ;;  %v13451_v10 = vld [vmem:[#allocation9 + $0x828] ss:$16 sps:$4 sm:$0xff]  }
 0x4ac   :  { %18081 = vst [vmem:[#allocation110_spill] sm:$0xff] %v16505_v5  ;;  %v6117_v59 = vpop.f32.mrf.mxu1  ;;  %v16510_v9 = vadd.f32 %v6115_v42, %v6013_v63  ;;  %v6015_v53 = vadd.f32 %v6014_v52, %v18084_v39  ;;  %8193 = vmatprep.subr.bf16.mxu0 %v13447_v49  ;;  %8299 = vmatpush2.bf16.msra.mxu1 %v13448_v43  ;;  %v13457_v42 = vld [vmem:[#allocation9 + $0xa08] ss:$16 sps:$4 sm:$0xff]  }
 0x4ad   :  { %v6016_v27 = vpop.f32.mrf.mxu0  ;;  %v18088_v52 = vld [vmem:[#allocation64_spill] sm:$0xff]  ;;  %8300 = vmatprep.subr.bf16.mxu1 %v13459_v62  ;;  %v18092_v62 = vld [vmem:[#allocation117_spill] sm:$0xff] }
 0x4ae   :  { %18083 = vst [vmem:[#allocation111_spill] sm:$0xff] %v16510_v9  ;;  %v6119_v5 = vpop.f32.mrf.mxu1  ;;  %v16513_v8 = vadd.f32 %v6117_v59, %v6015_v53  ;;  %8194 = vmatpush2.bf16.msra.mxu0 %v13445_v20  ;;  %v6017_v36 = vadd.f32 %v6016_v27, %v18086_v60  ;;  %v18090_v20 = vld [vmem:[#allocation116_spill] sm:$0xff] }
 0x4af   :  { %v6018_v26 = vpop.f32.mrf.mxu0  ;;  %8195 = vmatprep.subr.bf16.mxu0 %v13453_v18  ;;  %v13454_v43 = vld [vmem:[#allocation9 + $0x808] ss:$16 sps:$4 sm:$0xff]  }
 0x4b0   :  { %18085 = vst [vmem:[#allocation68_spill] sm:$0xff] %v16513_v8  ;;  %v6121_v4 = vpop.f32.mrf.mxu1  ;;  %v16516_v63 = vadd.f32 %v6119_v5, %v6017_v36  ;;  %v6019_v49 = vadd.f32 %v6018_v26, %v18088_v52  ;;  %8301 = vmatpush2.bf16.msra.mxu1 %v13457_v42 }
 0x4b1   :  { %v6022_v41 = vpop.f32.mrf.mxu0 }
 0x4b2   :  { %18087 = vst [vmem:[#allocation112_spill] sm:$0xff] %v16516_v63  ;;  %8054 = vmatmul.mubr.bf16.gmra.mxu1 %v16287_v40  ;;  %v6125_v59 = vpop.f32.mrf.mxu1  ;;  %v16520_v39 = vadd.f32 %v6121_v4, %v6019_v49  ;;  %8196 = vmatpush2.bf16.msra.mxu0 %v13451_v10  ;;  %v6023_v18 = vadd.f32 %v6022_v41, %v18090_v20  ;;  %v18094_v4 = vld [vmem:[#allocation118_spill] sm:$0xff]  ;;  %v18097_v20 = vld [vmem:[#allocation119_spill] sm:$0xff] }
 0x4b3   :  { %11950 = vmatprep.mubr.msk.bf16.mxu1 %vm2660_vm2, %v17795_v38  ;;  %v6024_v53 = vpop.f32.mrf.mxu0  ;;  %8197 = vmatprep.subr.bf16.mxu0 %v13456_v15 }
 0x4b4   :  { %18089 = vst [vmem:[#allocation113_spill] sm:$0xff] %v16520_v39  ;;  %v6127_v27 = vpop.f32.mrf.mxu1  ;;  %v16525_v5 = vadd.f32 %v6125_v59, %v6023_v18  ;;  %v6025_v60 = vadd.f32 %v6024_v53, %v18092_v62  ;;  %v18095_v39 = vmov 0  }
 0x4b5   :  { %v6026_v36 = vpop.f32.mrf.mxu0 }
 0x4b6   :  { %18091 = vst [vmem:[#allocation65_spill] sm:$0xff] %v16525_v5  ;;  %v6129_v26 = vpop.f32.mrf.mxu1  ;;  %v16528_v52 = vadd.f32 %v6127_v27, %v6025_v60  ;;  %8198 = vmatpush2.bf16.msra.mxu0 %v13454_v43  ;;  %v6027_v10 = vadd.f32 %v6026_v36, %v18094_v4  ;;  %v18099_v43 = vld [vmem:[#allocation120_spill] sm:$0xff]  ;;  %v18101_v36 = vld [vmem:[#allocation121_spill] sm:$0xff] }
 0x4b7   :  { %v6028_v49 = vpop.f32.mrf.mxu0  ;;  %9091 = vmatprep.subr.bf16.mxu0 %v18095_v39 }
 0x4b8   :  { %18093 = vst [vmem:[#allocation67_spill] sm:$0xff] %v16528_v52  ;;  %v6131_v38 = vpop.f32.mrf.mxu1  ;;  %v16532_v41 = vadd.f32 %v6129_v26, %v6027_v10  ;;  %v6029_v15 = vadd.f32 %v6028_v49, %v18097_v20  ;;  %v13461_v10 = vld [vmem:[#allocation12 + $0x118] sm:$0xff]  }
 0x4b9   :  { %8200 = vmatmul.mubr.bf16.vlgmr.msra.gmra.mxu0 %v17905_v45  ;;  %v6032_v42 = vpop.f32.mrf.mxu0  ;;  %v13460_v45 = vld [vmem:[#allocation12 + $0x158] sm:$0xff]  }
 0x4ba   :  { %18096 = vst [vmem:[#allocation114_spill] sm:$0xff] %v16532_v41  ;;  %8303 = vmatmul.mubr.bf16.vlgmr.msra.gmra.mxu1 %v17894_v22  ;;  %v6135_v59 = vpop.f32.mrf.mxu1  ;;  %v16537_v18 = vadd.f32 %v6131_v38, %v6029_v15  ;;  %8209 = vmatprep.mubr.bf16.mxu0 %v17908_v23  ;;  %v6033_v53 = vadd.f32 %v6032_v42, %v18099_v43  ;;  %v18103_v38 = vld [vmem:[#allocation122_spill] sm:$0xff]  ;;  %v18105_v15 = vld [vmem:[#allocation123_spill] sm:$0xff] }
 0x4bb   :  { %11951 = vmatprep.mubr.msk.bf16.mxu1 %vm2660_vm2, %v17898_v46  ;;  %v6034_v27 = vpop.f32.mrf.mxu0  ;;  %12170 = vmatprep.subr.bf16.mxu1 %v13460_v45  ;;  %v13462_v43 = vld [vmem:[#allocation12 + $0x150] sm:$0xff]  }
 0x4bc   :  { %18098 = vst [vmem:[#allocation115_spill] sm:$0xff] %v16537_v18  ;;  %v6137_v62 = vpop.f32.mrf.mxu1  ;;  %v16543_v60 = vadd.f32 %v6135_v59, %v6033_v53  ;;  %v6035_v26 = vadd.f32 %v6034_v27, %v18101_v36  ;;  %12171 = vmatpush3.bf16.msra.mxu1 %v13461_v10  ;;  %v13463_v27 = vld [vmem:[#allocation12 + $0x110] sm:$0xff]   ;;  %v18124_v18 = vld [vmem:[#allocation80_spill] sm:$0xff] }
 0x4bd   :  { %v6036_v4 = vpop.f32.mrf.mxu0  ;;  %12172 = vmatprep.subr.bf16.mxu1 %v13462_v43  ;;  %v13468_v43 = vld [vmem:[#allocation12 + $0x138] sm:$0xff]  }
 0x4be   :  { %18100 = vst [vmem:[#allocation64_spill] sm:$0xff] %v16543_v60  ;;  %v6139_v22 = vpop.f32.mrf.mxu1  ;;  %v16546_v49 = vadd.f32 %v6137_v62, %v6035_v26  ;;  %v6037_v20 = vadd.f32 %v6036_v4, %v18103_v38  ;;  %v13464_v26 = vld [vmem:[#allocation12 + $0x148] sm:$0xff]  }
 0x4bf   :  { %v6038_v23 = vpop.f32.mrf.mxu0  ;;  %v13465_v4 = vld [vmem:[#allocation12 + $0x108] sm:$0xff]  }
 0x4c0   :  { %18102 = vst [vmem:[#allocation116_spill] sm:$0xff] %v16546_v49  ;;  %v16549_v46 = vadd.f32 %v6139_v22, %v6037_v20  ;;  %v6039_v42 = vadd.f32 %v6038_v23, %v18105_v15  ;;  %v6141_v59 = vpop.f32.mrf.mxu1  ;;  %12173 = vmatpush3.bf16.msra.mxu1 %v13463_v27  ;;  %v18107_v23 = vld [vmem:[#allocation30_spill] sm:$0xff] }
 0x4c1   :  { %8210 = vmatmul.mubr.bf16.gmra.mxu0 %v17917_v24  ;;  %v6957_v53 = vpop.f32.mrf.mxu0  ;;  %12174 = vmatprep.subr.bf16.mxu1 %v13464_v26 }
 0x4c2   :  { %18104 = vst [vmem:[#allocation117_spill] sm:$0xff] %v16549_v46  ;;  %8313 = vmatmul.mubr.bf16.gmra.mxu1 %v17906_v56  ;;  %v16554_v36 = vadd.f32 %v6141_v59, %v6039_v42  ;;  %8219 = vmatprep.mubr.bf16.mxu0 %v18046_v50  ;;  %v13466_v50 = vld [vmem:[#allocation12 + $0x140] sm:$0xff]   ;;  %v18108_v59 = vld [vmem:[#allocation38_spill] sm:$0xff] }
 0x4c3   :  { %11952 = vmatprep.mubr.msk.bf16.mxu1 %vm2660_vm2, %v17910_v37  ;;  %v6959_v62 = vpop.f32.mrf.mxu0  ;;  %v13467_v37 = vld [vmem:[#allocation12 + $0x100] sm:$0xff]  }
 0x4c4   :  { %18106 = vst [vmem:[#allocation118_spill] sm:$0xff] %v16554_v36  ;;  %12175 = vmatpush3.bf16.msra.mxu1 %v13465_v4  ;;  %v18109_v4 = vld [vmem:[#allocation29_spill] sm:$0xff] }
 0x4c5   :  { %v6961_v45 = vpop.f32.mrf.mxu0  ;;  %12176 = vmatprep.subr.bf16.mxu1 %v13466_v50 }
 0x4c7   :  { %v16559_v22 = vpop.f32.mrf.mxu0 }
 0x4c8   :  { %12177 = vmatpush3.bf16.msra.mxu1 %v13467_v37 }
 0x4c9   :  { %8220 = vmatmul.mubr.bf16.gmra.mxu0 %v18055_v16  ;;  %v6967_v24 = vpop.f32.mrf.mxu0  ;;  %12178 = vmatprep.subr.bf16.mxu1 %v13468_v43 }
 0x4ca   :  { %8323 = vmatmul.mubr.bf16.gmra.mxu1 %v18044_v13  ;;  %v6854_v56 = vpop.f32.mrf.mxu1  ;;  %8229 = vmatprep.mubr.bf16.mxu0 %v18057_v51  ;;  %v13469_v51 = vld [vmem:[#allocation12 + $0xf8] sm:$0xff]  }
 0x4cb   :  { %v6958_v10 = vadd.f32 %v6957_v53, %v6854_v56  ;;  %11953 = vmatprep.mubr.msk.bf16.mxu1 %vm2660_vm2, %v18048_v28  ;;  %v6969_v20 = vpop.f32.mrf.mxu0 }
 0x4cc   :  { %v6856_v38 = vpop.f32.mrf.mxu1  ;;  %12179 = vmatpush3.bf16.msra.mxu1 %v13469_v51 }
 0x4cd   :  { %v16567_v15 = vadd.f32 %v6958_v10, %v18107_v23  ;;  %v6960_v42 = vadd.f32 %v6959_v62, %v6856_v38  ;;  %v6971_v13 = vpop.f32.mrf.mxu0  ;;  %v13470_v10 = vld [vmem:[#allocation12 + $0x130] sm:$0xff]  }
 0x4ce   :  { %v6858_v16 = vpop.f32.mrf.mxu1  ;;  %12180 = vmatprep.subr.bf16.mxu1 %v13470_v10 }
 0x4cf   :  { %v16570_v27 = vadd.f32 %v6960_v42, %v18108_v59  ;;  %v6962_v53 = vadd.f32 %v6961_v45, %v6858_v16  ;;  %v16574_v28 = vpop.f32.mrf.mxu0  ;;  %v13471_v45 = vld [vmem:[#allocation12 + $0xf0] sm:$0xff]   ;;  %v13472_v59 = vld [vmem:[#allocation12 + $0x128] sm:$0xff]  }
 0x4d0   :  { %v16572_v26 = vpop.f32.mrf.mxu1  ;;  %v18110_v42 = vld [vmem:[#allocation54_spill] sm:$0xff]  ;;  %12181 = vmatpush3.bf16.msra.mxu1 %v13471_v45  ;;  %v13474_v45 = vld [vmem:[#allocation12 + $0x120] sm:$0xff]  }
 0x4d1   :  { %v16577_v56 = vadd.f32 %v6962_v53, %v18109_v4  ;;  %8230 = vmatmul.mubr.bf16.gmra.mxu0 %v17941_v35  ;;  %v6977_v50 = vpop.f32.mrf.mxu0  ;;  %v18111_v53 = vld [vmem:[#allocation60_spill] sm:$0xff]  ;;  %12182 = vmatprep.subr.bf16.mxu1 %v13472_v59 }
 0x4d2   :  { %8333 = vmatmul.mubr.bf16.gmra.mxu1 %v17930_v17  ;;  %v6864_v62 = vpop.f32.mrf.mxu1  ;;  %8239 = vmatprep.mubr.bf16.mxu0 %v17944_v29  ;;  %v13473_v29 = vld [vmem:[#allocation12 + $0xe8] sm:$0xff]  }
 0x4d3   :  { %v6968_v37 = vadd.f32 %v6967_v24, %v6864_v62  ;;  %11954 = vmatprep.mubr.msk.bf16.mxu1 %vm2660_vm2, %v17934_v2  ;;  %v6979_v23 = vpop.f32.mrf.mxu0  ;;  %v18112_v62 = vld [vmem:[#allocation61_spill] sm:$0xff] }
 0x4d4   :  { %v6866_v38 = vpop.f32.mrf.mxu1  ;;  %12183 = vmatpush3.bf16.msra.mxu1 %v13473_v29  ;;  %v18114_v29 = vld [vmem:[#allocation66_spill] sm:$0xff] }
 0x4d5   :  { %v16585_v16 = vadd.f32 %v6968_v37, %v18110_v42  ;;  %v6970_v43 = vadd.f32 %v6969_v20, %v6866_v38  ;;  %v6981_v17 = vpop.f32.mrf.mxu0  ;;  %12184 = vmatprep.subr.bf16.mxu1 %v13474_v45 }
 0x4d6   :  { %v6868_v35 = vpop.f32.mrf.mxu1 }
 0x4d7   :  { %v16588_v51 = vadd.f32 %v6970_v43, %v18111_v53  ;;  %v6972_v24 = vadd.f32 %v6971_v13, %v6868_v35  ;;  %v16592_v2 = vpop.f32.mrf.mxu0  ;;  %v13475_v13 = vld [vmem:[#allocation12 + $0xe0] sm:$0xff]  }
 0x4d8   :  { %v16590_v4 = vpop.f32.mrf.mxu1  ;;  %v18113_v35 = vld [vmem:[#allocation59_spill] sm:$0xff]  ;;  %12185 = vmatpush3.bf16.msra.mxu1 %v13475_v13 }
 0x4d9   :  { %v16595_v10 = vadd.f32 %v6972_v24, %v18112_v62  ;;  %8240 = vmatmul.mubr.bf16.gmra.mxu0 %v17953_v6  ;;  %v6987_v37 = vpop.f32.mrf.mxu0  ;;  %v13476_v24 = vld [vmem:[#allocation12 + $0x78] sm:$0xff]  }
 0x4da   :  { %8343 = vmatmul.mubr.bf16.gmra.mxu1 %v17942_v54  ;;  %v6874_v20 = vpop.f32.mrf.mxu1  ;;  %8249 = vmatprep.mubr.bf16.mxu0 %v17956_v31 }
 0x4db   :  { %v6978_v38 = vadd.f32 %v6977_v50, %v6874_v20  ;;  %11955 = vmatprep.mubr.msk.bf16.mxu1 %vm2660_vm2, %v17946_v3  ;;  %v6989_v43 = vpop.f32.mrf.mxu0  ;;  %12192 = vmatprep.subr.bf16.mxu1 %v13476_v24  ;;  %v18115_v3 = vld [vmem:[#allocation69_spill] sm:$0xff] }
 0x4dc   :  { %v6876_v42 = vpop.f32.mrf.mxu1 }
 0x4dd   :  { %v16603_v59 = vadd.f32 %v6978_v38, %v18113_v35  ;;  %v6980_v53 = vadd.f32 %v6979_v23, %v6876_v42  ;;  %v6991_v54 = vpop.f32.mrf.mxu0  ;;  %v18116_v42 = vld [vmem:[#allocation76_spill] sm:$0xff] }
 0x4de   :  { %v6878_v6 = vpop.f32.mrf.mxu1 }
 0x4df   :  { %v16606_v62 = vadd.f32 %v6980_v53, %v18114_v29  ;;  %v6982_v50 = vadd.f32 %v6981_v17, %v6878_v6  ;;  %v16610_v20 = vpop.f32.mrf.mxu0  ;;  %v18117_v29 = vld [vmem:[#allocation77_spill] sm:$0xff] }
 0x4e0   :  { %v16608_v31 = vpop.f32.mrf.mxu1 }
 0x4e1   :  { %v16613_v36 = vadd.f32 %v6982_v50, %v18115_v3  ;;  %8250 = vmatmul.mubr.bf16.gmra.mxu0 %v17964_v21  ;;  %v6997_v45 = vpop.f32.mrf.mxu0  ;;  %v18118_v3 = vld [vmem:[#allocation78_spill] sm:$0xff] }
 0x4e2   :  { %8353 = vmatmul.mubr.bf16.gmra.mxu1 %v17954_v0  ;;  %v6884_v23 = vpop.f32.mrf.mxu1  ;;  %8259 = vmatprep.mubr.bf16.mxu0 %v16273_v55  ;;  %v13478_v55 = vld [vmem:[#allocation12 + $0x198] sm:$0xff]  }
 0x4e3   :  { %v6988_v38 = vadd.f32 %v6987_v37, %v6884_v23  ;;  %11956 = vmatprep.mubr.msk.bf16.mxu1 %vm2660_vm2, %v16254_v7  ;;  %v6999_v13 = vpop.f32.mrf.mxu0  ;;  %9092 = vmatpush1.bf16.msra.mxu0 %v13478_v55  ;;  %v13484_v55 = vld [vmem:[#allocation12 + $0x188] sm:$0xff]  }
 0x4e4   :  { %v6886_v17 = vpop.f32.mrf.mxu1  ;;  %9093 = vmatprep.subr.bf16.mxu0 %v18095_v39 }
 0x4e5   :  { %v16621_v35 = vadd.f32 %v6988_v38, %v18116_v42  ;;  %v6990_v53 = vadd.f32 %v6989_v43, %v6886_v17  ;;  %v7001_v24 = vpop.f32.mrf.mxu0 }
 0x4e6   :  { %v6888_v6 = vpop.f32.mrf.mxu1 }
 0x4e7   :  { %v16624_v21 = vadd.f32 %v6990_v53, %v18117_v29  ;;  %v6992_v0 = vadd.f32 %v6991_v54, %v6888_v6  ;;  %v16628_v37 = vpop.f32.mrf.mxu0  ;;  %v13481_v54 = vld [vmem:[#allocation12 + $0x190] sm:$0xff]   ;;  %v18119_v53 = vld [vmem:[#allocation75_spill] sm:$0xff] }
 0x4e8   :  { %v16626_v50 = vpop.f32.mrf.mxu1  ;;  %9094 = vmatpush1.bf16.msra.mxu0 %v13481_v54 }
 0x4e9   :  { %v16631_v23 = vadd.f32 %v6992_v0, %v18118_v3  ;;  %8260 = vmatmul.mubr.bf16.gmra.mxu0 %v16287_v40  ;;  %v7007_v43 = vpop.f32.mrf.mxu0  ;;  %v18120_v3 = vld [vmem:[#allocation71_spill] sm:$0xff]  ;;  %9095 = vmatprep.subr.bf16.mxu0 %v18095_v39 }
 0x4ea   :  { %8363 = vmatmul.mubr.bf16.gmra.mxu1 %v16267_v44  ;;  %v6894_v7 = vpop.f32.mrf.mxu1 }
 0x4eb   :  { %v6998_v38 = vadd.f32 %v6997_v45, %v6894_v7  ;;  %v7009_v42 = vpop.f32.mrf.mxu0  ;;  %v18121_v7 = vld [vmem:[#allocation72_spill] sm:$0xff] }
 0x4ec   :  { %v6896_v17 = vpop.f32.mrf.mxu1  ;;  %9096 = vmatpush1.bf16.msra.mxu0 %v13484_v55  ;;  %v18126_v55 = vld [vmem:[#allocation81_spill] sm:$0xff] }
 0x4ed   :  { %v16637_v6 = vadd.f32 %v6998_v38, %v18119_v53  ;;  %v7000_v29 = vadd.f32 %v6999_v13, %v6896_v17  ;;  %v7011_v0 = vpop.f32.mrf.mxu0  ;;  %9097 = vmatprep.subr.bf16.mxu0 %v18095_v39 }
 0x4ee   :  { %v6898_v46 = vpop.f32.mrf.mxu1 }
 0x4ef   :  { %v16640_v49 = vadd.f32 %v7000_v29, %v18120_v3  ;;  %v7002_v40 = vadd.f32 %v7001_v24, %v6898_v46  ;;  %v16644_v45 = vpop.f32.mrf.mxu0  ;;  %v13487_v29 = vld [vmem:[#allocation12 + $0x180] sm:$0xff]  }
 0x4f0   :  { %v16642_v44 = vpop.f32.mrf.mxu1  ;;  %v18122_v46 = vld [vmem:[#allocation104_spill] sm:$0xff]  ;;  %9098 = vmatpush1.bf16.msra.mxu0 %v13487_v29 }
 0x4f1   :  { %v16648_v60 = vadd.f32 %v7002_v40, %v18121_v7  ;;  %v7017_v13 = vpop.f32.mrf.mxu0  ;;  %9099 = vmatprep.subr.bf16.mxu0 %v18095_v39 }
 0x4f2   :  { %v6904_v38 = vpop.f32.mrf.mxu1 }
 0x4f3   :  { %v7008_v53 = vadd.f32 %v7007_v43, %v6904_v38  ;;  %v7019_v40 = vpop.f32.mrf.mxu0  ;;  %v13491_v43 = vld [vmem:[#allocation12 + $0x178] sm:$0xff]  }
 0x4f4   :  { %v6906_v17 = vpop.f32.mrf.mxu1  ;;  %9100 = vmatpush1.bf16.msra.mxu0 %v13491_v43 }
 0x4f5   :  { %v16652_v24 = vadd.f32 %v7008_v53, %v18122_v46  ;;  %v7010_v54 = vadd.f32 %v7009_v42, %v6906_v17  ;;  %v7021_v53 = vpop.f32.mrf.mxu0  ;;  %9101 = vmatprep.subr.bf16.mxu0 %v18095_v39  ;;  %v18128_v17 = vld [vmem:[#allocation74_spill] sm:$0xff] }
 0x4f6   :  { %v6908_v3 = vpop.f32.mrf.mxu1 }
 0x4f7   :  { %18123 = vst [vmem:[#allocation119_spill] sm:$0xff] %v16652_v24  ;;  %v16655_v41 = vadd.f32 %v7010_v54, %v18124_v18  ;;  %v7012_v52 = vadd.f32 %v7011_v0, %v6908_v3  ;;  %v13495_v18 = vld [vmem:[#allocation12 + $0x170] sm:$0xff]   ;;  %v18130_v54 = vld [vmem:[#allocation36_spill] sm:$0xff] }
 0x4f8   :  { %v16657_v7 = vpop.f32.mrf.mxu1  ;;  %9102 = vmatpush1.bf16.msra.mxu0 %v13495_v18  ;;  %v18136_v18 = vld [vmem:[#allocation44_spill] sm:$0xff] }
 0x4f9   :  { %18125 = vst [vmem:[#allocation120_spill] sm:$0xff] %v16655_v41  ;;  %v16661_v38 = vadd.f32 %v7012_v52, %v18126_v55  ;;  %v16670_v52 = vpop.f32.mrf.mxu0  ;;  %9103 = vmatprep.subr.bf16.mxu0 %v18095_v39 }
 0x4fa   :  { %v6914_v5 = vpop.f32.mrf.mxu1  ;;  %18132 = vst [vmem:[#allocation30_spill] sm:$0xff] %v16670_v52 }
 0x4fb   :  { %18127 = vst [vmem:[#allocation121_spill] sm:$0xff] %v16661_v38  ;;  %v7018_v63 = vadd.f32 %v7017_v13, %v6914_v5  ;;  %v13498_v5 = vld [vmem:[#allocation12 + $0x168] sm:$0xff]  }
 0x4fc   :  { %v6916_v42 = vpop.f32.mrf.mxu1  ;;  %v18134_v13 = vld [vmem:[#allocation37_spill] sm:$0xff]  ;;  %9104 = vmatpush1.bf16.msra.mxu0 %v13498_v5  ;;  %v18140_v5 = vld [vmem:[#allocation87_spill] sm:$0xff] }
 0x4fd   :  { %v16665_v0 = vadd.f32 %v7018_v63, %v18128_v17  ;;  %v7020_v29 = vadd.f32 %v7019_v40, %v6916_v42  ;;  %9105 = vmatprep.subr.bf16.mxu0 %v18095_v39 }
 0x4fe   :  { %v6918_v46 = vpop.f32.mrf.mxu1 }
 0x4ff   :  { %18129 = vst [vmem:[#allocation122_spill] sm:$0xff] %v16665_v0  ;;  %v16668_v3 = vadd.f32 %v7020_v29, %v18130_v54  ;;  %v7022_v8 = vadd.f32 %v7021_v53, %v6918_v46  ;;  %v13501_v53 = vld [vmem:[#allocation12 + $0x160] sm:$0xff]  }
 0x500   :  { %v16672_v55 = vpop.f32.mrf.mxu1  ;;  %9106 = vmatpush1.bf16.msra.mxu0 %v13501_v53  ;;  %v18144_v53 = vld [vmem:[#allocation35_spill] sm:$0xff] }
 0x501   :  { %18131 = vst [vmem:[#allocation123_spill] sm:$0xff] %v16668_v3  ;;  %18133 = vst [vmem:[#allocation38_spill] sm:$0xff] %v16672_v55  ;;  %v16676_v43 = vadd.f32 %v7022_v8, %v18134_v13  ;;  %v7060_v9 = vpop.f32.mrf.mxu0  ;;  %v18138_v3 = vld [vmem:[#allocation84_spill] sm:$0xff]  ;;  %9115 = vmatprep.subr.bf16.mxu0 %v18095_v39 }
 0x502   :  { %v7163_v63 = vpop.f32.mrf.mxu1 }
 0x503   :  { %18135 = vst [vmem:[#allocation29_spill] sm:$0xff] %v16676_v43  ;;  %v7164_v17 = vadd.f32 %v7163_v63, %v7060_v9  ;;  %v7062_v40 = vpop.f32.mrf.mxu0  ;;  %v13504_v9 = vld [vmem:[#allocation12 + $0x1b8] sm:$0xff]  }
 0x504   :  { %v7165_v42 = vpop.f32.mrf.mxu1  ;;  %9116 = vmatpush2.bf16.msra.mxu0 %v13504_v9  ;;  %v18148_v9 = vld [vmem:[#allocation43_spill] sm:$0xff] }
 0x505   :  { %v16680_v29 = vadd.f32 %v7164_v17, %v18136_v18  ;;  %v7166_v46 = vadd.f32 %v7165_v42, %v7062_v40  ;;  %v7064_v54 = vpop.f32.mrf.mxu0  ;;  %v18142_v18 = vld [vmem:[#allocation98_spill] sm:$0xff]  ;;  %9117 = vmatprep.subr.bf16.mxu0 %v18095_v39 }
 0x506   :  { %v7167_v33 = vpop.f32.mrf.mxu1 }
 0x507   :  { %18137 = vst [vmem:[#allocation54_spill] sm:$0xff] %v16680_v29  ;;  %v16683_v0 = vadd.f32 %v7166_v46, %v18138_v3  ;;  %v7168_v8 = vadd.f32 %v7167_v33, %v7064_v54  ;;  %v7066_v13 = vpop.f32.mrf.mxu0  ;;  %v13507_v33 = vld [vmem:[#allocation12 + $0x1b0] sm:$0xff]  }
 0x508   :  { %v7169_v43 = vpop.f32.mrf.mxu1  ;;  %9118 = vmatpush2.bf16.msra.mxu0 %v13507_v33  ;;  %v18152_v33 = vld [vmem:[#allocation50_spill] sm:$0xff] }
 0x509   :  { %18139 = vst [vmem:[#allocation60_spill] sm:$0xff] %v16683_v0  ;;  %v16687_v63 = vadd.f32 %v7168_v8, %v18140_v5  ;;  %v7170_v52 = vadd.f32 %v7169_v43, %v7066_v13  ;;  %v7070_v55 = vpop.f32.mrf.mxu0  ;;  %v18146_v5 = vld [vmem:[#allocation42_spill] sm:$0xff]  ;;  %9119 = vmatprep.subr.bf16.mxu0 %v18095_v39 }
 0x50a   :  { %v7173_v17 = vpop.f32.mrf.mxu1 }
 0x50b   :  { %18141 = vst [vmem:[#allocation61_spill] sm:$0xff] %v16687_v63  ;;  %v16690_v40 = vadd.f32 %v7170_v52, %v18142_v18  ;;  %v7174_v42 = vadd.f32 %v7173_v17, %v7070_v55  ;;  %v7072_v3 = vpop.f32.mrf.mxu0  ;;  %v13511_v55 = vld [vmem:[#allocation12 + $0x1a8] sm:$0xff]  }
 0x50c   :  { %v7175_v46 = vpop.f32.mrf.mxu1  ;;  %9120 = vmatpush2.bf16.msra.mxu0 %v13511_v55 }
 0x50d   :  { %18143 = vst [vmem:[#allocation59_spill] sm:$0xff] %v16690_v40  ;;  %v16694_v54 = vadd.f32 %v7174_v42, %v18144_v53  ;;  %v7176_v0 = vadd.f32 %v7175_v46, %v7072_v3  ;;  %v7074_v29 = vpop.f32.mrf.mxu0  ;;  %v18150_v53 = vld [vmem:[#allocation85_spill] sm:$0xff]  ;;  %9121 = vmatprep.subr.bf16.mxu0 %v18095_v39 }
 0x50e   :  { %v7177_v8 = vpop.f32.mrf.mxu1 }
 0x50f   :  { %18145 = vst [vmem:[#allocation66_spill] sm:$0xff] %v16694_v54  ;;  %v16697_v43 = vadd.f32 %v7176_v0, %v18146_v5  ;;  %v7178_v13 = vadd.f32 %v7177_v8, %v7074_v29  ;;  %v7076_v52 = vpop.f32.mrf.mxu0  ;;  %v13514_v29 = vld [vmem:[#allocation12 + $0x1a0] sm:$0xff]  }
 0x510   :  { %v7179_v18 = vpop.f32.mrf.mxu1  ;;  %9122 = vmatpush2.bf16.msra.mxu0 %v13514_v29 }
 0x511   :  { %18147 = vst [vmem:[#allocation69_spill] sm:$0xff] %v16697_v43  ;;  %v16701_v17 = vadd.f32 %v7178_v13, %v18148_v9  ;;  %v7180_v40 = vadd.f32 %v7179_v18, %v7076_v52  ;;  %v7080_v63 = vpop.f32.mrf.mxu0  ;;  %v18154_v9 = vld [vmem:[#allocation86_spill] sm:$0xff]  ;;  %9342 = vmatprep.subr.bf16.mxu0 %v18095_v39 }
 0x512   :  { %v7183_v42 = vpop.f32.mrf.mxu1 }
 0x513   :  { %18149 = vst [vmem:[#allocation76_spill] sm:$0xff] %v16701_v17  ;;  %v16704_v3 = vadd.f32 %v7180_v40, %v18150_v53  ;;  %v7184_v46 = vadd.f32 %v7183_v42, %v7080_v63  ;;  %v7082_v0 = vpop.f32.mrf.mxu0  ;;  %v18156_v63 = vld [vmem:[#allocation88_spill] sm:$0xff] }
 0x514   :  { %v7185_v5 = vpop.f32.mrf.mxu1 }
 0x515   :  { %18151 = vst [vmem:[#allocation77_spill] sm:$0xff] %v16704_v3  ;;  %v16708_v8 = vadd.f32 %v7184_v46, %v18152_v33  ;;  %v7186_v43 = vadd.f32 %v7185_v5, %v7082_v0  ;;  %v7084_v54 = vpop.f32.mrf.mxu0  ;;  %v18158_v46 = vld [vmem:[#allocation89_spill] sm:$0xff] }
 0x516   :  { %v7187_v13 = vpop.f32.mrf.mxu1 }
 0x517   :  { %18153 = vst [vmem:[#allocation78_spill] sm:$0xff] %v16708_v8  ;;  %v16711_v52 = vadd.f32 %v7186_v43, %v18154_v9  ;;  %v7188_v18 = vadd.f32 %v7187_v13, %v7084_v54  ;;  %v7086_v40 = vpop.f32.mrf.mxu0  ;;  %v18160_v43 = vld [vmem:[#allocation41_spill] sm:$0xff] }
 0x518   :  { %v7189_v53 = vpop.f32.mrf.mxu1 }
 0x519   :  { %18155 = vst [vmem:[#allocation75_spill] sm:$0xff] %v16711_v52  ;;  %v16715_v55 = vadd.f32 %v7188_v18, %v18156_v63  ;;  %v7190_v42 = vadd.f32 %v7189_v53, %v7086_v40  ;;  %v7090_v3 = vpop.f32.mrf.mxu0  ;;  %v18162_v52 = vld [vmem:[#allocation90_spill] sm:$0xff]  ;;  %v18164_v53 = vld [vmem:[#allocation91_spill] sm:$0xff] }
 0x51a   :  { %v7193_v17 = vpop.f32.mrf.mxu1 }
 0x51b   :  { %18157 = vst [vmem:[#allocation71_spill] sm:$0xff] %v16715_v55  ;;  %v16718_v33 = vadd.f32 %v7190_v42, %v18158_v46  ;;  %v7194_v0 = vadd.f32 %v7193_v17, %v7090_v3  ;;  %v7092_v5 = vpop.f32.mrf.mxu0  ;;  %v18166_v3 = vld [vmem:[#allocation92_spill] sm:$0xff] }
 0x51c   :  { %v7195_v8 = vpop.f32.mrf.mxu1 }
 0x51d   :  { %18159 = vst [vmem:[#allocation72_spill] sm:$0xff] %v16718_v33  ;;  %v16721_v9 = vadd.f32 %v7194_v0, %v18160_v43  ;;  %v7196_v54 = vadd.f32 %v7195_v8, %v7092_v5  ;;  %v7094_v29 = vpop.f32.mrf.mxu0  ;;  %v18168_v5 = vld [vmem:[#allocation94_spill] sm:$0xff] }
 0x51e   :  { %v7197_v13 = vpop.f32.mrf.mxu1 }
 0x51f   :  { %18161 = vst [vmem:[#allocation104_spill] sm:$0xff] %v16721_v9  ;;  %v16724_v39 = vadd.f32 %v7196_v54, %v18162_v52  ;;  %v7198_v18 = vadd.f32 %v7197_v13, %v7094_v29  ;;  %v7096_v63 = vpop.f32.mrf.mxu0  ;;  %v18170_v13 = vld [vmem:[#allocation51_spill] sm:$0xff] }
 0x520   :  { %v7199_v40 = vpop.f32.mrf.mxu1 }
 0x521   :  { %18163 = vst [vmem:[#allocation80_spill] sm:$0xff] %v16724_v39  ;;  %v16727_v55 = vadd.f32 %v7198_v18, %v18164_v53  ;;  %v7200_v42 = vadd.f32 %v7199_v40, %v7096_v63  ;;  %v7100_v46 = vpop.f32.mrf.mxu0  ;;  %v18172_v40 = vld [vmem:[#allocation93_spill] sm:$0xff] }
 0x522   :  { %v7203_v17 = vpop.f32.mrf.mxu1 }
 0x523   :  { %18165 = vst [vmem:[#allocation81_spill] sm:$0xff] %v16727_v55  ;;  %v16730_v33 = vadd.f32 %v7200_v42, %v18166_v3  ;;  %v7204_v0 = vadd.f32 %v7203_v17, %v7100_v46  ;;  %v7102_v43 = vpop.f32.mrf.mxu0  ;;  %v18174_v17 = vld [vmem:[#allocation58_spill] sm:$0xff] }
 0x524   :  { %v7205_v8 = vpop.f32.mrf.mxu1 }
 0x525   :  { %18167 = vst [vmem:[#allocation74_spill] sm:$0xff] %v16730_v33  ;;  %v16733_v9 = vadd.f32 %v7204_v0, %v18168_v5  ;;  %v7206_v52 = vadd.f32 %v7205_v8, %v7102_v43  ;;  %v7104_v54 = vpop.f32.mrf.mxu0  ;;  %v18176_v8 = vld [vmem:[#allocation95_spill] sm:$0xff] }
 0x526   :  { %v7207_v29 = vpop.f32.mrf.mxu1 }
 0x527   :  { %18169 = vst [vmem:[#allocation36_spill] sm:$0xff] %v16733_v9  ;;  %v16736_v39 = vadd.f32 %v7206_v52, %v18170_v13  ;;  %v7208_v18 = vadd.f32 %v7207_v29, %v7104_v54  ;;  %v7106_v53 = vpop.f32.mrf.mxu0  ;;  %v18178_v29 = vld [vmem:[#allocation96_spill] sm:$0xff] }
 0x528   :  { %v7209_v63 = vpop.f32.mrf.mxu1 }
 0x529   :  { %18171 = vst [vmem:[#allocation37_spill] sm:$0xff] %v16736_v39  ;;  %v16739_v55 = vadd.f32 %v7208_v18, %v18172_v40  ;;  %v7210_v42 = vadd.f32 %v7209_v63, %v7106_v53  ;;  %v7110_v3 = vpop.f32.mrf.mxu0  ;;  %v18180_v63 = vld [vmem:[#allocation97_spill] sm:$0xff] }
 0x52a   :  { %v7213_v46 = vpop.f32.mrf.mxu1 }
 0x52b   :  { %18173 = vst [vmem:[#allocation44_spill] sm:$0xff] %v16739_v55  ;;  %v16742_v33 = vadd.f32 %v7210_v42, %v18174_v17  ;;  %v7214_v0 = vadd.f32 %v7213_v46, %v7110_v3  ;;  %v7112_v5 = vpop.f32.mrf.mxu0  ;;  %v18182_v46 = vld [vmem:[#allocation48_spill] sm:$0xff] }
 0x52c   :  { %v7215_v43 = vpop.f32.mrf.mxu1 }
 0x52d   :  { %18175 = vst [vmem:[#allocation84_spill] sm:$0xff] %v16742_v33  ;;  %v16745_v9 = vadd.f32 %v7214_v0, %v18176_v8  ;;  %v7216_v52 = vadd.f32 %v7215_v43, %v7112_v5  ;;  %v7114_v13 = vpop.f32.mrf.mxu0  ;;  %v18184_v43 = vld [vmem:[#allocation57_spill] sm:$0xff] }
 0x52e   :  { %v7217_v54 = vpop.f32.mrf.mxu1 }
 0x52f   :  { %18177 = vst [vmem:[#allocation87_spill] sm:$0xff] %v16745_v9  ;;  %v16748_v39 = vadd.f32 %v7216_v52, %v18178_v29  ;;  %v7218_v18 = vadd.f32 %v7217_v54, %v7114_v13  ;;  %v7116_v40 = vpop.f32.mrf.mxu0  ;;  %v18186_v54 = vld [vmem:[#allocation55_spill] sm:$0xff] }
 0x530   :  { %v7219_v53 = vpop.f32.mrf.mxu1 }
 0x531   :  { %18179 = vst [vmem:[#allocation98_spill] sm:$0xff] %v16748_v39  ;;  %v16751_v55 = vadd.f32 %v7218_v18, %v18180_v63  ;;  %v7220_v42 = vadd.f32 %v7219_v53, %v7116_v40  ;;  %v7120_v17 = vpop.f32.mrf.mxu0  ;;  %v18188_v53 = vld [vmem:[#allocation99_spill] sm:$0xff] }
 0x532   :  { %v7223_v3 = vpop.f32.mrf.mxu1 }
 0x533   :  { %18181 = vst [vmem:[#allocation35_spill] sm:$0xff] %v16751_v55  ;;  %v16754_v33 = vadd.f32 %v7220_v42, %v18182_v46  ;;  %v7224_v0 = vadd.f32 %v7223_v3, %v7120_v17  ;;  %v7122_v8 = vpop.f32.mrf.mxu0  ;;  %v18190_v17 = vld [vmem:[#allocation62_spill] sm:$0xff] }
 0x534   :  { %v7225_v5 = vpop.f32.mrf.mxu1 }
 0x535   :  { %18183 = vst [vmem:[#allocation42_spill] sm:$0xff] %v16754_v33  ;;  %v16757_v9 = vadd.f32 %v7224_v0, %v18184_v43  ;;  %v7226_v52 = vadd.f32 %v7225_v5, %v7122_v8  ;;  %v7124_v29 = vpop.f32.mrf.mxu0  ;;  %v16768_v0 = vld [vmem:[#allocation10] sm:$0xf]  ;;  %v18193_v5 = vld [vmem:[#allocation24_spill] sm:$0xff] }
 0x536   :  { %v7227_v13 = vpop.f32.mrf.mxu1  ;;  %18192 = vst [vmem:[#allocation88_spill] sm:$0xff] %v16768_v0  ;;  %v18194_v43 = vsub.s32 0, %v18193_v5 }
 0x537   :  { %18185 = vst [vmem:[#allocation43_spill] sm:$0xff] %v16757_v9  ;;  %v16760_v39 = vadd.f32 %v7226_v52, %v18186_v54  ;;  %v7228_v18 = vadd.f32 %v7227_v13, %v7124_v29  ;;  %v7126_v63 = vpop.f32.mrf.mxu0  ;;  %v18195_v29 = vsub.s32 1, %v18193_v5 }
 0x538   :  { %v7229_v40 = vpop.f32.mrf.mxu1  ;;  %v16773_v52 = vrot.slane %v16768_v0, %v18194_v43  ;;  %v6974_v43 = vadd.f32 %v16574_v28, %v16590_v4  ;;  %v18197_v28 = vld [vmem:[#allocation70_spill] sm:$0xff] }
 0x539   :  { %18187 = vst [vmem:[#allocation85_spill] sm:$0xff] %v16760_v39  ;;  %v16763_v55 = vadd.f32 %v7228_v18, %v18188_v53  ;;  %v7230_v42 = vadd.f32 %v7229_v40, %v7126_v63  ;;  %v8098_v46 = vpop.f32.mrf.mxu0  ;;  %v16778_v13 = vrot.slane %v16768_v0, %v18195_v29  ;;  %v6964_v18 = vadd.f32 %v16559_v22, %v16572_v26  ;;  %v18196_v26 = vld [vmem:[#allocation26_spill] sm:$0xff] }
 0x53a   :  { %v8455_v22 = vadd.f32 %v16773_v52, %v16577_v56  ;;  %v7245_v4 = vadd.f32 %v6974_v43, %v18197_v28 }
 0x53b   :  { %18189 = vst [vmem:[#allocation50_spill] sm:$0xff] %v16763_v55  ;;  %v16766_v3 = vadd.f32 %v7230_v42, %v18190_v17  ;;  %v8100_v33 = vpop.f32.mrf.mxu0  ;;  %v8451_v42 = vadd.f32 %v16773_v52, %v16567_v15  ;;  %v8452_v17 = vadd.f32 %v16778_v13, %v16570_v27  ;;  %v7237_v9 = vadd.f32 %v6964_v18, %v18196_v26 }
 0x53c   :  { %v8511_v18 = vmax.f32 %v8455_v22, 0.0 }
 0x53d   :  { %18191 = vst [vmem:[#allocation86_spill] sm:$0xff] %v16766_v3  ;;  %v8102_v8 = vpop.f32.mrf.mxu0  ;;  %v8507_v5 = vmax.f32 %v8451_v42, 0.0  ;;  %v8508_v38 = vmax.f32 %v8452_v17, 0.0 }
 0x53f   :  { %v8104_v54 = vpop.f32.mrf.mxu0 }
 0x541   :  { %v8108_v40 = vpop.f32.mrf.mxu0 }
 0x542   :  { %v7995_v63 = vpop.f32.mrf.mxu1 }
 0x543   :  { %v8099_v53 = vadd.f32 %v8098_v46, %v7995_v63  ;;  %v8110_v55 = vpop.f32.mrf.mxu0 }
 0x544   :  { %v7997_v3 = vpop.f32.mrf.mxu1 }
 0x545   :  { %v8373_v29 = vadd.f32 %v8099_v53, %v16326_v1  ;;  %v8101_v39 = vadd.f32 %v8100_v33, %v7997_v3  ;;  %v8112_v63 = vpop.f32.mrf.mxu0  ;;  %v8456_v53 = vadd.f32 %v16778_v13, %v7237_v9 }
 0x546   :  { %v7999_v46 = vpop.f32.mrf.mxu1 }
 0x547   :  { %v8563_v15 = vadd.f32 %v16773_v52, %v8373_v29  ;;  %v8374_v0 = vadd.f32 %v8101_v39, %v16329_v30  ;;  %v8103_v27 = vadd.f32 %v8102_v8, %v7999_v46  ;;  %v8114_v24 = vpop.f32.mrf.mxu0  ;;  %v8459_v29 = vadd.f32 %v16773_v52, %v16585_v16 }
 0x548   :  { %v8001_v41 = vpop.f32.mrf.mxu1  ;;  %v8460_v30 = vadd.f32 %v16778_v13, %v16588_v51  ;;  %v6984_v16 = vadd.f32 %v16592_v2, %v16608_v31 }
 0x549   :  { %v8619_v1 = vmax.f32 %v8563_v15, 0.0  ;;  %v8564_v33 = vadd.f32 %v16778_v13, %v8374_v0  ;;  %v8377_v56 = vadd.f32 %v8103_v27, %v16332_v48  ;;  %v8105_v3 = vadd.f32 %v8104_v54, %v8001_v41  ;;  %v8118_v8 = vpop.f32.mrf.mxu0 }
 0x54a   :  { %v8005_v39 = vpop.f32.mrf.mxu1  ;;  %v8463_v48 = vadd.f32 %v16773_v52, %v16595_v10  ;;  %v16807_v41 = vadd.f32 %v16778_v13, %v7245_v4  ;;  %v8512_v15 = vmax.f32 %v8456_v53, 0.0  ;;  %v8515_v27 = vmax.f32 %v8459_v29, 0.0 }
 0x54b   :  { %v8675_v42 = vmax.f32 %v8507_v5, %v8619_v1  ;;  %v8620_v17 = vmax.f32 %v8564_v33, 0.0  ;;  %v8567_v43 = vadd.f32 %v16773_v52, %v8377_v56  ;;  %v8378_v0 = vadd.f32 %v8105_v3, %v16337_v19  ;;  %v8120_v51 = vpop.f32.mrf.mxu0  ;;  %v18198_v3 = vld [vmem:[#allocation63_spill] sm:$0xff] }
 0x54c   :  { %v8109_v9 = vadd.f32 %v8108_v40, %v8005_v39  ;;  %v8007_v54 = vpop.f32.mrf.mxu1  ;;  %v8516_v19 = vmax.f32 %v8460_v30, 0.0  ;;  %v8519_v31 = vmax.f32 %v8463_v48, 0.0  ;;  %v8520_v40 = vmax.f32 %v16807_v41, 0.0 }
 0x54d   :  { %v8623_v22 = vmax.f32 %v8567_v43, 0.0  ;;  %v8568_v5 = vadd.f32 %v16778_v13, %v8378_v0  ;;  %v8111_v26 = vadd.f32 %v8110_v55, %v8007_v54  ;;  %v8676_v46 = vmax.f32 %v8508_v38, %v8620_v17  ;;  %v8122_v1 = vpop.f32.mrf.mxu0 }
 0x54e   :  { %v8381_v28 = vadd.f32 %v8109_v9, %v16343_v61  ;;  %v8009_v10 = vpop.f32.mrf.mxu1  ;;  %v7253_v39 = vadd.f32 %v6984_v16, %v18198_v3  ;;  %v8471_v41 = vadd.f32 %v16773_v52, %v16613_v36 }
 0x54f   :  { %v8679_v4 = vmax.f32 %v8511_v18, %v8623_v22  ;;  %v8624_v33 = vmax.f32 %v8568_v5, 0.0  ;;  %v8382_v56 = vadd.f32 %v8111_v26, %v16346_v14  ;;  %v8113_v2 = vadd.f32 %v8112_v63, %v8009_v10  ;;  %v8124_v53 = vpop.f32.mrf.mxu0 }
 0x550   :  { %v8571_v55 = vadd.f32 %v16773_v52, %v8381_v28  ;;  %v8011_v38 = vpop.f32.mrf.mxu1  ;;  %v8467_v14 = vadd.f32 %v16773_v52, %v16603_v59  ;;  %v8468_v63 = vadd.f32 %v16778_v13, %v16606_v62  ;;  %v8527_v3 = vmax.f32 %v8471_v41, 0.0 }
 0x551   :  { %v16817_v29 = vmax.f32 %v8675_v42, %v8679_v4  ;;  %v8572_v61 = vadd.f32 %v16778_v13, %v8382_v56  ;;  %v8385_v30 = vadd.f32 %v8113_v2, %v16349_v25  ;;  %v8115_v18 = vadd.f32 %v8114_v24, %v8011_v38  ;;  %v8128_v0 = vpop.f32.mrf.mxu0 }
 0x552   :  { %v8627_v17 = vmax.f32 %v8571_v55, 0.0  ;;  %v8015_v43 = vpop.f32.mrf.mxu1  ;;  %v8680_v48 = vmax.f32 %v8512_v15, %v8624_v33  ;;  %v16830_v25 = vadd.f32 %v16778_v13, %v7253_v39  ;;  %v8523_v36 = vmax.f32 %v8467_v14, 0.0 }
 0x553   :  { %v8628_v42 = vmax.f32 %v8572_v61, 0.0  ;;  %v8575_v16 = vadd.f32 %v16773_v52, %v8385_v30  ;;  %v8386_v9 = vadd.f32 %v8115_v18, %v16354_v58  ;;  %v8119_v59 = vadd.f32 %v8118_v8, %v8015_v43  ;;  %v8130_v22 = vpop.f32.mrf.mxu0 }
 0x554   :  { %v8683_v24 = vmax.f32 %v8515_v27, %v8627_v17  ;;  %v8017_v54 = vpop.f32.mrf.mxu1  ;;  %v16832_v62 = vmax.f32 %v8676_v46, %v8680_v48  ;;  %v8524_v10 = vmax.f32 %v8468_v63, 0.0  ;;  %v16837_v4 = vadd.f32 %v16773_v52, %v16621_v35 }
 0x555   :  { %v8631_v5 = vmax.f32 %v8575_v16, 0.0  ;;  %v8576_v26 = vadd.f32 %v16778_v13, %v8386_v9  ;;  %v8121_v15 = vadd.f32 %v8120_v51, %v8017_v54  ;;  %v8684_v28 = vmax.f32 %v8516_v19, %v8628_v42  ;;  %v8132_v27 = vpop.f32.mrf.mxu0 }
 0x556   :  { %v8389_v58 = vadd.f32 %v8119_v59, %v16360_v11  ;;  %v8019_v33 = vpop.f32.mrf.mxu1  ;;  %v8528_v39 = vmax.f32 %v16830_v25, 0.0  ;;  %v6994_v51 = vadd.f32 %v16610_v20, %v16626_v50  ;;  %v8531_v30 = vmax.f32 %v16837_v4, 0.0 }
 0x557   :  { %v8687_v8 = vmax.f32 %v8519_v31, %v8631_v5  ;;  %v8632_v56 = vmax.f32 %v8576_v26, 0.0  ;;  %v8390_v46 = vadd.f32 %v8121_v15, %v16363_v34  ;;  %v8123_v2 = vadd.f32 %v8122_v1, %v8019_v33  ;;  %v8134_v35 = vpop.f32.mrf.mxu0  ;;  %v13477_v15 = vld [vmem:[#allocation12 + $0x38] sm:$0xff]  }
 0x558   :  { %v8579_v19 = vadd.f32 %v16773_v52, %v8389_v58  ;;  %v8021_v55 = vpop.f32.mrf.mxu1  ;;  %v16850_v34 = vadd.f32 %v16778_v13, %v16624_v21  ;;  %v16854_v50 = vadd.f32 %v16773_v52, %v16631_v23 }
 0x559   :  { %v8735_v38 = vmax.f32 %v8683_v24, %v8687_v8  ;;  %v8580_v11 = vadd.f32 %v16778_v13, %v8390_v46  ;;  %v8393_v61 = vadd.f32 %v8123_v2, %v16366_v47  ;;  %v8125_v31 = vadd.f32 %v8124_v53, %v8021_v55  ;;  %v8138_v14 = vpop.f32.mrf.mxu0  ;;  %v18199_v53 = vld [vmem:[#allocation79_spill] sm:$0xff] }
 0x55a   :  { %v8635_v1 = vmax.f32 %v8579_v19, 0.0  ;;  %v8025_v18 = vpop.f32.mrf.mxu1  ;;  %v8688_v20 = vmax.f32 %v8520_v40, %v8632_v56  ;;  %v7261_v43 = vadd.f32 %v6994_v51, %v18199_v53  ;;  %v8532_v23 = vmax.f32 %v16850_v34, 0.0 }
 0x55b   :  { %v8636_v63 = vmax.f32 %v8580_v11, 0.0  ;;  %v8583_v17 = vadd.f32 %v16773_v52, %v8393_v61  ;;  %v8394_v47 = vadd.f32 %v8125_v31, %v16371_v57  ;;  %v8129_v41 = vadd.f32 %v8128_v0, %v8025_v18  ;;  %v8140_v21 = vpop.f32.mrf.mxu0  ;;  %v13480_v11 = vld [vmem:[#allocation12 + $0x30] sm:$0xff]  }
 0x55c   :  { %v8691_v48 = vmax.f32 %v8523_v36, %v8635_v1  ;;  %v8027_v42 = vpop.f32.mrf.mxu1  ;;  %v8736_v16 = vmax.f32 %v8684_v28, %v8688_v20  ;;  %v8819_v59 = vpack.c.bf16 %v8735_v38, %v8735_v38  ;;  %v13479_v28 = vld [vmem:[#allocation12 + $0x70] sm:$0xff]   ;;  %v8535_v33 = vmax.f32 %v16854_v50, 0.0 }
 0x55d   :  { %v8639_v9 = vmax.f32 %v8583_v17, 0.0  ;;  %v8584_v25 = vadd.f32 %v16778_v13, %v8394_v47  ;;  %v8131_v40 = vadd.f32 %v8130_v22, %v8027_v42  ;;  %v8692_v24 = vmax.f32 %v8524_v10, %v8636_v63  ;;  %v8142_v26 = vpop.f32.mrf.mxu0  ;;  %v18201_v1 = vld [vmem:[#allocation125_spill] sm:$0xff]  ;;  %v18203_v42 = vld [vmem:[#allocation126_spill] sm:$0xff] }
 0x55e   :  { %v8397_v54 = vadd.f32 %v8129_v41, %v16377_v32  ;;  %v8029_v5 = vpop.f32.mrf.mxu1  ;;  %v8820_v57 = vpack.c.bf16 %v8736_v16, %v8736_v16  ;;  %v16865_v22 = vadd.f32 %v16778_v13, %v7261_v43  ;;  %v8760_v56 = vpack.c.bf16 %v16832_v62, %v16832_v62 }
 0x55f   :  { %v8695_v4 = vmax.f32 %v8527_v3, %v8639_v9  ;;  %v8640_v36 = vmax.f32 %v8584_v25, 0.0  ;;  %v8398_v0 = vadd.f32 %v8131_v40, %v16380_v12  ;;  %v8133_v58 = vadd.f32 %v8132_v27, %v8029_v5  ;;  %v8144_v32 = vpop.f32.mrf.mxu0  ;;  %v18200_v12 = vld [vmem:[#allocation124_spill] sm:$0xff]  ;;  %v18204_v40 = vld [vmem:[#allocation127_spill] sm:$0xff] }
 0x560   :  { %v8587_v10 = vadd.f32 %v16773_v52, %v8397_v54  ;;  %9083 = vmatprep.mubr.bf16.mxu1 %v8820_v57  ;;  %v8031_v8 = vpop.f32.mrf.mxu1  ;;  %v16876_v51 = vadd.f32 %v16773_v52, %v16637_v6  ;;  %v7004_v19 = vadd.f32 %v16628_v37, %v16642_v44  ;;  %v8484_v31 = vadd.f32 %v16778_v13, %v16640_v49  ;;  %v13482_v6 = vld [vmem:[#allocation12 + $0x68] sm:$0xff]   ;;  %v13485_v54 = vld [vmem:[#allocation12 + $0x60] sm:$0xff]  }
 0x561   :  { %v16870_v46 = vmax.f32 %v8691_v48, %v8695_v4  ;;  %v8588_v2 = vadd.f32 %v16778_v13, %v8398_v0  ;;  %v8401_v27 = vadd.f32 %v8133_v58, %v18200_v12  ;;  %v8135_v3 = vadd.f32 %v8134_v35, %v8031_v8  ;;  %9084 = vmatmul.mubr.bf16.vlgmr.msra.gmra.mxu1 %v8819_v59  ;;  %v8148_v62 = vpop.f32.mrf.mxu0  ;;  %v18202_v48 = vld [vmem:[#allocation73_spill] sm:$0xff]  ;;  %v18205_v58 = vld [vmem:[#allocation100_spill] sm:$0xff]  ;;  %v18206_v12 = vld [vmem:[#allocation119_spill] sm:$0xff] }
 0x562   :  { %v8643_v55 = vmax.f32 %v8587_v10, 0.0  ;;  %12193 = vmatpush3.bf16.msra.mxu1 %v13477_v15  ;;  %9334 = vmatprep.mubr.bf16.mxu1 %v8760_v56  ;;  %v8035_v38 = vpop.f32.mrf.mxu1  ;;  %v8696_v61 = vmax.f32 %v8528_v39, %v8640_v36  ;;  %v16886_v37 = vadd.f32 %v16773_v52, %v16648_v60  ;;  %v8536_v43 = vmax.f32 %v16865_v22, 0.0  ;;  %v13486_v56 = vld [vmem:[#allocation12 + $0x20] sm:$0xff]  }
 0x563   :  { %v8644_v34 = vmax.f32 %v8588_v2, 0.0  ;;  %v8591_v35 = vadd.f32 %v16773_v52, %v8401_v27  ;;  %v8402_v18 = vadd.f32 %v8135_v3, %v18201_v1  ;;  %12194 = vmatprep.subr.bf16.mxu1 %v13479_v28  ;;  %v8139_v20 = vadd.f32 %v8138_v14, %v8035_v38  ;;  %v8150_v63 = vpop.f32.mrf.mxu0  ;;  %v18208_v38 = vld [vmem:[#allocation120_spill] sm:$0xff] }
 0x564   :  { %v8699_v44 = vmax.f32 %v8531_v30, %v8643_v55  ;;  %v8037_v50 = vpop.f32.mrf.mxu1  ;;  %v16888_v17 = vmax.f32 %v8692_v24, %v8696_v61  ;;  %v7269_v41 = vadd.f32 %v7004_v19, %v18202_v48  ;;  %v13483_v30 = vld [vmem:[#allocation12 + $0x28] sm:$0xff]   ;;  %v8543_v5 = vmax.f32 %v16886_v37, 0.0 }
 0x565   :  { %v8647_v39 = vmax.f32 %v8591_v35, 0.0  ;;  %v8592_v49 = vadd.f32 %v16778_v13, %v8402_v18  ;;  %v8141_v47 = vadd.f32 %v8140_v21, %v8037_v50  ;;  %v8700_v53 = vmax.f32 %v8532_v23, %v8644_v34  ;;  %v8152_v9 = vpop.f32.mrf.mxu0  ;;  %v18207_v19 = vld [vmem:[#allocation101_spill] sm:$0xff] }
 0x566   :  { %v8405_v16 = vadd.f32 %v8139_v20, %v18203_v42  ;;  %12195 = vmatpush3.bf16.msra.mxu1 %v13480_v11  ;;  %v8039_v60 = vpop.f32.mrf.mxu1  ;;  %v8539_v21 = vmax.f32 %v16876_v51, 0.0  ;;  %v8540_v23 = vmax.f32 %v8484_v31, 0.0  ;;  %v7014_v22 = vadd.f32 %v16644_v45, %v16657_v7  ;;  %v18209_v37 = vld [vmem:[#allocation121_spill] sm:$0xff]  ;;  %v18210_v20 = vld [vmem:[#allocation82_spill] sm:$0xff] }
 0x567   :  { %v8703_v14 = vmax.f32 %v8535_v33, %v8647_v39  ;;  %v8648_v25 = vmax.f32 %v8592_v49, 0.0  ;;  %v8406_v24 = vadd.f32 %v8141_v47, %v18204_v40  ;;  %v8143_v59 = vadd.f32 %v8142_v26, %v8039_v60  ;;  %12196 = vmatprep.subr.bf16.mxu1 %v13482_v6  ;;  %v8154_v4 = vpop.f32.mrf.mxu0  ;;  %v18211_v39 = vld [vmem:[#allocation24_spill] sm:$0xff] }
 0x568   :  { %v8595_v57 = vadd.f32 %v16773_v52, %v8405_v16  ;;  %v8041_v15 = vpop.f32.mrf.mxu1  ;;  %v8488_v26 = vadd.f32 %v16778_v13, %v7269_v41  ;;  %v8491_v27 = vadd.f32 %v16773_v52, %v18206_v12  ;;  %v8492_v11 = vadd.f32 %v16778_v13, %v18208_v38  ;;  %v18213_v47 = vld [vmem:[#allocation88_spill] sm:$0xff]  ;;  %v13489_v41 = vld [vmem:[#allocation12 + $0x18] sm:$0xff]  }
 0x569   :  { %v16898_v36 = vmax.f32 %v8699_v44, %v8703_v14  ;;  %v8596_v0 = vadd.f32 %v16778_v13, %v8406_v24  ;;  %v8409_v28 = vadd.f32 %v8143_v59, %v18205_v58  ;;  %v8145_v33 = vadd.f32 %v8144_v32, %v8041_v15  ;;  %v13488_v32 = vld [vmem:[#allocation12 + $0x58] sm:$0xff]   ;;  %v8158_v7 = vpop.f32.mrf.mxu0  ;;  %v18215_v60 = vld [vmem:[#allocation56_spill] sm:$0xff]  ;;  %v13490_v14 = vld [vmem:[#allocation12 + $0x50] sm:$0xff]  }
 0x56a   :  { %v8651_v10 = vmax.f32 %v8595_v57, 0.0  ;;  %12197 = vmatpush3.bf16.msra.mxu1 %v13483_v30  ;;  %v8045_v8 = vpop.f32.mrf.mxu1  ;;  %v8704_v2 = vmax.f32 %v8536_v43, %v8648_v25  ;;  %v8495_v44 = vadd.f32 %v16773_v52, %v18209_v37  ;;  %v7277_v50 = vadd.f32 %v7014_v22, %v18210_v20  ;;  %v18216_v15 = vld [vmem:[#allocation27_spill] sm:$0xff] }
 0x56b   :  { %v8652_v3 = vmax.f32 %v8596_v0, 0.0  ;;  %v8599_v51 = vadd.f32 %v16773_v52, %v8409_v28  ;;  %v8410_v55 = vadd.f32 %v8145_v33, %v18207_v19  ;;  %12198 = vmatprep.subr.bf16.mxu1 %v13485_v54  ;;  %v8149_v45 = vadd.f32 %v8148_v62, %v8045_v8  ;;  %v18214_v62 = vld [vmem:[#allocation102_spill] sm:$0xff]  ;;  %v8160_v54 = vpop.f32.mrf.mxu0 }
 0x56c   :  { %v8707_v61 = vmax.f32 %v8539_v21, %v8651_v10  ;;  %v8047_v31 = vpop.f32.mrf.mxu1  ;;  %v16911_v34 = vmax.f32 %v8700_v53, %v8704_v2  ;;  %v18212_v49 = vsub.s32 2, %v18211_v39  ;;  %v8544_v25 = vmax.f32 %v8488_v26, 0.0  ;;  %v18217_v28 = vld [vmem:[#allocation38_spill] sm:$0xff] }
 0x56d   :  { %v8655_v35 = vmax.f32 %v8599_v51, 0.0  ;;  %v8600_v1 = vadd.f32 %v16778_v13, %v8410_v55  ;;  %v8151_v18 = vadd.f32 %v8150_v63, %v8047_v31  ;;  %v8708_v6 = vmax.f32 %v8540_v23, %v8652_v3  ;;  %v18218_v33 = vld [vmem:[#allocation30_spill] sm:$0xff]  ;;  %v13493_v51 = vld [vmem:[#allocation12 + $0x48] sm:$0xff]  }
 0x56e   :  { %v16920_v43 = vrot.slane %v18213_v47, %v18212_v49  ;;  %v8413_v48 = vadd.f32 %v8149_v45, %v18214_v62  ;;  %12199 = vmatpush3.bf16.msra.mxu1 %v13486_v56  ;;  %v8049_v53 = vpop.f32.mrf.mxu1  ;;  %v8547_v40 = vmax.f32 %v8491_v27, 0.0  ;;  %v8548_v24 = vmax.f32 %v8492_v11, 0.0  ;;  %v13492_v10 = vld [vmem:[#allocation12 + $0x10] sm:$0xff]   ;;  %v18219_v27 = vld [vmem:[#allocation32_spill] sm:$0xff]  ;;  %v18224_v62 = vld [vmem:[#allocation103_spill] sm:$0xff] }
 0x56f   :  { %v8711_v42 = vmax.f32 %v8543_v5, %v8655_v35  ;;  %v8656_v16 = vmax.f32 %v8600_v1, 0.0  ;;  %v8414_v63 = vadd.f32 %v8151_v18, %v18215_v60  ;;  %v8153_v30 = vadd.f32 %v8152_v9, %v8049_v53  ;;  %12200 = vmatprep.subr.bf16.mxu1 %v13488_v32  ;;  %v18220_v19 = vld [vmem:[#allocation122_spill] sm:$0xff]  ;;  %v8162_v32 = vpop.f32.mrf.mxu0  ;;  %v18221_v18 = vld [vmem:[#allocation123_spill] sm:$0xff]  ;;  %v13494_v53 = vld [vmem:[#allocation12 + $0x8] sm:$0xff]  }
 0x570   :  { %v8603_v59 = vadd.f32 %v16773_v52, %v8413_v48  ;;  %v8051_v21 = vpop.f32.mrf.mxu1  ;;  %v8551_v58 = vmax.f32 %v8495_v44, 0.0  ;;  %v7024_v9 = vadd.f32 %v18218_v33, %v18217_v28  ;;  %v8496_v56 = vadd.f32 %v16778_v13, %v7277_v50  ;;  %v18222_v44 = vld [vmem:[#allocation29_spill] sm:$0xff]  ;;  %v18223_v50 = vld [vmem:[#allocation83_spill] sm:$0xff] }
 0x571   :  { %v16925_v23 = vmax.f32 %v8707_v61, %v8711_v42  ;;  %v8604_v57 = vadd.f32 %v16778_v13, %v8414_v63  ;;  %v8417_v0 = vadd.f32 %v8153_v30, %v18216_v15  ;;  %v8155_v5 = vadd.f32 %v8154_v4, %v8051_v21  ;;  %v18225_v42 = vld [vmem:[#allocation33_spill] sm:$0xff]  ;;  %v13496_v63 = vld [vmem:[#allocation12 + $0x40] sm:$0xff]   ;;  %v18227_v15 = vld [vmem:[#allocation34_spill] sm:$0xff] }
 0x572   :  { %v8659_v22 = vmax.f32 %v8603_v59, 0.0  ;;  %12201 = vmatpush3.bf16.msra.mxu1 %v13489_v41  ;;  %v8055_v26 = vpop.f32.mrf.mxu1  ;;  %v8712_v8 = vmax.f32 %v8544_v25, %v8656_v16  ;;  %v8499_v4 = vadd.f32 %v16773_v52, %v18220_v19  ;;  %v8500_v37 = vadd.f32 %v16778_v13, %v18221_v18  ;;  %v18231_v18 = vld [vmem:[#allocation61_spill] sm:$0xff] }
 0x573   :  { %v8660_v2 = vmax.f32 %v8604_v57, 0.0  ;;  %v8607_v12 = vadd.f32 %v16773_v52, %v8417_v0  ;;  %v8418_v3 = vadd.f32 %v8155_v5, %v18219_v27  ;;  %12202 = vmatprep.subr.bf16.mxu1 %v13490_v14  ;;  %v8159_v38 = vadd.f32 %v8158_v7, %v8055_v26  ;;  %v18229_v27 = vld [vmem:[#allocation54_spill] sm:$0xff] }
 0x574   :  { %v8715_v55 = vmax.f32 %v8547_v40, %v8659_v22  ;;  %v8057_v11 = vpop.f32.mrf.mxu1  ;;  %v16936_v61 = vmax.f32 %v8708_v6, %v8712_v8  ;;  %v8503_v20 = vadd.f32 %v16773_v52, %v18222_v44  ;;  %v7285_v49 = vadd.f32 %v7024_v9, %v18223_v50  ;;  %v13497_v22 = vld [vmem:[#allocation12] sm:$0xff]  }
 0x575   :  { %v8663_v45 = vmax.f32 %v8607_v12, 0.0  ;;  %v8608_v31 = vadd.f32 %v16778_v13, %v8418_v3  ;;  %v8161_v35 = vadd.f32 %v8160_v54, %v8057_v11  ;;  %v8716_v1 = vmax.f32 %v8548_v24, %v8660_v2  ;;  %v8164_v24 = vpop.f32.mrf.mxu0  ;;  %v13499_v12 = vld [vmem:[#allocation12 + $0x238] sm:$0xff]  }
 0x576   :  { %v8421_v48 = vadd.f32 %v8159_v38, %v18224_v62  ;;  %12203 = vmatpush3.bf16.msra.mxu1 %v13492_v10  ;;  %v8059_v7 = vpop.f32.mrf.mxu1  ;;  %v8552_v30 = vmax.f32 %v8496_v56, 0.0  ;;  %v8555_v14 = vmax.f32 %v8499_v4, 0.0  ;;  %v18226_v25 = vsub.s32 3, %v18211_v39  ;;  %v18228_v56 = vld [vmem:[#allocation39_spill] sm:$0xff] }
 0x577   :  { %v8719_v6 = vmax.f32 %v8551_v58, %v8663_v45  ;;  %v8664_v41 = vmax.f32 %v8608_v31, 0.0  ;;  %v8422_v16 = vadd.f32 %v8161_v35, %v18225_v42  ;;  %v8163_v60 = vadd.f32 %v8162_v32, %v8059_v7  ;;  %12204 = vmatprep.subr.bf16.mxu1 %v13493_v51  ;;  %v18230_v35 = vld [vmem:[#allocation60_spill] sm:$0xff]  ;;  %v13500_v62 = vld [vmem:[#allocation12 + $0x1f8] sm:$0xff]  }
 0x578   :  { %v16949_v40 = vrot.slane %v18213_v47, %v18226_v25  ;;  %v8611_v59 = vadd.f32 %v16773_v52, %v8421_v48  ;;  %v8061_v54 = vpop.f32.mrf.mxu1  ;;  %v8556_v58 = vmax.f32 %v8500_v37, 0.0  ;;  %v8559_v28 = vmax.f32 %v8503_v20, 0.0  ;;  %v18232_v20 = vld [vmem:[#allocation47_spill] sm:$0xff] }
 0x579   :  { %v16952_v21 = vmax.f32 %v8715_v55, %v8719_v6  ;;  %v8612_v57 = vadd.f32 %v16778_v13, %v8422_v16  ;;  %v8425_v0 = vadd.f32 %v8163_v60, %v18227_v15  ;;  %v8165_v5 = vadd.f32 %v8164_v24, %v8061_v54  ;;  %v8201_v9 = vpop.f32.mrf.mxu0  ;;  %v18234_v24 = vld [vmem:[#allocation31_spill] sm:$0xff] }
 0x57a   :  { %v8667_v33 = vmax.f32 %v8611_v59, 0.0  ;;  %12205 = vmatpush3.bf16.msra.mxu1 %v13494_v53  ;;  %v8304_v39 = vpop.f32.mrf.mxu1  ;;  %v8720_v47 = vmax.f32 %v8552_v30, %v8664_v41  ;;  %v8504_v26 = vadd.f32 %v16778_v13, %v7285_v49  ;;  %v8453_v3 = vadd.f32 %v16920_v43, %v18229_v27  ;;  %v13502_v41 = vld [vmem:[#allocation12 + $0x230] sm:$0xff]   ;;  %v18235_v15 = vld [vmem:[#allocation59_spill] sm:$0xff] }
 0x57b   :  { %v8668_v10 = vmax.f32 %v8612_v57, 0.0  ;;  %v8615_v8 = vadd.f32 %v16773_v52, %v8425_v0  ;;  %v8426_v2 = vadd.f32 %v8165_v5, %v18228_v56  ;;  %12206 = vmatprep.subr.bf16.mxu1 %v13496_v63  ;;  %v8305_v19 = vadd.f32 %v8304_v39, %v8201_v9  ;;  %v8203_v4 = vpop.f32.mrf.mxu0 }
 0x57c   :  { %v8723_v51 = vmax.f32 %v8555_v14, %v8667_v33  ;;  %v8306_v55 = vpop.f32.mrf.mxu1  ;;  %v16961_v32 = vmax.f32 %v8716_v1, %v8720_v47  ;;  %v8454_v52 = vadd.f32 %v16949_v40, %v18230_v35  ;;  %v8457_v37 = vadd.f32 %v16920_v43, %v18231_v18  ;;  %v13503_v33 = vld [vmem:[#allocation12 + $0x1f0] sm:$0xff]  }
 0x57d   :  { %v8671_v38 = vmax.f32 %v8615_v8, 0.0  ;;  %v8616_v11 = vadd.f32 %v16778_v13, %v8426_v2  ;;  %v8307_v45 = vadd.f32 %v8306_v55, %v8203_v4  ;;  %v8724_v31 = vmax.f32 %v8556_v58, %v8668_v10  ;;  %v8205_v49 = vpop.f32.mrf.mxu0  ;;  %v18233_v13 = vld [vmem:[#allocation49_spill] sm:$0xff]  ;;  %v18237_v8 = vld [vmem:[#allocation66_spill] sm:$0xff] }
 0x57e   :  { %v8759_v44 = vpack.c.bf16 %v16817_v29, %v16817_v29  ;;  %v8375_v50 = vadd.f32 %v8305_v19, %v18232_v20  ;;  %12207 = vmatpush3.bf16.msra.mxu1 %v13497_v22  ;;  %v8308_v1 = vpop.f32.mrf.mxu1  ;;  %v8560_v42 = vmax.f32 %v8504_v26, 0.0  ;;  %v8509_v16 = vmax.f32 %v8453_v3, 0.0  ;;  %v18236_v47 = vld [vmem:[#allocation53_spill] sm:$0xff] }
 0x57f   :  { %v8727_v48 = vmax.f32 %v8559_v28, %v8671_v38  ;;  %v8672_v7 = vmax.f32 %v8616_v11, 0.0  ;;  %v8376_v53 = vadd.f32 %v8307_v45, %v18233_v13  ;;  %v8309_v6 = vadd.f32 %v8308_v1, %v8205_v49  ;;  %12214 = vmatprep.subr.bf16.mxu1 %v13499_v12  ;;  %v8207_v63 = vpop.f32.mrf.mxu0  ;;  %v13505_v10 = vld [vmem:[#allocation12 + $0x228] sm:$0xff]   ;;  %v13508_v13 = vld [vmem:[#allocation12 + $0x220] sm:$0xff]  }
 0x580   :  { %v8565_v60 = vadd.f32 %v16920_v43, %v8375_v50  ;;  %v8310_v30 = vpop.f32.mrf.mxu1  ;;  %v9383_v29 = vpack.c.bf16 %v16888_v17, %v16888_v17  ;;  %v8510_v57 = vmax.f32 %v8454_v52, 0.0  ;;  %v8458_v0 = vadd.f32 %v16949_v40, %v18235_v15  ;;  %v18238_v45 = vld [vmem:[#allocation69_spill] sm:$0xff]  ;;  %v18239_v52 = vld [vmem:[#allocation76_spill] sm:$0xff] }
 0x581   :  { %v16975_v14 = vmax.f32 %v8723_v51, %v8727_v48  ;;  %v8566_v25 = vadd.f32 %v16949_v40, %v8376_v53  ;;  %v8379_v59 = vadd.f32 %v8309_v6, %v18234_v24  ;;  %9335 = vmatmul.mubr.bf16.vlgmr.msra.gmra.mxu1 %v8759_v44  ;;  %v8311_v54 = vadd.f32 %v8310_v30, %v8207_v63  ;;  %v8211_v58 = vpop.f32.mrf.mxu0  ;;  %v13506_v49 = vld [vmem:[#allocation12 + $0x1e8] sm:$0xff]  }
 0x582   :  { %v8621_v5 = vmax.f32 %v8565_v60, 0.0  ;;  %12215 = vmatpush3.bf16.msra.mxu1 %v13500_v62  ;;  %9646 = vmatprep.mubr.bf16.mxu1 %v9383_v29  ;;  %v8314_v28 = vpop.f32.mrf.mxu1  ;;  %v8728_v9 = vmax.f32 %v8560_v42, %v8672_v7  ;;  %v8513_v17 = vmax.f32 %v8457_v37, 0.0  ;;  %v8461_v56 = vadd.f32 %v16920_v43, %v18237_v8  ;;  %v18240_v37 = vld [vmem:[#allocation40_spill] sm:$0xff]  ;;  %v18241_v62 = vld [vmem:[#allocation45_spill] sm:$0xff] }
 0x583   :  { %v8622_v39 = vmax.f32 %v8566_v25, 0.0  ;;  %v8569_v22 = vadd.f32 %v16920_v43, %v8379_v59  ;;  %v8380_v26 = vadd.f32 %v8311_v54, %v18236_v47  ;;  %12216 = vmatprep.subr.bf16.mxu1 %v13502_v41  ;;  %v8315_v12 = vadd.f32 %v8314_v28, %v8211_v58  ;;  %v8213_v27 = vpop.f32.mrf.mxu0  ;;  %v18242_v30 = vld [vmem:[#allocation25_spill] sm:$0xff] }
 0x584   :  { %v8677_v2 = vmax.f32 %v8509_v16, %v8621_v5  ;;  %v8316_v3 = vpop.f32.mrf.mxu1  ;;  %v16985_v51 = vmax.f32 %v8724_v31, %v8728_v9  ;;  %v8514_v11 = vmax.f32 %v8458_v0, 0.0  ;;  %v8462_v35 = vadd.f32 %v16949_v40, %v18238_v45  ;;  %v13509_v0 = vld [vmem:[#allocation12 + $0x1e0] sm:$0xff]   ;;  %v18243_v5 = vld [vmem:[#allocation77_spill] sm:$0xff] }
 0x585   :  { %v8678_v19 = vmax.f32 %v8510_v57, %v8622_v39  ;;  %v8625_v4 = vmax.f32 %v8569_v22, 0.0  ;;  %v8570_v55 = vadd.f32 %v16949_v40, %v8380_v26  ;;  %v8317_v38 = vadd.f32 %v8316_v3, %v8213_v27  ;;  %v8215_v20 = vpop.f32.mrf.mxu0  ;;  %v18244_v39 = vld [vmem:[#allocation78_spill] sm:$0xff]  ;;  %v18246_v3 = vld [vmem:[#allocation52_spill] sm:$0xff]  ;;  %v18248_v45 = vld [vmem:[#allocation71_spill] sm:$0xff] }
 0x586   :  { %v8465_v18 = vadd.f32 %v16920_v43, %v18239_v52  ;;  %v8383_v44 = vadd.f32 %v8315_v12, %v18240_v37  ;;  %12217 = vmatpush3.bf16.msra.mxu1 %v13503_v33  ;;  %v8318_v50 = vpop.f32.mrf.mxu1  ;;  %v8517_v53 = vmax.f32 %v8461_v56, 0.0  ;;  %v8518_v25 = vmax.f32 %v8462_v35, 0.0  ;;  %v18245_v26 = vld [vmem:[#allocation46_spill] sm:$0xff]  ;;  %v18249_v52 = vld [vmem:[#allocation72_spill] sm:$0xff] }
 0x587   :  { %v8681_v31 = vmax.f32 %v8513_v17, %v8625_v4  ;;  %v8626_v1 = vmax.f32 %v8570_v55, 0.0  ;;  %v8384_v48 = vadd.f32 %v8317_v38, %v18241_v62  ;;  %v8319_v7 = vadd.f32 %v8318_v50, %v8215_v20  ;;  %12218 = vmatprep.subr.bf16.mxu1 %v13505_v10  ;;  %v8217_v41 = vpop.f32.mrf.mxu0  ;;  %v13510_v17 = vld [vmem:[#allocation12 + $0x218] sm:$0xff]  }
 0x588   :  { %v8573_v6 = vadd.f32 %v16920_v43, %v8383_v44  ;;  %v8320_v42 = vpop.f32.mrf.mxu1  ;;  %v8521_v24 = vmax.f32 %v8465_v18, 0.0  ;;  %v8466_v58 = vadd.f32 %v16949_v40, %v18243_v5  ;;  %v8469_v22 = vadd.f32 %v16920_v43, %v18244_v39  ;;  %v18247_v38 = vld [vmem:[#allocation75_spill] sm:$0xff]  ;;  %v13516_v39 = vld [vmem:[#allocation12 + $0x208] sm:$0xff]  }
 0x589   :  { %v16995_v16 = vmax.f32 %v8677_v2, %v8681_v31  ;;  %v8682_v60 = vmax.f32 %v8514_v11, %v8626_v1  ;;  %v8574_v63 = vadd.f32 %v16949_v40, %v8384_v48  ;;  %v8387_v29 = vadd.f32 %v8319_v7, %v18242_v30  ;;  %v8221_v57 = vpop.f32.mrf.mxu0  ;;  %v13512_v20 = vld [vmem:[#allocation12 + $0x1d8] sm:$0xff]   ;;  %v18250_v31 = vld [vmem:[#allocation28_spill] sm:$0xff]  ;;  %v13513_v48 = vld [vmem:[#allocation12 + $0x210] sm:$0xff]  }
 0x58a   :  { %v8629_v59 = vmax.f32 %v8573_v6, 0.0  ;;  %v8321_v54 = vadd.f32 %v8320_v42, %v8217_v41  ;;  %12219 = vmatpush3.bf16.msra.mxu1 %v13506_v49  ;;  %v8324_v15 = vpop.f32.mrf.mxu1  ;;  %v8470_v11 = vadd.f32 %v16949_v40, %v18247_v38  ;;  %v8473_v35 = vadd.f32 %v16920_v43, %v18248_v45  ;;  %v18255_v45 = vld [vmem:[#allocation81_spill] sm:$0xff] }
 0x58b   :  { %v8630_v28 = vmax.f32 %v8574_v63, 0.0  ;;  %v8577_v33 = vadd.f32 %v16920_v43, %v8387_v29  ;;  %v8325_v9 = vadd.f32 %v8324_v15, %v8221_v57  ;;  %12220 = vmatprep.subr.bf16.mxu1 %v13508_v13  ;;  %v8223_v8 = vpop.f32.mrf.mxu0  ;;  %v17005_v2 = vmax.f32 %v8678_v19, %v8682_v60 }
 0x58c   :  { %v8685_v47 = vmax.f32 %v8517_v53, %v8629_v59  ;;  %v8388_v10 = vadd.f32 %v8321_v54, %v18245_v26  ;;  %v8326_v56 = vpop.f32.mrf.mxu1  ;;  %v17014_v18 = vadd.f32 %v16949_v40, %v18249_v52  ;;  %v8522_v7 = vmax.f32 %v8466_v58, 0.0  ;;  %v18251_v53 = vld [vmem:[#allocation104_spill] sm:$0xff]  ;;  %v13515_v58 = vld [vmem:[#allocation12 + $0x1d0] sm:$0xff]  }
 0x58d   :  { %v8686_v12 = vmax.f32 %v8518_v25, %v8630_v28  ;;  %v8633_v27 = vmax.f32 %v8577_v33, 0.0  ;;  %v8391_v4 = vadd.f32 %v8325_v9, %v18246_v3  ;;  %v8327_v55 = vadd.f32 %v8326_v56, %v8223_v8  ;;  %v8225_v19 = vpop.f32.mrf.mxu0  ;;  %v18252_v25 = vld [vmem:[#allocation105_spill] sm:$0xff]  ;;  %v18254_v26 = vld [vmem:[#allocation106_spill] sm:$0xff] }
 0x58e   :  { %v8578_v37 = vadd.f32 %v16949_v40, %v8388_v10  ;;  %12221 = vmatpush3.bf16.msra.mxu1 %v13509_v0  ;;  %v8328_v44 = vpop.f32.mrf.mxu1  ;;  %v8525_v13 = vmax.f32 %v8469_v22, 0.0  ;;  %v17021_v6 = vadd.f32 %v16920_v43, %v18251_v53  ;;  %v8526_v59 = vmax.f32 %v8470_v11, 0.0  ;;  %v18253_v22 = vld [vmem:[#allocation80_spill] sm:$0xff] }
 0x58f   :  { %v8689_v50 = vmax.f32 %v8521_v24, %v8633_v27  ;;  %v8581_v49 = vadd.f32 %v16920_v43, %v8391_v4  ;;  %v8392_v1 = vadd.f32 %v8327_v55, %v18250_v31  ;;  %v8329_v62 = vadd.f32 %v8328_v44, %v8225_v19  ;;  %12222 = vmatprep.subr.bf16.mxu1 %v13510_v17  ;;  %v8227_v42 = vpop.f32.mrf.mxu0 }
 0x590   :  { %v8634_v41 = vmax.f32 %v8578_v37, 0.0  ;;  %v8330_v60 = vpop.f32.mrf.mxu1  ;;  %v8529_v54 = vmax.f32 %v8473_v35, 0.0  ;;  %v8530_v28 = vmax.f32 %v17014_v18, 0.0  ;;  %v8533_v4 = vmax.f32 %v17021_v6, 0.0  ;;  %v18256_v18 = vld [vmem:[#allocation107_spill] sm:$0xff] }
 0x591   :  { %v8737_v63 = vmax.f32 %v8685_v47, %v8689_v50  ;;  %v8637_v30 = vmax.f32 %v8581_v49, 0.0  ;;  %v8582_v29 = vadd.f32 %v16949_v40, %v8392_v1  ;;  %v8395_v24 = vadd.f32 %v8329_v62, %v18252_v25  ;;  %v8231_v0 = vpop.f32.mrf.mxu0  ;;  %v13517_v50 = vld [vmem:[#allocation12 + $0xb8] sm:$0xff]   ;;  %v13518_v49 = vld [vmem:[#allocation12 + $0x1c8] sm:$0xff]  }
 0x592   :  { %v8690_v57 = vmax.f32 %v8522_v7, %v8634_v41  ;;  %v8331_v15 = vadd.f32 %v8330_v60, %v8227_v42  ;;  %12223 = vmatpush3.bf16.msra.mxu1 %v13512_v20  ;;  %v8334_v5 = vpop.f32.mrf.mxu1  ;;  %v8478_v47 = vadd.f32 %v16949_v40, %v18253_v22  ;;  %v17033_v35 = vadd.f32 %v16920_v43, %v18255_v45  ;;  %v18257_v1 = vld [vmem:[#allocation108_spill] sm:$0xff] }
 0x593   :  { %v8693_v33 = vmax.f32 %v8525_v13, %v8637_v30  ;;  %v8638_v9 = vmax.f32 %v8582_v29, 0.0  ;;  %v8585_v17 = vadd.f32 %v16920_v43, %v8395_v24  ;;  %12224 = vmatprep.subr.bf16.mxu1 %v13513_v48  ;;  %v8335_v8 = vadd.f32 %v8334_v5, %v8231_v0  ;;  %v8233_v56 = vpop.f32.mrf.mxu0  ;;  %v13519_v60 = vld [vmem:[#allocation12 + $0x200] sm:$0xff]   ;;  %v18258_v29 = vld [vmem:[#allocation109_spill] sm:$0xff] }
 0x594   :  { %v8396_v10 = vadd.f32 %v8331_v15, %v18254_v26  ;;  %v8336_v27 = vpop.f32.mrf.mxu1  ;;  %v8738_v3 = vmax.f32 %v8686_v12, %v8690_v57  ;;  %v8821_v12 = vpack.c.bf16 %v8737_v63, %v8737_v63  ;;  %v8534_v7 = vmax.f32 %v8478_v47, 0.0  ;;  %v18261_v47 = vld [vmem:[#allocation110_spill] sm:$0xff] }
 0x595   :  { %v8694_v55 = vmax.f32 %v8526_v59, %v8638_v9  ;;  %v8641_v38 = vmax.f32 %v8585_v17, 0.0  ;;  %v8337_v11 = vadd.f32 %v8336_v27, %v8233_v56  ;;  %v8399_v37 = vadd.f32 %v8335_v8, %v18256_v18  ;;  %v8235_v19 = vpop.f32.mrf.mxu0  ;;  %v18260_v9 = vld [vmem:[#allocation36_spill] sm:$0xff]  ;;  %v18263_v8 = vld [vmem:[#allocation37_spill] sm:$0xff] }
 0x596   :  { %v8586_v52 = vadd.f32 %v16949_v40, %v8396_v10  ;;  %12225 = vmatpush3.bf16.msra.mxu1 %v13515_v58  ;;  %v8338_v44 = vpop.f32.mrf.mxu1  ;;  %v8822_v20 = vpack.c.bf16 %v8738_v3, %v8738_v3  ;;  %v8762_v42 = vpack.c.bf16 %v17005_v2, %v17005_v2  ;;  %v8537_v59 = vmax.f32 %v17033_v35, 0.0  ;;  %v13520_v58 = vld [vmem:[#allocation12 + $0xb0] sm:$0xff]  }
 0x597   :  { %v8697_v31 = vmax.f32 %v8529_v54, %v8641_v38  ;;  %v8400_v62 = vadd.f32 %v8337_v11, %v18257_v1  ;;  %v8339_v48 = vadd.f32 %v8338_v44, %v8235_v19  ;;  %12226 = vmatprep.subr.bf16.mxu1 %v13516_v39  ;;  %v8589_v53 = vadd.f32 %v16920_v43, %v8399_v37  ;;  %v8237_v6 = vpop.f32.mrf.mxu0  ;;  %v18259_v54 = vld [vmem:[#allocation74_spill] sm:$0xff]  ;;  %v18264_v44 = vld [vmem:[#allocation44_spill] sm:$0xff] }
 0x598   :  { %v8642_v13 = vmax.f32 %v8586_v52, 0.0  ;;  %11985 = vmatprep.mubr.msk.bf16.mxu0 %vm2660_vm2, %v8822_v20  ;;  %v8340_v41 = vpop.f32.mrf.mxu1  ;;  %v8482_v57 = vadd.f32 %v16949_v40, %v18259_v54  ;;  %v17051_v17 = vadd.f32 %v16920_v43, %v18260_v9  ;;  %v18262_v10 = vmov 0   ;;  %v13524_v1 = vld [vmem:[#allocation12 + $0x2d8] sm:$0xff]   ;;  %v18268_v9 = vld [vmem:[#allocation84_spill] sm:$0xff] }
 0x599   :  { %v17042_v30 = vmax.f32 %v8693_v33, %v8697_v31  ;;  %v8590_v63 = vadd.f32 %v16949_v40, %v8400_v62  ;;  %v8403_v25 = vadd.f32 %v8339_v48, %v18258_v29  ;;  %v8341_v24 = vadd.f32 %v8340_v41, %v8237_v6  ;;  %9124 = vmatmul.mubr.bf16.vlgmr.msra.gmra.mxu0 %v8821_v12  ;;  %v8241_v5 = vpop.f32.mrf.mxu0  ;;  %v13521_v33 = vld [vmem:[#allocation12 + $0x1c0] sm:$0xff]   ;;  %v13523_v31 = vld [vmem:[#allocation12 + $0xa8] sm:$0xff]  }
 0x59a   :  { %v8698_v15 = vmax.f32 %v8530_v28, %v8642_v13  ;;  %v8645_v0 = vmax.f32 %v8589_v53, 0.0  ;;  %9343 = vmatpush1.bf16.msra.mxu0 %v13517_v50  ;;  %12227 = vmatpush3.bf16.msra.mxu1 %v13518_v49  ;;  %v8344_v2 = vpop.f32.mrf.mxu1  ;;  %v13522_v28 = vld [vmem:[#allocation12 + $0x318] sm:$0xff]   ;;  %v17059_v56 = vadd.f32 %v16949_v40, %v18263_v8  ;;  %v8538_v19 = vmax.f32 %v8482_v57, 0.0 }
 0x59b   :  { %v8646_v39 = vmax.f32 %v8590_v63, 0.0  ;;  %v8593_v22 = vadd.f32 %v16920_v43, %v8403_v25  ;;  %v8404_v26 = vadd.f32 %v8341_v24, %v18261_v47  ;;  %12014 = vmatprep.mubr.msk.bf16.mxu0 %vm2660_vm2, %v8762_v42  ;;  %9344 = vmatprep.subr.bf16.mxu0 %v18262_v10  ;;  %v8345_v3 = vadd.f32 %v8344_v2, %v8241_v5  ;;  %v8243_v38 = vpop.f32.mrf.mxu0  ;;  %v13525_v63 = vld [vmem:[#allocation12 + $0x310] sm:$0xff]  }
 0x59c   :  { %v8701_v27 = vmax.f32 %v8533_v4, %v8645_v0  ;;  %12228 = vmatprep.subr.bf16.mxu1 %v13519_v60  ;;  %v8346_v11 = vpop.f32.mrf.mxu1  ;;  %v17061_v45 = vmax.f32 %v8694_v55, %v8698_v15  ;;  %v17066_v20 = vadd.f32 %v16920_v43, %v18264_v44  ;;  %v9382_v50 = vpack.c.bf16 %v16870_v46, %v16870_v46  ;;  %v18265_v4 = vld [vmem:[#allocation111_spill] sm:$0xff] }
 0x59d   :  { %v8702_v35 = vmax.f32 %v8534_v7, %v8646_v39  ;;  %v8649_v52 = vmax.f32 %v8593_v22, 0.0  ;;  %v8594_v18 = vadd.f32 %v16949_v40, %v8404_v26  ;;  %v8347_v37 = vadd.f32 %v8346_v11, %v8243_v38  ;;  %v8245_v12 = vpop.f32.mrf.mxu0  ;;  %v18266_v7 = vld [vmem:[#allocation68_spill] sm:$0xff]  ;;  %v18269_v26 = vld [vmem:[#allocation87_spill] sm:$0xff] }
 0x59e   :  { %v8407_v49 = vadd.f32 %v8345_v3, %v18265_v4  ;;  %9345 = vmatpush1.bf16.msra.mxu0 %v13520_v58  ;;  %12229 = vmatpush3.bf16.msra.mxu1 %v13521_v33  ;;  %v8348_v55 = vpop.f32.mrf.mxu1  ;;  %v8541_v6 = vmax.f32 %v17051_v17, 0.0  ;;  %v9696_v60 = vpack.c.bf16 %v16911_v34, %v16911_v34  ;;  %v8542_v57 = vmax.f32 %v17059_v56, 0.0  ;;  %v13526_v34 = vld [vmem:[#allocation12 + $0xa0] sm:$0xff]   ;;  %v13527_v33 = vld [vmem:[#allocation12 + $0x2d0] sm:$0xff]   ;;  %v13528_v11 = vld [vmem:[#allocation12 + $0x308] sm:$0xff]  }
 0x59f   :  { %v8705_v62 = vmax.f32 %v8537_v59, %v8649_v52  ;;  %v8650_v48 = vmax.f32 %v8594_v18, 0.0  ;;  %v8408_v13 = vadd.f32 %v8347_v37, %v18266_v7  ;;  %v8349_v53 = vadd.f32 %v8348_v55, %v8245_v12  ;;  %9346 = vmatprep.subr.bf16.mxu0 %v18262_v10  ;;  %12236 = vmatprep.subr.bf16.mxu1 %v13522_v28  ;;  %v8247_v41 = vpop.f32.mrf.mxu0  ;;  %v18267_v59 = vld [vmem:[#allocation112_spill] sm:$0xff]  ;;  %v18270_v56 = vld [vmem:[#allocation113_spill] sm:$0xff] }
 0x5a0   :  { %v8597_v46 = vadd.f32 %v16920_v43, %v8407_v49  ;;  %v8350_v42 = vpop.f32.mrf.mxu1  ;;  %v8545_v15 = vmax.f32 %v17066_v20, 0.0  ;;  %v8490_v17 = vadd.f32 %v16949_v40, %v18268_v9  ;;  %v8493_v28 = vadd.f32 %v16920_v43, %v18269_v26  ;;  %v18273_v49 = vld [vmem:[#allocation35_spill] sm:$0xff] }
 0x5a1   :  { %v17077_v29 = vmax.f32 %v8701_v27, %v8705_v62  ;;  %v8706_v25 = vmax.f32 %v8538_v19, %v8650_v48  ;;  %v8598_v24 = vadd.f32 %v16949_v40, %v8408_v13  ;;  %v8411_v54 = vadd.f32 %v8349_v53, %v18267_v59  ;;  %9647 = vmatmul.mubr.bf16.vlgmr.msra.gmra.mxu1 %v9382_v50  ;;  %v8251_v2 = vpop.f32.mrf.mxu0  ;;  %v18271_v19 = vld [vmem:[#allocation65_spill] sm:$0xff]  ;;  %v18272_v50 = vld [vmem:[#allocation98_spill] sm:$0xff]  ;;  %v18274_v13 = vld [vmem:[#allocation67_spill] sm:$0xff] }
 0x5a2   :  { %v8653_v0 = vmax.f32 %v8597_v46, 0.0  ;;  %v8351_v5 = vadd.f32 %v8350_v42, %v8247_v41  ;;  %9347 = vmatpush1.bf16.msra.mxu0 %v13523_v31  ;;  %12237 = vmatpush3.bf16.msra.mxu1 %v13524_v1  ;;  %v8354_v58 = vpop.f32.mrf.mxu1  ;;  %v8494_v4 = vadd.f32 %v16949_v40, %v18272_v50  ;;  %v8497_v12 = vadd.f32 %v16920_v43, %v18273_v49  ;;  %v13529_v62 = vld [vmem:[#allocation12 + $0x98] sm:$0xff]   ;;  %v13531_v46 = vld [vmem:[#allocation12 + $0x300] sm:$0xff]   ;;  %v18279_v49 = vld [vmem:[#allocation85_spill] sm:$0xff] }
 0x5a3   :  { %v8654_v39 = vmax.f32 %v8598_v24, 0.0  ;;  %v8601_v22 = vadd.f32 %v16920_v43, %v8411_v54  ;;  %9959 = vmatprep.mubr.bf16.mxu1 %v9696_v60  ;;  %v8355_v47 = vadd.f32 %v8354_v58, %v8251_v2  ;;  %9348 = vmatprep.subr.bf16.mxu0 %v18262_v10  ;;  %v8253_v3 = vpop.f32.mrf.mxu0  ;;  %v17090_v52 = vmax.f32 %v8702_v35, %v8706_v25  ;;  %v13530_v35 = vld [vmem:[#allocation12 + $0x2c8] sm:$0xff]   ;;  %v13533_v9 = vld [vmem:[#allocation12 + $0x2c0] sm:$0xff]   ;;  %v13534_v26 = vld [vmem:[#allocation12 + $0x2f8] sm:$0xff]  }
 0x5a4   :  { %v8709_v8 = vmax.f32 %v8541_v6, %v8653_v0  ;;  %v8412_v27 = vadd.f32 %v8351_v5, %v18270_v56  ;;  %12238 = vmatprep.subr.bf16.mxu1 %v13525_v63  ;;  %v8356_v38 = vpop.f32.mrf.mxu1  ;;  %v8546_v41 = vmax.f32 %v8490_v17, 0.0  ;;  %v8549_v42 = vmax.f32 %v8493_v28, 0.0  ;;  %v18276_v28 = vld [vmem:[#allocation42_spill] sm:$0xff]  ;;  %v18277_v56 = vld [vmem:[#allocation115_spill] sm:$0xff] }
 0x5a5   :  { %v8710_v18 = vmax.f32 %v8542_v57, %v8654_v39  ;;  %v8657_v37 = vmax.f32 %v8601_v22, 0.0  ;;  %v8415_v44 = vadd.f32 %v8355_v47, %v18271_v19  ;;  %v8357_v20 = vadd.f32 %v8356_v38, %v8253_v3  ;;  %v8255_v31 = vpop.f32.mrf.mxu0  ;;  %v18275_v57 = vld [vmem:[#allocation114_spill] sm:$0xff]  ;;  %v18278_v19 = vld [vmem:[#allocation43_spill] sm:$0xff] }
 0x5a6   :  { %v8602_v55 = vadd.f32 %v16949_v40, %v8412_v27  ;;  %9349 = vmatpush1.bf16.msra.mxu0 %v13526_v34  ;;  %12239 = vmatpush3.bf16.msra.mxu1 %v13527_v33  ;;  %v8358_v1 = vpop.f32.mrf.mxu1  ;;  %v8550_v0 = vmax.f32 %v8494_v4, 0.0  ;;  %v13532_v33 = vld [vmem:[#allocation12 + $0x90] sm:$0xff]   ;;  %v8553_v17 = vmax.f32 %v8497_v12, 0.0  ;;  %v8502_v12 = vadd.f32 %v16949_v40, %v18279_v49  ;;  %v13542_v49 = vld [vmem:[#allocation12 + $0x2a8] sm:$0xff]  }
 0x5a7   :  { %v8713_v48 = vmax.f32 %v8545_v15, %v8657_v37  ;;  %v8605_v7 = vadd.f32 %v16920_v43, %v8415_v44  ;;  %v8416_v53 = vadd.f32 %v8357_v20, %v18274_v13  ;;  %v8359_v6 = vadd.f32 %v8358_v1, %v8255_v31  ;;  %9350 = vmatprep.subr.bf16.mxu0 %v18262_v10  ;;  %v8257_v63 = vpop.f32.mrf.mxu0  ;;  %v18280_v31 = vld [vmem:[#allocation64_spill] sm:$0xff] }
 0x5a8   :  { %v8658_v60 = vmax.f32 %v8602_v55, 0.0  ;;  %12240 = vmatprep.subr.bf16.mxu1 %v13528_v11  ;;  %v8360_v25 = vpop.f32.mrf.mxu1  ;;  %v8501_v44 = vadd.f32 %v16920_v43, %v18278_v19  ;;  %v18281_v13 = vld [vmem:[#allocation116_spill] sm:$0xff] }
 0x5a9   :  { %v17101_v24 = vmax.f32 %v8709_v8, %v8713_v48  ;;  %v8661_v59 = vmax.f32 %v8605_v7, 0.0  ;;  %v8606_v54 = vadd.f32 %v16949_v40, %v8416_v53  ;;  %v8419_v15 = vadd.f32 %v8359_v6, %v18275_v57  ;;  %v8261_v58 = vpop.f32.mrf.mxu0  ;;  %v13535_v48 = vld [vmem:[#allocation12 + $0x88] sm:$0xff]  }
 0x5aa   :  { %v8714_v5 = vmax.f32 %v8546_v41, %v8658_v60  ;;  %v8361_v2 = vadd.f32 %v8360_v25, %v8257_v63  ;;  %9351 = vmatpush1.bf16.msra.mxu0 %v13529_v62  ;;  %12241 = vmatpush3.bf16.msra.mxu1 %v13530_v35  ;;  %v8364_v34 = vpop.f32.mrf.mxu1  ;;  %v8498_v8 = vadd.f32 %v16949_v40, %v18276_v28 }
 0x5ab   :  { %v8717_v39 = vmax.f32 %v8549_v42, %v8661_v59  ;;  %v8662_v22 = vmax.f32 %v8606_v54, 0.0  ;;  %v8609_v47 = vadd.f32 %v16920_v43, %v8419_v15  ;;  %9352 = vmatprep.subr.bf16.mxu0 %v18262_v10  ;;  %12242 = vmatprep.subr.bf16.mxu1 %v13531_v46  ;;  %v8365_v3 = vadd.f32 %v8364_v34, %v8261_v58  ;;  %v8263_v38 = vpop.f32.mrf.mxu0  ;;  %v13537_v46 = vld [vmem:[#allocation12 + $0x2f0] sm:$0xff]  }
 0x5ac   :  { %v8420_v27 = vadd.f32 %v8361_v2, %v18277_v56  ;;  %v8366_v11 = vpop.f32.mrf.mxu1  ;;  %v17110_v37 = vmax.f32 %v8710_v18, %v8714_v5  ;;  %v13536_v18 = vld [vmem:[#allocation12 + $0x2b8] sm:$0xff]   ;;  %v8554_v41 = vmax.f32 %v8498_v8, 0.0  ;;  %v8557_v58 = vmax.f32 %v8501_v44, 0.0 }
 0x5ad   :  { %v8718_v20 = vmax.f32 %v8550_v0, %v8662_v22  ;;  %v8665_v50 = vmax.f32 %v8609_v47, 0.0  ;;  %v8367_v4 = vadd.f32 %v8366_v11, %v8263_v38  ;;  %v8423_v1 = vadd.f32 %v8365_v3, %v18280_v31  ;;  %v8265_v62 = vpop.f32.mrf.mxu0  ;;  %v18282_v42 = vld [vmem:[#allocation50_spill] sm:$0xff]  ;;  %v18283_v0 = vld [vmem:[#allocation117_spill] sm:$0xff]  ;;  %v13543_v31 = vld [vmem:[#allocation12 + $0x2e0] sm:$0xff]  }
 0x5ae   :  { %v8610_v55 = vadd.f32 %v16949_v40, %v8420_v27  ;;  %9353 = vmatpush1.bf16.msra.mxu0 %v13532_v33  ;;  %12243 = vmatpush3.bf16.msra.mxu1 %v13533_v9  ;;  %v8368_v35 = vpop.f32.mrf.mxu1  ;;  %v8505_v60 = vadd.f32 %v16920_v43, %v18282_v42  ;;  %v8558_v34 = vmax.f32 %v8502_v12, 0.0  ;;  %v13539_v22 = vld [vmem:[#allocation12 + $0x2b0] sm:$0xff]   ;;  %v13540_v27 = vld [vmem:[#allocation12 + $0x2e8] sm:$0xff]  }
 0x5af   :  { %v8721_v7 = vmax.f32 %v8553_v17, %v8665_v50  ;;  %v8424_v53 = vadd.f32 %v8367_v4, %v18281_v13  ;;  %v8369_v6 = vadd.f32 %v8368_v35, %v8265_v62  ;;  %9354 = vmatprep.subr.bf16.mxu0 %v18262_v10  ;;  %12244 = vmatprep.subr.bf16.mxu1 %v13534_v26  ;;  %v8267_v59 = vpop.f32.mrf.mxu0  ;;  %v13538_v17 = vld [vmem:[#allocation12 + $0x80] sm:$0xff]   ;;  %v18284_v47 = vld [vmem:[#allocation86_spill] sm:$0xff] }
 0x5b0   :  { %v8666_v63 = vmax.f32 %v8610_v55, 0.0  ;;  %v8613_v25 = vadd.f32 %v16920_v43, %v8423_v1  ;;  %v8370_v54 = vpop.f32.mrf.mxu1  ;;  %v8506_v26 = vadd.f32 %v16949_v40, %v18284_v47  ;;  %v18285_v8 = vld [vmem:[#allocation118_spill] sm:$0xff]  ;;  %v8561_v11 = vmax.f32 %v8505_v60, 0.0  ;;  %v13545_v35 = vld [vmem:[#allocation12 + $0x2a0] sm:$0xff]  }
 0x5b1   :  { %v17123_v57 = vmax.f32 %v8717_v39, %v8721_v7  ;;  %v8614_v15 = vadd.f32 %v16949_v40, %v8424_v53  ;;  %v8427_v5 = vadd.f32 %v8369_v6, %v18283_v0  ;;  %v8371_v2 = vadd.f32 %v8370_v54, %v8267_v59  ;;  %v13541_v4 = vld [vmem:[#allocation12 + $0xd8] sm:$0xff]   ;;  %v13544_v62 = vld [vmem:[#allocation12 + $0xd0] sm:$0xff]   ;;  %v13548_v53 = vld [vmem:[#allocation12 + $0xc0] sm:$0xff]  }
 0x5b2   :  { %v8722_v33 = vmax.f32 %v8554_v41, %v8666_v63  ;;  %v8669_v9 = vmax.f32 %v8613_v25, 0.0  ;;  %9355 = vmatpush1.bf16.msra.mxu0 %v13535_v48  ;;  %12245 = vmatpush3.bf16.msra.mxu1 %v13536_v18  ;;  %v8562_v12 = vmax.f32 %v8506_v26, 0.0  ;;  %v13546_v48 = vld [vmem:[#allocation12 + $0xc8] sm:$0xff]   ;;  %v13547_v18 = vld [vmem:[#allocation12 + $0x358] sm:$0xff]   ;;  %v9695_v7 = vpack.c.bf16 %v16898_v36, %v16898_v36  ;;  %v13549_v6 = vld [vmem:[#allocation12 + $0x350] sm:$0xff]  }
 0x5b3   :  { %v8670_v28 = vmax.f32 %v8614_v15, 0.0  ;;  %v8617_v39 = vadd.f32 %v16920_v43, %v8427_v5  ;;  %v8428_v56 = vadd.f32 %v8371_v2, %v18285_v8  ;;  %9356 = vmatprep.subr.bf16.mxu0 %v18262_v10  ;;  %12246 = vmatprep.subr.bf16.mxu1 %v13537_v46  ;;  %v9698_v13 = vpack.c.bf16 %v17090_v52, %v17090_v52  ;;  %v13550_v36 = vld [vmem:[#allocation12 + $0x278] sm:$0xff]   ;;  %v13551_v52 = vld [vmem:[#allocation12 + $0x348] sm:$0xff]   ;;  %v13552_v42 = vld [vmem:[#allocation12 + $0x270] sm:$0xff]  }
 0x5b4   :  { %v8725_v3 = vmax.f32 %v8557_v58, %v8669_v9  ;;  %v17132_v38 = vmax.f32 %v8718_v20, %v8722_v33  ;;  %v8761_v46 = vpack.c.bf16 %v16995_v16, %v16995_v16  ;;  %v9385_v41 = vpack.c.bf16 %v17061_v45, %v17061_v45  ;;  %v13553_v60 = vld [vmem:[#allocation12 + $0x340] sm:$0xff]   ;;  %v13554_v16 = vld [vmem:[#allocation12 + $0x268] sm:$0xff]   ;;  %v13555_v63 = vld [vmem:[#allocation12 + $0x338] sm:$0xff]  }
 0x5b5   :  { %v8726_v19 = vmax.f32 %v8558_v34, %v8670_v28  ;;  %v8673_v44 = vmax.f32 %v8617_v39, 0.0  ;;  %v8618_v50 = vadd.f32 %v16949_v40, %v8428_v56  ;;  %v13556_v45 = vld [vmem:[#allocation12 + $0x260] sm:$0xff]   ;;  %v13557_v25 = vld [vmem:[#allocation12 + $0x330] sm:$0xff]   ;;  %v13558_v59 = vld [vmem:[#allocation12 + $0x258] sm:$0xff]   ;;  %v9697_v39 = vpack.c.bf16 %v17077_v29, %v17077_v29 }
 0x5b6   :  { %9357 = vmatpush1.bf16.msra.mxu0 %v13538_v17  ;;  %12247 = vmatpush3.bf16.msra.mxu1 %v13539_v22  ;;  %v13559_v54 = vld [vmem:[#allocation12 + $0x328] sm:$0xff]   ;;  %v13560_v15 = vld [vmem:[#allocation12 + $0x250] sm:$0xff]   ;;  %v13561_v0 = vld [vmem:[#allocation12 + $0x320] sm:$0xff]   ;;  %v10322_v56 = vpack.c.bf16 %v16961_v32, %v16961_v32  ;;  %v9384_v29 = vpack.c.bf16 %v17042_v30, %v17042_v30 }
 0x5b7   :  { %v8729_v43 = vmax.f32 %v8561_v11, %v8673_v44  ;;  %v8674_v55 = vmax.f32 %v8618_v50, 0.0  ;;  %9366 = vmatprep.subr.bf16.mxu0 %v18262_v10  ;;  %12248 = vmatprep.subr.bf16.mxu1 %v13540_v27  ;;  %v13562_v5 = vld [vmem:[#allocation12 + $0x248] sm:$0xff]   ;;  %v13563_v2 = vld [vmem:[#allocation12 + $0x378] sm:$0xff]   ;;  %v13564_v58 = vld [vmem:[#allocation12 + $0x240] sm:$0xff]  }
 0x5b8   :  { %v13565_v34 = vld [vmem:[#allocation12 + $0x370] sm:$0xff]   ;;  %v13566_v33 = vld [vmem:[#allocation12 + $0x298] sm:$0xff]   ;;  %v13567_v9 = vld [vmem:[#allocation12 + $0x368] sm:$0xff]  }
 0x5b9   :  { %v17136_v1 = vmax.f32 %v8725_v3, %v8729_v43  ;;  %v8730_v20 = vmax.f32 %v8562_v12, %v8674_v55  ;;  %v13568_v17 = vld [vmem:[#allocation12 + $0x290] sm:$0xff]   ;;  %v13569_v22 = vld [vmem:[#allocation12 + $0x360] sm:$0xff]   ;;  %v13570_v47 = vld [vmem:[#allocation12 + $0x4d8] sm:$0xff]  }
 0x5ba   :  { %9367 = vmatpush2.bf16.msra.mxu0 %v13541_v4  ;;  %12249 = vmatpush3.bf16.msra.mxu1 %v13542_v49  ;;  %v13571_v26 = vld [vmem:[#allocation12 + $0x288] sm:$0xff]   ;;  %v13572_v28 = vld [vmem:[#allocation12 + $0x498] sm:$0xff]   ;;  %v13573_v8 = vld [vmem:[#allocation12 + $0x4d0] sm:$0xff]   ;;  %v10009_v4 = vpack.c.bf16 %v16936_v61, %v16936_v61 }
 0x5bb   :  { %9368 = vmatprep.subr.bf16.mxu0 %v18262_v10  ;;  %12250 = vmatprep.subr.bf16.mxu1 %v13543_v31  ;;  %v17139_v40 = vmax.f32 %v8726_v19, %v8730_v20  ;;  %v13574_v27 = vld [vmem:[#allocation12 + $0x280] sm:$0xff]   ;;  %v13575_v3 = vld [vmem:[#allocation12 + $0x490] sm:$0xff]   ;;  %v13576_v11 = vld [vmem:[#allocation12 + $0x3f8] sm:$0xff]  }
 0x5bc   :  { %v13577_v19 = vld [vmem:[#allocation12 + $0x4c8] sm:$0xff]   ;;  %v13578_v44 = vld [vmem:[#allocation12 + $0x3b8] sm:$0xff]   ;;  %v13580_v32 = vld [vmem:[#allocation12 + $0x3f0] sm:$0xff]  }
 0x5bd   :  { %v13579_v50 = vld [vmem:[#allocation12 + $0x488] sm:$0xff]   ;;  %v13581_v49 = vld [vmem:[#allocation12 + $0x4c0] sm:$0xff]   ;;  %v13582_v12 = vld [vmem:[#allocation12 + $0x3b0] sm:$0xff]  }
 0x5be   :  { %9369 = vmatpush2.bf16.msra.mxu0 %v13544_v62  ;;  %12251 = vmatpush3.bf16.msra.mxu1 %v13545_v35  ;;  %v13583_v43 = vld [vmem:[#allocation12 + $0x480] sm:$0xff]   ;;  %v13584_v55 = vld [vmem:[#allocation12 + $0x3e8] sm:$0xff]   ;;  %v13585_v31 = vld [vmem:[#allocation12 + $0x4b8] sm:$0xff]  }
 0x5bf   :  { %9370 = vmatprep.subr.bf16.mxu0 %v18262_v10  ;;  %9967 = vmatprep.subr.bf16.mxu1 %v18262_v10  ;;  %v13586_v30 = vld [vmem:[#allocation12 + $0x3a8] sm:$0xff]   ;;  %v13587_v20 = vld [vmem:[#allocation12 + $0x478] sm:$0xff]   ;;  %v13588_v62 = vld [vmem:[#allocation12 + $0x3e0] sm:$0xff]  }
 0x5c0   :  { %v13589_v35 = vld [vmem:[#allocation12 + $0x4b0] sm:$0xff]   ;;  %v13590_v61 = vld [vmem:[#allocation12 + $0x3a0] sm:$0xff]  }
 0x5c1   :  { %9960 = vmatmul.mubr.bf16.vlgmr.msra.gmra.mxu1 %v9695_v7  ;;  %v13593_v7 = vld [vmem:[#allocation12 + $0x4a8] sm:$0xff]  }
 0x5c2   :  { %9371 = vmatpush2.bf16.msra.mxu0 %v13546_v48  ;;  %9968 = vmatpush1.bf16.msra.mxu1 %v13547_v18  ;;  %v13591_v48 = vld [vmem:[#allocation12 + $0x470] sm:$0xff]   ;;  %v13592_v18 = vld [vmem:[#allocation12 + $0x3d8] sm:$0xff]  }
 0x5c3   :  { %12072 = vmatprep.mubr.msk.bf16.mxu1 %vm2660_vm2, %v9698_v13  ;;  %9372 = vmatprep.subr.bf16.mxu0 %v18262_v10  ;;  %v13594_v13 = vld [vmem:[#allocation12 + $0x398] sm:$0xff]  }
 0x5c4   :  { %9969 = vmatprep.subr.bf16.mxu1 %v18262_v10 }
 0x5c6   :  { %9373 = vmatpush2.bf16.msra.mxu0 %v13548_v53  ;;  %9970 = vmatpush1.bf16.msra.mxu1 %v13549_v6  ;;  %v13595_v53 = vld [vmem:[#allocation12 + $0x468] sm:$0xff]   ;;  %v13596_v6 = vld [vmem:[#allocation12 + $0x3d0] sm:$0xff]  }
 0x5c7   :  { %9654 = vmatprep.subr.bf16.mxu0 %v18262_v10  ;;  %9971 = vmatprep.subr.bf16.mxu1 %v18262_v10 }
 0x5c9   :  { %9375 = vmatmul.mubr.bf16.vlgmr.msra.gmra.mxu0 %v8761_v46  ;;  %v13598_v46 = vld [vmem:[#allocation12 + $0x390] sm:$0xff]  }
 0x5ca   :  { %9655 = vmatpush1.bf16.msra.mxu0 %v13550_v36  ;;  %12043 = vmatprep.mubr.msk.bf16.mxu0 %vm2660_vm2, %v9385_v41  ;;  %v13597_v36 = vld [vmem:[#allocation12 + $0x4a0] sm:$0xff]   ;;  %v13600_v41 = vld [vmem:[#allocation12 + $0x3c8] sm:$0xff]  }
 0x5cb   :  { %9972 = vmatpush1.bf16.msra.mxu1 %v13551_v52  ;;  %9656 = vmatprep.subr.bf16.mxu0 %v18262_v10  ;;  %v13599_v52 = vld [vmem:[#allocation12 + $0x460] sm:$0xff]  }
 0x5cc   :  { %9973 = vmatprep.subr.bf16.mxu1 %v18262_v10 }
 0x5ce   :  { %9657 = vmatpush1.bf16.msra.mxu0 %v13552_v42  ;;  %v13601_v42 = vld [vmem:[#allocation12 + $0x388] sm:$0xff]  }
 0x5cf   :  { %9974 = vmatpush1.bf16.msra.mxu1 %v13553_v60  ;;  %9658 = vmatprep.subr.bf16.mxu0 %v18262_v10  ;;  %v13602_v60 = vld [vmem:[#allocation12 + $0x518] sm:$0xff]  }
 0x5d0   :  { %9975 = vmatprep.subr.bf16.mxu1 %v18262_v10 }
 0x5d2   :  { %9659 = vmatpush1.bf16.msra.mxu0 %v13554_v16  ;;  %v10321_v16 = vpack.c.bf16 %v16952_v21, %v16952_v21  ;;  %v10008_v21 = vpack.c.bf16 %v16925_v23, %v16925_v23  ;;  %v13610_v23 = vld [vmem:[#allocation12 + $0x428] sm:$0xff]  }
 0x5d3   :  { %9976 = vmatpush1.bf16.msra.mxu1 %v13555_v63  ;;  %9660 = vmatprep.subr.bf16.mxu0 %v18262_v10  ;;  %v13603_v63 = vld [vmem:[#allocation12 + $0x3c0] sm:$0xff]  }
 0x5d4   :  { %9977 = vmatprep.subr.bf16.mxu1 %v18262_v10 }
 0x5d6   :  { %9661 = vmatpush1.bf16.msra.mxu0 %v13556_v45  ;;  %v10324_v45 = vpack.c.bf16 %v17132_v38, %v17132_v38  ;;  %v10011_v38 = vpack.c.bf16 %v17110_v37, %v17110_v37 }
 0x5d7   :  { %9978 = vmatpush1.bf16.msra.mxu1 %v13557_v25  ;;  %9662 = vmatprep.subr.bf16.mxu0 %v18262_v10  ;;  %v13604_v25 = vld [vmem:[#allocation12 + $0x380] sm:$0xff]  }
 0x5d8   :  { %9979 = vmatprep.subr.bf16.mxu1 %v18262_v10 }
 0x5da   :  { %9663 = vmatpush1.bf16.msra.mxu0 %v13558_v59  ;;  %v13605_v59 = vld [vmem:[#allocation12 + $0x510] sm:$0xff]  }
 0x5db   :  { %9980 = vmatpush1.bf16.msra.mxu1 %v13559_v54  ;;  %9664 = vmatprep.subr.bf16.mxu0 %v18262_v10  ;;  %v13606_v54 = vld [vmem:[#allocation12 + $0x438] sm:$0xff]  }
 0x5dc   :  { %9981 = vmatprep.subr.bf16.mxu1 %v18262_v10 }
 0x5de   :  { %9665 = vmatpush1.bf16.msra.mxu0 %v13560_v15  ;;  %v13607_v15 = vld [vmem:[#allocation12 + $0x508] sm:$0xff]  }
 0x5df   :  { %9982 = vmatpush1.bf16.msra.mxu1 %v13561_v0  ;;  %9666 = vmatprep.subr.bf16.mxu0 %v18262_v10  ;;  %v13608_v0 = vld [vmem:[#allocation12 + $0x430] sm:$0xff]  }
 0x5e0   :  { %9991 = vmatprep.subr.bf16.mxu1 %v18262_v10 }
 0x5e2   :  { %9667 = vmatpush1.bf16.msra.mxu0 %v13562_v5  ;;  %v13609_v5 = vld [vmem:[#allocation12 + $0x500] sm:$0xff]  }
 0x5e3   :  { %9992 = vmatpush2.bf16.msra.mxu1 %v13563_v2  ;;  %9668 = vmatprep.subr.bf16.mxu0 %v18262_v10  ;;  %v13611_v2 = vld [vmem:[#allocation12 + $0x4f8] sm:$0xff]  }
 0x5e4   :  { %9993 = vmatprep.subr.bf16.mxu1 %v18262_v10 }
 0x5e6   :  { %9669 = vmatpush1.bf16.msra.mxu0 %v13564_v58  ;;  %v13612_v58 = vld [vmem:[#allocation12 + $0x420] sm:$0xff]  }
 0x5e7   :  { %9994 = vmatpush2.bf16.msra.mxu1 %v13565_v34  ;;  %9678 = vmatprep.subr.bf16.mxu0 %v18262_v10 }
 0x5e8   :  { %9995 = vmatprep.subr.bf16.mxu1 %v18262_v10 }
 0x5ea   :  { %9679 = vmatpush2.bf16.msra.mxu0 %v13566_v33  ;;  %v13613_v33 = vld [vmem:[#allocation12 + $0x4f0] sm:$0xff]  }
 0x5eb   :  { %9996 = vmatpush2.bf16.msra.mxu1 %v13567_v9  ;;  %9680 = vmatprep.subr.bf16.mxu0 %v18262_v10 }
 0x5ec   :  { %9997 = vmatprep.subr.bf16.mxu1 %v18262_v10 }
 0x5ee   :  { %9681 = vmatpush2.bf16.msra.mxu0 %v13568_v17 }
 0x5ef   :  { %9998 = vmatpush2.bf16.msra.mxu1 %v13569_v22  ;;  %9682 = vmatprep.subr.bf16.mxu0 %v18262_v10  ;;  %v13614_v22 = vld [vmem:[#allocation12 + $0x418] sm:$0xff]  }
 0x5f0   :  { %12280 = vmatprep.subr.bf16.mxu1 %v13570_v47 }
 0x5f2   :  { %10000 = vmatmul.mubr.bf16.vlgmr.msra.gmra.mxu1 %v9697_v39  ;;  %9683 = vmatpush2.bf16.msra.mxu0 %v13571_v26  ;;  %v13615_v26 = vld [vmem:[#allocation12 + $0x4e8] sm:$0xff]   ;;  %v13617_v39 = vld [vmem:[#allocation12 + $0x4e0] sm:$0xff]  }
 0x5f3   :  { %12281 = vmatpush3.bf16.msra.mxu1 %v13572_v28  ;;  %10585 = vmatprep.mubr.bf16.mxu1 %v10322_v56  ;;  %v13616_v28 = vld [vmem:[#allocation12 + $0x410] sm:$0xff]   ;;  %v13619_v56 = vld [vmem:[#allocation12 + $0x538] sm:$0xff]  }
 0x5f4   :  { %9684 = vmatprep.subr.bf16.mxu0 %v18262_v10  ;;  %12282 = vmatprep.subr.bf16.mxu1 %v13573_v8  ;;  %v13618_v8 = vld [vmem:[#allocation12 + $0x408] sm:$0xff]  }
 0x5f6   :  { %9685 = vmatpush2.bf16.msra.mxu0 %v13574_v27  ;;  %v13620_v27 = vld [vmem:[#allocation12 + $0x400] sm:$0xff]  }
 0x5f7   :  { %12283 = vmatpush3.bf16.msra.mxu1 %v13575_v3  ;;  %12258 = vmatprep.subr.bf16.mxu0 %v13576_v11  ;;  %v13621_v3 = vld [vmem:[#allocation12 + $0x530] sm:$0xff]   ;;  %v13622_v11 = vld [vmem:[#allocation12 + $0x458] sm:$0xff]  }
 0x5f8   :  { %12284 = vmatprep.subr.bf16.mxu1 %v13577_v19  ;;  %v13623_v19 = vld [vmem:[#allocation12 + $0x528] sm:$0xff]  }
 0x5f9   :  { %9687 = vmatmul.mubr.bf16.vlgmr.msra.gmra.mxu0 %v9384_v29  ;;  %v13625_v29 = vld [vmem:[#allocation12 + $0x520] sm:$0xff]  }
 0x5fa   :  { %12259 = vmatpush3.bf16.msra.mxu0 %v13578_v44  ;;  %10272 = vmatprep.mubr.bf16.mxu0 %v10009_v4  ;;  %v13624_v44 = vld [vmem:[#allocation12 + $0x450] sm:$0xff]   ;;  %v18286_v4 = vmov 0.0  }
 0x5fb   :  { %12285 = vmatpush3.bf16.msra.mxu1 %v13579_v50  ;;  %12260 = vmatprep.subr.bf16.mxu0 %v13580_v32  ;;  %v13626_v50 = vld [vmem:[#allocation12 + $0x448] sm:$0xff]   ;;  %v10323_v32 = vpack.c.bf16 %v17123_v57, %v17123_v57  ;;  %v13630_v57 = vld [vmem:[#allocation12 + $0x5b0] sm:$0xff]  }
 0x5fc   :  { %12286 = vmatprep.subr.bf16.mxu1 %v13581_v49 }
 0x5fe   :  { %12261 = vmatpush3.bf16.msra.mxu0 %v13582_v12  ;;  %v13627_v12 = vld [vmem:[#allocation12 + $0x440] sm:$0xff]  }
 0x5ff   :  { %12287 = vmatpush3.bf16.msra.mxu1 %v13583_v43  ;;  %12262 = vmatprep.subr.bf16.mxu0 %v13584_v55  ;;  %v13628_v55 = vld [vmem:[#allocation12 + $0x5b8] sm:$0xff]  }
 0x600   :  { %12288 = vmatprep.subr.bf16.mxu1 %v13585_v31 }
 0x602   :  { %12263 = vmatpush3.bf16.msra.mxu0 %v13586_v30 }
 0x603   :  { %12289 = vmatpush3.bf16.msra.mxu1 %v13587_v20  ;;  %12264 = vmatprep.subr.bf16.mxu0 %v13588_v62  ;;  %v13629_v20 = vld [vmem:[#allocation12 + $0x578] sm:$0xff]   ;;  %v10010_v62 = vpack.c.bf16 %v17101_v24, %v17101_v24 }
 0x604   :  { %12290 = vmatprep.subr.bf16.mxu1 %v13589_v35  ;;  %v13636_v24 = vld [vmem:[#allocation12 + $0x598] sm:$0xff]  }
 0x606   :  { %12265 = vmatpush3.bf16.msra.mxu0 %v13590_v61  ;;  %v10635_v61 = vpack.c.bf16 %v16985_v51, %v16985_v51 }
 0x607   :  { %12291 = vmatpush3.bf16.msra.mxu1 %v13591_v48  ;;  %12266 = vmatprep.subr.bf16.mxu0 %v13592_v18  ;;  %v13631_v48 = vld [vmem:[#allocation12 + $0x570] sm:$0xff]   ;;  %v13632_v18 = vld [vmem:[#allocation12 + $0x5a8] sm:$0xff]  }
 0x608   :  { %12292 = vmatprep.subr.bf16.mxu1 %v13593_v7  ;;  %v13633_v7 = vld [vmem:[#allocation12 + $0x568] sm:$0xff]  }
 0x60a   :  { %12267 = vmatpush3.bf16.msra.mxu0 %v13594_v13  ;;  %v13634_v13 = vld [vmem:[#allocation12 + $0x5a0] sm:$0xff]  }
 0x60b   :  { %12293 = vmatpush3.bf16.msra.mxu1 %v13595_v53  ;;  %12268 = vmatprep.subr.bf16.mxu0 %v13596_v6  ;;  %v13635_v53 = vld [vmem:[#allocation12 + $0x560] sm:$0xff]   ;;  %v13637_v6 = vld [vmem:[#allocation12 + $0x558] sm:$0xff]  }
 0x60c   :  { %12294 = vmatprep.subr.bf16.mxu1 %v13597_v36  ;;  %v13638_v36 = vld [vmem:[#allocation12 + $0x590] sm:$0xff]  }
 0x60e   :  { %12269 = vmatpush3.bf16.msra.mxu0 %v13598_v46 }
 0x60f   :  { %12295 = vmatpush3.bf16.msra.mxu1 %v13599_v52  ;;  %12270 = vmatprep.subr.bf16.mxu0 %v13600_v41  ;;  %v13639_v52 = vld [vmem:[#allocation12 + $0x550] sm:$0xff]  }
 0x610   :  { %10593 = vmatprep.subr.bf16.mxu1 %v18262_v10 }
 0x612   :  { %10586 = vmatmul.mubr.bf16.vlgmr.msra.gmra.mxu1 %v10321_v16  ;;  %12271 = vmatpush3.bf16.msra.mxu0 %v13601_v42  ;;  %v13640_v42 = vld [vmem:[#allocation12 + $0x588] sm:$0xff]  }
 0x613   :  { %10594 = vmatpush1.bf16.msra.mxu1 %v13602_v60  ;;  %12130 = vmatprep.mubr.msk.bf16.mxu1 %vm2660_vm2, %v10324_v45 }
 0x614   :  { %12272 = vmatprep.subr.bf16.mxu0 %v13603_v63  ;;  %10595 = vmatprep.subr.bf16.mxu1 %v18262_v10  ;;  %v13641_v63 = vld [vmem:[#allocation12 + $0x548] sm:$0xff]  }
 0x616   :  { %12273 = vmatpush3.bf16.msra.mxu0 %v13604_v25  ;;  %v13642_v25 = vld [vmem:[#allocation12 + $0x580] sm:$0xff]  }
 0x617   :  { %10596 = vmatpush1.bf16.msra.mxu1 %v13605_v59  ;;  %10280 = vmatprep.subr.bf16.mxu0 %v18262_v10 }
 0x618   :  { %10597 = vmatprep.subr.bf16.mxu1 %v18262_v10 }
 0x619   :  { %10273 = vmatmul.mubr.bf16.vlgmr.msra.gmra.mxu0 %v10008_v21 }
 0x61a   :  { %10281 = vmatpush1.bf16.msra.mxu0 %v13606_v54  ;;  %12101 = vmatprep.mubr.msk.bf16.mxu0 %vm2660_vm2, %v10011_v38  ;;  %v13643_v54 = vld [vmem:[#allocation12 + $0x540] sm:$0xff]  }
 0x61b   :  { %10598 = vmatpush1.bf16.msra.mxu1 %v13607_v15  ;;  %10282 = vmatprep.subr.bf16.mxu0 %v18262_v10 }
 0x61c   :  { %10599 = vmatprep.subr.bf16.mxu1 %v18262_v10 }
 0x61e   :  { %10283 = vmatpush1.bf16.msra.mxu0 %v13608_v0  ;;  %v13644_v0 = vld [vmem:[#allocation12 + $0x5f8] sm:$0xff]  }
 0x61f   :  { %10600 = vmatpush1.bf16.msra.mxu1 %v13609_v5  ;;  %10284 = vmatprep.subr.bf16.mxu0 %v18262_v10  ;;  %v10634_v5 = vpack.c.bf16 %v16975_v14, %v16975_v14  ;;  %v13648_v14 = vld [vmem:[#allocation12 + $0x5d8] sm:$0xff]  }
 0x620   :  { %10601 = vmatprep.subr.bf16.mxu1 %v18262_v10 }
 0x621   :  { %v12186_v37 = vpop.f32.mrf.mxu1 }
 0x622   :  { %10285 = vmatpush1.bf16.msra.mxu0 %v13610_v23 }
 0x623   :  { %10602 = vmatpush1.bf16.msra.mxu1 %v13611_v2  ;;  %v12187_v34 = vpop.f32.mrf.mxu1  ;;  %10286 = vmatprep.subr.bf16.mxu0 %v18262_v10  ;;  %v10637_v2 = vpack.c.bf16 %v17139_v40, %v17139_v40  ;;  %v13649_v40 = vld [vmem:[#allocation12 + $0x5d0] sm:$0xff]  }
 0x624   :  { %v17204_v9 = vadd.f32 %v12187_v34, %v12186_v37  ;;  %10603 = vmatprep.subr.bf16.mxu1 %v18262_v10  ;;  %v13645_v37 = vld [vmem:[#allocation12 + $0x5f0] sm:$0xff]   ;;  %v13647_v34 = vld [vmem:[#allocation12 + $0x5e0] sm:$0xff]  }
 0x625   :  { %v12189_v17 = vpop.f32.mrf.mxu1 }
 0x626   :  { %10287 = vmatpush1.bf16.msra.mxu0 %v13612_v58  ;;  %v13646_v58 = vld [vmem:[#allocation12 + $0x5e8] sm:$0xff]   ;;  %v13651_v17 = vld [vmem:[#allocation12 + $0x5c0] sm:$0xff]  }
 0x627   :  { %10604 = vmatpush1.bf16.msra.mxu1 %v13613_v33  ;;  %v12190_v47 = vpop.f32.mrf.mxu1  ;;  %10288 = vmatprep.subr.bf16.mxu0 %v18262_v10  ;;  %v13650_v33 = vld [vmem:[#allocation12 + $0x5c8] sm:$0xff]  }
 0x628   :  { %10605 = vmatprep.subr.bf16.mxu1 %v18262_v10 }
 0x62a   :  { %10289 = vmatpush1.bf16.msra.mxu0 %v13614_v22 }
 0x62b   :  { %10606 = vmatpush1.bf16.msra.mxu1 %v13615_v26  ;;  %10290 = vmatprep.subr.bf16.mxu0 %v18262_v10 }
 0x62c   :  { %10607 = vmatprep.subr.bf16.mxu1 %v18262_v10 }
 0x62e   :  { %10291 = vmatpush1.bf16.msra.mxu0 %v13616_v28  ;;  %v13652_v28 = vld [vmem:[#allocation12 + $0x618] sm:$0xff]  }
 0x62f   :  { %10608 = vmatpush1.bf16.msra.mxu1 %v13617_v39  ;;  %10292 = vmatprep.subr.bf16.mxu0 %v18262_v10 }
 0x630   :  { %10617 = vmatprep.subr.bf16.mxu1 %v18262_v10 }
 0x632   :  { %10293 = vmatpush1.bf16.msra.mxu0 %v13618_v8 }
 0x633   :  { %10618 = vmatpush2.bf16.msra.mxu1 %v13619_v56  ;;  %10294 = vmatprep.subr.bf16.mxu0 %v18262_v10 }
 0x634   :  { %10619 = vmatprep.subr.bf16.mxu1 %v18262_v10 }
 0x636   :  { %10295 = vmatpush1.bf16.msra.mxu0 %v13620_v27  ;;  %v13653_v27 = vld [vmem:[#allocation12 + $0x610] sm:$0xff]  }
 0x637   :  { %10620 = vmatpush2.bf16.msra.mxu1 %v13621_v3  ;;  %10304 = vmatprep.subr.bf16.mxu0 %v18262_v10 }
 0x638   :  { %10621 = vmatprep.subr.bf16.mxu1 %v18262_v10 }
 0x63a   :  { %10305 = vmatpush2.bf16.msra.mxu0 %v13622_v11 }
 0x63b   :  { %10622 = vmatpush2.bf16.msra.mxu1 %v13623_v19  ;;  %10306 = vmatprep.subr.bf16.mxu0 %v18262_v10  ;;  %v13654_v19 = vld [vmem:[#allocation12 + $0x608] sm:$0xff]  }
 0x63c   :  { %10623 = vmatprep.subr.bf16.mxu1 %v18262_v10 }
 0x63e   :  { %10307 = vmatpush2.bf16.msra.mxu0 %v13624_v44 }
 0x63f   :  { %10624 = vmatpush2.bf16.msra.mxu1 %v13625_v29  ;;  %10308 = vmatprep.subr.bf16.mxu0 %v18262_v10  ;;  %v13655_v29 = vld [vmem:[#allocation12 + $0x600] sm:$0xff]  }
 0x640   :  { %12333 = vmatprep.subr.bf16.mxu1 %v18286_v4 }
 0x641   :  { %v12208_v49 = vpop.f32.mrf.mxu1 }
 0x642   :  { %10626 = vmatmul.mubr.bf16.vlgmr.msra.gmra.mxu1 %v10323_v32  ;;  %10309 = vmatpush2.bf16.msra.mxu0 %v13626_v50  ;;  %v10636_v50 = vpack.c.bf16 %v17136_v1, %v17136_v1  ;;  %v13656_v32 = vld [vmem:[#allocation15 + $0x38] sm:$0xff]  }
 0x643   :  { %v12209_v43 = vpop.f32.mrf.mxu1  ;;  %10310 = vmatprep.subr.bf16.mxu0 %v18262_v10  ;;  %12334 = vmatpush3.bf16.msra.mxu1 %v13656_v32 }
 0x644   :  { %v12210_v31 = vadd.f32 %v12209_v43, %v12208_v49  ;;  %v13657_v49 = vld [vmem:[#allocation15 + $0x30] sm:$0xff]   ;;  %12335 = vmatprep.subr.bf16.mxu1 %v18286_v4  ;;  %12349 = vmatprep.mubr.msk.bf16.mxu1 %vm13892_vm3, %v18286_v4 }
 0x645   :  { %v12211_v30 = vpop.f32.mrf.mxu1 }
 0x646   :  { %10311 = vmatpush2.bf16.msra.mxu0 %v13627_v12 }
 0x647   :  { %v12212_v35 = vpop.f32.mrf.mxu1  ;;  %12302 = vmatprep.subr.bf16.mxu0 %v13628_v55  ;;  %12336 = vmatpush3.bf16.msra.mxu1 %v13657_v49 }
 0x648   :  { %12337 = vmatprep.subr.bf16.mxu1 %v18286_v4 }
 0x649   :  { %10313 = vmatmul.mubr.bf16.vlgmr.msra.gmra.mxu0 %v10010_v62  ;;  %v13659_v62 = vld [vmem:[#allocation15 + $0x20] sm:$0xff]  }
 0x64a   :  { %12303 = vmatpush3.bf16.msra.mxu0 %v13629_v20  ;;  %10898 = vmatprep.mubr.bf16.mxu0 %v10635_v61 }
 0x64b   :  { %12304 = vmatprep.subr.bf16.mxu0 %v13630_v57 }
 0x64e   :  { %12305 = vmatpush3.bf16.msra.mxu0 %v13631_v48  ;;  %v13660_v48 = vld [vmem:[#allocation15 + $0x18] sm:$0xff]  }
 0x64f   :  { %12306 = vmatprep.subr.bf16.mxu0 %v13632_v18 }
 0x652   :  { %12307 = vmatpush3.bf16.msra.mxu0 %v13633_v7 }
 0x653   :  { %12308 = vmatprep.subr.bf16.mxu0 %v13634_v13 }
 0x656   :  { %12309 = vmatpush3.bf16.msra.mxu0 %v13635_v53 }
 0x657   :  { %12310 = vmatprep.subr.bf16.mxu0 %v13636_v24 }
 0x659   :  { %v9125_v46 = vpop.f32.mrf.mxu0 }
 0x65a   :  { %v9126_v51 = vadd.f32 %v17204_v9, %v9125_v46  ;;  %12311 = vmatpush3.bf16.msra.mxu0 %v13637_v6  ;;  %v13661_v46 = vld [vmem:[#allocation15 + $0x10] sm:$0xff]  }
 0x65b   :  { %v9127_v41 = vpop.f32.mrf.mxu0  ;;  %12312 = vmatprep.subr.bf16.mxu0 %v13638_v36 }
 0x65c   :  { %v9337_v60 = vadd.f32 %v12210_v31, %v9126_v51  ;;  %v13658_v31 = vld [vmem:[#allocation15 + $0x28] sm:$0xff]  }
 0x65d   :  { %v9128_v16 = vpop.f32.mrf.mxu0  ;;  %12338 = vmatpush3.bf16.msra.mxu1 %v13658_v31 }
 0x65e   :  { %12313 = vmatpush3.bf16.msra.mxu0 %v13639_v52  ;;  %12339 = vmatprep.subr.bf16.mxu1 %v18286_v4 }
 0x65f   :  { %v9129_v45 = vpop.f32.mrf.mxu0  ;;  %12314 = vmatprep.subr.bf16.mxu0 %v13640_v42  ;;  %v13662_v42 = vld [vmem:[#allocation15 + $0x8] sm:$0xff]  }
 0x661   :  { %v12230_v59 = vpop.f32.mrf.mxu1  ;;  %12340 = vmatpush3.bf16.msra.mxu1 %v13659_v62 }
 0x662   :  { %12315 = vmatpush3.bf16.msra.mxu0 %v13641_v63  ;;  %12341 = vmatprep.subr.bf16.mxu1 %v18286_v4  ;;  %v13663_v63 = vld [vmem:[#allocation15] sm:$0xff]  }
 0x663   :  { %v12231_v21 = vpop.f32.mrf.mxu1  ;;  %12316 = vmatprep.subr.bf16.mxu0 %v13642_v25 }
 0x664   :  { %v17229_v15 = vadd.f32 %v12231_v21, %v12230_v59 }
 0x665   :  { %v12233_v38 = vpop.f32.mrf.mxu1  ;;  %12342 = vmatpush3.bf16.msra.mxu1 %v13660_v48 }
 0x666   :  { %12317 = vmatpush3.bf16.msra.mxu0 %v13643_v54  ;;  %12343 = vmatprep.subr.bf16.mxu1 %v18286_v4 }
 0x667   :  { %v12234_v23 = vpop.f32.mrf.mxu1  ;;  %10906 = vmatprep.subr.bf16.mxu0 %v18262_v10 }
 0x669   :  { %10899 = vmatmul.mubr.bf16.vlgmr.msra.gmra.mxu0 %v10634_v5  ;;  %12344 = vmatpush3.bf16.msra.mxu1 %v13661_v46 }
 0x66a   :  { %10907 = vmatpush1.bf16.msra.mxu0 %v13644_v0  ;;  %12159 = vmatprep.mubr.msk.bf16.mxu0 %vm2660_vm2, %v10637_v2 }
 0x66b   :  { %10908 = vmatprep.subr.bf16.mxu0 %v18262_v10  ;;  %12345 = vmatprep.subr.bf16.mxu1 %v18286_v4 }
 0x66d   :  { %12346 = vmatpush3.bf16.msra.mxu1 %v13662_v42 }
 0x66e   :  { %10909 = vmatpush1.bf16.msra.mxu0 %v13645_v37  ;;  %12347 = vmatprep.subr.bf16.mxu1 %v18286_v4  ;;  %v12160_v4 = vld [vmem:[#allocation13] ss:$0 sm:$0xff] }
 0x66f   :  { %10910 = vmatprep.subr.bf16.mxu0 %v18262_v10 }
 0x671   :  { %12348 = vmatpush3.bf16.msra.mxu1 %v13663_v63 }
 0x672   :  { %10911 = vmatpush1.bf16.msra.mxu0 %v13646_v58 }
 0x673   :  { %10912 = vmatprep.subr.bf16.mxu0 %v18262_v10 }
 0x676   :  { %10913 = vmatpush1.bf16.msra.mxu0 %v13647_v34 }
 0x677   :  { %10914 = vmatprep.subr.bf16.mxu0 %v18262_v10 }
 0x67a   :  { %10915 = vmatpush1.bf16.msra.mxu0 %v13648_v14 }
 0x67b   :  { %10916 = vmatprep.subr.bf16.mxu0 %v18262_v10 }
 0x67e   :  { %10917 = vmatpush1.bf16.msra.mxu0 %v13649_v40 }
 0x67f   :  { %10918 = vmatprep.subr.bf16.mxu0 %v18262_v10 }
 0x681   :  { %v12252_v9 = vpop.f32.mrf.mxu1 }
 0x682   :  { %10919 = vmatpush1.bf16.msra.mxu0 %v13650_v33 }
 0x683   :  { %v12253_v22 = vpop.f32.mrf.mxu1  ;;  %10920 = vmatprep.subr.bf16.mxu0 %v18262_v10 }
 0x684   :  { %v12254_v47 = vadd.f32 %v12253_v22, %v12252_v9 }
 0x685   :  { %v12255_v26 = vpop.f32.mrf.mxu1 }
 0x686   :  { %10921 = vmatpush1.bf16.msra.mxu0 %v13651_v17 }
 0x687   :  { %v12256_v39 = vpop.f32.mrf.mxu1  ;;  %10930 = vmatprep.subr.bf16.mxu0 %v18262_v10 }
 0x689   :  { %v9376_v8 = vpop.f32.mrf.mxu0 }
 0x68a   :  { %v9377_v56 = vadd.f32 %v9376_v8, %v9337_v60  ;;  %10931 = vmatpush2.bf16.msra.mxu0 %v13652_v28 }
 0x68b   :  { %v9378_v3 = vpop.f32.mrf.mxu0  ;;  %10932 = vmatprep.subr.bf16.mxu0 %v18262_v10 }
 0x68d   :  { %v9379_v11 = vpop.f32.mrf.mxu0 }
 0x68e   :  { %10933 = vmatpush2.bf16.msra.mxu0 %v13653_v27  ;;  %v12161_v27 = vld [vmem:[#allocation16] ss:$0 sm:$0xff] }
 0x68f   :  { %v9380_v44 = vpop.f32.mrf.mxu0  ;;  %10934 = vmatprep.subr.bf16.mxu0 %v18262_v10 }
 0x692   :  { %10935 = vmatpush2.bf16.msra.mxu0 %v13654_v19 }
 0x693   :  { %10936 = vmatprep.subr.bf16.mxu0 %v18262_v10 }
 0x696   :  { %10937 = vmatpush2.bf16.msra.mxu0 %v13655_v29 }
 0x699   :  { %10939 = vmatmul.mubr.bf16.vlgmr.msra.gmra.mxu0 %v10636_v50 }
 0x6b2   :  { %v10001_v12 = vpop.f32.mrf.mxu1 }
 0x6b3   :  { %v10002_v43 = vadd.f32 %v12254_v47, %v10001_v12 }
 0x6b4   :  { %v10003_v55 = vpop.f32.mrf.mxu1 }
 0x6b6   :  { %v10004_v30 = vpop.f32.mrf.mxu1 }
 0x6b8   :  { %v10005_v20 = vpop.f32.mrf.mxu1 }
 0x6b9   :  { %v9688_v10 = vpop.f32.mrf.mxu0 }
 0x6ba   :  { %v9689_v1 = vadd.f32 %v17229_v15, %v9688_v10 }
 0x6bb   :  { %v9690_v35 = vpop.f32.mrf.mxu0 }
 0x6bc   :  { %v9694_v57 = vadd.f32 %v9689_v1, %v9377_v56 }
 0x6bd   :  { %v9691_v61 = vpop.f32.mrf.mxu0 }
 0x6be   :  { %v10007_v18 = vadd.f32 %v10002_v43, %v9694_v57 }
 0x6bf   :  { %v9692_v7 = vpop.f32.mrf.mxu0 }
 0x6d2   :  { %v12296_v13 = vpop.f32.mrf.mxu1 }
 0x6d4   :  { %v12297_v53 = vpop.f32.mrf.mxu1 }
 0x6d5   :  { %v12298_v24 = vadd.f32 %v12297_v53, %v12296_v13 }
 0x6d6   :  { %v12299_v6 = vpop.f32.mrf.mxu1 }
 0x6d8   :  { %v12300_v36 = vpop.f32.mrf.mxu1 }
 0x6d9   :  { %v12274_v51 = vpop.f32.mrf.mxu0 }
 0x6db   :  { %v12275_v52 = vpop.f32.mrf.mxu0 }
 0x6dc   :  { %v12276_v41 = vadd.f32 %v12275_v52, %v12274_v51 }
 0x6dd   :  { %v12277_v60 = vpop.f32.mrf.mxu0 }
 0x6df   :  { %v12278_v16 = vpop.f32.mrf.mxu0 }
 0x702   :  { %v10627_v45 = vpop.f32.mrf.mxu1 }
 0x703   :  { %v10628_v25 = vadd.f32 %v12298_v24, %v10627_v45 }
 0x704   :  { %v10629_v59 = vpop.f32.mrf.mxu1 }
 0x706   :  { %v10630_v54 = vpop.f32.mrf.mxu1 }
 0x708   :  { %v10631_v21 = vpop.f32.mrf.mxu1 }
 0x709   :  { %v10314_v15 = vpop.f32.mrf.mxu0 }
 0x70a   :  { %v10315_v38 = vadd.f32 %v12276_v41, %v10314_v15 }
 0x70b   :  { %v10316_v0 = vpop.f32.mrf.mxu0 }
 0x70c   :  { %v10320_v5 = vadd.f32 %v10315_v38, %v10007_v18 }
 0x70d   :  { %v10317_v23 = vpop.f32.mrf.mxu0 }
 0x70e   :  { %v10633_v2 = vadd.f32 %v10628_v25, %v10320_v5 }
 0x70f   :  { %v10318_v37 = vpop.f32.mrf.mxu0 }
 0x729   :  { %v12318_v58 = vpop.f32.mrf.mxu0 }
 0x72b   :  { %v12319_v34 = vpop.f32.mrf.mxu0 }
 0x72c   :  { %v12320_v33 = vadd.f32 %v12319_v34, %v12318_v58 }
 0x72d   :  { %v12321_v14 = vpop.f32.mrf.mxu0 }
 0x72f   :  { %v12322_v40 = vpop.f32.mrf.mxu0 }
 0x759   :  { %v10940_v9 = vpop.f32.mrf.mxu0 }
 0x75a   :  { %v10941_v17 = vadd.f32 %v12320_v33, %v10940_v9 }
 0x75b   :  { %v10942_v22 = vpop.f32.mrf.mxu0 }
 0x75c   :  { %v10946_v47 = vadd.f32 %v10941_v17, %v10633_v2 }
 0x75d   :  { %v10943_v26 = vpop.f32.mrf.mxu0 }
 0x75e   :  { %v10954_v28 = vadd.f32 %v12160_v4, %v10946_v47 }
 0x75f   :  { %v10944_v39 = vpop.f32.mrf.mxu0 }
 0x760   :  { %v10955_v8 = vmax.f32 %v10954_v28, 0.0 }
 0x762   :  { %v10956_v56 = vpack.c.bf16 %v10955_v8, %v10955_v8 }
 0x764   :  { %12350 = vmatmul.mubr.bf16.vlgmr.msra.gmra.mxu1 %v10956_v56 }
 0x824   :  { %v11062_v3 = vpop.f32.mrf.mxu1 }
 0x825   :  { %v11063_v11 = vadd.f32 %v12161_v27, %v11062_v3 }
 0x826   :  { %v12351_v19 = vpop.f32.mrf.mxu1 }
 0x827   :  { %11068 = vst [vmem:[%s17273_s11] sm:$0xff] %v11063_v11 }
 0x828   :  { %v11065_v44 = vpop.f32.mrf.mxu1 }
 0x82a   :  { %v12352_v29 = vpop.f32.mrf.mxu1 }
 0x82b   :  { %11073 = vsyncpa [#allocation3], 1 }
 0x82c   :  { %11074 = vsyncpa [#allocation5], 1 }
 0x82d   :  { %11075 = vsyncpa [#allocation8], 1 }
 0x82e   :  { %11076 = vsyncpa [#allocation11], 1 }
 0x82f   :  { %11077 = vsyncpa [#allocation14], 1 }
 0x830   :  { %11078 = vsyncpa [#allocation17], 1 }

</bundles_post_ra>
